<compile_context>
chip_gen: v7x
topology: tpu7x:2x2x1
jax: 0.10.0
libtpu: 0.0.40
codegen_flags: <defaults>
</compile_context>

<pallas_src>
import jax
import jax.numpy as jnp
from jax.experimental import pallas as pl
from jax.experimental.pallas import tpu as pltpu

# ---------------------------------------------------------------------------
# Static geometry (CIFAR input 3x32x32, exactly what Net.forward implies).
# Activations are flattened row-major (rows = height * buffer_width, channels).
# ---------------------------------------------------------------------------
CIN, CH1, CH2, CH3 = 3, 32, 64, 128
H1, W1 = 32, 32            # conv1 input: 32 valid rows, buffer width 32 (all cols valid)
H2, W2 = 15, 16            # conv2 input: 15 valid rows, buffer width 16 (15 valid cols)
H3, W3 = 6, 8              # conv3 input:  6 valid rows, buffer width  8 ( 6 valid cols)
A1_ROWS = H1 * W1 + 8      # +8 pad rows so the 9 shifted conv reads stay in bounds
A2_ROWS = H2 * W2 + 8
A3_ROWS = H3 * W3 + 8
HP1, HP2, HP3 = (H1 - 2) // 2, (H2 - 2) // 2, (H3 - 2) // 2   # 15, 6, 2
FC_ROWS = (0, 1, 4, 5)     # pooled-buffer rows for (h, w) = (0,0),(0,1),(1,0),(1,1)
NCLS = 10


# ---------------------------------------------------------------------------
# In-kernel helper: 3x3 valid conv + bias + ReLU + fused 2x2/2 max-pool.
#   read(s, n): returns activation rows [s, s+n) as an (n, Cin) value.
#   The pooled, column-compacted result is written to dst_ref[0 : hp*wb/2].
# ---------------------------------------------------------------------------
def _conv_relu_pool(read, w_ref, b_ref, d_ref, dst_ref, h, wb):
    ho = h - 2
    hp = ho // 2
    rows = ho * wb
    # conv as 9 shifted matmuls (im2col folded into the kernel); columns
    # >= wb-2 of the result are junk and are never selected below.
    acc = None
    for k in range(9):
        di, dj = divmod(k, 3)
        a = read(di * wb + dj, rows)                       # (rows, cin)
        part = jnp.dot(a, w_ref[k], preferred_element_type=jnp.float32)
        acc = part if acc is None else acc + part
    y = jnp.maximum(acc + b_ref[...], 0.0)                 # (rows, cout)
    # fused max-pool, H direction: max of adjacent (aligned) row blocks.
    for i in range(hp):
        top = y[(2 * i) * wb:(2 * i + 1) * wb, :]
        bot = y[(2 * i + 1) * wb:(2 * i + 2) * wb, :]
        d_ref[pl.ds(i * wb, wb), :] = jnp.maximum(top, bot)
    # fused max-pool, W direction: flat stride-2 reads (wb is even, so even
    # flat rows == even columns; junk stays confined to junk columns).
    n2 = (hp * wb) // 2
    left = d_ref[pl.ds(0, n2, stride=2), :]
    right = d_ref[pl.ds(1, n2, stride=2), :]
    dst_ref[pl.ds(0, n2), :] = jnp.maximum(left, right)


# ---------------------------------------------------------------------------
# The fused whole-network kernel (one image per grid step).
# ---------------------------------------------------------------------------
def _net_kernel(x_ref, w1_ref, b1_ref, w2_ref, b2_ref, w3_ref, b3_ref,
                wf1_ref, bf1_ref, wf2_ref, bf2_ref, o_ref,
                d1_ref, a2_ref, d2_ref, a3_ref, d3_ref, p3_ref):
    # Zero the padded tail rows of the intermediate activation buffers so the
    # (junk-column-only) shifted over-reads are deterministic.
    a2_ref[pl.ds(H2 * W2, A2_ROWS - H2 * W2), :] = jnp.zeros(
        (A2_ROWS - H2 * W2, CH1), jnp.float32)
    a3_ref[pl.ds(H3 * W3, A3_ROWS - H3 * W3), :] = jnp.zeros(
        (A3_ROWS - H3 * W3, CH2), jnp.float32)

    # conv1 -> relu -> pool : (32,32,3) -> pooled buffer (15*16, 32) in a2
    _conv_relu_pool(lambda s, n: x_ref[0, pl.ds(s, n), :],
                    w1_ref, b1_ref, d1_ref, a2_ref, H1, W1)
    # conv2 -> relu -> pool : -> pooled buffer (6*8, 64) in a3
    _conv_relu_pool(lambda s, n: a2_ref[pl.ds(s, n), :],
                    w2_ref, b2_ref, d2_ref, a3_ref, H2, W2)
    # conv3 -> relu -> pool : -> pooled buffer (2*4, 128) in p3
    _conv_relu_pool(lambda s, n: a3_ref[pl.ds(s, n), :],
                    w3_ref, b3_ref, d3_ref, p3_ref, H3, W3)

    # TODO(synk): nn.Dropout(0.25) treated as eval-mode identity; training-mode
    # stochastic masking is not replicated.

    # fc1 + ReLU + fc2.  The PyTorch NCHW flatten order is folded into wf1's
    # row permutation (wf1_ref[p] holds the rows for spatial position p).
    h = bf1_ref[...]                                       # (1, 512)
    for p, r in enumerate(FC_ROWS):
        h = h + jnp.dot(p3_ref[pl.ds(r, 1), :], wf1_ref[p],
                        preferred_element_type=jnp.float32)
    h = jnp.maximum(h, 0.0)
    o_ref[0] = (jnp.dot(h, wf2_ref[...], preferred_element_type=jnp.float32)
                + bf2_ref[...])


# ---------------------------------------------------------------------------
# Wrapper: boundary layout plumbing + the single pallas_call.
# ---------------------------------------------------------------------------
def net_forward(params, x_nchw):
    n = x_nchw.shape[0]
    # NCHW -> row-major (H*W, C) with a few zero pad rows (boundary-only work).
    x = jnp.transpose(x_nchw, (0, 2, 3, 1)).astype(jnp.float32)
    x = x.reshape(n, H1 * W1, CIN)
    x = jnp.pad(x, ((0, 0), (0, A1_ROWS - H1 * W1), (0, 0)))

    # conv weights: HWIO -> (kh*kw, Cin, Cout); biases -> (1, Cout).
    w1 = params["w1"].reshape(9, CIN, CH1)
    w2 = params["w2"].reshape(9, CH1, CH2)
    w3 = params["w3"].reshape(9, CH2, CH3)
    b1 = params["b1"].reshape(1, CH1)
    b2 = params["b2"].reshape(1, CH2)
    b3 = params["b3"].reshape(1, CH3)
    # fc1: permute rows so the kernel can consume per-spatial-position channel
    # vectors directly (feature index f = c*4 + h*2 + w  ->  [p, c, :]).
    wf1 = params["wf1"].reshape(CH3, 4, 512).transpose(1, 0, 2)   # (4, 128, 512)
    bf1 = params["bf1"].reshape(1, 512)
    wf2 = params["wf2"]                                           # (512, 10)
    bf2 = params["bf2"].reshape(1, NCLS)

    def full(*shape):
        return pl.BlockSpec(shape, lambda i, _s=len(shape): (0,) * _s)

    out = pl.pallas_call(
        _net_kernel,
        out_shape=jax.ShapeDtypeStruct((n, 1, NCLS), jnp.float32),
        grid=(n,),
        in_specs=[
            pl.BlockSpec((1, A1_ROWS, CIN), lambda i: (i, 0, 0)),
            full(9, CIN, CH1), full(1, CH1),
            full(9, CH1, CH2), full(1, CH2),
            full(9, CH2, CH3), full(1, CH3),
            full(4, CH3, 512), full(1, 512),
            full(512, NCLS), full(1, NCLS),
        ],
        out_specs=pl.BlockSpec((1, 1, NCLS), lambda i: (i, 0, 0)),
        scratch_shapes=[
            pltpu.VMEM((HP1 * W1, CH1), jnp.float32),   # d1: row-pooled conv1
            pltpu.VMEM((A2_ROWS, CH1), jnp.float32),    # a2: layer-2 activation
            pltpu.VMEM((HP2 * W2, CH2), jnp.float32),   # d2: row-pooled conv2
            pltpu.VMEM((A3_ROWS, CH2), jnp.float32),    # a3: layer-3 activation
            pltpu.VMEM((HP3 * W3, CH3), jnp.float32),   # d3: row-pooled conv3
            pltpu.VMEM((HP3 * (W3 // 2), CH3), jnp.float32),  # p3: final pooled
        ],
        compiler_params=pltpu.CompilerParams(
            dimension_semantics=("parallel",),
            vmem_limit_bytes=32 * 1024 * 1024,
        ),
    )(x, w1, b1, w2, b2, w3, b3, wf1, bf1, wf2, bf2)
    return out.reshape(n, NCLS)


# ---------------------------------------------------------------------------
# Deterministic parameter init (PyTorch-default-like uniform bounds).
# ---------------------------------------------------------------------------
def init_params(key):
    ks = jax.random.split(key, 10)

    def u(k, shape, fan_in):
        bound = 1.0 / jnp.sqrt(jnp.float32(fan_in))
        return jax.random.uniform(k, shape, jnp.float32, -bound, bound)

    return {
        "w1": u(ks[0], (3, 3, CIN, CH1), CIN * 9),
        "b1": u(ks[1], (CH1,), CIN * 9),
        "w2": u(ks[2], (3, 3, CH1, CH2), CH1 * 9),
        "b2": u(ks[3], (CH2,), CH1 * 9),
        "w3": u(ks[4], (3, 3, CH2, CH3), CH2 * 9),
        "b3": u(ks[5], (CH3,), CH2 * 9),
        "wf1": u(ks[6], (512, 512), 512),   # n_size = 128 * 2 * 2 = 512
        "bf1": u(ks[7], (512,), 512),
        "wf2": u(ks[8], (512, NCLS), 512),
        "bf2": u(ks[9], (NCLS,), 512),
    }


if __name__ == "__main__":
    key = jax.random.PRNGKey(0)
    pkey, xkey = jax.random.split(key)
    params = init_params(pkey)
    x = jax.random.normal(xkey, (2, 3, 32, 32), jnp.float32)  # NCHW like PyTorch
    out = jax.jit(net_forward)(params, x)
    jax.block_until_ready(out)
    assert out.shape == (2, NCLS) and out.dtype == jnp.float32
    print("KERNEL_OK")
</pallas_src>

<mosaic_0001>
module attributes {stable_mosaic.version = 11 : i64} {
  func.func @_net_kernel(%arg0: i32, %arg1: memref<1x1032x3xf32, #tpu.memory_space<vmem>>, %arg2: memref<9x3x32xf32, #tpu.memory_space<vmem>>, %arg3: memref<1x32xf32, #tpu.memory_space<vmem>>, %arg4: memref<9x32x64xf32, #tpu.memory_space<vmem>>, %arg5: memref<1x64xf32, #tpu.memory_space<vmem>>, %arg6: memref<9x64x128xf32, #tpu.memory_space<vmem>>, %arg7: memref<1x128xf32, #tpu.memory_space<vmem>>, %arg8: memref<4x128x512xf32, #tpu.memory_space<vmem>>, %arg9: memref<1x512xf32, #tpu.memory_space<vmem>>, %arg10: memref<512x10xf32, #tpu.memory_space<vmem>>, %arg11: memref<1x10xf32, #tpu.memory_space<vmem>>, %arg12: memref<1x1x10xf32, #tpu.memory_space<vmem>>, %arg13: memref<480x32xf32, #tpu.memory_space<vmem>>, %arg14: memref<248x32xf32, #tpu.memory_space<vmem>>, %arg15: memref<96x64xf32, #tpu.memory_space<vmem>>, %arg16: memref<56x64xf32, #tpu.memory_space<vmem>>, %arg17: memref<16x128xf32, #tpu.memory_space<vmem>>, %arg18: memref<8x128xf32, #tpu.memory_space<vmem>>) attributes {dimension_semantics = [#tpu.dimension_semantics<parallel>], iteration_bounds = array<i64: 2>, scalar_prefetch = 0 : i64, scratch_operands = 6 : i64, tpu.core_type = #tpu.core_type<tc>, window_params = [{transform_indices = @transform_0, window_bounds = array<i64: 1, 1032, 3>}, {pipeline_mode = #tpu.pipeline_mode<synchronous>, transform_indices = @transform_1, window_bounds = array<i64: 9, 3, 32>}, {pipeline_mode = #tpu.pipeline_mode<synchronous>, transform_indices = @transform_2, window_bounds = array<i64: 1, 32>}, {pipeline_mode = #tpu.pipeline_mode<synchronous>, transform_indices = @transform_3, window_bounds = array<i64: 9, 32, 64>}, {pipeline_mode = #tpu.pipeline_mode<synchronous>, transform_indices = @transform_4, window_bounds = array<i64: 1, 64>}, {pipeline_mode = #tpu.pipeline_mode<synchronous>, transform_indices = @transform_5, window_bounds = array<i64: 9, 64, 128>}, {pipeline_mode = #tpu.pipeline_mode<synchronous>, transform_indices = @transform_6, window_bounds = array<i64: 1, 128>}, {pipeline_mode = #tpu.pipeline_mode<synchronous>, transform_indices = @transform_7, window_bounds = array<i64: 4, 128, 512>}, {pipeline_mode = #tpu.pipeline_mode<synchronous>, transform_indices = @transform_8, window_bounds = array<i64: 1, 512>}, {pipeline_mode = #tpu.pipeline_mode<synchronous>, transform_indices = @transform_9, window_bounds = array<i64: 512, 10>}, {pipeline_mode = #tpu.pipeline_mode<synchronous>, transform_indices = @transform_10, window_bounds = array<i64: 1, 10>}, {transform_indices = @transform_11, window_bounds = array<i64: 1, 1, 10>}]} {
    %cst = arith.constant 0.000000e+00 : f32
    %0 = vector.broadcast %cst : f32 to vector<8x32xf32>
    %c240 = arith.constant 240 : index
    %c0 = arith.constant 0 : index
    %1 = vector.load %arg14[%c240, %c0] : memref<248x32xf32, #tpu.memory_space<vmem>>, vector<8x32xf32>
    tpu.vector_store %arg14[%c240, %c0], %0 {strides = array<i32>} : memref<248x32xf32, #tpu.memory_space<vmem>>, vector<8x32xf32>,
    %cst_0 = arith.constant 0.000000e+00 : f32
    %2 = vector.broadcast %cst_0 : f32 to vector<8x64xf32>
    %c48 = arith.constant 48 : index
    %c0_1 = arith.constant 0 : index
    %3 = vector.load %arg16[%c48, %c0_1] : memref<56x64xf32, #tpu.memory_space<vmem>>, vector<8x64xf32>
    tpu.vector_store %arg16[%c48, %c0_1], %2 {strides = array<i32>} : memref<56x64xf32, #tpu.memory_space<vmem>>, vector<8x64xf32>,
    %c0_2 = arith.constant 0 : index
    %c0_3 = arith.constant 0 : index
    %c0_4 = arith.constant 0 : index
    %4 = vector.load %arg1[%c0_2, %c0_3, %c0_4] : memref<1x1032x3xf32, #tpu.memory_space<vmem>>, vector<1x960x3xf32>
    %5 = vector.shape_cast %4 : vector<1x960x3xf32> to vector<960x3xf32>
    %c0_5 = arith.constant 0 : index
    %c0_6 = arith.constant 0 : index
    %c0_7 = arith.constant 0 : index
    %6 = vector.load %arg2[%c0_5, %c0_6, %c0_7] : memref<9x3x32xf32, #tpu.memory_space<vmem>>, vector<1x3x32xf32>
    %7 = vector.shape_cast %6 : vector<1x3x32xf32> to vector<3x32xf32>
    %cst_8 = arith.constant dense<0.000000e+00> : vector<960x32xf32>
    %8 = tpu.matmul %5, %7, %cst_8 {dimension_numbers = #tpu.dot_dimension_numbers<[1], [0], [0], [1], [0, 0, 1, 1], [], []>} : vector<960x3xf32>, vector<3x32xf32>, vector<960x32xf32> -> vector<960x32xf32>
    %c0_9 = arith.constant 0 : index
    %c1 = arith.constant 1 : index
    %c0_10 = arith.constant 0 : index
    %9 = vector.load %arg1[%c0_9, %c1, %c0_10] : memref<1x1032x3xf32, #tpu.memory_space<vmem>>, vector<1x960x3xf32>
    %10 = vector.shape_cast %9 : vector<1x960x3xf32> to vector<960x3xf32>
    %c1_11 = arith.constant 1 : index
    %c0_12 = arith.constant 0 : index
    %c0_13 = arith.constant 0 : index
    %11 = vector.load %arg2[%c1_11, %c0_12, %c0_13] : memref<9x3x32xf32, #tpu.memory_space<vmem>>, vector<1x3x32xf32>
    %12 = vector.shape_cast %11 : vector<1x3x32xf32> to vector<3x32xf32>
    %cst_14 = arith.constant dense<0.000000e+00> : vector<960x32xf32>
    %13 = tpu.matmul %10, %12, %cst_14 {dimension_numbers = #tpu.dot_dimension_numbers<[1], [0], [0], [1], [0, 0, 1, 1], [], []>} : vector<960x3xf32>, vector<3x32xf32>, vector<960x32xf32> -> vector<960x32xf32>
    %14 = arith.addf %8, %13 : vector<960x32xf32>
    %c0_15 = arith.constant 0 : index
    %c2 = arith.constant 2 : index
    %c0_16 = arith.constant 0 : index
    %15 = vector.load %arg1[%c0_15, %c2, %c0_16] : memref<1x1032x3xf32, #tpu.memory_space<vmem>>, vector<1x960x3xf32>
    %16 = vector.shape_cast %15 : vector<1x960x3xf32> to vector<960x3xf32>
    %c2_17 = arith.constant 2 : index
    %c0_18 = arith.constant 0 : index
    %c0_19 = arith.constant 0 : index
    %17 = vector.load %arg2[%c2_17, %c0_18, %c0_19] : memref<9x3x32xf32, #tpu.memory_space<vmem>>, vector<1x3x32xf32>
    %18 = vector.shape_cast %17 : vector<1x3x32xf32> to vector<3x32xf32>
    %cst_20 = arith.constant dense<0.000000e+00> : vector<960x32xf32>
    %19 = tpu.matmul %16, %18, %cst_20 {dimension_numbers = #tpu.dot_dimension_numbers<[1], [0], [0], [1], [0, 0, 1, 1], [], []>} : vector<960x3xf32>, vector<3x32xf32>, vector<960x32xf32> -> vector<960x32xf32>
    %20 = arith.addf %14, %19 : vector<960x32xf32>
    %c0_21 = arith.constant 0 : index
    %c32 = arith.constant 32 : index
    %c0_22 = arith.constant 0 : index
    %21 = vector.load %arg1[%c0_21, %c32, %c0_22] : memref<1x1032x3xf32, #tpu.memory_space<vmem>>, vector<1x960x3xf32>
    %22 = vector.shape_cast %21 : vector<1x960x3xf32> to vector<960x3xf32>
    %c3 = arith.constant 3 : index
    %c0_23 = arith.constant 0 : index
    %c0_24 = arith.constant 0 : index
    %23 = vector.load %arg2[%c3, %c0_23, %c0_24] : memref<9x3x32xf32, #tpu.memory_space<vmem>>, vector<1x3x32xf32>
    %24 = vector.shape_cast %23 : vector<1x3x32xf32> to vector<3x32xf32>
    %cst_25 = arith.constant dense<0.000000e+00> : vector<960x32xf32>
    %25 = tpu.matmul %22, %24, %cst_25 {dimension_numbers = #tpu.dot_dimension_numbers<[1], [0], [0], [1], [0, 0, 1, 1], [], []>} : vector<960x3xf32>, vector<3x32xf32>, vector<960x32xf32> -> vector<960x32xf32>
    %26 = arith.addf %20, %25 : vector<960x32xf32>
    %c0_26 = arith.constant 0 : index
    %c33 = arith.constant 33 : index
    %c0_27 = arith.constant 0 : index
    %27 = vector.load %arg1[%c0_26, %c33, %c0_27] : memref<1x1032x3xf32, #tpu.memory_space<vmem>>, vector<1x960x3xf32>
    %28 = vector.shape_cast %27 : vector<1x960x3xf32> to vector<960x3xf32>
    %c4 = arith.constant 4 : index
    %c0_28 = arith.constant 0 : index
    %c0_29 = arith.constant 0 : index
    %29 = vector.load %arg2[%c4, %c0_28, %c0_29] : memref<9x3x32xf32, #tpu.memory_space<vmem>>, vector<1x3x32xf32>
    %30 = vector.shape_cast %29 : vector<1x3x32xf32> to vector<3x32xf32>
    %cst_30 = arith.constant dense<0.000000e+00> : vector<960x32xf32>
    %31 = tpu.matmul %28, %30, %cst_30 {dimension_numbers = #tpu.dot_dimension_numbers<[1], [0], [0], [1], [0, 0, 1, 1], [], []>} : vector<960x3xf32>, vector<3x32xf32>, vector<960x32xf32> -> vector<960x32xf32>
    %32 = arith.addf %26, %31 : vector<960x32xf32>
    %c0_31 = arith.constant 0 : index
    %c34 = arith.constant 34 : index
    %c0_32 = arith.constant 0 : index
    %33 = vector.load %arg1[%c0_31, %c34, %c0_32] : memref<1x1032x3xf32, #tpu.memory_space<vmem>>, vector<1x960x3xf32>
    %34 = vector.shape_cast %33 : vector<1x960x3xf32> to vector<960x3xf32>
    %c5 = arith.constant 5 : index
    %c0_33 = arith.constant 0 : index
    %c0_34 = arith.constant 0 : index
    %35 = vector.load %arg2[%c5, %c0_33, %c0_34] : memref<9x3x32xf32, #tpu.memory_space<vmem>>, vector<1x3x32xf32>
    %36 = vector.shape_cast %35 : vector<1x3x32xf32> to vector<3x32xf32>
    %cst_35 = arith.constant dense<0.000000e+00> : vector<960x32xf32>
    %37 = tpu.matmul %34, %36, %cst_35 {dimension_numbers = #tpu.dot_dimension_numbers<[1], [0], [0], [1], [0, 0, 1, 1], [], []>} : vector<960x3xf32>, vector<3x32xf32>, vector<960x32xf32> -> vector<960x32xf32>
    %38 = arith.addf %32, %37 : vector<960x32xf32>
    %c0_36 = arith.constant 0 : index
    %c64 = arith.constant 64 : index
    %c0_37 = arith.constant 0 : index
    %39 = vector.load %arg1[%c0_36, %c64, %c0_37] : memref<1x1032x3xf32, #tpu.memory_space<vmem>>, vector<1x960x3xf32>
    %40 = vector.shape_cast %39 : vector<1x960x3xf32> to vector<960x3xf32>
    %c6 = arith.constant 6 : index
    %c0_38 = arith.constant 0 : index
    %c0_39 = arith.constant 0 : index
    %41 = vector.load %arg2[%c6, %c0_38, %c0_39] : memref<9x3x32xf32, #tpu.memory_space<vmem>>, vector<1x3x32xf32>
    %42 = vector.shape_cast %41 : vector<1x3x32xf32> to vector<3x32xf32>
    %cst_40 = arith.constant dense<0.000000e+00> : vector<960x32xf32>
    %43 = tpu.matmul %40, %42, %cst_40 {dimension_numbers = #tpu.dot_dimension_numbers<[1], [0], [0], [1], [0, 0, 1, 1], [], []>} : vector<960x3xf32>, vector<3x32xf32>, vector<960x32xf32> -> vector<960x32xf32>
    %44 = arith.addf %38, %43 : vector<960x32xf32>
    %c0_41 = arith.constant 0 : index
    %c65 = arith.constant 65 : index
    %c0_42 = arith.constant 0 : index
    %45 = vector.load %arg1[%c0_41, %c65, %c0_42] : memref<1x1032x3xf32, #tpu.memory_space<vmem>>, vector<1x960x3xf32>
    %46 = vector.shape_cast %45 : vector<1x960x3xf32> to vector<960x3xf32>
    %c7 = arith.constant 7 : index
    %c0_43 = arith.constant 0 : index
    %c0_44 = arith.constant 0 : index
    %47 = vector.load %arg2[%c7, %c0_43, %c0_44] : memref<9x3x32xf32, #tpu.memory_space<vmem>>, vector<1x3x32xf32>
    %48 = vector.shape_cast %47 : vector<1x3x32xf32> to vector<3x32xf32>
    %cst_45 = arith.constant dense<0.000000e+00> : vector<960x32xf32>
    %49 = tpu.matmul %46, %48, %cst_45 {dimension_numbers = #tpu.dot_dimension_numbers<[1], [0], [0], [1], [0, 0, 1, 1], [], []>} : vector<960x3xf32>, vector<3x32xf32>, vector<960x32xf32> -> vector<960x32xf32>
    %50 = arith.addf %44, %49 : vector<960x32xf32>
    %c0_46 = arith.constant 0 : index
    %c66 = arith.constant 66 : index
    %c0_47 = arith.constant 0 : index
    %51 = vector.load %arg1[%c0_46, %c66, %c0_47] : memref<1x1032x3xf32, #tpu.memory_space<vmem>>, vector<1x960x3xf32>
    %52 = vector.shape_cast %51 : vector<1x960x3xf32> to vector<960x3xf32>
    %c8 = arith.constant 8 : index
    %c0_48 = arith.constant 0 : index
    %c0_49 = arith.constant 0 : index
    %53 = vector.load %arg2[%c8, %c0_48, %c0_49] : memref<9x3x32xf32, #tpu.memory_space<vmem>>, vector<1x3x32xf32>
    %54 = vector.shape_cast %53 : vector<1x3x32xf32> to vector<3x32xf32>
    %cst_50 = arith.constant dense<0.000000e+00> : vector<960x32xf32>
    %55 = tpu.matmul %52, %54, %cst_50 {dimension_numbers = #tpu.dot_dimension_numbers<[1], [0], [0], [1], [0, 0, 1, 1], [], []>} : vector<960x3xf32>, vector<3x32xf32>, vector<960x32xf32> -> vector<960x32xf32>
    %56 = arith.addf %50, %55 : vector<960x32xf32>
    %c0_51 = arith.constant 0 : index
    %c0_52 = arith.constant 0 : index
    %57 = vector.load %arg3[%c0_51, %c0_52] : memref<1x32xf32, #tpu.memory_space<vmem>>, vector<1x32xf32>
    %58 = vector.broadcast %57 : vector<1x32xf32> to vector<960x32xf32>
    %59 = arith.addf %56, %58 : vector<960x32xf32>
    %cst_53 = arith.constant 0.000000e+00 : f32
    %60 = vector.broadcast %cst_53 : f32 to vector<960x32xf32>
    %61 = arith.maximumf %59, %60 : vector<960x32xf32>
    %62 = vector.extract_strided_slice %61 {offsets = [0, 0], sizes = [32, 32], strides = [1, 1]} : vector<960x32xf32> to vector<32x32xf32>
    %63 = vector.extract_strided_slice %61 {offsets = [32, 0], sizes = [32, 32], strides = [1, 1]} : vector<960x32xf32> to vector<32x32xf32>
    %64 = arith.maximumf %62, %63 : vector<32x32xf32>
    %c0_54 = arith.constant 0 : index
    %c0_55 = arith.constant 0 : index
    %65 = vector.load %arg13[%c0_54, %c0_55] : memref<480x32xf32, #tpu.memory_space<vmem>>, vector<32x32xf32>
    tpu.vector_store %arg13[%c0_54, %c0_55], %64 {strides = array<i32>} : memref<480x32xf32, #tpu.memory_space<vmem>>, vector<32x32xf32>,
    %66 = vector.extract_strided_slice %61 {offsets = [64, 0], sizes = [32, 32], strides = [1, 1]} : vector<960x32xf32> to vector<32x32xf32>
    %67 = vector.extract_strided_slice %61 {offsets = [96, 0], sizes = [32, 32], strides = [1, 1]} : vector<960x32xf32> to vector<32x32xf32>
    %68 = arith.maximumf %66, %67 : vector<32x32xf32>
    %c32_56 = arith.constant 32 : index
    %c0_57 = arith.constant 0 : index
    %69 = vector.load %arg13[%c32_56, %c0_57] : memref<480x32xf32, #tpu.memory_space<vmem>>, vector<32x32xf32>
    tpu.vector_store %arg13[%c32_56, %c0_57], %68 {strides = array<i32>} : memref<480x32xf32, #tpu.memory_space<vmem>>, vector<32x32xf32>,
    %70 = vector.extract_strided_slice %61 {offsets = [128, 0], sizes = [32, 32], strides = [1, 1]} : vector<960x32xf32> to vector<32x32xf32>
    %71 = vector.extract_strided_slice %61 {offsets = [160, 0], sizes = [32, 32], strides = [1, 1]} : vector<960x32xf32> to vector<32x32xf32>
    %72 = arith.maximumf %70, %71 : vector<32x32xf32>
    %c64_58 = arith.constant 64 : index
    %c0_59 = arith.constant 0 : index
    %73 = vector.load %arg13[%c64_58, %c0_59] : memref<480x32xf32, #tpu.memory_space<vmem>>, vector<32x32xf32>
    tpu.vector_store %arg13[%c64_58, %c0_59], %72 {strides = array<i32>} : memref<480x32xf32, #tpu.memory_space<vmem>>, vector<32x32xf32>,
    %74 = vector.extract_strided_slice %61 {offsets = [192, 0], sizes = [32, 32], strides = [1, 1]} : vector<960x32xf32> to vector<32x32xf32>
    %75 = vector.extract_strided_slice %61 {offsets = [224, 0], sizes = [32, 32], strides = [1, 1]} : vector<960x32xf32> to vector<32x32xf32>
    %76 = arith.maximumf %74, %75 : vector<32x32xf32>
    %c96 = arith.constant 96 : index
    %c0_60 = arith.constant 0 : index
    %77 = vector.load %arg13[%c96, %c0_60] : memref<480x32xf32, #tpu.memory_space<vmem>>, vector<32x32xf32>
    tpu.vector_store %arg13[%c96, %c0_60], %76 {strides = array<i32>} : memref<480x32xf32, #tpu.memory_space<vmem>>, vector<32x32xf32>,
    %78 = vector.extract_strided_slice %61 {offsets = [256, 0], sizes = [32, 32], strides = [1, 1]} : vector<960x32xf32> to vector<32x32xf32>
    %79 = vector.extract_strided_slice %61 {offsets = [288, 0], sizes = [32, 32], strides = [1, 1]} : vector<960x32xf32> to vector<32x32xf32>
    %80 = arith.maximumf %78, %79 : vector<32x32xf32>
    %c128 = arith.constant 128 : index
    %c0_61 = arith.constant 0 : index
    %81 = vector.load %arg13[%c128, %c0_61] : memref<480x32xf32, #tpu.memory_space<vmem>>, vector<32x32xf32>
    tpu.vector_store %arg13[%c128, %c0_61], %80 {strides = array<i32>} : memref<480x32xf32, #tpu.memory_space<vmem>>, vector<32x32xf32>,
    %82 = vector.extract_strided_slice %61 {offsets = [320, 0], sizes = [32, 32], strides = [1, 1]} : vector<960x32xf32> to vector<32x32xf32>
    %83 = vector.extract_strided_slice %61 {offsets = [352, 0], sizes = [32, 32], strides = [1, 1]} : vector<960x32xf32> to vector<32x32xf32>
    %84 = arith.maximumf %82, %83 : vector<32x32xf32>
    %c160 = arith.constant 160 : index
    %c0_62 = arith.constant 0 : index
    %85 = vector.load %arg13[%c160, %c0_62] : memref<480x32xf32, #tpu.memory_space<vmem>>, vector<32x32xf32>
    tpu.vector_store %arg13[%c160, %c0_62], %84 {strides = array<i32>} : memref<480x32xf32, #tpu.memory_space<vmem>>, vector<32x32xf32>,
    %86 = vector.extract_strided_slice %61 {offsets = [384, 0], sizes = [32, 32], strides = [1, 1]} : vector<960x32xf32> to vector<32x32xf32>
    %87 = vector.extract_strided_slice %61 {offsets = [416, 0], sizes = [32, 32], strides = [1, 1]} : vector<960x32xf32> to vector<32x32xf32>
    %88 = arith.maximumf %86, %87 : vector<32x32xf32>
    %c192 = arith.constant 192 : index
    %c0_63 = arith.constant 0 : index
    %89 = vector.load %arg13[%c192, %c0_63] : memref<480x32xf32, #tpu.memory_space<vmem>>, vector<32x32xf32>
    tpu.vector_store %arg13[%c192, %c0_63], %88 {strides = array<i32>} : memref<480x32xf32, #tpu.memory_space<vmem>>, vector<32x32xf32>,
    %90 = vector.extract_strided_slice %61 {offsets = [448, 0], sizes = [32, 32], strides = [1, 1]} : vector<960x32xf32> to vector<32x32xf32>
    %91 = vector.extract_strided_slice %61 {offsets = [480, 0], sizes = [32, 32], strides = [1, 1]} : vector<960x32xf32> to vector<32x32xf32>
    %92 = arith.maximumf %90, %91 : vector<32x32xf32>
    %c224 = arith.constant 224 : index
    %c0_64 = arith.constant 0 : index
    %93 = vector.load %arg13[%c224, %c0_64] : memref<480x32xf32, #tpu.memory_space<vmem>>, vector<32x32xf32>
    tpu.vector_store %arg13[%c224, %c0_64], %92 {strides = array<i32>} : memref<480x32xf32, #tpu.memory_space<vmem>>, vector<32x32xf32>,
    %94 = vector.extract_strided_slice %61 {offsets = [512, 0], sizes = [32, 32], strides = [1, 1]} : vector<960x32xf32> to vector<32x32xf32>
    %95 = vector.extract_strided_slice %61 {offsets = [544, 0], sizes = [32, 32], strides = [1, 1]} : vector<960x32xf32> to vector<32x32xf32>
    %96 = arith.maximumf %94, %95 : vector<32x32xf32>
    %c256 = arith.constant 256 : index
    %c0_65 = arith.constant 0 : index
    %97 = vector.load %arg13[%c256, %c0_65] : memref<480x32xf32, #tpu.memory_space<vmem>>, vector<32x32xf32>
    tpu.vector_store %arg13[%c256, %c0_65], %96 {strides = array<i32>} : memref<480x32xf32, #tpu.memory_space<vmem>>, vector<32x32xf32>,
    %98 = vector.extract_strided_slice %61 {offsets = [576, 0], sizes = [32, 32], strides = [1, 1]} : vector<960x32xf32> to vector<32x32xf32>
    %99 = vector.extract_strided_slice %61 {offsets = [608, 0], sizes = [32, 32], strides = [1, 1]} : vector<960x32xf32> to vector<32x32xf32>
    %100 = arith.maximumf %98, %99 : vector<32x32xf32>
    %c288 = arith.constant 288 : index
    %c0_66 = arith.constant 0 : index
    %101 = vector.load %arg13[%c288, %c0_66] : memref<480x32xf32, #tpu.memory_space<vmem>>, vector<32x32xf32>
    tpu.vector_store %arg13[%c288, %c0_66], %100 {strides = array<i32>} : memref<480x32xf32, #tpu.memory_space<vmem>>, vector<32x32xf32>,
    %102 = vector.extract_strided_slice %61 {offsets = [640, 0], sizes = [32, 32], strides = [1, 1]} : vector<960x32xf32> to vector<32x32xf32>
    %103 = vector.extract_strided_slice %61 {offsets = [672, 0], sizes = [32, 32], strides = [1, 1]} : vector<960x32xf32> to vector<32x32xf32>
    %104 = arith.maximumf %102, %103 : vector<32x32xf32>
    %c320 = arith.constant 320 : index
    %c0_67 = arith.constant 0 : index
    %105 = vector.load %arg13[%c320, %c0_67] : memref<480x32xf32, #tpu.memory_space<vmem>>, vector<32x32xf32>
    tpu.vector_store %arg13[%c320, %c0_67], %104 {strides = array<i32>} : memref<480x32xf32, #tpu.memory_space<vmem>>, vector<32x32xf32>,
    %106 = vector.extract_strided_slice %61 {offsets = [704, 0], sizes = [32, 32], strides = [1, 1]} : vector<960x32xf32> to vector<32x32xf32>
    %107 = vector.extract_strided_slice %61 {offsets = [736, 0], sizes = [32, 32], strides = [1, 1]} : vector<960x32xf32> to vector<32x32xf32>
    %108 = arith.maximumf %106, %107 : vector<32x32xf32>
    %c352 = arith.constant 352 : index
    %c0_68 = arith.constant 0 : index
    %109 = vector.load %arg13[%c352, %c0_68] : memref<480x32xf32, #tpu.memory_space<vmem>>, vector<32x32xf32>
    tpu.vector_store %arg13[%c352, %c0_68], %108 {strides = array<i32>} : memref<480x32xf32, #tpu.memory_space<vmem>>, vector<32x32xf32>,
    %110 = vector.extract_strided_slice %61 {offsets = [768, 0], sizes = [32, 32], strides = [1, 1]} : vector<960x32xf32> to vector<32x32xf32>
    %111 = vector.extract_strided_slice %61 {offsets = [800, 0], sizes = [32, 32], strides = [1, 1]} : vector<960x32xf32> to vector<32x32xf32>
    %112 = arith.maximumf %110, %111 : vector<32x32xf32>
    %c384 = arith.constant 384 : index
    %c0_69 = arith.constant 0 : index
    %113 = vector.load %arg13[%c384, %c0_69] : memref<480x32xf32, #tpu.memory_space<vmem>>, vector<32x32xf32>
    tpu.vector_store %arg13[%c384, %c0_69], %112 {strides = array<i32>} : memref<480x32xf32, #tpu.memory_space<vmem>>, vector<32x32xf32>,
    %114 = vector.extract_strided_slice %61 {offsets = [832, 0], sizes = [32, 32], strides = [1, 1]} : vector<960x32xf32> to vector<32x32xf32>
    %115 = vector.extract_strided_slice %61 {offsets = [864, 0], sizes = [32, 32], strides = [1, 1]} : vector<960x32xf32> to vector<32x32xf32>
    %116 = arith.maximumf %114, %115 : vector<32x32xf32>
    %c416 = arith.constant 416 : index
    %c0_70 = arith.constant 0 : index
    %117 = vector.load %arg13[%c416, %c0_70] : memref<480x32xf32, #tpu.memory_space<vmem>>, vector<32x32xf32>
    tpu.vector_store %arg13[%c416, %c0_70], %116 {strides = array<i32>} : memref<480x32xf32, #tpu.memory_space<vmem>>, vector<32x32xf32>,
    %118 = vector.extract_strided_slice %61 {offsets = [896, 0], sizes = [32, 32], strides = [1, 1]} : vector<960x32xf32> to vector<32x32xf32>
    %119 = vector.extract_strided_slice %61 {offsets = [928, 0], sizes = [32, 32], strides = [1, 1]} : vector<960x32xf32> to vector<32x32xf32>
    %120 = arith.maximumf %118, %119 : vector<32x32xf32>
    %c448 = arith.constant 448 : index
    %c0_71 = arith.constant 0 : index
    %121 = vector.load %arg13[%c448, %c0_71] : memref<480x32xf32, #tpu.memory_space<vmem>>, vector<32x32xf32>
    tpu.vector_store %arg13[%c448, %c0_71], %120 {strides = array<i32>} : memref<480x32xf32, #tpu.memory_space<vmem>>, vector<32x32xf32>,
    %c0_72 = arith.constant 0 : index
    %c0_73 = arith.constant 0 : index
    %122 = tpu.strided_load %arg13[%c0_72, %c0_73] {strides = array<i32: 2, 1>} : memref<480x32xf32, #tpu.memory_space<vmem>>, vector<240x32xf32>
    %c1_74 = arith.constant 1 : index
    %c0_75 = arith.constant 0 : index
    %123 = tpu.strided_load %arg13[%c1_74, %c0_75] {strides = array<i32: 2, 1>} : memref<480x32xf32, #tpu.memory_space<vmem>>, vector<240x32xf32>
    %124 = arith.maximumf %122, %123 : vector<240x32xf32>
    %c0_76 = arith.constant 0 : index
    %c0_77 = arith.constant 0 : index
    %125 = vector.load %arg14[%c0_76, %c0_77] : memref<248x32xf32, #tpu.memory_space<vmem>>, vector<240x32xf32>
    tpu.vector_store %arg14[%c0_76, %c0_77], %124 {strides = array<i32>} : memref<248x32xf32, #tpu.memory_space<vmem>>, vector<240x32xf32>,
    %c0_78 = arith.constant 0 : index
    %c0_79 = arith.constant 0 : index
    %126 = vector.load %arg14[%c0_78, %c0_79] : memref<248x32xf32, #tpu.memory_space<vmem>>, vector<208x32xf32>
    %c0_80 = arith.constant 0 : index
    %c0_81 = arith.constant 0 : index
    %c0_82 = arith.constant 0 : index
    %127 = vector.load %arg4[%c0_80, %c0_81, %c0_82] : memref<9x32x64xf32, #tpu.memory_space<vmem>>, vector<1x32x64xf32>
    %128 = vector.shape_cast %127 : vector<1x32x64xf32> to vector<32x64xf32>
    %cst_83 = arith.constant dense<0.000000e+00> : vector<208x64xf32>
    %129 = tpu.matmul %126, %128, %cst_83 {dimension_numbers = #tpu.dot_dimension_numbers<[1], [0], [0], [1], [0, 0, 1, 1], [], []>} : vector<208x32xf32>, vector<32x64xf32>, vector<208x64xf32> -> vector<208x64xf32>
    %c1_84 = arith.constant 1 : index
    %c0_85 = arith.constant 0 : index
    %130 = vector.load %arg14[%c1_84, %c0_85] : memref<248x32xf32, #tpu.memory_space<vmem>>, vector<208x32xf32>
    %c1_86 = arith.constant 1 : index
    %c0_87 = arith.constant 0 : index
    %c0_88 = arith.constant 0 : index
    %131 = vector.load %arg4[%c1_86, %c0_87, %c0_88] : memref<9x32x64xf32, #tpu.memory_space<vmem>>, vector<1x32x64xf32>
    %132 = vector.shape_cast %131 : vector<1x32x64xf32> to vector<32x64xf32>
    %cst_89 = arith.constant dense<0.000000e+00> : vector<208x64xf32>
    %133 = tpu.matmul %130, %132, %cst_89 {dimension_numbers = #tpu.dot_dimension_numbers<[1], [0], [0], [1], [0, 0, 1, 1], [], []>} : vector<208x32xf32>, vector<32x64xf32>, vector<208x64xf32> -> vector<208x64xf32>
    %134 = arith.addf %129, %133 : vector<208x64xf32>
    %c2_90 = arith.constant 2 : index
    %c0_91 = arith.constant 0 : index
    %135 = vector.load %arg14[%c2_90, %c0_91] : memref<248x32xf32, #tpu.memory_space<vmem>>, vector<208x32xf32>
    %c2_92 = arith.constant 2 : index
    %c0_93 = arith.constant 0 : index
    %c0_94 = arith.constant 0 : index
    %136 = vector.load %arg4[%c2_92, %c0_93, %c0_94] : memref<9x32x64xf32, #tpu.memory_space<vmem>>, vector<1x32x64xf32>
    %137 = vector.shape_cast %136 : vector<1x32x64xf32> to vector<32x64xf32>
    %cst_95 = arith.constant dense<0.000000e+00> : vector<208x64xf32>
    %138 = tpu.matmul %135, %137, %cst_95 {dimension_numbers = #tpu.dot_dimension_numbers<[1], [0], [0], [1], [0, 0, 1, 1], [], []>} : vector<208x32xf32>, vector<32x64xf32>, vector<208x64xf32> -> vector<208x64xf32>
    %139 = arith.addf %134, %138 : vector<208x64xf32>
    %c16 = arith.constant 16 : index
    %c0_96 = arith.constant 0 : index
    %140 = vector.load %arg14[%c16, %c0_96] : memref<248x32xf32, #tpu.memory_space<vmem>>, vector<208x32xf32>
    %c3_97 = arith.constant 3 : index
    %c0_98 = arith.constant 0 : index
    %c0_99 = arith.constant 0 : index
    %141 = vector.load %arg4[%c3_97, %c0_98, %c0_99] : memref<9x32x64xf32, #tpu.memory_space<vmem>>, vector<1x32x64xf32>
    %142 = vector.shape_cast %141 : vector<1x32x64xf32> to vector<32x64xf32>
    %cst_100 = arith.constant dense<0.000000e+00> : vector<208x64xf32>
    %143 = tpu.matmul %140, %142, %cst_100 {dimension_numbers = #tpu.dot_dimension_numbers<[1], [0], [0], [1], [0, 0, 1, 1], [], []>} : vector<208x32xf32>, vector<32x64xf32>, vector<208x64xf32> -> vector<208x64xf32>
    %144 = arith.addf %139, %143 : vector<208x64xf32>
    %c17 = arith.constant 17 : index
    %c0_101 = arith.constant 0 : index
    %145 = vector.load %arg14[%c17, %c0_101] : memref<248x32xf32, #tpu.memory_space<vmem>>, vector<208x32xf32>
    %c4_102 = arith.constant 4 : index
    %c0_103 = arith.constant 0 : index
    %c0_104 = arith.constant 0 : index
    %146 = vector.load %arg4[%c4_102, %c0_103, %c0_104] : memref<9x32x64xf32, #tpu.memory_space<vmem>>, vector<1x32x64xf32>
    %147 = vector.shape_cast %146 : vector<1x32x64xf32> to vector<32x64xf32>
    %cst_105 = arith.constant dense<0.000000e+00> : vector<208x64xf32>
    %148 = tpu.matmul %145, %147, %cst_105 {dimension_numbers = #tpu.dot_dimension_numbers<[1], [0], [0], [1], [0, 0, 1, 1], [], []>} : vector<208x32xf32>, vector<32x64xf32>, vector<208x64xf32> -> vector<208x64xf32>
    %149 = arith.addf %144, %148 : vector<208x64xf32>
    %c18 = arith.constant 18 : index
    %c0_106 = arith.constant 0 : index
    %150 = vector.load %arg14[%c18, %c0_106] : memref<248x32xf32, #tpu.memory_space<vmem>>, vector<208x32xf32>
    %c5_107 = arith.constant 5 : index
    %c0_108 = arith.constant 0 : index
    %c0_109 = arith.constant 0 : index
    %151 = vector.load %arg4[%c5_107, %c0_108, %c0_109] : memref<9x32x64xf32, #tpu.memory_space<vmem>>, vector<1x32x64xf32>
    %152 = vector.shape_cast %151 : vector<1x32x64xf32> to vector<32x64xf32>
    %cst_110 = arith.constant dense<0.000000e+00> : vector<208x64xf32>
    %153 = tpu.matmul %150, %152, %cst_110 {dimension_numbers = #tpu.dot_dimension_numbers<[1], [0], [0], [1], [0, 0, 1, 1], [], []>} : vector<208x32xf32>, vector<32x64xf32>, vector<208x64xf32> -> vector<208x64xf32>
    %154 = arith.addf %149, %153 : vector<208x64xf32>
    %c32_111 = arith.constant 32 : index
    %c0_112 = arith.constant 0 : index
    %155 = vector.load %arg14[%c32_111, %c0_112] : memref<248x32xf32, #tpu.memory_space<vmem>>, vector<208x32xf32>
    %c6_113 = arith.constant 6 : index
    %c0_114 = arith.constant 0 : index
    %c0_115 = arith.constant 0 : index
    %156 = vector.load %arg4[%c6_113, %c0_114, %c0_115] : memref<9x32x64xf32, #tpu.memory_space<vmem>>, vector<1x32x64xf32>
    %157 = vector.shape_cast %156 : vector<1x32x64xf32> to vector<32x64xf32>
    %cst_116 = arith.constant dense<0.000000e+00> : vector<208x64xf32>
    %158 = tpu.matmul %155, %157, %cst_116 {dimension_numbers = #tpu.dot_dimension_numbers<[1], [0], [0], [1], [0, 0, 1, 1], [], []>} : vector<208x32xf32>, vector<32x64xf32>, vector<208x64xf32> -> vector<208x64xf32>
    %159 = arith.addf %154, %158 : vector<208x64xf32>
    %c33_117 = arith.constant 33 : index
    %c0_118 = arith.constant 0 : index
    %160 = vector.load %arg14[%c33_117, %c0_118] : memref<248x32xf32, #tpu.memory_space<vmem>>, vector<208x32xf32>
    %c7_119 = arith.constant 7 : index
    %c0_120 = arith.constant 0 : index
    %c0_121 = arith.constant 0 : index
    %161 = vector.load %arg4[%c7_119, %c0_120, %c0_121] : memref<9x32x64xf32, #tpu.memory_space<vmem>>, vector<1x32x64xf32>
    %162 = vector.shape_cast %161 : vector<1x32x64xf32> to vector<32x64xf32>
    %cst_122 = arith.constant dense<0.000000e+00> : vector<208x64xf32>
    %163 = tpu.matmul %160, %162, %cst_122 {dimension_numbers = #tpu.dot_dimension_numbers<[1], [0], [0], [1], [0, 0, 1, 1], [], []>} : vector<208x32xf32>, vector<32x64xf32>, vector<208x64xf32> -> vector<208x64xf32>
    %164 = arith.addf %159, %163 : vector<208x64xf32>
    %c34_123 = arith.constant 34 : index
    %c0_124 = arith.constant 0 : index
    %165 = vector.load %arg14[%c34_123, %c0_124] : memref<248x32xf32, #tpu.memory_space<vmem>>, vector<208x32xf32>
    %c8_125 = arith.constant 8 : index
    %c0_126 = arith.constant 0 : index
    %c0_127 = arith.constant 0 : index
    %166 = vector.load %arg4[%c8_125, %c0_126, %c0_127] : memref<9x32x64xf32, #tpu.memory_space<vmem>>, vector<1x32x64xf32>
    %167 = vector.shape_cast %166 : vector<1x32x64xf32> to vector<32x64xf32>
    %cst_128 = arith.constant dense<0.000000e+00> : vector<208x64xf32>
    %168 = tpu.matmul %165, %167, %cst_128 {dimension_numbers = #tpu.dot_dimension_numbers<[1], [0], [0], [1], [0, 0, 1, 1], [], []>} : vector<208x32xf32>, vector<32x64xf32>, vector<208x64xf32> -> vector<208x64xf32>
    %169 = arith.addf %164, %168 : vector<208x64xf32>
    %c0_129 = arith.constant 0 : index
    %c0_130 = arith.constant 0 : index
    %170 = vector.load %arg5[%c0_129, %c0_130] : memref<1x64xf32, #tpu.memory_space<vmem>>, vector<1x64xf32>
    %171 = vector.broadcast %170 : vector<1x64xf32> to vector<208x64xf32>
    %172 = arith.addf %169, %171 : vector<208x64xf32>
    %cst_131 = arith.constant 0.000000e+00 : f32
    %173 = vector.broadcast %cst_131 : f32 to vector<208x64xf32>
    %174 = arith.maximumf %172, %173 : vector<208x64xf32>
    %175 = vector.extract_strided_slice %174 {offsets = [0, 0], sizes = [16, 64], strides = [1, 1]} : vector<208x64xf32> to vector<16x64xf32>
    %176 = vector.extract_strided_slice %174 {offsets = [16, 0], sizes = [16, 64], strides = [1, 1]} : vector<208x64xf32> to vector<16x64xf32>
    %177 = arith.maximumf %175, %176 : vector<16x64xf32>
    %c0_132 = arith.constant 0 : index
    %c0_133 = arith.constant 0 : index
    %178 = vector.load %arg15[%c0_132, %c0_133] : memref<96x64xf32, #tpu.memory_space<vmem>>, vector<16x64xf32>
    tpu.vector_store %arg15[%c0_132, %c0_133], %177 {strides = array<i32>} : memref<96x64xf32, #tpu.memory_space<vmem>>, vector<16x64xf32>,
    %179 = vector.extract_strided_slice %174 {offsets = [32, 0], sizes = [16, 64], strides = [1, 1]} : vector<208x64xf32> to vector<16x64xf32>
    %180 = vector.extract_strided_slice %174 {offsets = [48, 0], sizes = [16, 64], strides = [1, 1]} : vector<208x64xf32> to vector<16x64xf32>
    %181 = arith.maximumf %179, %180 : vector<16x64xf32>
    %c16_134 = arith.constant 16 : index
    %c0_135 = arith.constant 0 : index
    %182 = vector.load %arg15[%c16_134, %c0_135] : memref<96x64xf32, #tpu.memory_space<vmem>>, vector<16x64xf32>
    tpu.vector_store %arg15[%c16_134, %c0_135], %181 {strides = array<i32>} : memref<96x64xf32, #tpu.memory_space<vmem>>, vector<16x64xf32>,
    %183 = vector.extract_strided_slice %174 {offsets = [64, 0], sizes = [16, 64], strides = [1, 1]} : vector<208x64xf32> to vector<16x64xf32>
    %184 = vector.extract_strided_slice %174 {offsets = [80, 0], sizes = [16, 64], strides = [1, 1]} : vector<208x64xf32> to vector<16x64xf32>
    %185 = arith.maximumf %183, %184 : vector<16x64xf32>
    %c32_136 = arith.constant 32 : index
    %c0_137 = arith.constant 0 : index
    %186 = vector.load %arg15[%c32_136, %c0_137] : memref<96x64xf32, #tpu.memory_space<vmem>>, vector<16x64xf32>
    tpu.vector_store %arg15[%c32_136, %c0_137], %185 {strides = array<i32>} : memref<96x64xf32, #tpu.memory_space<vmem>>, vector<16x64xf32>,
    %187 = vector.extract_strided_slice %174 {offsets = [96, 0], sizes = [16, 64], strides = [1, 1]} : vector<208x64xf32> to vector<16x64xf32>
    %188 = vector.extract_strided_slice %174 {offsets = [112, 0], sizes = [16, 64], strides = [1, 1]} : vector<208x64xf32> to vector<16x64xf32>
    %189 = arith.maximumf %187, %188 : vector<16x64xf32>
    %c48_138 = arith.constant 48 : index
    %c0_139 = arith.constant 0 : index
    %190 = vector.load %arg15[%c48_138, %c0_139] : memref<96x64xf32, #tpu.memory_space<vmem>>, vector<16x64xf32>
    tpu.vector_store %arg15[%c48_138, %c0_139], %189 {strides = array<i32>} : memref<96x64xf32, #tpu.memory_space<vmem>>, vector<16x64xf32>,
    %191 = vector.extract_strided_slice %174 {offsets = [128, 0], sizes = [16, 64], strides = [1, 1]} : vector<208x64xf32> to vector<16x64xf32>
    %192 = vector.extract_strided_slice %174 {offsets = [144, 0], sizes = [16, 64], strides = [1, 1]} : vector<208x64xf32> to vector<16x64xf32>
    %193 = arith.maximumf %191, %192 : vector<16x64xf32>
    %c64_140 = arith.constant 64 : index
    %c0_141 = arith.constant 0 : index
    %194 = vector.load %arg15[%c64_140, %c0_141] : memref<96x64xf32, #tpu.memory_space<vmem>>, vector<16x64xf32>
    tpu.vector_store %arg15[%c64_140, %c0_141], %193 {strides = array<i32>} : memref<96x64xf32, #tpu.memory_space<vmem>>, vector<16x64xf32>,
    %195 = vector.extract_strided_slice %174 {offsets = [160, 0], sizes = [16, 64], strides = [1, 1]} : vector<208x64xf32> to vector<16x64xf32>
    %196 = vector.extract_strided_slice %174 {offsets = [176, 0], sizes = [16, 64], strides = [1, 1]} : vector<208x64xf32> to vector<16x64xf32>
    %197 = arith.maximumf %195, %196 : vector<16x64xf32>
    %c80 = arith.constant 80 : index
    %c0_142 = arith.constant 0 : index
    %198 = vector.load %arg15[%c80, %c0_142] : memref<96x64xf32, #tpu.memory_space<vmem>>, vector<16x64xf32>
    tpu.vector_store %arg15[%c80, %c0_142], %197 {strides = array<i32>} : memref<96x64xf32, #tpu.memory_space<vmem>>, vector<16x64xf32>,
    %c0_143 = arith.constant 0 : index
    %c0_144 = arith.constant 0 : index
    %199 = tpu.strided_load %arg15[%c0_143, %c0_144] {strides = array<i32: 2, 1>} : memref<96x64xf32, #tpu.memory_space<vmem>>, vector<48x64xf32>
    %c1_145 = arith.constant 1 : index
    %c0_146 = arith.constant 0 : index
    %200 = tpu.strided_load %arg15[%c1_145, %c0_146] {strides = array<i32: 2, 1>} : memref<96x64xf32, #tpu.memory_space<vmem>>, vector<48x64xf32>
    %201 = arith.maximumf %199, %200 : vector<48x64xf32>
    %c0_147 = arith.constant 0 : index
    %c0_148 = arith.constant 0 : index
    %202 = vector.load %arg16[%c0_147, %c0_148] : memref<56x64xf32, #tpu.memory_space<vmem>>, vector<48x64xf32>
    tpu.vector_store %arg16[%c0_147, %c0_148], %201 {strides = array<i32>} : memref<56x64xf32, #tpu.memory_space<vmem>>, vector<48x64xf32>,
    %c0_149 = arith.constant 0 : index
    %c0_150 = arith.constant 0 : index
    %203 = vector.load %arg16[%c0_149, %c0_150] : memref<56x64xf32, #tpu.memory_space<vmem>>, vector<32x64xf32>
    %c0_151 = arith.constant 0 : index
    %c0_152 = arith.constant 0 : index
    %c0_153 = arith.constant 0 : index
    %204 = vector.load %arg6[%c0_151, %c0_152, %c0_153] : memref<9x64x128xf32, #tpu.memory_space<vmem>>, vector<1x64x128xf32>
    %205 = vector.shape_cast %204 : vector<1x64x128xf32> to vector<64x128xf32>
    %cst_154 = arith.constant dense<0.000000e+00> : vector<32x128xf32>
    %206 = tpu.matmul %203, %205, %cst_154 {dimension_numbers = #tpu.dot_dimension_numbers<[1], [0], [0], [1], [0, 0, 1, 1], [], []>} : vector<32x64xf32>, vector<64x128xf32>, vector<32x128xf32> -> vector<32x128xf32>
    %c1_155 = arith.constant 1 : index
    %c0_156 = arith.constant 0 : index
    %207 = vector.load %arg16[%c1_155, %c0_156] : memref<56x64xf32, #tpu.memory_space<vmem>>, vector<32x64xf32>
    %c1_157 = arith.constant 1 : index
    %c0_158 = arith.constant 0 : index
    %c0_159 = arith.constant 0 : index
    %208 = vector.load %arg6[%c1_157, %c0_158, %c0_159] : memref<9x64x128xf32, #tpu.memory_space<vmem>>, vector<1x64x128xf32>
    %209 = vector.shape_cast %208 : vector<1x64x128xf32> to vector<64x128xf32>
    %cst_160 = arith.constant dense<0.000000e+00> : vector<32x128xf32>
    %210 = tpu.matmul %207, %209, %cst_160 {dimension_numbers = #tpu.dot_dimension_numbers<[1], [0], [0], [1], [0, 0, 1, 1], [], []>} : vector<32x64xf32>, vector<64x128xf32>, vector<32x128xf32> -> vector<32x128xf32>
    %211 = arith.addf %206, %210 : vector<32x128xf32>
    %c2_161 = arith.constant 2 : index
    %c0_162 = arith.constant 0 : index
    %212 = vector.load %arg16[%c2_161, %c0_162] : memref<56x64xf32, #tpu.memory_space<vmem>>, vector<32x64xf32>
    %c2_163 = arith.constant 2 : index
    %c0_164 = arith.constant 0 : index
    %c0_165 = arith.constant 0 : index
    %213 = vector.load %arg6[%c2_163, %c0_164, %c0_165] : memref<9x64x128xf32, #tpu.memory_space<vmem>>, vector<1x64x128xf32>
    %214 = vector.shape_cast %213 : vector<1x64x128xf32> to vector<64x128xf32>
    %cst_166 = arith.constant dense<0.000000e+00> : vector<32x128xf32>
    %215 = tpu.matmul %212, %214, %cst_166 {dimension_numbers = #tpu.dot_dimension_numbers<[1], [0], [0], [1], [0, 0, 1, 1], [], []>} : vector<32x64xf32>, vector<64x128xf32>, vector<32x128xf32> -> vector<32x128xf32>
    %216 = arith.addf %211, %215 : vector<32x128xf32>
    %c8_167 = arith.constant 8 : index
    %c0_168 = arith.constant 0 : index
    %217 = vector.load %arg16[%c8_167, %c0_168] : memref<56x64xf32, #tpu.memory_space<vmem>>, vector<32x64xf32>
    %c3_169 = arith.constant 3 : index
    %c0_170 = arith.constant 0 : index
    %c0_171 = arith.constant 0 : index
    %218 = vector.load %arg6[%c3_169, %c0_170, %c0_171] : memref<9x64x128xf32, #tpu.memory_space<vmem>>, vector<1x64x128xf32>
    %219 = vector.shape_cast %218 : vector<1x64x128xf32> to vector<64x128xf32>
    %cst_172 = arith.constant dense<0.000000e+00> : vector<32x128xf32>
    %220 = tpu.matmul %217, %219, %cst_172 {dimension_numbers = #tpu.dot_dimension_numbers<[1], [0], [0], [1], [0, 0, 1, 1], [], []>} : vector<32x64xf32>, vector<64x128xf32>, vector<32x128xf32> -> vector<32x128xf32>
    %221 = arith.addf %216, %220 : vector<32x128xf32>
    %c9 = arith.constant 9 : index
    %c0_173 = arith.constant 0 : index
    %222 = vector.load %arg16[%c9, %c0_173] : memref<56x64xf32, #tpu.memory_space<vmem>>, vector<32x64xf32>
    %c4_174 = arith.constant 4 : index
    %c0_175 = arith.constant 0 : index
    %c0_176 = arith.constant 0 : index
    %223 = vector.load %arg6[%c4_174, %c0_175, %c0_176] : memref<9x64x128xf32, #tpu.memory_space<vmem>>, vector<1x64x128xf32>
    %224 = vector.shape_cast %223 : vector<1x64x128xf32> to vector<64x128xf32>
    %cst_177 = arith.constant dense<0.000000e+00> : vector<32x128xf32>
    %225 = tpu.matmul %222, %224, %cst_177 {dimension_numbers = #tpu.dot_dimension_numbers<[1], [0], [0], [1], [0, 0, 1, 1], [], []>} : vector<32x64xf32>, vector<64x128xf32>, vector<32x128xf32> -> vector<32x128xf32>
    %226 = arith.addf %221, %225 : vector<32x128xf32>
    %c10 = arith.constant 10 : index
    %c0_178 = arith.constant 0 : index
    %227 = vector.load %arg16[%c10, %c0_178] : memref<56x64xf32, #tpu.memory_space<vmem>>, vector<32x64xf32>
    %c5_179 = arith.constant 5 : index
    %c0_180 = arith.constant 0 : index
    %c0_181 = arith.constant 0 : index
    %228 = vector.load %arg6[%c5_179, %c0_180, %c0_181] : memref<9x64x128xf32, #tpu.memory_space<vmem>>, vector<1x64x128xf32>
    %229 = vector.shape_cast %228 : vector<1x64x128xf32> to vector<64x128xf32>
    %cst_182 = arith.constant dense<0.000000e+00> : vector<32x128xf32>
    %230 = tpu.matmul %227, %229, %cst_182 {dimension_numbers = #tpu.dot_dimension_numbers<[1], [0], [0], [1], [0, 0, 1, 1], [], []>} : vector<32x64xf32>, vector<64x128xf32>, vector<32x128xf32> -> vector<32x128xf32>
    %231 = arith.addf %226, %230 : vector<32x128xf32>
    %c16_183 = arith.constant 16 : index
    %c0_184 = arith.constant 0 : index
    %232 = vector.load %arg16[%c16_183, %c0_184] : memref<56x64xf32, #tpu.memory_space<vmem>>, vector<32x64xf32>
    %c6_185 = arith.constant 6 : index
    %c0_186 = arith.constant 0 : index
    %c0_187 = arith.constant 0 : index
    %233 = vector.load %arg6[%c6_185, %c0_186, %c0_187] : memref<9x64x128xf32, #tpu.memory_space<vmem>>, vector<1x64x128xf32>
    %234 = vector.shape_cast %233 : vector<1x64x128xf32> to vector<64x128xf32>
    %cst_188 = arith.constant dense<0.000000e+00> : vector<32x128xf32>
    %235 = tpu.matmul %232, %234, %cst_188 {dimension_numbers = #tpu.dot_dimension_numbers<[1], [0], [0], [1], [0, 0, 1, 1], [], []>} : vector<32x64xf32>, vector<64x128xf32>, vector<32x128xf32> -> vector<32x128xf32>
    %236 = arith.addf %231, %235 : vector<32x128xf32>
    %c17_189 = arith.constant 17 : index
    %c0_190 = arith.constant 0 : index
    %237 = vector.load %arg16[%c17_189, %c0_190] : memref<56x64xf32, #tpu.memory_space<vmem>>, vector<32x64xf32>
    %c7_191 = arith.constant 7 : index
    %c0_192 = arith.constant 0 : index
    %c0_193 = arith.constant 0 : index
    %238 = vector.load %arg6[%c7_191, %c0_192, %c0_193] : memref<9x64x128xf32, #tpu.memory_space<vmem>>, vector<1x64x128xf32>
    %239 = vector.shape_cast %238 : vector<1x64x128xf32> to vector<64x128xf32>
    %cst_194 = arith.constant dense<0.000000e+00> : vector<32x128xf32>
    %240 = tpu.matmul %237, %239, %cst_194 {dimension_numbers = #tpu.dot_dimension_numbers<[1], [0], [0], [1], [0, 0, 1, 1], [], []>} : vector<32x64xf32>, vector<64x128xf32>, vector<32x128xf32> -> vector<32x128xf32>
    %241 = arith.addf %236, %240 : vector<32x128xf32>
    %c18_195 = arith.constant 18 : index
    %c0_196 = arith.constant 0 : index
    %242 = vector.load %arg16[%c18_195, %c0_196] : memref<56x64xf32, #tpu.memory_space<vmem>>, vector<32x64xf32>
    %c8_197 = arith.constant 8 : index
    %c0_198 = arith.constant 0 : index
    %c0_199 = arith.constant 0 : index
    %243 = vector.load %arg6[%c8_197, %c0_198, %c0_199] : memref<9x64x128xf32, #tpu.memory_space<vmem>>, vector<1x64x128xf32>
    %244 = vector.shape_cast %243 : vector<1x64x128xf32> to vector<64x128xf32>
    %cst_200 = arith.constant dense<0.000000e+00> : vector<32x128xf32>
    %245 = tpu.matmul %242, %244, %cst_200 {dimension_numbers = #tpu.dot_dimension_numbers<[1], [0], [0], [1], [0, 0, 1, 1], [], []>} : vector<32x64xf32>, vector<64x128xf32>, vector<32x128xf32> -> vector<32x128xf32>
    %246 = arith.addf %241, %245 : vector<32x128xf32>
    %c0_201 = arith.constant 0 : index
    %c0_202 = arith.constant 0 : index
    %247 = vector.load %arg7[%c0_201, %c0_202] : memref<1x128xf32, #tpu.memory_space<vmem>>, vector<1x128xf32>
    %248 = vector.broadcast %247 : vector<1x128xf32> to vector<32x128xf32>
    %249 = arith.addf %246, %248 : vector<32x128xf32>
    %cst_203 = arith.constant 0.000000e+00 : f32
    %250 = vector.broadcast %cst_203 : f32 to vector<32x128xf32>
    %251 = arith.maximumf %249, %250 : vector<32x128xf32>
    %252 = vector.extract_strided_slice %251 {offsets = [0, 0], sizes = [8, 128], strides = [1, 1]} : vector<32x128xf32> to vector<8x128xf32>
    %253 = vector.extract_strided_slice %251 {offsets = [8, 0], sizes = [8, 128], strides = [1, 1]} : vector<32x128xf32> to vector<8x128xf32>
    %254 = arith.maximumf %252, %253 : vector<8x128xf32>
    %c0_204 = arith.constant 0 : index
    %c0_205 = arith.constant 0 : index
    %255 = vector.load %arg17[%c0_204, %c0_205] : memref<16x128xf32, #tpu.memory_space<vmem>>, vector<8x128xf32>
    tpu.vector_store %arg17[%c0_204, %c0_205], %254 {strides = array<i32>} : memref<16x128xf32, #tpu.memory_space<vmem>>, vector<8x128xf32>,
    %256 = vector.extract_strided_slice %251 {offsets = [16, 0], sizes = [8, 128], strides = [1, 1]} : vector<32x128xf32> to vector<8x128xf32>
    %257 = vector.extract_strided_slice %251 {offsets = [24, 0], sizes = [8, 128], strides = [1, 1]} : vector<32x128xf32> to vector<8x128xf32>
    %258 = arith.maximumf %256, %257 : vector<8x128xf32>
    %c8_206 = arith.constant 8 : index
    %c0_207 = arith.constant 0 : index
    %259 = vector.load %arg17[%c8_206, %c0_207] : memref<16x128xf32, #tpu.memory_space<vmem>>, vector<8x128xf32>
    tpu.vector_store %arg17[%c8_206, %c0_207], %258 {strides = array<i32>} : memref<16x128xf32, #tpu.memory_space<vmem>>, vector<8x128xf32>,
    %c0_208 = arith.constant 0 : index
    %c0_209 = arith.constant 0 : index
    %260 = tpu.strided_load %arg17[%c0_208, %c0_209] {strides = array<i32: 2, 1>} : memref<16x128xf32, #tpu.memory_space<vmem>>, vector<8x128xf32>
    %c1_210 = arith.constant 1 : index
    %c0_211 = arith.constant 0 : index
    %261 = tpu.strided_load %arg17[%c1_210, %c0_211] {strides = array<i32: 2, 1>} : memref<16x128xf32, #tpu.memory_space<vmem>>, vector<8x128xf32>
    %262 = arith.maximumf %260, %261 : vector<8x128xf32>
    %c0_212 = arith.constant 0 : index
    %c0_213 = arith.constant 0 : index
    %263 = vector.load %arg18[%c0_212, %c0_213] : memref<8x128xf32, #tpu.memory_space<vmem>>, vector<8x128xf32>
    tpu.vector_store %arg18[%c0_212, %c0_213], %262 {strides = array<i32>} : memref<8x128xf32, #tpu.memory_space<vmem>>, vector<8x128xf32>,
    %c0_214 = arith.constant 0 : index
    %c0_215 = arith.constant 0 : index
    %264 = vector.load %arg9[%c0_214, %c0_215] : memref<1x512xf32, #tpu.memory_space<vmem>>, vector<1x512xf32>
    %c0_216 = arith.constant 0 : index
    %c0_217 = arith.constant 0 : index
    %265 = vector.load %arg18[%c0_216, %c0_217] : memref<8x128xf32, #tpu.memory_space<vmem>>, vector<1x128xf32>
    %c0_218 = arith.constant 0 : index
    %c0_219 = arith.constant 0 : index
    %c0_220 = arith.constant 0 : index
    %266 = vector.load %arg8[%c0_218, %c0_219, %c0_220] : memref<4x128x512xf32, #tpu.memory_space<vmem>>, vector<1x128x512xf32>
    %267 = vector.shape_cast %266 : vector<1x128x512xf32> to vector<128x512xf32>
    %cst_221 = arith.constant dense<0.000000e+00> : vector<1x512xf32>
    %268 = tpu.matmul %265, %267, %cst_221 {dimension_numbers = #tpu.dot_dimension_numbers<[1], [0], [0], [1], [0, 0, 1, 1], [], []>} : vector<1x128xf32>, vector<128x512xf32>, vector<1x512xf32> -> vector<1x512xf32>
    %269 = arith.addf %264, %268 : vector<1x512xf32>
    %c1_222 = arith.constant 1 : index
    %c0_223 = arith.constant 0 : index
    %270 = vector.load %arg18[%c1_222, %c0_223] : memref<8x128xf32, #tpu.memory_space<vmem>>, vector<1x128xf32>
    %c1_224 = arith.constant 1 : index
    %c0_225 = arith.constant 0 : index
    %c0_226 = arith.constant 0 : index
    %271 = vector.load %arg8[%c1_224, %c0_225, %c0_226] : memref<4x128x512xf32, #tpu.memory_space<vmem>>, vector<1x128x512xf32>
    %272 = vector.shape_cast %271 : vector<1x128x512xf32> to vector<128x512xf32>
    %cst_227 = arith.constant dense<0.000000e+00> : vector<1x512xf32>
    %273 = tpu.matmul %270, %272, %cst_227 {dimension_numbers = #tpu.dot_dimension_numbers<[1], [0], [0], [1], [0, 0, 1, 1], [], []>} : vector<1x128xf32>, vector<128x512xf32>, vector<1x512xf32> -> vector<1x512xf32>
    %274 = arith.addf %269, %273 : vector<1x512xf32>
    %c4_228 = arith.constant 4 : index
    %c0_229 = arith.constant 0 : index
    %275 = vector.load %arg18[%c4_228, %c0_229] : memref<8x128xf32, #tpu.memory_space<vmem>>, vector<1x128xf32>
    %c2_230 = arith.constant 2 : index
    %c0_231 = arith.constant 0 : index
    %c0_232 = arith.constant 0 : index
    %276 = vector.load %arg8[%c2_230, %c0_231, %c0_232] : memref<4x128x512xf32, #tpu.memory_space<vmem>>, vector<1x128x512xf32>
    %277 = vector.shape_cast %276 : vector<1x128x512xf32> to vector<128x512xf32>
    %cst_233 = arith.constant dense<0.000000e+00> : vector<1x512xf32>
    %278 = tpu.matmul %275, %277, %cst_233 {dimension_numbers = #tpu.dot_dimension_numbers<[1], [0], [0], [1], [0, 0, 1, 1], [], []>} : vector<1x128xf32>, vector<128x512xf32>, vector<1x512xf32> -> vector<1x512xf32>
    %279 = arith.addf %274, %278 : vector<1x512xf32>
    %c5_234 = arith.constant 5 : index
    %c0_235 = arith.constant 0 : index
    %280 = vector.load %arg18[%c5_234, %c0_235] : memref<8x128xf32, #tpu.memory_space<vmem>>, vector<1x128xf32>
    %c3_236 = arith.constant 3 : index
    %c0_237 = arith.constant 0 : index
    %c0_238 = arith.constant 0 : index
    %281 = vector.load %arg8[%c3_236, %c0_237, %c0_238] : memref<4x128x512xf32, #tpu.memory_space<vmem>>, vector<1x128x512xf32>
    %282 = vector.shape_cast %281 : vector<1x128x512xf32> to vector<128x512xf32>
    %cst_239 = arith.constant dense<0.000000e+00> : vector<1x512xf32>
    %283 = tpu.matmul %280, %282, %cst_239 {dimension_numbers = #tpu.dot_dimension_numbers<[1], [0], [0], [1], [0, 0, 1, 1], [], []>} : vector<1x128xf32>, vector<128x512xf32>, vector<1x512xf32> -> vector<1x512xf32>
    %284 = arith.addf %279, %283 : vector<1x512xf32>
    %cst_240 = arith.constant 0.000000e+00 : f32
    %285 = vector.broadcast %cst_240 : f32 to vector<1x512xf32>
    %286 = arith.maximumf %284, %285 : vector<1x512xf32>
    %c0_241 = arith.constant 0 : index
    %c0_242 = arith.constant 0 : index
    %287 = vector.load %arg10[%c0_241, %c0_242] : memref<512x10xf32, #tpu.memory_space<vmem>>, vector<512x10xf32>
    %cst_243 = arith.constant dense<0.000000e+00> : vector<1x10xf32>
    %288 = tpu.matmul %286, %287, %cst_243 {dimension_numbers = #tpu.dot_dimension_numbers<[1], [0], [0], [1], [0, 0, 1, 1], [], []>} : vector<1x512xf32>, vector<512x10xf32>, vector<1x10xf32> -> vector<1x10xf32>
    %c0_244 = arith.constant 0 : index
    %c0_245 = arith.constant 0 : index
    %289 = vector.load %arg11[%c0_244, %c0_245] : memref<1x10xf32, #tpu.memory_space<vmem>>, vector<1x10xf32>
    %290 = arith.addf %288, %289 : vector<1x10xf32>
    %c0_246 = arith.constant 0 : index
    %c0_247 = arith.constant 0 : index
    %c0_248 = arith.constant 0 : index
    %291 = vector.load %arg12[%c0_246, %c0_247, %c0_248] : memref<1x1x10xf32, #tpu.memory_space<vmem>>, vector<1x1x10xf32>
    %292 = vector.shape_cast %291 : vector<1x1x10xf32> to vector<1x10xf32>
    %293 = vector.shape_cast %290 : vector<1x10xf32> to vector<1x1x10xf32>
    tpu.vector_store %arg12[%c0_246, %c0_247, %c0_248], %293 {strides = array<i32>} : memref<1x1x10xf32, #tpu.memory_space<vmem>>, vector<1x1x10xf32>,
    return
  }
  func.func @transform_0(%arg0: i32) -> (i32, i32, i32) {
    %c0_i32 = arith.constant 0 : i32
    %c0_i32_0 = arith.constant 0 : i32
    %c0_i32_1 = arith.constant 0 : i32
    return %arg0, %c0_i32, %c0_i32_0 : i32, i32, i32
  }
  func.func @transform_1(%arg0: i32) -> (i32, i32, i32) {
    %c0_i32 = arith.constant 0 : i32
    %c0_i32_0 = arith.constant 0 : i32
    %c0_i32_1 = arith.constant 0 : i32
    %c0_i32_2 = arith.constant 0 : i32
    return %c0_i32, %c0_i32_0, %c0_i32_1 : i32, i32, i32
  }
  func.func @transform_2(%arg0: i32) -> (i32, i32) {
    %c0_i32 = arith.constant 0 : i32
    %c0_i32_0 = arith.constant 0 : i32
    %c0_i32_1 = arith.constant 0 : i32
    return %c0_i32, %c0_i32_0 : i32, i32
  }
  func.func @transform_3(%arg0: i32) -> (i32, i32, i32) {
    %c0_i32 = arith.constant 0 : i32
    %c0_i32_0 = arith.constant 0 : i32
    %c0_i32_1 = arith.constant 0 : i32
    %c0_i32_2 = arith.constant 0 : i32
    return %c0_i32, %c0_i32_0, %c0_i32_1 : i32, i32, i32
  }
  func.func @transform_4(%arg0: i32) -> (i32, i32) {
    %c0_i32 = arith.constant 0 : i32
    %c0_i32_0 = arith.constant 0 : i32
    %c0_i32_1 = arith.constant 0 : i32
    return %c0_i32, %c0_i32_0 : i32, i32
  }
  func.func @transform_5(%arg0: i32) -> (i32, i32, i32) {
    %c0_i32 = arith.constant 0 : i32
    %c0_i32_0 = arith.constant 0 : i32
    %c0_i32_1 = arith.constant 0 : i32
    %c0_i32_2 = arith.constant 0 : i32
    return %c0_i32, %c0_i32_0, %c0_i32_1 : i32, i32, i32
  }
  func.func @transform_6(%arg0: i32) -> (i32, i32) {
    %c0_i32 = arith.constant 0 : i32
    %c0_i32_0 = arith.constant 0 : i32
    %c0_i32_1 = arith.constant 0 : i32
    return %c0_i32, %c0_i32_0 : i32, i32
  }
  func.func @transform_7(%arg0: i32) -> (i32, i32, i32) {
    %c0_i32 = arith.constant 0 : i32
    %c0_i32_0 = arith.constant 0 : i32
    %c0_i32_1 = arith.constant 0 : i32
    %c0_i32_2 = arith.constant 0 : i32
    return %c0_i32, %c0_i32_0, %c0_i32_1 : i32, i32, i32
  }
  func.func @transform_8(%arg0: i32) -> (i32, i32) {
    %c0_i32 = arith.constant 0 : i32
    %c0_i32_0 = arith.constant 0 : i32
    %c0_i32_1 = arith.constant 0 : i32
    return %c0_i32, %c0_i32_0 : i32, i32
  }
  func.func @transform_9(%arg0: i32) -> (i32, i32) {
    %c0_i32 = arith.constant 0 : i32
    %c0_i32_0 = arith.constant 0 : i32
    %c0_i32_1 = arith.constant 0 : i32
    return %c0_i32, %c0_i32_0 : i32, i32
  }
  func.func @transform_10(%arg0: i32) -> (i32, i32) {
    %c0_i32 = arith.constant 0 : i32
    %c0_i32_0 = arith.constant 0 : i32
    %c0_i32_1 = arith.constant 0 : i32
    return %c0_i32, %c0_i32_0 : i32, i32
  }
  func.func @transform_11(%arg0: i32) -> (i32, i32, i32) {
    %c0_i32 = arith.constant 0 : i32
    %c0_i32_0 = arith.constant 0 : i32
    %c0_i32_1 = arith.constant 0 : i32
    return %arg0, %c0_i32, %c0_i32_0 : i32, i32, i32
  }
}

</mosaic_0001>

<bundles_post_ra>
// kernel: net_forward.1
= control target key start
LH: loop header
LB: loop body
LE: loop exit
PB: predicated region body
PF: predicated region fallthrough
CT: control target
= control target key end

     0   :  { %s30453_s0 = inlined_call_operand.vmem [shape: f32[2,1032,3], index: 0, kind: input, shape index: {}]   ;;  %s30454_s1 = inlined_call_operand.vmem [shape: f32[9,3,32], index: 1, kind: input, shape index: {}]   ;;  %s30455_s2 = inlined_call_operand.vmem [shape: f32[1,32], index: 2, kind: input, shape index: {}]   ;;  %s30456_s3 = inlined_call_operand.vmem [shape: f32[9,32,64], index: 3, kind: input, shape index: {}]   ;;  %s30457_s4 = inlined_call_operand.vmem [shape: f32[1,64], index: 4, kind: input, shape index: {}]   ;;  %s30458_s5 = inlined_call_operand.vmem [shape: f32[9,64,128], index: 5, kind: input, shape index: {}]   ;;  %s30459_s6 = inlined_call_operand.vmem [shape: f32[1,128], index: 6, kind: input, shape index: {}]   ;;  %s30460_s7 = inlined_call_operand.vmem [shape: f32[4,128,512], index: 7, kind: input, shape index: {}]   ;;  %s30461_s8 = inlined_call_operand.vmem [shape: f32[1,512], index: 8, kind: input, shape index: {}]   ;;  %s30462_s9 = inlined_call_operand.vmem [shape: f32[512,10], index: 9, kind: input, shape index: {}]   ;;  %s30463_s10 = inlined_call_operand.vmem [shape: f32[1,10], index: 10, kind: input, shape index: {}]   ;;  %s30464_s11 = inlined_call_operand.hbm [shape: f32[2,1,10], index: 11, kind: output, shape index: {}]  }
   0x1   :  { %30495 = sst [smem:[#allocation82_spill]] %s30453_s0 }
   0x2   :  { %16 = vsyncpa [#allocation9], 0 }
   0x3   :  { %18 = vsyncpa [#allocation9 + $0x1], 0  ;;  %s24783_s17 = smov 0   ;;  %s24785_s18 = smov 0  }
   0x4   :  { %s24787_s19 = smov 0   ;;  %s24789_s20 = smov 0  }
   0x5 LB: > { %s24804_s21 = sadd.s32 4294967295, %s24718_s20   ;;  %s17414_s22 = sadd.s32 4294967294, %s24718_s20   ;;  %s24718_s20 = sphi %s24789_s20, %s30698_s20   ;;  %s24714_s19 = sphi %s24787_s19, %s30697_s19   ;;  %s24710_s18 = sphi %s24785_s18, %s30696_s18   ;;  %s24706_s17 = sphi %s24783_s17, %s30695_s17  }
   0x6   : > { %s24808_s23 = sadd.s32 1, %s24718_s20   ;;  %s267_s24 = sadd.s32 1, %s24714_s19 }
   0x7   : > { %s264_s25 = ssub.s32 %s24718_s20, %s24808_s23  ;;  %p277_p0 = scmp.ne.s32.totalorder %s24714_s19, %s24710_s18 }
   0x8   : > { %p265_p1 = scmp.eq.s32.totalorder %s264_s25, 0  ;;  %p278_p2 = scmp.eq.s32.totalorder %s24804_s21, 1 }
   0x9   : > { %p283_p3 = scmp.ne.s32.totalorder %s24710_s18, %s24706_s17  ;;  %p284_p4 = scmp.eq.s32.totalorder %s17414_s22, 1 }
   0xa   : > { %s24819_s26 = scalar_select %p265_p1, %s24714_s19, %s267_s24  }
   0xb   : > { %p24821_p5 = por %p278_p2, %p277_p0  ;;  %p24825_p6 = por %p284_p4, %p283_p3 }
   0xc   : > { %p17417_p7 = scmp.ge.s32.totalorder %s24718_s20, 1  ;;  %p340_p8 = scmp.lt.s32.totalorder %s24718_s20, 3 }
   0xe   : > { %p341_p9 = pnand %p17417_p7, %p340_p8 }
  0x10   : > { %344 = sbr.rel (%p341_p9) target bundleno = 3501 (0xdad), region = 64 }
  0x17   : > { %vm992_vm0 = vcmask 1042432   ;;  %v17662_v0 = vld [vmem:[%s30454_s1 + $0x8] sm:$0x7]  ;;  %p379_p10 = scmp.lt.s32.totalorder %s24804_s21, 1  ;;  %v17784_v1 = vld [vmem:[%s30454_s1 + $0xc] sm:$0x7] }
  0x18   : > { %20981 = vmatprep.subr.msk.mxu0 %vm992_vm0, %v17662_v0  ;;  %vm631_vm1 = vcmask 23552   ;;  %s30498_s0 = sld [smem:[#allocation82_spill]]  ;;  %v24854_v5 = vld [vmem:[%s30454_s1 + $0x10] sm:$0x7]  ;;  %vm384_vm2 = vcmask 261120   ;;  %vm386_vm3 = vcmask 523264  }
  0x19   : > { %20982 = vmatpush3.msk.msra.mxu0 %vm992_vm0, %v17662_v0  ;;  %s380_s14 = scalar_select %p379_p10, %s24804_s21, 1  ;;  %vm17344_vm4 = vcmask 73728  }
  0x1a   : > { %21163 = vmatprep.subr.msk.mxu0 %vm992_vm0, %v17784_v1  ;;  %s377_s25 = sand.u32 1, %s24710_s18   ;;  %s19077_s12 = sshll.u32 %s24804_s21, 4 }
  0x1b   : > { %s24598_s15 = smul.u32 1032, %s380_s14  ;;  %s378_s13 = scalar_lea.vmem [#allocation8], %s377_s25 }
  0x1c   : > { %s17359_s14 = sshll.u32 %s378_s13, 4  ;;  %s24722_s21 = smov [#allocation8]   ;;  %s30413_s14 = int_to_ptr.vmem [resolvable:$true] %s17359_s14 }
  0x1d   : > { %s24656_s22 = scalar_lea.vmem %s30413_s14, 16  ;;  %s24660_s29 = sshll.u32 %s24722_s21, 4  ;;  %s24661_s29 = int_to_ptr.vmem [resolvable:$false] %s24660_s29 }
  0x1e   : > { %s24845_s24 = scalar_lea.vmem %s30498_s0, %s24598_s15  ;;  %s17347_s0 = scalar_lea.sflag [#allocation9], %s377_s25 }
  0x1f   : > { %v2689_v2 = vld [vmem:[%s24845_s24 + $0x2] sm:$0xff]  ;;  %v2690_v3 = vld [vmem:[%s24845_s24 + $0xa] sm:$0xff]  ;;  %v2691_v4 = vld [vmem:[%s24845_s24 + $0x12] sm:$0xff]  ;;  %p24657_p11 = scmp.ne.s32.totalorder %s30413_s14, %s24656_s22  ;;  %s24662_s30 = scalar_lea.vmem %s24661_s29, 32 }
  0x20   : > { %20983 = vmatprep.mubr.msk.f32.mxu0 %vm631_vm1, %v2689_v2  ;;  %v2692_v6 = vld [vmem:[%s24845_s24 + $0x1a] sm:$0xff]  ;;  %v2693_v7 = vld [vmem:[%s24845_s24 + $0x22] sm:$0xff]  ;;  %v2694_v8 = vld [vmem:[%s24845_s24 + $0x2a] sm:$0xff]  ;;  %p24663_p0 = scmp.lt.s32.totalorder %s30413_s14, %s24661_s29  ;;  %p24664_p1 = scmp.lt.s32.totalorder %s24662_s30, %s24656_s22 }
  0x21   : > { %20984 = vmatmul.mubr.msk.f32.vlgmr.msra.gmra.mrb[0].mxu0 %vm631_vm1, %v2690_v3  ;;  %v2695_v9 = vld [vmem:[%s24845_s24 + $0x32] sm:$0xff]  ;;  %v2696_v10 = vld [vmem:[%s24845_s24 + $0x3a] sm:$0xff]  ;;  %v2697_v11 = vld [vmem:[%s24845_s24 + $0x42] sm:$0xff]  ;;  %p24658_p12 = pnand %p24657_p11, %p24821_p5 }
  0x22   : > { %21164 = vmatpush3.msk.msra.mxu0 %vm992_vm0, %v17784_v1  ;;  %20986 = vmatprep.mubr.msk.f32.mxu0 %vm631_vm1, %v2691_v4  ;;  %v2698_v12 = vld [vmem:[%s24845_s24 + $0x4a] sm:$0xff]  ;;  %v2699_v13 = vld [vmem:[%s24845_s24 + $0x52] sm:$0xff]  ;;  %v2700_v14 = vld [vmem:[%s24845_s24 + $0x5a] sm:$0xff]  ;;  %p24665_p2 = por %p24664_p1, %p24663_p0 }
  0x23   : > { %21345 = vmatprep.subr.msk.mxu0 %vm992_vm0, %v24854_v5  ;;  %v2701_v15 = vld [vmem:[%s24845_s24 + $0x62] sm:$0xff]  ;;  %v2702_v16 = vld [vmem:[%s24845_s24 + $0x6a] sm:$0xff]  ;;  %v2703_v17 = vld [vmem:[%s24845_s24 + $0x72] sm:$0xff]  ;;  %p24659_p13 = pneg %p24658_p12 }
  0x24   : > { %v2704_v18 = vld [vmem:[%s24845_s24 + $0x7a] sm:$0xff]  ;;  %v2705_v19 = vld [vmem:[%s24845_s24 + $0x82] sm:$0xff]  ;;  %v2706_v20 = vld [vmem:[%s24845_s24 + $0x8a] sm:$0xff] }
  0x25   : > { %20987 = vmatmul.mubr.msk.f32.gmra.mrb[2].mxu0 %vm631_vm1, %v2692_v6  ;;  %v2707_v21 = vld [vmem:[%s24845_s24 + $0x92] sm:$0xff]  ;;  %v2708_v22 = vld [vmem:[%s24845_s24 + $0x9a] sm:$0xff]  ;;  %v2709_v23 = vld [vmem:[%s24845_s24 + $0xa2] sm:$0xff]  ;;  %p24666_p3 = pnand %p24665_p2, %p24659_p13 }
  0x26   : > { %20989 = vmatprep.mubr.msk.f32.mxu0 %vm631_vm1, %v2693_v7  ;;  %v2710_v24 = vld [vmem:[%s24845_s24 + $0xaa] sm:$0xff]  ;;  %v2711_v25 = vld [vmem:[%s24845_s24 + $0xb2] sm:$0xff]  ;;  %v2712_v26 = vld [vmem:[%s24845_s24 + $0xba] sm:$0xff] }
  0x27   : > { %v2713_v27 = vld [vmem:[%s24845_s24 + $0xc2] sm:$0xff]  ;;  %v2714_v28 = vld [vmem:[%s24845_s24 + $0xca] sm:$0xff]  ;;  %v2715_v29 = vld [vmem:[%s24845_s24 + $0xd2] sm:$0xff] }
  0x28   : > { %v2716_v30 = vld [vmem:[%s24845_s24 + $0xda] sm:$0xff]  ;;  %v2717_v31 = vld [vmem:[%s24845_s24 + $0xe2] sm:$0xff]  ;;  %v2718_v32 = vld [vmem:[%s24845_s24 + $0xea] sm:$0xff] }
  0x29   : > { %20990 = vmatmul.mubr.msk.f32.gmra.mrb[4].mxu0 %vm631_vm1, %v2694_v8  ;;  %v2719_v33 = vld [vmem:[%s24845_s24 + $0xf2] sm:$0xff]  ;;  %v2720_v34 = vld [vmem:[%s24845_s24 + $0xfa] sm:$0xff]  ;;  %v2721_v35 = vld [vmem:[%s24845_s24 + $0x102] sm:$0xff] }
  0x2a   : > { %20992 = vmatprep.mubr.msk.f32.mxu0 %vm631_vm1, %v2695_v9  ;;  %v2722_v36 = vld [vmem:[%s24845_s24 + $0x10a] sm:$0xff]  ;;  %v2723_v37 = vld [vmem:[%s24845_s24 + $0x112] sm:$0xff]  ;;  %v2724_v38 = vld [vmem:[%s24845_s24 + $0x11a] sm:$0xff] }
  0x2b   : > { %v2725_v39 = vld [vmem:[%s24845_s24 + $0x122] sm:$0xff]  ;;  %v2726_v40 = vld [vmem:[%s24845_s24 + $0x12a] sm:$0xff]  ;;  %v2727_v41 = vld [vmem:[%s24845_s24 + $0x132] sm:$0xff] }
  0x2c   : > { %v2728_v42 = vld [vmem:[%s24845_s24 + $0x13a] sm:$0xff]  ;;  %v2729_v43 = vld [vmem:[%s24845_s24 + $0x142] sm:$0xff]  ;;  %v2730_v44 = vld [vmem:[%s24845_s24 + $0x14a] sm:$0xff] }
  0x2d   : > { %20993 = vmatmul.mubr.msk.f32.gmra.mrb[6].mxu0 %vm631_vm1, %v2696_v10  ;;  %v2731_v45 = vld [vmem:[%s24845_s24 + $0x152] sm:$0xff]  ;;  %v2732_v46 = vld [vmem:[%s24845_s24 + $0x15a] sm:$0xff]  ;;  %v2733_v47 = vld [vmem:[%s24845_s24 + $0x162] sm:$0xff] }
  0x2e   : > { %20995 = vmatprep.mubr.msk.f32.mxu0 %vm631_vm1, %v2697_v11  ;;  %v2734_v48 = vld [vmem:[%s24845_s24 + $0x16a] sm:$0xff]  ;;  %v2735_v49 = vld [vmem:[%s24845_s24 + $0x172] sm:$0xff]  ;;  %v2736_v50 = vld [vmem:[%s24845_s24 + $0x17a] sm:$0xff] }
  0x2f   : > { %v2737_v51 = vld [vmem:[%s24845_s24 + $0x182] sm:$0xff]  ;;  %v2738_v52 = vld [vmem:[%s24845_s24 + $0x18a] sm:$0xff]  ;;  %v3962_v56 = vld [vmem:[%s24845_s24 + $0x38] sm:$0xff] }
  0x30   : > { %v3959_v53 = vld [vmem:[%s24845_s24 + $0x20] sm:$0xff]  ;;  %v3960_v54 = vld [vmem:[%s24845_s24 + $0x28] sm:$0xff]  ;;  %v3961_v55 = vld [vmem:[%s24845_s24 + $0x30] sm:$0xff] }
  0x31   : > { %20996 = vmatmul.mubr.msk.f32.gmra.mrb[8].mxu0 %vm631_vm1, %v2698_v12  ;;  %v3963_v57 = vld [vmem:[%s24845_s24 + $0x40] sm:$0xff]  ;;  %v3964_v58 = vld [vmem:[%s24845_s24 + $0x48] sm:$0xff]  ;;  %v3965_v59 = vld [vmem:[%s24845_s24 + $0x50] sm:$0xff] }
  0x32   : > { %20998 = vmatprep.mubr.msk.f32.mxu0 %vm631_vm1, %v2699_v13  ;;  %v3966_v60 = vld [vmem:[%s24845_s24 + $0x58] sm:$0xff]  ;;  %v3967_v61 = vld [vmem:[%s24845_s24 + $0x60] sm:$0xff]  ;;  %v3968_v62 = vld [vmem:[%s24845_s24 + $0x68] sm:$0xff] }
  0x33   : > { %v3969_v63 = vld [vmem:[%s24845_s24 + $0x70] sm:$0xff]  ;;  %v3970_v0 = vld [vmem:[%s24845_s24 + $0x78] sm:$0xff]  ;;  %v3971_v1 = vld [vmem:[%s24845_s24 + $0x80] sm:$0xff] }
  0x34   : > { %v3972_v2 = vld [vmem:[%s24845_s24 + $0x88] sm:$0xff]  ;;  %v3973_v3 = vld [vmem:[%s24845_s24 + $0x90] sm:$0xff]  ;;  %v3974_v4 = vld [vmem:[%s24845_s24 + $0x98] sm:$0xff] }
  0x35   : > { %20999 = vmatmul.mubr.msk.f32.gmra.mrb[10].mxu0 %vm631_vm1, %v2700_v14  ;;  %v3976_v6 = vld [vmem:[%s24845_s24 + $0xa8] sm:$0xff]  ;;  %v3977_v7 = vld [vmem:[%s24845_s24 + $0xb0] sm:$0xff]  ;;  %v3978_v8 = vld [vmem:[%s24845_s24 + $0xb8] sm:$0xff] }
  0x36   : > { %21001 = vmatprep.mubr.msk.f32.mxu0 %vm631_vm1, %v2701_v15  ;;  %v3979_v9 = vld [vmem:[%s24845_s24 + $0xc0] sm:$0xff]  ;;  %v3980_v10 = vld [vmem:[%s24845_s24 + $0xc8] sm:$0xff]  ;;  %v3981_v11 = vld [vmem:[%s24845_s24 + $0xd0] sm:$0xff] }
  0x37   : > { %v3982_v12 = vld [vmem:[%s24845_s24 + $0xd8] sm:$0xff]  ;;  %v3983_v13 = vld [vmem:[%s24845_s24 + $0xe0] sm:$0xff]  ;;  %v3984_v14 = vld [vmem:[%s24845_s24 + $0xe8] sm:$0xff] }
  0x38   : > { %v3985_v15 = vld [vmem:[%s24845_s24 + $0xf0] sm:$0xff] }
  0x39   : > { %21002 = vmatmul.mubr.msk.f32.gmra.mrb[12].mxu0 %vm631_vm1, %v2702_v16  ;;  %v3986_v16 = vld [vmem:[%s24845_s24 + $0xf8] sm:$0xff] }
  0x3a   : > { %21004 = vmatprep.mubr.msk.f32.mxu0 %vm631_vm1, %v2703_v17  ;;  %v3987_v17 = vld [vmem:[%s24845_s24 + $0x100] sm:$0xff] }
  0x3d   : > { %21005 = vmatmul.mubr.msk.f32.gmra.mrb[14].mxu0 %vm631_vm1, %v2704_v18  ;;  %v3988_v18 = vld [vmem:[%s24845_s24 + $0x108] sm:$0xff] }
  0x3e   : > { %21007 = vmatprep.mubr.msk.f32.mxu0 %vm631_vm1, %v2705_v19  ;;  %v3989_v19 = vld [vmem:[%s24845_s24 + $0x110] sm:$0xff] }
  0x41   : > { %21008 = vmatmul.mubr.msk.f32.gmra.mrb[16].mxu0 %vm631_vm1, %v2706_v20  ;;  %v3990_v20 = vld [vmem:[%s24845_s24 + $0x118] sm:$0xff] }
  0x42   : > { %21010 = vmatprep.mubr.msk.f32.mxu0 %vm631_vm1, %v2707_v21  ;;  %v3991_v21 = vld [vmem:[%s24845_s24 + $0x120] sm:$0xff] }
  0x45   : > { %21011 = vmatmul.mubr.msk.f32.gmra.mrb[18].mxu0 %vm631_vm1, %v2708_v22  ;;  %v3992_v22 = vld [vmem:[%s24845_s24 + $0x128] sm:$0xff] }
  0x46   : > { %21013 = vmatprep.mubr.msk.f32.mxu0 %vm631_vm1, %v2709_v23  ;;  %v3993_v23 = vld [vmem:[%s24845_s24 + $0x130] sm:$0xff] }
  0x49   : > { %21014 = vmatmul.mubr.msk.f32.gmra.mrb[20].mxu0 %vm631_vm1, %v2710_v24  ;;  %v3994_v24 = vld [vmem:[%s24845_s24 + $0x138] sm:$0xff] }
  0x4a   : > { %21016 = vmatprep.mubr.msk.f32.mxu0 %vm631_vm1, %v2711_v25  ;;  %v3995_v25 = vld [vmem:[%s24845_s24 + $0x140] sm:$0xff] }
  0x4d   : > { %21017 = vmatmul.mubr.msk.f32.gmra.mrb[22].mxu0 %vm631_vm1, %v2712_v26  ;;  %v3996_v26 = vld [vmem:[%s24845_s24 + $0x148] sm:$0xff] }
  0x4e   : > { %21019 = vmatprep.mubr.msk.f32.mxu0 %vm631_vm1, %v2713_v27  ;;  %v3997_v27 = vld [vmem:[%s24845_s24 + $0x150] sm:$0xff] }
  0x51   : > { %21020 = vmatmul.mubr.msk.f32.gmra.mrb[24].mxu0 %vm631_vm1, %v2714_v28  ;;  %v3998_v28 = vld [vmem:[%s24845_s24 + $0x158] sm:$0xff] }
  0x52   : > { %21022 = vmatprep.mubr.msk.f32.mxu0 %vm631_vm1, %v2715_v29  ;;  %v3999_v29 = vld [vmem:[%s24845_s24 + $0x160] sm:$0xff] }
  0x55   : > { %21023 = vmatmul.mubr.msk.f32.gmra.mrb[26].mxu0 %vm631_vm1, %v2716_v30  ;;  %v4000_v30 = vld [vmem:[%s24845_s24 + $0x168] sm:$0xff] }
  0x56   : > { %21025 = vmatprep.mubr.msk.f32.mxu0 %vm631_vm1, %v2717_v31  ;;  %v4001_v31 = vld [vmem:[%s24845_s24 + $0x170] sm:$0xff] }
  0x59   : > { %21026 = vmatmul.mubr.msk.f32.gmra.mrb[28].mxu0 %vm631_vm1, %v2718_v32  ;;  %v4002_v32 = vld [vmem:[%s24845_s24 + $0x178] sm:$0xff] }
  0x5a   : > { %21028 = vmatprep.mubr.msk.f32.mxu0 %vm631_vm1, %v2719_v33  ;;  %v4003_v33 = vld [vmem:[%s24845_s24 + $0x180] sm:$0xff] }
  0x5d   : > { %21029 = vmatmul.mubr.msk.f32.gmra.mrb[30].mxu0 %vm631_vm1, %v2720_v34  ;;  %v4004_v34 = vld [vmem:[%s24845_s24 + $0x188] sm:$0xff] }
  0x5e   : > { %21031 = vmatprep.mubr.msk.f32.mxu0 %vm631_vm1, %v2721_v35  ;;  %v4005_v35 = vld [vmem:[%s24845_s24 + $0x190] sm:$0xff] }
  0x61   : > { %21032 = vmatmul.mubr.msk.f32.gmra.mrb[32].mxu0 %vm631_vm1, %v2722_v36  ;;  %v4006_v36 = vld [vmem:[%s24845_s24 + $0x198] sm:$0xff] }
  0x62   : > { %21034 = vmatprep.mubr.msk.f32.mxu0 %vm631_vm1, %v2723_v37  ;;  %v4007_v37 = vld [vmem:[%s24845_s24 + $0x1a0] sm:$0xff] }
  0x65   : > { %21035 = vmatmul.mubr.msk.f32.gmra.mrb[34].mxu0 %vm631_vm1, %v2724_v38  ;;  %v4008_v38 = vld [vmem:[%s24845_s24 + $0x1a8] sm:$0xff] }
  0x66   : > { %21037 = vmatprep.mubr.msk.f32.mxu0 %vm631_vm1, %v2725_v39  ;;  %v4009_v39 = vld [vmem:[%s24845_s24 + $0x1b0] sm:$0xff] }
  0x69   : > { %21038 = vmatmul.mubr.msk.f32.gmra.mrb[36].mxu0 %vm631_vm1, %v2726_v40  ;;  %v4010_v40 = vld [vmem:[%s24845_s24 + $0x1b8] sm:$0xff] }
  0x6a   : > { %21040 = vmatprep.mubr.msk.f32.mxu0 %vm631_vm1, %v2727_v41  ;;  %v4011_v41 = vld [vmem:[%s24845_s24 + $0x1c0] sm:$0xff] }
  0x6d   : > { %21041 = vmatmul.mubr.msk.f32.gmra.mrb[38].mxu0 %vm631_vm1, %v2728_v42  ;;  %v4012_v42 = vld [vmem:[%s24845_s24 + $0x1c8] sm:$0xff] }
  0x6e   : > { %21043 = vmatprep.mubr.msk.f32.mxu0 %vm631_vm1, %v2729_v43  ;;  %v4013_v43 = vld [vmem:[%s24845_s24 + $0x1d0] sm:$0xff] }
  0x71   : > { %21044 = vmatmul.mubr.msk.f32.gmra.mrb[40].mxu0 %vm631_vm1, %v2730_v44  ;;  %v4014_v44 = vld [vmem:[%s24845_s24 + $0x1d8] sm:$0xff] }
  0x72   : > { %21046 = vmatprep.mubr.msk.f32.mxu0 %vm631_vm1, %v2731_v45  ;;  %v4015_v45 = vld [vmem:[%s24845_s24 + $0x1e0] sm:$0xff] }
  0x75   : > { %21047 = vmatmul.mubr.msk.f32.gmra.mrb[42].mxu0 %vm631_vm1, %v2732_v46  ;;  %v4016_v46 = vld [vmem:[%s24845_s24 + $0x1e8] sm:$0xff] }
  0x76   : > { %21049 = vmatprep.mubr.msk.f32.mxu0 %vm631_vm1, %v2733_v47  ;;  %v25075_v47 = vld [vmem:[%s30454_s1 + $0x14] sm:$0x7] }
  0x79   : > { %21050 = vmatmul.mubr.msk.f32.gmra.mrb[44].mxu0 %vm631_vm1, %v2734_v48  ;;  %v4017_v48 = vld [vmem:[%s24845_s24 + $0x1f0] sm:$0xff] }
  0x7a   : > { %21052 = vmatprep.mubr.msk.f32.mxu0 %vm631_vm1, %v2735_v49  ;;  %v4018_v49 = vld [vmem:[%s24845_s24 + $0x1f8] sm:$0xff] }
  0x7d   : > { %21053 = vmatmul.mubr.msk.f32.gmra.mrb[46].mxu0 %vm631_vm1, %v2736_v50  ;;  %v4019_v50 = vld [vmem:[%s24845_s24 + $0x200] sm:$0xff] }
  0x7e   : > { %21055 = vmatprep.mubr.msk.f32.mxu0 %vm631_vm1, %v2737_v51  ;;  %v4020_v51 = vld [vmem:[%s24845_s24 + $0x208] sm:$0xff] }
  0x81   : > { %21056 = vmatmul.mubr.msk.f32.gmra.mrb[48].mxu0 %vm631_vm1, %v2738_v52  ;;  %v4021_v52 = vld [vmem:[%s24845_s24 + $0x210] sm:$0xff] }
  0x82   : > { %21165 = vmatprep.mubr.msk.f32.mxu0 %vm631_vm1, %v3959_v53  ;;  %v4022_v53 = vld [vmem:[%s24845_s24 + $0x218] sm:$0xff] }
  0x85   : > { %21166 = vmatmul.mubr.msk.f32.vlgmr.msra.gmra.mrb[0].mxu0 %vm631_vm1, %v3960_v54  ;;  %v4023_v54 = vld [vmem:[%s24845_s24 + $0x220] sm:$0xff] }
  0x86   : > { %21346 = vmatpush3.msk.msra.mxu0 %vm992_vm0, %v24854_v5  ;;  %21168 = vmatprep.mubr.msk.f32.mxu0 %vm631_vm1, %v3961_v55  ;;  %v3975_v5 = vld [vmem:[%s24845_s24 + $0xa0] sm:$0xff]  ;;  %v4024_v55 = vld [vmem:[%s24845_s24 + $0x228] sm:$0xff] }
  0x87   : > { %21527 = vmatprep.subr.msk.mxu0 %vm992_vm0, %v25075_v47 }
  0x89   : > { %21169 = vmatmul.mubr.msk.f32.gmra.mrb[2].mxu0 %vm631_vm1, %v3962_v56  ;;  %v4025_v56 = vld [vmem:[%s24845_s24 + $0x230] sm:$0xff] }
  0x8a   : > { %21171 = vmatprep.mubr.msk.f32.mxu0 %vm631_vm1, %v3963_v57  ;;  %v4026_v57 = vld [vmem:[%s24845_s24 + $0x238] sm:$0xff] }
  0x8d   : > { %21172 = vmatmul.mubr.msk.f32.gmra.mrb[4].mxu0 %vm631_vm1, %v3964_v58  ;;  %v4027_v58 = vld [vmem:[%s24845_s24 + $0x240] sm:$0xff] }
  0x8e   : > { %21174 = vmatprep.mubr.msk.f32.mxu0 %vm631_vm1, %v3965_v59  ;;  %v4028_v59 = vld [vmem:[%s24845_s24 + $0x248] sm:$0xff] }
  0x91   : > { %21175 = vmatmul.mubr.msk.f32.gmra.mrb[6].mxu0 %vm631_vm1, %v3966_v60  ;;  %v4029_v60 = vld [vmem:[%s24845_s24 + $0x250] sm:$0xff] }
  0x92   : > { %21177 = vmatprep.mubr.msk.f32.mxu0 %vm631_vm1, %v3967_v61  ;;  %v4030_v61 = vld [vmem:[%s24845_s24 + $0x258] sm:$0xff] }
  0x95   : > { %21178 = vmatmul.mubr.msk.f32.gmra.mrb[8].mxu0 %vm631_vm1, %v3968_v62  ;;  %v4031_v62 = vld [vmem:[%s24845_s24 + $0x260] sm:$0xff] }
  0x96   : > { %21180 = vmatprep.mubr.msk.f32.mxu0 %vm631_vm1, %v3969_v63  ;;  %v4032_v63 = vld [vmem:[%s24845_s24 + $0x268] sm:$0xff] }
  0x99   : > { %21181 = vmatmul.mubr.msk.f32.gmra.mrb[10].mxu0 %vm631_vm1, %v3970_v0  ;;  %v4033_v0 = vld [vmem:[%s24845_s24 + $0x270] sm:$0xff] }
  0x9a   : > { %21183 = vmatprep.mubr.msk.f32.mxu0 %vm631_vm1, %v3971_v1  ;;  %v4034_v1 = vld [vmem:[%s24845_s24 + $0x278] sm:$0xff] }
  0x9d   : > { %21184 = vmatmul.mubr.msk.f32.gmra.mrb[12].mxu0 %vm631_vm1, %v3972_v2  ;;  %v4035_v2 = vld [vmem:[%s24845_s24 + $0x280] sm:$0xff] }
  0x9e   : > { %21186 = vmatprep.mubr.msk.f32.mxu0 %vm631_vm1, %v3973_v3  ;;  %v4036_v3 = vld [vmem:[%s24845_s24 + $0x288] sm:$0xff] }
  0xa1   : > { %21187 = vmatmul.mubr.msk.f32.gmra.mrb[14].mxu0 %vm631_vm1, %v3974_v4  ;;  %v4037_v4 = vld [vmem:[%s24845_s24 + $0x290] sm:$0xff] }
  0xa2   : > { %21189 = vmatprep.mubr.msk.f32.mxu0 %vm631_vm1, %v3975_v5  ;;  %v4038_v5 = vld [vmem:[%s24845_s24 + $0x298] sm:$0xff] }
  0xa5   : > { %21190 = vmatmul.mubr.msk.f32.gmra.mrb[16].mxu0 %vm631_vm1, %v3976_v6  ;;  %v4039_v6 = vld [vmem:[%s24845_s24 + $0x2a0] sm:$0xff] }
  0xa6   : > { %21192 = vmatprep.mubr.msk.f32.mxu0 %vm631_vm1, %v3977_v7  ;;  %v4040_v7 = vld [vmem:[%s24845_s24 + $0x2a8] sm:$0xff] }
  0xa9   : > { %21193 = vmatmul.mubr.msk.f32.gmra.mrb[18].mxu0 %vm631_vm1, %v3978_v8  ;;  %v4041_v8 = vld [vmem:[%s24845_s24 + $0x2b0] sm:$0xff] }
  0xaa   : > { %21195 = vmatprep.mubr.msk.f32.mxu0 %vm631_vm1, %v3979_v9  ;;  %v4042_v9 = vld [vmem:[%s24845_s24 + $0x2b8] sm:$0xff] }
  0xad   : > { %21196 = vmatmul.mubr.msk.f32.gmra.mrb[20].mxu0 %vm631_vm1, %v3980_v10  ;;  %v4043_v10 = vld [vmem:[%s24845_s24 + $0x2c0] sm:$0xff] }
  0xae   : > { %21198 = vmatprep.mubr.msk.f32.mxu0 %vm631_vm1, %v3981_v11  ;;  %v4044_v11 = vld [vmem:[%s24845_s24 + $0x2c8] sm:$0xff] }
  0xb1   : > { %21199 = vmatmul.mubr.msk.f32.gmra.mrb[22].mxu0 %vm631_vm1, %v3982_v12  ;;  %v4045_v12 = vld [vmem:[%s24845_s24 + $0x2d0] sm:$0xff] }
  0xb2   : > { %21201 = vmatprep.mubr.msk.f32.mxu0 %vm631_vm1, %v3983_v13  ;;  %v4046_v13 = vld [vmem:[%s24845_s24 + $0x2d8] sm:$0xff] }
  0xb5   : > { %21202 = vmatmul.mubr.msk.f32.gmra.mrb[24].mxu0 %vm631_vm1, %v3984_v14  ;;  %v4047_v14 = vld [vmem:[%s24845_s24 + $0x2e0] sm:$0xff] }
  0xb6   : > { %21204 = vmatprep.mubr.msk.f32.mxu0 %vm631_vm1, %v3985_v15  ;;  %v4048_v15 = vld [vmem:[%s24845_s24 + $0x2e8] sm:$0xff] }
  0xb9   : > { %21205 = vmatmul.mubr.msk.f32.gmra.mrb[26].mxu0 %vm631_vm1, %v3986_v16  ;;  %v4049_v16 = vld [vmem:[%s24845_s24 + $0x2f0] sm:$0xff] }
  0xba   : > { %21207 = vmatprep.mubr.msk.f32.mxu0 %vm631_vm1, %v3987_v17  ;;  %v4050_v17 = vld [vmem:[%s24845_s24 + $0x2f8] sm:$0xff] }
  0xbd   : > { %21208 = vmatmul.mubr.msk.f32.gmra.mrb[28].mxu0 %vm631_vm1, %v3988_v18  ;;  %v4051_v18 = vld [vmem:[%s24845_s24 + $0x300] sm:$0xff] }
  0xbe   : > { %21210 = vmatprep.mubr.msk.f32.mxu0 %vm631_vm1, %v3989_v19  ;;  %v4052_v19 = vld [vmem:[%s24845_s24 + $0x308] sm:$0xff] }
  0xc1   : > { %21211 = vmatmul.mubr.msk.f32.gmra.mrb[30].mxu0 %vm631_vm1, %v3990_v20  ;;  %v4053_v20 = vld [vmem:[%s24845_s24 + $0x310] sm:$0xff] }
  0xc2   : > { %21213 = vmatprep.mubr.msk.f32.mxu0 %vm631_vm1, %v3991_v21  ;;  %v4054_v21 = vld [vmem:[%s24845_s24 + $0x318] sm:$0xff] }
  0xc5   : > { %21214 = vmatmul.mubr.msk.f32.gmra.mrb[32].mxu0 %vm631_vm1, %v3992_v22  ;;  %v4055_v22 = vld [vmem:[%s24845_s24 + $0x320] sm:$0xff] }
  0xc6   : > { %21216 = vmatprep.mubr.msk.f32.mxu0 %vm631_vm1, %v3993_v23  ;;  %v4056_v23 = vld [vmem:[%s24845_s24 + $0x328] sm:$0xff] }
  0xc9   : > { %21217 = vmatmul.mubr.msk.f32.gmra.mrb[34].mxu0 %vm631_vm1, %v3994_v24  ;;  %v4057_v24 = vld [vmem:[%s24845_s24 + $0x330] sm:$0xff] }
  0xca   : > { %21219 = vmatprep.mubr.msk.f32.mxu0 %vm631_vm1, %v3995_v25  ;;  %v4058_v25 = vld [vmem:[%s24845_s24 + $0x338] sm:$0xff] }
  0xcd   : > { %21220 = vmatmul.mubr.msk.f32.gmra.mrb[36].mxu0 %vm631_vm1, %v3996_v26  ;;  %v4059_v26 = vld [vmem:[%s24845_s24 + $0x340] sm:$0xff] }
  0xce   : > { %21222 = vmatprep.mubr.msk.f32.mxu0 %vm631_vm1, %v3997_v27  ;;  %v4060_v27 = vld [vmem:[%s24845_s24 + $0x348] sm:$0xff] }
  0xd1   : > { %21223 = vmatmul.mubr.msk.f32.gmra.mrb[38].mxu0 %vm631_vm1, %v3998_v28  ;;  %v4061_v28 = vld [vmem:[%s24845_s24 + $0x350] sm:$0xff] }
  0xd2   : > { %21225 = vmatprep.mubr.msk.f32.mxu0 %vm631_vm1, %v3999_v29  ;;  %v4062_v29 = vld [vmem:[%s24845_s24 + $0x358] sm:$0xff] }
  0xd5   : > { %21226 = vmatmul.mubr.msk.f32.gmra.mrb[40].mxu0 %vm631_vm1, %v4000_v30  ;;  %v4063_v30 = vld [vmem:[%s24845_s24 + $0x360] sm:$0xff] }
  0xd6   : > { %21228 = vmatprep.mubr.msk.f32.mxu0 %vm631_vm1, %v4001_v31  ;;  %v4064_v31 = vld [vmem:[%s24845_s24 + $0x368] sm:$0xff] }
  0xd9   : > { %21229 = vmatmul.mubr.msk.f32.gmra.mrb[42].mxu0 %vm631_vm1, %v4002_v32  ;;  %v4065_v32 = vld [vmem:[%s24845_s24 + $0x370] sm:$0xff] }
  0xda   : > { %21231 = vmatprep.mubr.msk.f32.mxu0 %vm631_vm1, %v4003_v33  ;;  %v4066_v33 = vld [vmem:[%s24845_s24 + $0x378] sm:$0xff] }
  0xdd   : > { %21232 = vmatmul.mubr.msk.f32.gmra.mrb[44].mxu0 %vm631_vm1, %v4004_v34  ;;  %v4067_v34 = vld [vmem:[%s24845_s24 + $0x380] sm:$0xff] }
  0xde   : > { %21234 = vmatprep.mubr.msk.f32.mxu0 %vm631_vm1, %v4005_v35  ;;  %v4068_v35 = vld [vmem:[%s24845_s24 + $0x388] sm:$0xff] }
  0xe1   : > { %21235 = vmatmul.mubr.msk.f32.gmra.mrb[46].mxu0 %vm631_vm1, %v4006_v36  ;;  %v4069_v36 = vld [vmem:[%s24845_s24 + $0x390] sm:$0xff] }
  0xe2   : > { %21237 = vmatprep.mubr.msk.f32.mxu0 %vm631_vm1, %v4007_v37  ;;  %v4070_v37 = vld [vmem:[%s24845_s24 + $0x398] sm:$0xff] }
  0xe5   : > { %21238 = vmatmul.mubr.msk.f32.gmra.mrb[48].mxu0 %vm631_vm1, %v4008_v38  ;;  %v4071_v38 = vld [vmem:[%s24845_s24 + $0x3a0] sm:$0xff] }
  0xe6   : > { %21240 = vmatprep.mubr.msk.f32.mxu0 %vm631_vm1, %v4009_v39  ;;  %v4072_v39 = vld [vmem:[%s24845_s24 + $0x3a8] sm:$0xff] }
  0xe9   : > { %21241 = vmatmul.mubr.msk.f32.gmra.mrb[50].mxu0 %vm631_vm1, %v4010_v40  ;;  %v4073_v40 = vld [vmem:[%s24845_s24 + $0x3b0] sm:$0xff] }
  0xea   : > { %21243 = vmatprep.mubr.msk.f32.mxu0 %vm631_vm1, %v4011_v41  ;;  %v4074_v41 = vld [vmem:[%s24845_s24 + $0x3b8] sm:$0xff] }
  0xed   : > { %21244 = vmatmul.mubr.msk.f32.gmra.mrb[52].mxu0 %vm631_vm1, %v4012_v42  ;;  %v4075_v42 = vld [vmem:[%s24845_s24 + $0x3c0] sm:$0xff] }
  0xee   : > { %21246 = vmatprep.mubr.msk.f32.mxu0 %vm631_vm1, %v4013_v43  ;;  %v4076_v43 = vld [vmem:[%s24845_s24 + $0x3c8] sm:$0xff] }
  0xf1   : > { %21247 = vmatmul.mubr.msk.f32.gmra.mrb[54].mxu0 %vm631_vm1, %v4014_v44  ;;  %v4077_v44 = vld [vmem:[%s24845_s24 + $0x3d0] sm:$0xff] }
  0xf2   : > { %21249 = vmatprep.mubr.msk.f32.mxu0 %vm631_vm1, %v4015_v45  ;;  %v4078_v45 = vld [vmem:[%s24845_s24 + $0x3d8] sm:$0xff] }
  0xf5   : > { %21250 = vmatmul.mubr.msk.f32.gmra.mrb[56].mxu0 %vm631_vm1, %v4016_v46  ;;  %v25204_v46 = vld [vmem:[%s24845_s24 + $0x21] sm:$0xff] }
  0xf6   : > { %21252 = vmatprep.mubr.msk.f32.mxu0 %vm631_vm1, %v4017_v48  ;;  %v25210_v48 = vld [vmem:[%s24845_s24 + $0x29] sm:$0xff] }
  0xf9   : > { %21253 = vmatmul.mubr.msk.f32.gmra.mrb[58].mxu0 %vm631_vm1, %v4018_v49  ;;  %v25213_v49 = vld [vmem:[%s24845_s24 + $0x31] sm:$0xff] }
  0xfa   : > { %21255 = vmatprep.mubr.msk.f32.mxu0 %vm631_vm1, %v4019_v50  ;;  %v25222_v50 = vld [vmem:[%s24845_s24 + $0x39] sm:$0xff] }
  0xfd   : > { %21256 = vmatmul.mubr.msk.f32.gmra.mrb[60].mxu0 %vm631_vm1, %v4020_v51  ;;  %v25225_v51 = vld [vmem:[%s24845_s24 + $0x41] sm:$0xff] }
  0xfe   : > { %21258 = vmatprep.mubr.msk.f32.mxu0 %vm631_vm1, %v4021_v52  ;;  %v25232_v52 = vld [vmem:[%s24845_s24 + $0x49] sm:$0xff] }
 0x101   : > { %21259 = vmatmul.mubr.msk.f32.gmra.mrb[62].mxu0 %vm631_vm1, %v4022_v53  ;;  %v25235_v53 = vld [vmem:[%s24845_s24 + $0x51] sm:$0xff] }
 0x102   : > { %21261 = vmatprep.mubr.msk.f32.mxu0 %vm631_vm1, %v4023_v54  ;;  %v25245_v54 = vld [vmem:[%s24845_s24 + $0x61] sm:$0xff] }
 0x105   : > { %21262 = vmatmul.mubr.msk.f32.gmra.mrb[64].mxu0 %vm631_vm1, %v4024_v55  ;;  %v25252_v55 = vld [vmem:[%s24845_s24 + $0x69] sm:$0xff] }
 0x106   : > { %21264 = vmatprep.mubr.msk.f32.mxu0 %vm631_vm1, %v4025_v56  ;;  %v25255_v56 = vld [vmem:[%s24845_s24 + $0x71] sm:$0xff] }
 0x109   : > { %21265 = vmatmul.mubr.msk.f32.gmra.mrb[66].mxu0 %vm631_vm1, %v4026_v57  ;;  %v25262_v57 = vld [vmem:[%s24845_s24 + $0x79] sm:$0xff] }
 0x10a   : > { %21267 = vmatprep.mubr.msk.f32.mxu0 %vm631_vm1, %v4027_v58  ;;  %v25265_v58 = vld [vmem:[%s24845_s24 + $0x81] sm:$0xff] }
 0x10d   : > { %21268 = vmatmul.mubr.msk.f32.gmra.mrb[68].mxu0 %vm631_vm1, %v4028_v59  ;;  %v25272_v59 = vld [vmem:[%s24845_s24 + $0x89] sm:$0xff] }
 0x10e   : > { %21270 = vmatprep.mubr.msk.f32.mxu0 %vm631_vm1, %v4029_v60  ;;  %v25275_v60 = vld [vmem:[%s24845_s24 + $0x91] sm:$0xff] }
 0x111   : > { %21271 = vmatmul.mubr.msk.f32.gmra.mrb[70].mxu0 %vm631_vm1, %v4030_v61  ;;  %v25282_v61 = vld [vmem:[%s24845_s24 + $0x99] sm:$0xff] }
 0x112   : > { %21273 = vmatprep.mubr.msk.f32.mxu0 %vm631_vm1, %v4031_v62  ;;  %v25285_v62 = vld [vmem:[%s24845_s24 + $0xa1] sm:$0xff] }
 0x115   : > { %21274 = vmatmul.mubr.msk.f32.gmra.mrb[72].mxu0 %vm631_vm1, %v4032_v63  ;;  %v25292_v63 = vld [vmem:[%s24845_s24 + $0xa9] sm:$0xff] }
 0x116   : > { %21276 = vmatprep.mubr.msk.f32.mxu0 %vm631_vm1, %v4033_v0  ;;  %v25295_v0 = vld [vmem:[%s24845_s24 + $0xb1] sm:$0xff] }
 0x119   : > { %21277 = vmatmul.mubr.msk.f32.gmra.mrb[74].mxu0 %vm631_vm1, %v4034_v1  ;;  %v25302_v1 = vld [vmem:[%s24845_s24 + $0xb9] sm:$0xff] }
 0x11a   : > { %21279 = vmatprep.mubr.msk.f32.mxu0 %vm631_vm1, %v4035_v2  ;;  %v25305_v2 = vld [vmem:[%s24845_s24 + $0xc1] sm:$0xff] }
 0x11d   : > { %21280 = vmatmul.mubr.msk.f32.gmra.mrb[76].mxu0 %vm631_vm1, %v4036_v3  ;;  %v25312_v3 = vld [vmem:[%s24845_s24 + $0xc9] sm:$0xff] }
 0x11e   : > { %21282 = vmatprep.mubr.msk.f32.mxu0 %vm631_vm1, %v4037_v4  ;;  %v25315_v4 = vld [vmem:[%s24845_s24 + $0xd1] sm:$0xff] }
 0x121   : > { %21283 = vmatmul.mubr.msk.f32.gmra.mrb[78].mxu0 %vm631_vm1, %v4038_v5  ;;  %v25322_v5 = vld [vmem:[%s24845_s24 + $0xd9] sm:$0xff] }
 0x122   : > { %21285 = vmatprep.mubr.msk.f32.mxu0 %vm631_vm1, %v4039_v6  ;;  %v25325_v6 = vld [vmem:[%s24845_s24 + $0xe1] sm:$0xff] }
 0x125   : > { %21286 = vmatmul.mubr.msk.f32.gmra.mrb[80].mxu0 %vm631_vm1, %v4040_v7  ;;  %v25332_v7 = vld [vmem:[%s24845_s24 + $0xe9] sm:$0xff] }
 0x126   : > { %21288 = vmatprep.mubr.msk.f32.mxu0 %vm631_vm1, %v4041_v8  ;;  %v25335_v8 = vld [vmem:[%s24845_s24 + $0xf1] sm:$0xff] }
 0x129   : > { %21289 = vmatmul.mubr.msk.f32.gmra.mrb[82].mxu0 %vm631_vm1, %v4042_v9  ;;  %v25342_v9 = vld [vmem:[%s24845_s24 + $0xf9] sm:$0xff] }
 0x12a   : > { %21291 = vmatprep.mubr.msk.f32.mxu0 %vm631_vm1, %v4043_v10  ;;  %v25345_v10 = vld [vmem:[%s24845_s24 + $0x101] sm:$0xff] }
 0x12d   : > { %21292 = vmatmul.mubr.msk.f32.gmra.mrb[84].mxu0 %vm631_vm1, %v4044_v11  ;;  %v25352_v11 = vld [vmem:[%s24845_s24 + $0x109] sm:$0xff] }
 0x12e   : > { %21294 = vmatprep.mubr.msk.f32.mxu0 %vm631_vm1, %v4045_v12  ;;  %v25355_v12 = vld [vmem:[%s24845_s24 + $0x111] sm:$0xff] }
 0x131   : > { %21295 = vmatmul.mubr.msk.f32.gmra.mrb[86].mxu0 %vm631_vm1, %v4046_v13  ;;  %v25362_v13 = vld [vmem:[%s24845_s24 + $0x119] sm:$0xff] }
 0x132   : > { %21297 = vmatprep.mubr.msk.f32.mxu0 %vm631_vm1, %v4047_v14  ;;  %v25365_v14 = vld [vmem:[%s24845_s24 + $0x121] sm:$0xff] }
 0x135   : > { %21298 = vmatmul.mubr.msk.f32.gmra.mrb[88].mxu0 %vm631_vm1, %v4048_v15  ;;  %v25372_v15 = vld [vmem:[%s24845_s24 + $0x129] sm:$0xff] }
 0x136   : > { %21300 = vmatprep.mubr.msk.f32.mxu0 %vm631_vm1, %v4049_v16  ;;  %v25375_v16 = vld [vmem:[%s24845_s24 + $0x131] sm:$0xff] }
 0x139   : > { %21301 = vmatmul.mubr.msk.f32.gmra.mrb[90].mxu0 %vm631_vm1, %v4050_v17  ;;  %v25382_v17 = vld [vmem:[%s24845_s24 + $0x139] sm:$0xff] }
 0x13a   : > { %21303 = vmatprep.mubr.msk.f32.mxu0 %vm631_vm1, %v4051_v18  ;;  %v25385_v18 = vld [vmem:[%s24845_s24 + $0x141] sm:$0xff] }
 0x13d   : > { %21304 = vmatmul.mubr.msk.f32.gmra.mrb[92].mxu0 %vm631_vm1, %v4052_v19  ;;  %v17419_v19 = vld [vmem:[%s30454_s1 + $0x4] sm:$0x7] }
 0x13e   : > { %21306 = vmatprep.mubr.msk.f32.mxu0 %vm631_vm1, %v4053_v20  ;;  %v509_v20 = vld [vmem:[%s24845_s24 + $0x1] sm:$0xff]  ;;  %20617 = vmatprep.subr.msk.mxu1 %vm992_vm0, %v17419_v19 }
 0x13f   : > { %20618 = vmatpush3.msk.msra.mxu1 %vm992_vm0, %v17419_v19  ;;  %20619 = vmatprep.mubr.msk.f32.mxu1 %vm631_vm1, %v509_v20  ;;  %v25812_v19 = vld [vmem:[%s24845_s24 + $0x319] sm:$0xff]  ;;  %v25815_v20 = vld [vmem:[%s24845_s24 + $0x321] sm:$0xff] }
 0x141   : > { %21307 = vmatmul.mubr.msk.f32.gmra.mrb[94].mxu0 %vm631_vm1, %v4054_v21  ;;  %v510_v21 = vld [vmem:[%s24845_s24 + $0x9] sm:$0xff] }
 0x142   : > { %21309 = vmatprep.mubr.msk.f32.mxu0 %vm631_vm1, %v4055_v22  ;;  %v25397_v22 = vld [vmem:[%s24845_s24 + $0x149] sm:$0xff]  ;;  %20620 = vmatmul.mubr.msk.f32.vlgmr.msra.gmra.mrb[0].mxu1 %vm631_vm1, %v510_v21 }
 0x143   : > { %v25826_v21 = vld [vmem:[%s24845_s24 + $0x329] sm:$0xff] }
 0x145   : > { %21310 = vmatmul.mubr.msk.f32.gmra.mrb[96].mxu0 %vm631_vm1, %v4056_v23  ;;  %v25401_v23 = vld [vmem:[%s24845_s24 + $0x151] sm:$0xff] }
 0x146   : > { %21312 = vmatprep.mubr.msk.f32.mxu0 %vm631_vm1, %v4057_v24  ;;  %v511_v24 = vld [vmem:[%s24845_s24 + $0x11] sm:$0xff] }
 0x147   : > { %20622 = vmatprep.mubr.msk.f32.mxu1 %vm631_vm1, %v511_v24  ;;  %v25843_v24 = vld [vmem:[%s24845_s24 + $0x341] sm:$0xff] }
 0x149   : > { %21313 = vmatmul.mubr.msk.f32.gmra.mrb[98].mxu0 %vm631_vm1, %v4058_v25  ;;  %v512_v25 = vld [vmem:[%s24845_s24 + $0x19] sm:$0xff] }
 0x14a   : > { %21315 = vmatprep.mubr.msk.f32.mxu0 %vm631_vm1, %v4059_v26  ;;  %v25413_v26 = vld [vmem:[%s24845_s24 + $0x159] sm:$0xff]  ;;  %20623 = vmatmul.mubr.msk.f32.gmra.mrb[2].mxu1 %vm631_vm1, %v512_v25  ;;  %v25854_v25 = vld [vmem:[%s24845_s24 + $0x349] sm:$0xff] }
 0x14b   : > { %20625 = vmatprep.mubr.msk.f32.mxu1 %vm631_vm1, %v25204_v46 }
 0x14d   : > { %21316 = vmatmul.mubr.msk.f32.gmra.mrb[100].mxu0 %vm631_vm1, %v4060_v27  ;;  %v25417_v27 = vld [vmem:[%s24845_s24 + $0x161] sm:$0xff] }
 0x14e   : > { %21318 = vmatprep.mubr.msk.f32.mxu0 %vm631_vm1, %v4061_v28  ;;  %v25427_v28 = vld [vmem:[%s24845_s24 + $0x169] sm:$0xff]  ;;  %20626 = vmatmul.mubr.msk.f32.gmra.mrb[4].mxu1 %vm631_vm1, %v25210_v48 }
 0x14f   : > { %20628 = vmatprep.mubr.msk.f32.mxu1 %vm631_vm1, %v25213_v49 }
 0x151   : > { %21319 = vmatmul.mubr.msk.f32.gmra.mrb[102].mxu0 %vm631_vm1, %v4062_v29  ;;  %v25430_v29 = vld [vmem:[%s24845_s24 + $0x171] sm:$0xff] }
 0x152   : > { %21321 = vmatprep.mubr.msk.f32.mxu0 %vm631_vm1, %v4063_v30  ;;  %v25441_v30 = vld [vmem:[%s24845_s24 + $0x179] sm:$0xff]  ;;  %20629 = vmatmul.mubr.msk.f32.gmra.mrb[6].mxu1 %vm631_vm1, %v25222_v50 }
 0x153   : > { %20631 = vmatprep.mubr.msk.f32.mxu1 %vm631_vm1, %v25225_v51 }
 0x155   : > { %21322 = vmatmul.mubr.msk.f32.gmra.mrb[104].mxu0 %vm631_vm1, %v4064_v31  ;;  %v25444_v31 = vld [vmem:[%s24845_s24 + $0x181] sm:$0xff] }
 0x156   : > { %21324 = vmatprep.mubr.msk.f32.mxu0 %vm631_vm1, %v4065_v32  ;;  %v25455_v32 = vld [vmem:[%s24845_s24 + $0x189] sm:$0xff]  ;;  %20632 = vmatmul.mubr.msk.f32.gmra.mrb[8].mxu1 %vm631_vm1, %v25232_v52 }
 0x157   : > { %20634 = vmatprep.mubr.msk.f32.mxu1 %vm631_vm1, %v25235_v53 }
 0x159   : > { %21325 = vmatmul.mubr.msk.f32.gmra.mrb[106].mxu0 %vm631_vm1, %v4066_v33  ;;  %v25458_v33 = vld [vmem:[%s24845_s24 + $0x191] sm:$0xff] }
 0x15a   : > { %21327 = vmatprep.mubr.msk.f32.mxu0 %vm631_vm1, %v4067_v34  ;;  %v25469_v34 = vld [vmem:[%s24845_s24 + $0x199] sm:$0xff] }
 0x15d   : > { %21328 = vmatmul.mubr.msk.f32.gmra.mrb[108].mxu0 %vm631_vm1, %v4068_v35  ;;  %v25472_v35 = vld [vmem:[%s24845_s24 + $0x1a1] sm:$0xff] }
 0x15e   : > { %21330 = vmatprep.mubr.msk.f32.mxu0 %vm631_vm1, %v4069_v36  ;;  %v25483_v36 = vld [vmem:[%s24845_s24 + $0x1a9] sm:$0xff] }
 0x161   : > { %21331 = vmatmul.mubr.msk.f32.gmra.mrb[110].mxu0 %vm631_vm1, %v4070_v37  ;;  %v25486_v37 = vld [vmem:[%s24845_s24 + $0x1b1] sm:$0xff] }
 0x162   : > { %21333 = vmatprep.mubr.msk.f32.mxu0 %vm631_vm1, %v4071_v38  ;;  %v25497_v38 = vld [vmem:[%s24845_s24 + $0x1b9] sm:$0xff] }
 0x165   : > { %21334 = vmatmul.mubr.msk.f32.gmra.mrb[112].mxu0 %vm631_vm1, %v4072_v39  ;;  %v25500_v39 = vld [vmem:[%s24845_s24 + $0x1c1] sm:$0xff] }
 0x166   : > { %21336 = vmatprep.mubr.msk.f32.mxu0 %vm631_vm1, %v4073_v40  ;;  %v25511_v40 = vld [vmem:[%s24845_s24 + $0x1c9] sm:$0xff] }
 0x169   : > { %21337 = vmatmul.mubr.msk.f32.gmra.mrb[114].mxu0 %vm631_vm1, %v4074_v41  ;;  %v25514_v41 = vld [vmem:[%s24845_s24 + $0x1d1] sm:$0xff] }
 0x16a   : > { %21339 = vmatprep.mubr.msk.f32.mxu0 %vm631_vm1, %v4075_v42  ;;  %v25525_v42 = vld [vmem:[%s24845_s24 + $0x1d9] sm:$0xff] }
 0x16d   : > { %21340 = vmatmul.mubr.msk.f32.gmra.mrb[116].mxu0 %vm631_vm1, %v4076_v43  ;;  %v25528_v43 = vld [vmem:[%s24845_s24 + $0x1e1] sm:$0xff] }
 0x16e   : > { %21342 = vmatprep.mubr.msk.f32.mxu0 %vm631_vm1, %v4077_v44  ;;  %v25539_v44 = vld [vmem:[%s24845_s24 + $0x1e9] sm:$0xff] }
 0x171   : > { %21343 = vmatmul.mubr.msk.f32.gmra.mrb[118].mxu0 %vm631_vm1, %v4078_v45  ;;  %v25544_v45 = vld [vmem:[%s30454_s1 + $0x18] sm:$0x7] }
 0x172   : > { %21347 = vmatprep.mubr.msk.f32.mxu0 %vm631_vm1, %v25204_v46  ;;  %v25547_v46 = vld [vmem:[%s24845_s24 + $0x1f1] sm:$0xff] }
 0x175   : > { %21348 = vmatmul.mubr.msk.f32.vlgmr.msra.gmra.mrb[0].mxu0 %vm631_vm1, %v25210_v48  ;;  %v25560_v48 = vld [vmem:[%s24845_s24 + $0x1f9] sm:$0xff] }
 0x176   : > { %21528 = vmatpush3.msk.msra.mxu0 %vm992_vm0, %v25075_v47  ;;  %21350 = vmatprep.mubr.msk.f32.mxu0 %vm631_vm1, %v25213_v49  ;;  %v25242_v47 = vld [vmem:[%s24845_s24 + $0x59] sm:$0xff]  ;;  %v25563_v49 = vld [vmem:[%s24845_s24 + $0x201] sm:$0xff] }
 0x177   : > { %20635 = vmatmul.mubr.msk.f32.gmra.mrb[10].mxu1 %vm631_vm1, %v25242_v47  ;;  %21709 = vmatprep.subr.msk.mxu0 %vm992_vm0, %v25544_v45 }
 0x178   : > { %20637 = vmatprep.mubr.msk.f32.mxu1 %vm631_vm1, %v25245_v54 }
 0x179   : > { %21351 = vmatmul.mubr.msk.f32.gmra.mrb[2].mxu0 %vm631_vm1, %v25222_v50  ;;  %v25574_v50 = vld [vmem:[%s24845_s24 + $0x209] sm:$0xff] }
 0x17a   : > { %21353 = vmatprep.mubr.msk.f32.mxu0 %vm631_vm1, %v25225_v51  ;;  %v25577_v51 = vld [vmem:[%s24845_s24 + $0x211] sm:$0xff] }
 0x17b   : > { %20638 = vmatmul.mubr.msk.f32.gmra.mrb[12].mxu1 %vm631_vm1, %v25252_v55 }
 0x17c   : > { %20640 = vmatprep.mubr.msk.f32.mxu1 %vm631_vm1, %v25255_v56 }
 0x17d   : > { %21354 = vmatmul.mubr.msk.f32.gmra.mrb[4].mxu0 %vm631_vm1, %v25232_v52  ;;  %v25588_v52 = vld [vmem:[%s24845_s24 + $0x219] sm:$0xff] }
 0x17e   : > { %21356 = vmatprep.mubr.msk.f32.mxu0 %vm631_vm1, %v25235_v53  ;;  %v25591_v53 = vld [vmem:[%s24845_s24 + $0x221] sm:$0xff] }
 0x17f   : > { %20641 = vmatmul.mubr.msk.f32.gmra.mrb[14].mxu1 %vm631_vm1, %v25262_v57 }
 0x180   : > { %20643 = vmatprep.mubr.msk.f32.mxu1 %vm631_vm1, %v25265_v58 }
 0x181   : > { %21357 = vmatmul.mubr.msk.f32.gmra.mrb[6].mxu0 %vm631_vm1, %v25242_v47  ;;  %v25602_v47 = vld [vmem:[%s24845_s24 + $0x229] sm:$0xff] }
 0x182   : > { %21359 = vmatprep.mubr.msk.f32.mxu0 %vm631_vm1, %v25245_v54  ;;  %v25605_v54 = vld [vmem:[%s24845_s24 + $0x231] sm:$0xff] }
 0x183   : > { %20644 = vmatmul.mubr.msk.f32.gmra.mrb[16].mxu1 %vm631_vm1, %v25272_v59 }
 0x184   : > { %20646 = vmatprep.mubr.msk.f32.mxu1 %vm631_vm1, %v25275_v60 }
 0x185   : > { %21360 = vmatmul.mubr.msk.f32.gmra.mrb[8].mxu0 %vm631_vm1, %v25252_v55  ;;  %v25616_v55 = vld [vmem:[%s24845_s24 + $0x239] sm:$0xff] }
 0x186   : > { %21362 = vmatprep.mubr.msk.f32.mxu0 %vm631_vm1, %v25255_v56  ;;  %v25619_v56 = vld [vmem:[%s24845_s24 + $0x241] sm:$0xff] }
 0x187   : > { %20647 = vmatmul.mubr.msk.f32.gmra.mrb[18].mxu1 %vm631_vm1, %v25282_v61 }
 0x188   : > { %20649 = vmatprep.mubr.msk.f32.mxu1 %vm631_vm1, %v25285_v62 }
 0x189   : > { %21363 = vmatmul.mubr.msk.f32.gmra.mrb[10].mxu0 %vm631_vm1, %v25262_v57  ;;  %v25630_v57 = vld [vmem:[%s24845_s24 + $0x249] sm:$0xff] }
 0x18a   : > { %21365 = vmatprep.mubr.msk.f32.mxu0 %vm631_vm1, %v25265_v58  ;;  %v25633_v58 = vld [vmem:[%s24845_s24 + $0x251] sm:$0xff] }
 0x18b   : > { %20650 = vmatmul.mubr.msk.f32.gmra.mrb[20].mxu1 %vm631_vm1, %v25292_v63 }
 0x18c   : > { %20652 = vmatprep.mubr.msk.f32.mxu1 %vm631_vm1, %v25295_v0 }
 0x18d   : > { %21366 = vmatmul.mubr.msk.f32.gmra.mrb[12].mxu0 %vm631_vm1, %v25272_v59  ;;  %v25644_v59 = vld [vmem:[%s24845_s24 + $0x259] sm:$0xff] }
 0x18e   : > { %21368 = vmatprep.mubr.msk.f32.mxu0 %vm631_vm1, %v25275_v60  ;;  %v25647_v60 = vld [vmem:[%s24845_s24 + $0x261] sm:$0xff] }
 0x18f   : > { %20653 = vmatmul.mubr.msk.f32.gmra.mrb[22].mxu1 %vm631_vm1, %v25302_v1 }
 0x190   : > { %20655 = vmatprep.mubr.msk.f32.mxu1 %vm631_vm1, %v25305_v2 }
 0x191   : > { %21369 = vmatmul.mubr.msk.f32.gmra.mrb[14].mxu0 %vm631_vm1, %v25282_v61  ;;  %v25658_v61 = vld [vmem:[%s24845_s24 + $0x269] sm:$0xff] }
 0x192   : > { %21371 = vmatprep.mubr.msk.f32.mxu0 %vm631_vm1, %v25285_v62  ;;  %v25661_v62 = vld [vmem:[%s24845_s24 + $0x271] sm:$0xff] }
 0x193   : > { %20656 = vmatmul.mubr.msk.f32.gmra.mrb[24].mxu1 %vm631_vm1, %v25312_v3 }
 0x194   : > { %20658 = vmatprep.mubr.msk.f32.mxu1 %vm631_vm1, %v25315_v4 }
 0x195   : > { %21372 = vmatmul.mubr.msk.f32.gmra.mrb[16].mxu0 %vm631_vm1, %v25292_v63  ;;  %v25672_v63 = vld [vmem:[%s24845_s24 + $0x279] sm:$0xff] }
 0x196   : > { %21374 = vmatprep.mubr.msk.f32.mxu0 %vm631_vm1, %v25295_v0  ;;  %v25675_v0 = vld [vmem:[%s24845_s24 + $0x281] sm:$0xff] }
 0x197   : > { %20659 = vmatmul.mubr.msk.f32.gmra.mrb[26].mxu1 %vm631_vm1, %v25322_v5 }
 0x198   : > { %20661 = vmatprep.mubr.msk.f32.mxu1 %vm631_vm1, %v25325_v6 }
 0x199   : > { %21375 = vmatmul.mubr.msk.f32.gmra.mrb[18].mxu0 %vm631_vm1, %v25302_v1  ;;  %v25686_v1 = vld [vmem:[%s24845_s24 + $0x289] sm:$0xff] }
 0x19a   : > { %21377 = vmatprep.mubr.msk.f32.mxu0 %vm631_vm1, %v25305_v2  ;;  %v25689_v2 = vld [vmem:[%s24845_s24 + $0x291] sm:$0xff] }
 0x19b   : > { %20662 = vmatmul.mubr.msk.f32.gmra.mrb[28].mxu1 %vm631_vm1, %v25332_v7 }
 0x19c   : > { %20664 = vmatprep.mubr.msk.f32.mxu1 %vm631_vm1, %v25335_v8 }
 0x19d   : > { %21378 = vmatmul.mubr.msk.f32.gmra.mrb[20].mxu0 %vm631_vm1, %v25312_v3  ;;  %v25700_v3 = vld [vmem:[%s24845_s24 + $0x299] sm:$0xff] }
 0x19e   : > { %21380 = vmatprep.mubr.msk.f32.mxu0 %vm631_vm1, %v25315_v4  ;;  %v25703_v4 = vld [vmem:[%s24845_s24 + $0x2a1] sm:$0xff] }
 0x19f   : > { %20665 = vmatmul.mubr.msk.f32.gmra.mrb[30].mxu1 %vm631_vm1, %v25342_v9 }
 0x1a0   : > { %20667 = vmatprep.mubr.msk.f32.mxu1 %vm631_vm1, %v25345_v10 }
 0x1a1   : > { %21381 = vmatmul.mubr.msk.f32.gmra.mrb[22].mxu0 %vm631_vm1, %v25322_v5  ;;  %v25714_v5 = vld [vmem:[%s24845_s24 + $0x2a9] sm:$0xff] }
 0x1a2   : > { %21383 = vmatprep.mubr.msk.f32.mxu0 %vm631_vm1, %v25325_v6  ;;  %v25717_v6 = vld [vmem:[%s24845_s24 + $0x2b1] sm:$0xff] }
 0x1a3   : > { %20668 = vmatmul.mubr.msk.f32.gmra.mrb[32].mxu1 %vm631_vm1, %v25352_v11 }
 0x1a4   : > { %20670 = vmatprep.mubr.msk.f32.mxu1 %vm631_vm1, %v25355_v12 }
 0x1a5   : > { %21384 = vmatmul.mubr.msk.f32.gmra.mrb[24].mxu0 %vm631_vm1, %v25332_v7  ;;  %v25728_v7 = vld [vmem:[%s24845_s24 + $0x2b9] sm:$0xff] }
 0x1a6   : > { %21386 = vmatprep.mubr.msk.f32.mxu0 %vm631_vm1, %v25335_v8  ;;  %v25731_v8 = vld [vmem:[%s24845_s24 + $0x2c1] sm:$0xff] }
 0x1a7   : > { %20671 = vmatmul.mubr.msk.f32.gmra.mrb[34].mxu1 %vm631_vm1, %v25362_v13 }
 0x1a8   : > { %20673 = vmatprep.mubr.msk.f32.mxu1 %vm631_vm1, %v25365_v14 }
 0x1a9   : > { %21387 = vmatmul.mubr.msk.f32.gmra.mrb[26].mxu0 %vm631_vm1, %v25342_v9  ;;  %v25742_v9 = vld [vmem:[%s24845_s24 + $0x2c9] sm:$0xff] }
 0x1aa   : > { %21389 = vmatprep.mubr.msk.f32.mxu0 %vm631_vm1, %v25345_v10  ;;  %v25745_v10 = vld [vmem:[%s24845_s24 + $0x2d1] sm:$0xff] }
 0x1ab   : > { %20674 = vmatmul.mubr.msk.f32.gmra.mrb[36].mxu1 %vm631_vm1, %v25372_v15 }
 0x1ac   : > { %20676 = vmatprep.mubr.msk.f32.mxu1 %vm631_vm1, %v25375_v16 }
 0x1ad   : > { %21390 = vmatmul.mubr.msk.f32.gmra.mrb[28].mxu0 %vm631_vm1, %v25352_v11  ;;  %v25756_v11 = vld [vmem:[%s24845_s24 + $0x2d9] sm:$0xff] }
 0x1ae   : > { %21392 = vmatprep.mubr.msk.f32.mxu0 %vm631_vm1, %v25355_v12  ;;  %v25759_v12 = vld [vmem:[%s24845_s24 + $0x2e1] sm:$0xff] }
 0x1af   : > { %20677 = vmatmul.mubr.msk.f32.gmra.mrb[38].mxu1 %vm631_vm1, %v25382_v17 }
 0x1b0   : > { %20679 = vmatprep.mubr.msk.f32.mxu1 %vm631_vm1, %v25385_v18 }
 0x1b1   : > { %21393 = vmatmul.mubr.msk.f32.gmra.mrb[30].mxu0 %vm631_vm1, %v25362_v13  ;;  %v25770_v13 = vld [vmem:[%s24845_s24 + $0x2e9] sm:$0xff] }
 0x1b2   : > { %21395 = vmatprep.mubr.msk.f32.mxu0 %vm631_vm1, %v25365_v14  ;;  %v25773_v14 = vld [vmem:[%s24845_s24 + $0x2f1] sm:$0xff] }
 0x1b3   : > { %20680 = vmatmul.mubr.msk.f32.gmra.mrb[40].mxu1 %vm631_vm1, %v25397_v22 }
 0x1b4   : > { %20682 = vmatprep.mubr.msk.f32.mxu1 %vm631_vm1, %v25401_v23 }
 0x1b5   : > { %21396 = vmatmul.mubr.msk.f32.gmra.mrb[32].mxu0 %vm631_vm1, %v25372_v15  ;;  %v25784_v15 = vld [vmem:[%s24845_s24 + $0x2f9] sm:$0xff] }
 0x1b6   : > { %21398 = vmatprep.mubr.msk.f32.mxu0 %vm631_vm1, %v25375_v16  ;;  %v25787_v16 = vld [vmem:[%s24845_s24 + $0x301] sm:$0xff] }
 0x1b7   : > { %20683 = vmatmul.mubr.msk.f32.gmra.mrb[42].mxu1 %vm631_vm1, %v25413_v26 }
 0x1b8   : > { %20685 = vmatprep.mubr.msk.f32.mxu1 %vm631_vm1, %v25417_v27 }
 0x1b9   : > { %21399 = vmatmul.mubr.msk.f32.gmra.mrb[34].mxu0 %vm631_vm1, %v25382_v17  ;;  %v25798_v17 = vld [vmem:[%s24845_s24 + $0x309] sm:$0xff] }
 0x1ba   : > { %21401 = vmatprep.mubr.msk.f32.mxu0 %vm631_vm1, %v25385_v18  ;;  %v25801_v18 = vld [vmem:[%s24845_s24 + $0x311] sm:$0xff] }
 0x1bb   : > { %20686 = vmatmul.mubr.msk.f32.gmra.mrb[44].mxu1 %vm631_vm1, %v25427_v28 }
 0x1bc   : > { %20688 = vmatprep.mubr.msk.f32.mxu1 %vm631_vm1, %v25430_v29 }
 0x1bd   : > { %21402 = vmatmul.mubr.msk.f32.gmra.mrb[36].mxu0 %vm631_vm1, %v25397_v22  ;;  %v25829_v22 = vld [vmem:[%s24845_s24 + $0x331] sm:$0xff] }
 0x1be   : > { %21404 = vmatprep.mubr.msk.f32.mxu0 %vm631_vm1, %v25401_v23  ;;  %v25840_v23 = vld [vmem:[%s24845_s24 + $0x339] sm:$0xff] }
 0x1bf   : > { %20689 = vmatmul.mubr.msk.f32.gmra.mrb[46].mxu1 %vm631_vm1, %v25441_v30 }
 0x1c0   : > { %20691 = vmatprep.mubr.msk.f32.mxu1 %vm631_vm1, %v25444_v31 }
 0x1c1   : > { %21405 = vmatmul.mubr.msk.f32.gmra.mrb[38].mxu0 %vm631_vm1, %v25413_v26  ;;  %v25857_v26 = vld [vmem:[%s24845_s24 + $0x351] sm:$0xff] }
 0x1c2   : > { %21407 = vmatprep.mubr.msk.f32.mxu0 %vm631_vm1, %v25417_v27  ;;  %v25868_v27 = vld [vmem:[%s24845_s24 + $0x359] sm:$0xff] }
 0x1c3   : > { %20692 = vmatmul.mubr.msk.f32.gmra.mrb[48].mxu1 %vm631_vm1, %v25455_v32 }
 0x1c4   : > { %20694 = vmatprep.mubr.msk.f32.mxu1 %vm631_vm1, %v25458_v33 }
 0x1c5   : > { %21408 = vmatmul.mubr.msk.f32.gmra.mrb[40].mxu0 %vm631_vm1, %v25427_v28  ;;  %v25871_v28 = vld [vmem:[%s24845_s24 + $0x361] sm:$0xff] }
 0x1c6   : > { %21410 = vmatprep.mubr.msk.f32.mxu0 %vm631_vm1, %v25430_v29  ;;  %v25882_v29 = vld [vmem:[%s24845_s24 + $0x369] sm:$0xff] }
 0x1c7   : > { %20695 = vmatmul.mubr.msk.f32.gmra.mrb[50].mxu1 %vm631_vm1, %v25469_v34 }
 0x1c8   : > { %20697 = vmatprep.mubr.msk.f32.mxu1 %vm631_vm1, %v25472_v35 }
 0x1c9   : > { %21411 = vmatmul.mubr.msk.f32.gmra.mrb[42].mxu0 %vm631_vm1, %v25441_v30  ;;  %v25885_v30 = vld [vmem:[%s24845_s24 + $0x371] sm:$0xff] }
 0x1ca   : > { %21413 = vmatprep.mubr.msk.f32.mxu0 %vm631_vm1, %v25444_v31  ;;  %v25896_v31 = vld [vmem:[%s24845_s24 + $0x379] sm:$0xff] }
 0x1cb   : > { %20698 = vmatmul.mubr.msk.f32.gmra.mrb[52].mxu1 %vm631_vm1, %v25483_v36 }
 0x1cc   : > { %20700 = vmatprep.mubr.msk.f32.mxu1 %vm631_vm1, %v25486_v37 }
 0x1cd   : > { %21414 = vmatmul.mubr.msk.f32.gmra.mrb[44].mxu0 %vm631_vm1, %v25455_v32  ;;  %v25899_v32 = vld [vmem:[%s24845_s24 + $0x381] sm:$0xff] }
 0x1ce   : > { %21416 = vmatprep.mubr.msk.f32.mxu0 %vm631_vm1, %v25458_v33  ;;  %v25910_v33 = vld [vmem:[%s24845_s24 + $0x389] sm:$0xff] }
 0x1cf   : > { %20701 = vmatmul.mubr.msk.f32.gmra.mrb[54].mxu1 %vm631_vm1, %v25497_v38 }
 0x1d0   : > { %20703 = vmatprep.mubr.msk.f32.mxu1 %vm631_vm1, %v25500_v39 }
 0x1d1   : > { %21417 = vmatmul.mubr.msk.f32.gmra.mrb[46].mxu0 %vm631_vm1, %v25469_v34  ;;  %v25913_v34 = vld [vmem:[%s24845_s24 + $0x391] sm:$0xff] }
 0x1d2   : > { %21419 = vmatprep.mubr.msk.f32.mxu0 %vm631_vm1, %v25472_v35  ;;  %v25924_v35 = vld [vmem:[%s24845_s24 + $0x399] sm:$0xff] }
 0x1d3   : > { %20704 = vmatmul.mubr.msk.f32.gmra.mrb[56].mxu1 %vm631_vm1, %v25511_v40 }
 0x1d4   : > { %20706 = vmatprep.mubr.msk.f32.mxu1 %vm631_vm1, %v25514_v41 }
 0x1d5   : > { %21420 = vmatmul.mubr.msk.f32.gmra.mrb[48].mxu0 %vm631_vm1, %v25483_v36  ;;  %v25927_v36 = vld [vmem:[%s24845_s24 + $0x3a1] sm:$0xff] }
 0x1d6   : > { %21422 = vmatprep.mubr.msk.f32.mxu0 %vm631_vm1, %v25486_v37  ;;  %v25938_v37 = vld [vmem:[%s24845_s24 + $0x3a9] sm:$0xff] }
 0x1d7   : > { %20707 = vmatmul.mubr.msk.f32.gmra.mrb[58].mxu1 %vm631_vm1, %v25525_v42 }
 0x1d8   : > { %20709 = vmatprep.mubr.msk.f32.mxu1 %vm631_vm1, %v25528_v43 }
 0x1d9   : > { %21423 = vmatmul.mubr.msk.f32.gmra.mrb[50].mxu0 %vm631_vm1, %v25497_v38  ;;  %v25941_v38 = vld [vmem:[%s24845_s24 + $0x3b1] sm:$0xff] }
 0x1da   : > { %21425 = vmatprep.mubr.msk.f32.mxu0 %vm631_vm1, %v25500_v39  ;;  %v25952_v39 = vld [vmem:[%s24845_s24 + $0x3b9] sm:$0xff] }
 0x1db   : > { %20710 = vmatmul.mubr.msk.f32.gmra.mrb[60].mxu1 %vm631_vm1, %v25539_v44 }
 0x1dc   : > { %20712 = vmatprep.mubr.msk.f32.mxu1 %vm631_vm1, %v25547_v46 }
 0x1dd   : > { %21426 = vmatmul.mubr.msk.f32.gmra.mrb[52].mxu0 %vm631_vm1, %v25511_v40  ;;  %v5345_v40 = vld [vmem:[%s24845_s24 + $0x3c1] sm:$0xff] }
 0x1de   : > { %21428 = vmatprep.mubr.msk.f32.mxu0 %vm631_vm1, %v25514_v41  ;;  %v5346_v41 = vld [vmem:[%s24845_s24 + $0x3c9] sm:$0xff] }
 0x1df   : > { %20713 = vmatmul.mubr.msk.f32.gmra.mrb[62].mxu1 %vm631_vm1, %v25560_v48 }
 0x1e0   : > { %20715 = vmatprep.mubr.msk.f32.mxu1 %vm631_vm1, %v25563_v49 }
 0x1e1   : > { %21429 = vmatmul.mubr.msk.f32.gmra.mrb[54].mxu0 %vm631_vm1, %v25525_v42  ;;  %v5347_v42 = vld [vmem:[%s24845_s24 + $0x3d1] sm:$0xff] }
 0x1e2   : > { %21431 = vmatprep.mubr.msk.f32.mxu0 %vm631_vm1, %v25528_v43  ;;  %v5348_v43 = vld [vmem:[%s24845_s24 + $0x3d9] sm:$0xff] }
 0x1e3   : > { %20716 = vmatmul.mubr.msk.f32.gmra.mrb[64].mxu1 %vm631_vm1, %v25574_v50 }
 0x1e4   : > { %20718 = vmatprep.mubr.msk.f32.mxu1 %vm631_vm1, %v25577_v51 }
 0x1e5   : > { %21432 = vmatmul.mubr.msk.f32.gmra.mrb[56].mxu0 %vm631_vm1, %v25539_v44  ;;  %v6499_v44 = vld [vmem:[%s24845_s24 + $0x22] sm:$0xff] }
 0x1e6   : > { %21434 = vmatprep.mubr.msk.f32.mxu0 %vm631_vm1, %v25547_v46  ;;  %v6500_v46 = vld [vmem:[%s24845_s24 + $0x2a] sm:$0xff] }
 0x1e7   : > { %20719 = vmatmul.mubr.msk.f32.gmra.mrb[66].mxu1 %vm631_vm1, %v25588_v52 }
 0x1e8   : > { %20721 = vmatprep.mubr.msk.f32.mxu1 %vm631_vm1, %v25591_v53 }
 0x1e9   : > { %21435 = vmatmul.mubr.msk.f32.gmra.mrb[58].mxu0 %vm631_vm1, %v25560_v48  ;;  %v6501_v48 = vld [vmem:[%s24845_s24 + $0x32] sm:$0xff] }
 0x1ea   : > { %21437 = vmatprep.mubr.msk.f32.mxu0 %vm631_vm1, %v25563_v49  ;;  %v6502_v49 = vld [vmem:[%s24845_s24 + $0x3a] sm:$0xff] }
 0x1eb   : > { %20722 = vmatmul.mubr.msk.f32.gmra.mrb[68].mxu1 %vm631_vm1, %v25602_v47 }
 0x1ec   : > { %20724 = vmatprep.mubr.msk.f32.mxu1 %vm631_vm1, %v25605_v54 }
 0x1ed   : > { %21438 = vmatmul.mubr.msk.f32.gmra.mrb[60].mxu0 %vm631_vm1, %v25574_v50  ;;  %v6503_v50 = vld [vmem:[%s24845_s24 + $0x42] sm:$0xff] }
 0x1ee   : > { %21440 = vmatprep.mubr.msk.f32.mxu0 %vm631_vm1, %v25577_v51  ;;  %v6504_v51 = vld [vmem:[%s24845_s24 + $0x4a] sm:$0xff] }
 0x1ef   : > { %20725 = vmatmul.mubr.msk.f32.gmra.mrb[70].mxu1 %vm631_vm1, %v25616_v55 }
 0x1f0   : > { %20727 = vmatprep.mubr.msk.f32.mxu1 %vm631_vm1, %v25619_v56 }
 0x1f1   : > { %21441 = vmatmul.mubr.msk.f32.gmra.mrb[62].mxu0 %vm631_vm1, %v25588_v52  ;;  %v6505_v52 = vld [vmem:[%s24845_s24 + $0x52] sm:$0xff] }
 0x1f2   : > { %21443 = vmatprep.mubr.msk.f32.mxu0 %vm631_vm1, %v25591_v53  ;;  %v6507_v53 = vld [vmem:[%s24845_s24 + $0x62] sm:$0xff] }
 0x1f3   : > { %20728 = vmatmul.mubr.msk.f32.gmra.mrb[72].mxu1 %vm631_vm1, %v25630_v57 }
 0x1f4   : > { %20730 = vmatprep.mubr.msk.f32.mxu1 %vm631_vm1, %v25633_v58 }
 0x1f5   : > { %21444 = vmatmul.mubr.msk.f32.gmra.mrb[64].mxu0 %vm631_vm1, %v25602_v47  ;;  %v6508_v47 = vld [vmem:[%s24845_s24 + $0x6a] sm:$0xff] }
 0x1f6   : > { %21446 = vmatprep.mubr.msk.f32.mxu0 %vm631_vm1, %v25605_v54  ;;  %v6509_v54 = vld [vmem:[%s24845_s24 + $0x72] sm:$0xff] }
 0x1f7   : > { %20731 = vmatmul.mubr.msk.f32.gmra.mrb[74].mxu1 %vm631_vm1, %v25644_v59 }
 0x1f8   : > { %20733 = vmatprep.mubr.msk.f32.mxu1 %vm631_vm1, %v25647_v60 }
 0x1f9   : > { %21447 = vmatmul.mubr.msk.f32.gmra.mrb[66].mxu0 %vm631_vm1, %v25616_v55  ;;  %v6510_v55 = vld [vmem:[%s24845_s24 + $0x7a] sm:$0xff] }
 0x1fa   : > { %21449 = vmatprep.mubr.msk.f32.mxu0 %vm631_vm1, %v25619_v56  ;;  %v6511_v56 = vld [vmem:[%s24845_s24 + $0x82] sm:$0xff] }
 0x1fb   : > { %20734 = vmatmul.mubr.msk.f32.gmra.mrb[76].mxu1 %vm631_vm1, %v25658_v61 }
 0x1fc   : > { %20736 = vmatprep.mubr.msk.f32.mxu1 %vm631_vm1, %v25661_v62 }
 0x1fd   : > { %21450 = vmatmul.mubr.msk.f32.gmra.mrb[68].mxu0 %vm631_vm1, %v25630_v57  ;;  %v6512_v57 = vld [vmem:[%s24845_s24 + $0x8a] sm:$0xff] }
 0x1fe   : > { %21452 = vmatprep.mubr.msk.f32.mxu0 %vm631_vm1, %v25633_v58  ;;  %v6513_v58 = vld [vmem:[%s24845_s24 + $0x92] sm:$0xff] }
 0x1ff   : > { %20737 = vmatmul.mubr.msk.f32.gmra.mrb[78].mxu1 %vm631_vm1, %v25672_v63 }
 0x200   : > { %20739 = vmatprep.mubr.msk.f32.mxu1 %vm631_vm1, %v25675_v0 }
 0x201   : > { %21453 = vmatmul.mubr.msk.f32.gmra.mrb[70].mxu0 %vm631_vm1, %v25644_v59  ;;  %v6514_v59 = vld [vmem:[%s24845_s24 + $0x9a] sm:$0xff] }
 0x202   : > { %21455 = vmatprep.mubr.msk.f32.mxu0 %vm631_vm1, %v25647_v60  ;;  %v6515_v60 = vld [vmem:[%s24845_s24 + $0xa2] sm:$0xff] }
 0x203   : > { %20740 = vmatmul.mubr.msk.f32.gmra.mrb[80].mxu1 %vm631_vm1, %v25686_v1 }
 0x204   : > { %20742 = vmatprep.mubr.msk.f32.mxu1 %vm631_vm1, %v25689_v2 }
 0x205   : > { %21456 = vmatmul.mubr.msk.f32.gmra.mrb[72].mxu0 %vm631_vm1, %v25658_v61  ;;  %v6516_v61 = vld [vmem:[%s24845_s24 + $0xaa] sm:$0xff] }
 0x206   : > { %21458 = vmatprep.mubr.msk.f32.mxu0 %vm631_vm1, %v25661_v62  ;;  %v6517_v62 = vld [vmem:[%s24845_s24 + $0xb2] sm:$0xff] }
 0x207   : > { %20743 = vmatmul.mubr.msk.f32.gmra.mrb[82].mxu1 %vm631_vm1, %v25700_v3 }
 0x208   : > { %20745 = vmatprep.mubr.msk.f32.mxu1 %vm631_vm1, %v25703_v4 }
 0x209   : > { %21459 = vmatmul.mubr.msk.f32.gmra.mrb[74].mxu0 %vm631_vm1, %v25672_v63  ;;  %v6518_v63 = vld [vmem:[%s24845_s24 + $0xba] sm:$0xff] }
 0x20a   : > { %21461 = vmatprep.mubr.msk.f32.mxu0 %vm631_vm1, %v25675_v0  ;;  %v6519_v0 = vld [vmem:[%s24845_s24 + $0xc2] sm:$0xff] }
 0x20b   : > { %20746 = vmatmul.mubr.msk.f32.gmra.mrb[84].mxu1 %vm631_vm1, %v25714_v5 }
 0x20c   : > { %20748 = vmatprep.mubr.msk.f32.mxu1 %vm631_vm1, %v25717_v6 }
 0x20d   : > { %21462 = vmatmul.mubr.msk.f32.gmra.mrb[76].mxu0 %vm631_vm1, %v25686_v1  ;;  %v6520_v1 = vld [vmem:[%s24845_s24 + $0xca] sm:$0xff] }
 0x20e   : > { %21464 = vmatprep.mubr.msk.f32.mxu0 %vm631_vm1, %v25689_v2  ;;  %v6521_v2 = vld [vmem:[%s24845_s24 + $0xd2] sm:$0xff] }
 0x20f   : > { %20749 = vmatmul.mubr.msk.f32.gmra.mrb[86].mxu1 %vm631_vm1, %v25728_v7 }
 0x210   : > { %20751 = vmatprep.mubr.msk.f32.mxu1 %vm631_vm1, %v25731_v8 }
 0x211   : > { %21465 = vmatmul.mubr.msk.f32.gmra.mrb[78].mxu0 %vm631_vm1, %v25700_v3  ;;  %v6522_v3 = vld [vmem:[%s24845_s24 + $0xda] sm:$0xff] }
 0x212   : > { %21467 = vmatprep.mubr.msk.f32.mxu0 %vm631_vm1, %v25703_v4  ;;  %v6523_v4 = vld [vmem:[%s24845_s24 + $0xe2] sm:$0xff] }
 0x213   : > { %20752 = vmatmul.mubr.msk.f32.gmra.mrb[88].mxu1 %vm631_vm1, %v25742_v9 }
 0x214   : > { %20754 = vmatprep.mubr.msk.f32.mxu1 %vm631_vm1, %v25745_v10 }
 0x215   : > { %21468 = vmatmul.mubr.msk.f32.gmra.mrb[80].mxu0 %vm631_vm1, %v25714_v5  ;;  %v6524_v5 = vld [vmem:[%s24845_s24 + $0xea] sm:$0xff] }
 0x216   : > { %21470 = vmatprep.mubr.msk.f32.mxu0 %vm631_vm1, %v25717_v6  ;;  %v6525_v6 = vld [vmem:[%s24845_s24 + $0xf2] sm:$0xff] }
 0x217   : > { %20755 = vmatmul.mubr.msk.f32.gmra.mrb[90].mxu1 %vm631_vm1, %v25756_v11 }
 0x218   : > { %20757 = vmatprep.mubr.msk.f32.mxu1 %vm631_vm1, %v25759_v12 }
 0x219   : > { %21471 = vmatmul.mubr.msk.f32.gmra.mrb[82].mxu0 %vm631_vm1, %v25728_v7  ;;  %v6526_v7 = vld [vmem:[%s24845_s24 + $0xfa] sm:$0xff] }
 0x21a   : > { %21473 = vmatprep.mubr.msk.f32.mxu0 %vm631_vm1, %v25731_v8  ;;  %v6527_v8 = vld [vmem:[%s24845_s24 + $0x102] sm:$0xff] }
 0x21b   : > { %20758 = vmatmul.mubr.msk.f32.gmra.mrb[92].mxu1 %vm631_vm1, %v25770_v13 }
 0x21c   : > { %20760 = vmatprep.mubr.msk.f32.mxu1 %vm631_vm1, %v25773_v14 }
 0x21d   : > { %21474 = vmatmul.mubr.msk.f32.gmra.mrb[84].mxu0 %vm631_vm1, %v25742_v9  ;;  %v6528_v9 = vld [vmem:[%s24845_s24 + $0x10a] sm:$0xff] }
 0x21e   : > { %21476 = vmatprep.mubr.msk.f32.mxu0 %vm631_vm1, %v25745_v10  ;;  %v6529_v10 = vld [vmem:[%s24845_s24 + $0x112] sm:$0xff] }
 0x21f   : > { %20761 = vmatmul.mubr.msk.f32.gmra.mrb[94].mxu1 %vm631_vm1, %v25784_v15 }
 0x220   : > { %20763 = vmatprep.mubr.msk.f32.mxu1 %vm631_vm1, %v25787_v16 }
 0x221   : > { %21477 = vmatmul.mubr.msk.f32.gmra.mrb[86].mxu0 %vm631_vm1, %v25756_v11  ;;  %v6530_v11 = vld [vmem:[%s24845_s24 + $0x11a] sm:$0xff] }
 0x222   : > { %21479 = vmatprep.mubr.msk.f32.mxu0 %vm631_vm1, %v25759_v12  ;;  %v6531_v12 = vld [vmem:[%s24845_s24 + $0x122] sm:$0xff] }
 0x223   : > { %20764 = vmatmul.mubr.msk.f32.gmra.mrb[96].mxu1 %vm631_vm1, %v25798_v17 }
 0x224   : > { %20766 = vmatprep.mubr.msk.f32.mxu1 %vm631_vm1, %v25801_v18 }
 0x225   : > { %21480 = vmatmul.mubr.msk.f32.gmra.mrb[88].mxu0 %vm631_vm1, %v25770_v13  ;;  %v6532_v13 = vld [vmem:[%s24845_s24 + $0x12a] sm:$0xff] }
 0x226   : > { %21482 = vmatprep.mubr.msk.f32.mxu0 %vm631_vm1, %v25773_v14  ;;  %v6533_v14 = vld [vmem:[%s24845_s24 + $0x132] sm:$0xff] }
 0x227   : > { %20767 = vmatmul.mubr.msk.f32.gmra.mrb[98].mxu1 %vm631_vm1, %v25812_v19 }
 0x228   : > { %20769 = vmatprep.mubr.msk.f32.mxu1 %vm631_vm1, %v25815_v20 }
 0x229   : > { %21483 = vmatmul.mubr.msk.f32.gmra.mrb[90].mxu0 %vm631_vm1, %v25784_v15  ;;  %v6534_v15 = vld [vmem:[%s24845_s24 + $0x13a] sm:$0xff] }
 0x22a   : > { %21485 = vmatprep.mubr.msk.f32.mxu0 %vm631_vm1, %v25787_v16  ;;  %v6535_v16 = vld [vmem:[%s24845_s24 + $0x142] sm:$0xff] }
 0x22b   : > { %20770 = vmatmul.mubr.msk.f32.gmra.mrb[100].mxu1 %vm631_vm1, %v25826_v21 }
 0x22c   : > { %20772 = vmatprep.mubr.msk.f32.mxu1 %vm631_vm1, %v25829_v22 }
 0x22d   : > { %21486 = vmatmul.mubr.msk.f32.gmra.mrb[92].mxu0 %vm631_vm1, %v25798_v17  ;;  %v508_v17 = vld [vmem:[%s30454_s1] sm:$0x7] }
 0x22e   : > { %21488 = vmatprep.mubr.msk.f32.mxu0 %vm631_vm1, %v25801_v18  ;;  %v388_v18 = vld [vmem:[%s24845_s24] sm:$0xff]  ;;  %20799 = vmatprep.subr.msk.mxu1 %vm992_vm0, %v508_v17 }
 0x22f   : > { %20773 = vmatmul.mubr.msk.f32.gmra.mrb[102].mxu1 %vm631_vm1, %v25840_v23 }
 0x230   : > { %20775 = vmatprep.mubr.msk.f32.mxu1 %vm631_vm1, %v25843_v24  ;;  %20800 = vmatpush3.msk.msra.mxu1 %vm992_vm0, %v508_v17  ;;  %v26328_v17 = vld [vmem:[%s24845_s24 + $0xf8] sm:$0xff] }
 0x231   : > { %21489 = vmatmul.mubr.msk.f32.gmra.mrb[94].mxu0 %vm631_vm1, %v25812_v19  ;;  %v389_v19 = vld [vmem:[%s24845_s24 + $0x8] sm:$0xff] }
 0x232   : > { %21491 = vmatprep.mubr.msk.f32.mxu0 %vm631_vm1, %v25815_v20  ;;  %v6536_v20 = vld [vmem:[%s24845_s24 + $0x14a] sm:$0xff] }
 0x233   : > { %20776 = vmatmul.mubr.msk.f32.gmra.mrb[104].mxu1 %vm631_vm1, %v25854_v25 }
 0x234   : > { %20778 = vmatprep.mubr.msk.f32.mxu1 %vm631_vm1, %v25857_v26 }
 0x235   : > { %21492 = vmatmul.mubr.msk.f32.gmra.mrb[96].mxu0 %vm631_vm1, %v25826_v21  ;;  %v6537_v21 = vld [vmem:[%s24845_s24 + $0x152] sm:$0xff] }
 0x236   : > { %21494 = vmatprep.mubr.msk.f32.mxu0 %vm631_vm1, %v25829_v22  ;;  %v24640_v22 = vld [vmem:[%s30454_s1 + $0x8] sm:$0x7] }
 0x237   : > { %20779 = vmatmul.mubr.msk.f32.gmra.mrb[106].mxu1 %vm631_vm1, %v25868_v27  ;;  %23412 = vmatprep.subr.msk.mxu1 %vm992_vm0, %v24640_v22 }
 0x238   : > { %20781 = vmatprep.mubr.msk.f32.mxu1 %vm631_vm1, %v25871_v28 }
 0x239   : > { %21495 = vmatmul.mubr.msk.f32.gmra.mrb[98].mxu0 %vm631_vm1, %v25840_v23  ;;  %v390_v23 = vld [vmem:[%s24845_s24 + $0x10] sm:$0xff] }
 0x23a   : > { %21497 = vmatprep.mubr.msk.f32.mxu0 %vm631_vm1, %v25843_v24  ;;  %v391_v24 = vld [vmem:[%s24845_s24 + $0x18] sm:$0xff] }
 0x23b   : > { %20782 = vmatmul.mubr.msk.f32.gmra.mrb[108].mxu1 %vm631_vm1, %v25882_v29 }
 0x23c   : > { %20784 = vmatprep.mubr.msk.f32.mxu1 %vm631_vm1, %v25885_v30 }
 0x23d   : > { %21498 = vmatmul.mubr.msk.f32.gmra.mrb[100].mxu0 %vm631_vm1, %v25854_v25  ;;  %v6538_v25 = vld [vmem:[%s24845_s24 + $0x15a] sm:$0xff] }
 0x23e   : > { %21500 = vmatprep.mubr.msk.f32.mxu0 %vm631_vm1, %v25857_v26  ;;  %v6539_v26 = vld [vmem:[%s24845_s24 + $0x162] sm:$0xff] }
 0x23f   : > { %20785 = vmatmul.mubr.msk.f32.gmra.mrb[110].mxu1 %vm631_vm1, %v25896_v31 }
 0x240   : > { %20787 = vmatprep.mubr.msk.f32.mxu1 %vm631_vm1, %v25899_v32 }
 0x241   : > { %21501 = vmatmul.mubr.msk.f32.gmra.mrb[102].mxu0 %vm631_vm1, %v25868_v27  ;;  %v392_v27 = vld [vmem:[%s24845_s24 + $0x20] sm:$0xff] }
 0x242   : > { %21503 = vmatprep.mubr.msk.f32.mxu0 %vm631_vm1, %v25871_v28  ;;  %v393_v28 = vld [vmem:[%s24845_s24 + $0x28] sm:$0xff] }
 0x243   : > { %20788 = vmatmul.mubr.msk.f32.gmra.mrb[112].mxu1 %vm631_vm1, %v25910_v33 }
 0x244   : > { %20790 = vmatprep.mubr.msk.f32.mxu1 %vm631_vm1, %v25913_v34 }
 0x245   : > { %21504 = vmatmul.mubr.msk.f32.gmra.mrb[104].mxu0 %vm631_vm1, %v25882_v29  ;;  %v6540_v29 = vld [vmem:[%s24845_s24 + $0x16a] sm:$0xff] }
 0x246   : > { %21506 = vmatprep.mubr.msk.f32.mxu0 %vm631_vm1, %v25885_v30  ;;  %v6541_v30 = vld [vmem:[%s24845_s24 + $0x172] sm:$0xff] }
 0x247   : > { %20791 = vmatmul.mubr.msk.f32.gmra.mrb[114].mxu1 %vm631_vm1, %v25924_v35 }
 0x248   : > { %20793 = vmatprep.mubr.msk.f32.mxu1 %vm631_vm1, %v25927_v36 }
 0x249   : > { %21507 = vmatmul.mubr.msk.f32.gmra.mrb[106].mxu0 %vm631_vm1, %v25896_v31  ;;  %v394_v31 = vld [vmem:[%s24845_s24 + $0x30] sm:$0xff] }
 0x24a   : > { %21509 = vmatprep.mubr.msk.f32.mxu0 %vm631_vm1, %v25899_v32  ;;  %v395_v32 = vld [vmem:[%s24845_s24 + $0x38] sm:$0xff] }
 0x24b   : > { %20794 = vmatmul.mubr.msk.f32.gmra.mrb[116].mxu1 %vm631_vm1, %v25938_v37 }
 0x24c   : > { %20796 = vmatprep.mubr.msk.f32.mxu1 %vm631_vm1, %v25941_v38 }
 0x24d   : > { %21510 = vmatmul.mubr.msk.f32.gmra.mrb[108].mxu0 %vm631_vm1, %v25910_v33  ;;  %v6542_v33 = vld [vmem:[%s24845_s24 + $0x17a] sm:$0xff] }
 0x24e   : > { %21512 = vmatprep.mubr.msk.f32.mxu0 %vm631_vm1, %v25913_v34  ;;  %v6543_v34 = vld [vmem:[%s24845_s24 + $0x182] sm:$0xff] }
 0x24f   : > { %20797 = vmatmul.mubr.msk.f32.gmra.mrb[118].mxu1 %vm631_vm1, %v25952_v39 }
 0x250   : > { %20801 = vmatprep.mubr.msk.f32.mxu1 %vm631_vm1, %v388_v18  ;;  %v6566_v18 = vld [vmem:[%s24845_s24 + $0x23a] sm:$0xff] }
 0x251   : > { %21513 = vmatmul.mubr.msk.f32.gmra.mrb[110].mxu0 %vm631_vm1, %v25924_v35  ;;  %v26164_v35 = vld [vmem:[%s24845_s24 + $0x40] sm:$0xff] }
 0x252   : > { %21515 = vmatprep.mubr.msk.f32.mxu0 %vm631_vm1, %v25927_v36  ;;  %v26167_v36 = vld [vmem:[%s24845_s24 + $0x48] sm:$0xff] }
 0x253   : > { %20802 = vmatmul.mubr.msk.f32.vlgmr.msra.gmra.mrb[0].mxu1 %vm631_vm1, %v389_v19  ;;  %v6567_v19 = vld [vmem:[%s24845_s24 + $0x242] sm:$0xff] }
 0x254   : > { %23413 = vmatpush3.msk.msra.mxu1 %vm992_vm0, %v24640_v22  ;;  %20804 = vmatprep.mubr.msk.f32.mxu1 %vm631_vm1, %v390_v23  ;;  %v6568_v22 = vld [vmem:[%s24845_s24 + $0x24a] sm:$0xff]  ;;  %v6569_v23 = vld [vmem:[%s24845_s24 + $0x252] sm:$0xff] }
 0x255   : > { %21516 = vmatmul.mubr.msk.f32.gmra.mrb[112].mxu0 %vm631_vm1, %v25938_v37  ;;  %v6544_v37 = vld [vmem:[%s24845_s24 + $0x18a] sm:$0xff] }
 0x256   : > { %21518 = vmatprep.mubr.msk.f32.mxu0 %vm631_vm1, %v25941_v38  ;;  %v6545_v38 = vld [vmem:[%s24845_s24 + $0x192] sm:$0xff] }
 0x257   : > { %20805 = vmatmul.mubr.msk.f32.gmra.mrb[2].mxu1 %vm631_vm1, %v391_v24  ;;  %v26353_v24 = vld [vmem:[%s24845_s24 + $0x110] sm:$0xff] }
 0x258   : > { %20807 = vmatprep.mubr.msk.f32.mxu1 %vm631_vm1, %v392_v27  ;;  %v6571_v27 = vld [vmem:[%s24845_s24 + $0x262] sm:$0xff] }
 0x259   : > { %21519 = vmatmul.mubr.msk.f32.gmra.mrb[114].mxu0 %vm631_vm1, %v25952_v39  ;;  %v26178_v39 = vld [vmem:[%s24845_s24 + $0x50] sm:$0xff] }
 0x25a   : > { %21521 = vmatprep.mubr.msk.f32.mxu0 %vm631_vm1, %v5345_v40  ;;  %v26181_v40 = vld [vmem:[%s24845_s24 + $0x58] sm:$0xff] }
 0x25b   : > { %20808 = vmatmul.mubr.msk.f32.gmra.mrb[4].mxu1 %vm631_vm1, %v393_v28  ;;  %v26367_v28 = vld [vmem:[%s24845_s24 + $0x120] sm:$0xff] }
 0x25c   : > { %20810 = vmatprep.mubr.msk.f32.mxu1 %vm631_vm1, %v394_v31  ;;  %v6573_v31 = vld [vmem:[%s24845_s24 + $0x272] sm:$0xff] }
 0x25d   : > { %21522 = vmatmul.mubr.msk.f32.gmra.mrb[116].mxu0 %vm631_vm1, %v5346_v41  ;;  %v6546_v41 = vld [vmem:[%s24845_s24 + $0x19a] sm:$0xff] }
 0x25e   : > { %21524 = vmatprep.mubr.msk.f32.mxu0 %vm631_vm1, %v5347_v42  ;;  %v6547_v42 = vld [vmem:[%s24845_s24 + $0x1a2] sm:$0xff] }
 0x25f   : > { %20811 = vmatmul.mubr.msk.f32.gmra.mrb[6].mxu1 %vm631_vm1, %v395_v32  ;;  %v26381_v32 = vld [vmem:[%s24845_s24 + $0x130] sm:$0xff] }
 0x260   : > { %20813 = vmatprep.mubr.msk.f32.mxu1 %vm631_vm1, %v26164_v35 }
 0x261   : > { %21525 = vmatmul.mubr.msk.f32.gmra.mrb[118].mxu0 %vm631_vm1, %v5348_v43  ;;  %v26192_v43 = vld [vmem:[%s24845_s24 + $0x60] sm:$0xff] }
 0x262   : > { %21529 = vmatprep.mubr.msk.f32.mxu0 %vm631_vm1, %v6499_v44  ;;  %v26195_v44 = vld [vmem:[%s24845_s24 + $0x68] sm:$0xff] }
 0x263   : > { %20814 = vmatmul.mubr.msk.f32.gmra.mrb[8].mxu1 %vm631_vm1, %v26167_v36 }
 0x264   : > { %20816 = vmatprep.mubr.msk.f32.mxu1 %vm631_vm1, %v26178_v39 }
 0x265   : > { %21530 = vmatmul.mubr.msk.f32.vlgmr.msra.gmra.mrb[0].mxu0 %vm631_vm1, %v6500_v46  ;;  %v6548_v46 = vld [vmem:[%s24845_s24 + $0x1aa] sm:$0xff] }
 0x266   : > { %21710 = vmatpush3.msk.msra.mxu0 %vm992_vm0, %v25544_v45  ;;  %21532 = vmatprep.mubr.msk.f32.mxu0 %vm631_vm1, %v6501_v48  ;;  %v6506_v45 = vld [vmem:[%s24845_s24 + $0x5a] sm:$0xff]  ;;  %v6549_v48 = vld [vmem:[%s24845_s24 + $0x1b2] sm:$0xff] }
 0x267   : > { %20817 = vmatmul.mubr.msk.f32.gmra.mrb[10].mxu1 %vm631_vm1, %v26181_v40 }
 0x268   : > { %20819 = vmatprep.mubr.msk.f32.mxu1 %vm631_vm1, %v26192_v43 }
 0x269   : > { %21533 = vmatmul.mubr.msk.f32.gmra.mrb[2].mxu0 %vm631_vm1, %v6502_v49  ;;  %v26206_v49 = vld [vmem:[%s24845_s24 + $0x70] sm:$0xff] }
 0x26a   : > { %21535 = vmatprep.mubr.msk.f32.mxu0 %vm631_vm1, %v6503_v50  ;;  %v26209_v50 = vld [vmem:[%s24845_s24 + $0x78] sm:$0xff] }
 0x26b   : > { %20820 = vmatmul.mubr.msk.f32.gmra.mrb[12].mxu1 %vm631_vm1, %v26195_v44 }
 0x26c   : > { %20822 = vmatprep.mubr.msk.f32.mxu1 %vm631_vm1, %v26206_v49 }
 0x26d   : > { %21536 = vmatmul.mubr.msk.f32.gmra.mrb[4].mxu0 %vm631_vm1, %v6504_v51  ;;  %v6550_v51 = vld [vmem:[%s24845_s24 + $0x1ba] sm:$0xff] }
 0x26e   : > { %21538 = vmatprep.mubr.msk.f32.mxu0 %vm631_vm1, %v6505_v52  ;;  %v6551_v52 = vld [vmem:[%s24845_s24 + $0x1c2] sm:$0xff] }
 0x26f   : > { %20823 = vmatmul.mubr.msk.f32.gmra.mrb[14].mxu1 %vm631_vm1, %v26209_v50 }
 0x271   : > { %21539 = vmatmul.mubr.msk.f32.gmra.mrb[6].mxu0 %vm631_vm1, %v6506_v45  ;;  %v26220_v45 = vld [vmem:[%s24845_s24 + $0x80] sm:$0xff] }
 0x272   : > { %21541 = vmatprep.mubr.msk.f32.mxu0 %vm631_vm1, %v6507_v53  ;;  %v26223_v53 = vld [vmem:[%s24845_s24 + $0x88] sm:$0xff]  ;;  %20825 = vmatprep.mubr.msk.f32.mxu1 %vm631_vm1, %v26220_v45 }
 0x273   : > { %20826 = vmatmul.mubr.msk.f32.gmra.mrb[16].mxu1 %vm631_vm1, %v26223_v53 }
 0x275   : > { %21542 = vmatmul.mubr.msk.f32.gmra.mrb[8].mxu0 %vm631_vm1, %v6508_v47  ;;  %v6552_v47 = vld [vmem:[%s24845_s24 + $0x1ca] sm:$0xff] }
 0x276   : > { %21544 = vmatprep.mubr.msk.f32.mxu0 %vm631_vm1, %v6509_v54  ;;  %v6553_v54 = vld [vmem:[%s24845_s24 + $0x1d2] sm:$0xff] }
 0x279   : > { %21545 = vmatmul.mubr.msk.f32.gmra.mrb[10].mxu0 %vm631_vm1, %v6510_v55  ;;  %v26234_v55 = vld [vmem:[%s24845_s24 + $0x90] sm:$0xff] }
 0x27a   : > { %21547 = vmatprep.mubr.msk.f32.mxu0 %vm631_vm1, %v6511_v56  ;;  %v26237_v56 = vld [vmem:[%s24845_s24 + $0x98] sm:$0xff]  ;;  %20828 = vmatprep.mubr.msk.f32.mxu1 %vm631_vm1, %v26234_v55 }
 0x27b   : > { %20829 = vmatmul.mubr.msk.f32.gmra.mrb[18].mxu1 %vm631_vm1, %v26237_v56 }
 0x27d   : > { %21548 = vmatmul.mubr.msk.f32.gmra.mrb[12].mxu0 %vm631_vm1, %v6512_v57  ;;  %v6554_v57 = vld [vmem:[%s24845_s24 + $0x1da] sm:$0xff] }
 0x27e   : > { %21550 = vmatprep.mubr.msk.f32.mxu0 %vm631_vm1, %v6513_v58  ;;  %v6555_v58 = vld [vmem:[%s24845_s24 + $0x1e2] sm:$0xff] }
 0x281   : > { %21551 = vmatmul.mubr.msk.f32.gmra.mrb[14].mxu0 %vm631_vm1, %v6514_v59  ;;  %v26248_v59 = vld [vmem:[%s24845_s24 + $0xa0] sm:$0xff] }
 0x282   : > { %21553 = vmatprep.mubr.msk.f32.mxu0 %vm631_vm1, %v6515_v60  ;;  %v26251_v60 = vld [vmem:[%s24845_s24 + $0xa8] sm:$0xff]  ;;  %20831 = vmatprep.mubr.msk.f32.mxu1 %vm631_vm1, %v26248_v59 }
 0x283   : > { %20832 = vmatmul.mubr.msk.f32.gmra.mrb[20].mxu1 %vm631_vm1, %v26251_v60 }
 0x285   : > { %21554 = vmatmul.mubr.msk.f32.gmra.mrb[16].mxu0 %vm631_vm1, %v6516_v61  ;;  %v6556_v61 = vld [vmem:[%s24845_s24 + $0x1ea] sm:$0xff] }
 0x286   : > { %21556 = vmatprep.mubr.msk.f32.mxu0 %vm631_vm1, %v6517_v62  ;;  %v26260_v62 = vld [vmem:[%s30454_s1 + $0x1c] sm:$0x7] }
 0x287   : > { %21891 = vmatprep.subr.msk.mxu0 %vm992_vm0, %v26260_v62 }
 0x289   : > { %21557 = vmatmul.mubr.msk.f32.gmra.mrb[18].mxu0 %vm631_vm1, %v6518_v63  ;;  %v6557_v63 = vld [vmem:[%s24845_s24 + $0x1f2] sm:$0xff] }
 0x28a   : > { %21559 = vmatprep.mubr.msk.f32.mxu0 %vm631_vm1, %v6519_v0  ;;  %v6558_v0 = vld [vmem:[%s24845_s24 + $0x1fa] sm:$0xff] }
 0x28d   : > { %21560 = vmatmul.mubr.msk.f32.gmra.mrb[20].mxu0 %vm631_vm1, %v6520_v1  ;;  %v26271_v1 = vld [vmem:[%s24845_s24 + $0xb0] sm:$0xff] }
 0x28e   : > { %21562 = vmatprep.mubr.msk.f32.mxu0 %vm631_vm1, %v6521_v2  ;;  %v26274_v2 = vld [vmem:[%s24845_s24 + $0xb8] sm:$0xff]  ;;  %20834 = vmatprep.mubr.msk.f32.mxu1 %vm631_vm1, %v26271_v1 }
 0x28f   : > { %20835 = vmatmul.mubr.msk.f32.gmra.mrb[22].mxu1 %vm631_vm1, %v26274_v2 }
 0x291   : > { %21563 = vmatmul.mubr.msk.f32.gmra.mrb[22].mxu0 %vm631_vm1, %v6522_v3  ;;  %v6559_v3 = vld [vmem:[%s24845_s24 + $0x202] sm:$0xff] }
 0x292   : > { %21565 = vmatprep.mubr.msk.f32.mxu0 %vm631_vm1, %v6523_v4  ;;  %v26283_v4 = vld [vmem:[%s24845_s24 + $0xc0] sm:$0xff] }
 0x293   : > { %20837 = vmatprep.mubr.msk.f32.mxu1 %vm631_vm1, %v26283_v4 }
 0x295   : > { %21566 = vmatmul.mubr.msk.f32.gmra.mrb[24].mxu0 %vm631_vm1, %v6524_v5  ;;  %v26286_v5 = vld [vmem:[%s24845_s24 + $0xc8] sm:$0xff] }
 0x296   : > { %21568 = vmatprep.mubr.msk.f32.mxu0 %vm631_vm1, %v6525_v6  ;;  %v6560_v6 = vld [vmem:[%s24845_s24 + $0x20a] sm:$0xff]  ;;  %20838 = vmatmul.mubr.msk.f32.gmra.mrb[24].mxu1 %vm631_vm1, %v26286_v5 }
 0x299   : > { %21569 = vmatmul.mubr.msk.f32.gmra.mrb[26].mxu0 %vm631_vm1, %v6526_v7  ;;  %v6561_v7 = vld [vmem:[%s24845_s24 + $0x212] sm:$0xff] }
 0x29a   : > { %21571 = vmatprep.mubr.msk.f32.mxu0 %vm631_vm1, %v6527_v8  ;;  %v26297_v8 = vld [vmem:[%s24845_s24 + $0xd0] sm:$0xff] }
 0x29b   : > { %20840 = vmatprep.mubr.msk.f32.mxu1 %vm631_vm1, %v26297_v8 }
 0x29d   : > { %21572 = vmatmul.mubr.msk.f32.gmra.mrb[28].mxu0 %vm631_vm1, %v6528_v9  ;;  %v26300_v9 = vld [vmem:[%s24845_s24 + $0xd8] sm:$0xff] }
 0x29e   : > { %21574 = vmatprep.mubr.msk.f32.mxu0 %vm631_vm1, %v6529_v10  ;;  %v6562_v10 = vld [vmem:[%s24845_s24 + $0x21a] sm:$0xff]  ;;  %20841 = vmatmul.mubr.msk.f32.gmra.mrb[26].mxu1 %vm631_vm1, %v26300_v9 }
 0x2a1   : > { %21575 = vmatmul.mubr.msk.f32.gmra.mrb[30].mxu0 %vm631_vm1, %v6530_v11  ;;  %v6563_v11 = vld [vmem:[%s24845_s24 + $0x222] sm:$0xff] }
 0x2a2   : > { %21577 = vmatprep.mubr.msk.f32.mxu0 %vm631_vm1, %v6531_v12  ;;  %v26311_v12 = vld [vmem:[%s24845_s24 + $0xe0] sm:$0xff] }
 0x2a3   : > { %20843 = vmatprep.mubr.msk.f32.mxu1 %vm631_vm1, %v26311_v12 }
 0x2a5   : > { %21578 = vmatmul.mubr.msk.f32.gmra.mrb[32].mxu0 %vm631_vm1, %v6532_v13  ;;  %v26314_v13 = vld [vmem:[%s24845_s24 + $0xe8] sm:$0xff] }
 0x2a6   : > { %21580 = vmatprep.mubr.msk.f32.mxu0 %vm631_vm1, %v6533_v14  ;;  %v6564_v14 = vld [vmem:[%s24845_s24 + $0x22a] sm:$0xff]  ;;  %20844 = vmatmul.mubr.msk.f32.gmra.mrb[28].mxu1 %vm631_vm1, %v26314_v13 }
 0x2a9   : > { %21581 = vmatmul.mubr.msk.f32.gmra.mrb[34].mxu0 %vm631_vm1, %v6534_v15  ;;  %v6565_v15 = vld [vmem:[%s24845_s24 + $0x232] sm:$0xff] }
 0x2aa   : > { %21583 = vmatprep.mubr.msk.f32.mxu0 %vm631_vm1, %v6535_v16  ;;  %v26325_v16 = vld [vmem:[%s24845_s24 + $0xf0] sm:$0xff] }
 0x2ab   : > { %20846 = vmatprep.mubr.msk.f32.mxu1 %vm631_vm1, %v26325_v16 }
 0x2ac   : > { %20847 = vmatmul.mubr.msk.f32.gmra.mrb[30].mxu1 %vm631_vm1, %v26328_v17 }
 0x2ad   : > { %21584 = vmatmul.mubr.msk.f32.gmra.mrb[36].mxu0 %vm631_vm1, %v6536_v20  ;;  %v26339_v20 = vld [vmem:[%s24845_s24 + $0x100] sm:$0xff] }
 0x2ae   : > { %21586 = vmatprep.mubr.msk.f32.mxu0 %vm631_vm1, %v6537_v21  ;;  %v26342_v21 = vld [vmem:[%s24845_s24 + $0x108] sm:$0xff]  ;;  %20849 = vmatprep.mubr.msk.f32.mxu1 %vm631_vm1, %v26339_v20 }
 0x2b0   : > { %20850 = vmatmul.mubr.msk.f32.gmra.mrb[32].mxu1 %vm631_vm1, %v26342_v21 }
 0x2b1   : > { %21587 = vmatmul.mubr.msk.f32.gmra.mrb[38].mxu0 %vm631_vm1, %v6538_v25  ;;  %v26356_v25 = vld [vmem:[%s24845_s24 + $0x118] sm:$0xff]  ;;  %20852 = vmatprep.mubr.msk.f32.mxu1 %vm631_vm1, %v26353_v24 }
 0x2b2   : > { %21589 = vmatprep.mubr.msk.f32.mxu0 %vm631_vm1, %v6539_v26  ;;  %v6570_v26 = vld [vmem:[%s24845_s24 + $0x25a] sm:$0xff] }
 0x2b4   : > { %20853 = vmatmul.mubr.msk.f32.gmra.mrb[34].mxu1 %vm631_vm1, %v26356_v25 }
 0x2b5   : > { %21590 = vmatmul.mubr.msk.f32.gmra.mrb[40].mxu0 %vm631_vm1, %v6540_v29  ;;  %v26370_v29 = vld [vmem:[%s24845_s24 + $0x128] sm:$0xff]  ;;  %20855 = vmatprep.mubr.msk.f32.mxu1 %vm631_vm1, %v26367_v28 }
 0x2b6   : > { %21592 = vmatprep.mubr.msk.f32.mxu0 %vm631_vm1, %v6541_v30  ;;  %v6572_v30 = vld [vmem:[%s24845_s24 + $0x26a] sm:$0xff] }
 0x2b8   : > { %20856 = vmatmul.mubr.msk.f32.gmra.mrb[36].mxu1 %vm631_vm1, %v26370_v29 }
 0x2b9   : > { %21593 = vmatmul.mubr.msk.f32.gmra.mrb[42].mxu0 %vm631_vm1, %v6542_v33  ;;  %v26384_v33 = vld [vmem:[%s24845_s24 + $0x138] sm:$0xff]  ;;  %20858 = vmatprep.mubr.msk.f32.mxu1 %vm631_vm1, %v26381_v32 }
 0x2ba   : > { %21595 = vmatprep.mubr.msk.f32.mxu0 %vm631_vm1, %v6543_v34  ;;  %v6574_v34 = vld [vmem:[%s24845_s24 + $0x27a] sm:$0xff] }
 0x2bc   : > { %20859 = vmatmul.mubr.msk.f32.gmra.mrb[38].mxu1 %vm631_vm1, %v26384_v33 }
 0x2bd   : > { %21596 = vmatmul.mubr.msk.f32.gmra.mrb[44].mxu0 %vm631_vm1, %v6544_v37  ;;  %v6575_v37 = vld [vmem:[%s24845_s24 + $0x282] sm:$0xff] }
 0x2be   : > { %21598 = vmatprep.mubr.msk.f32.mxu0 %vm631_vm1, %v6545_v38  ;;  %v26395_v38 = vld [vmem:[%s24845_s24 + $0x140] sm:$0xff] }
 0x2bf   : > { %20861 = vmatprep.mubr.msk.f32.mxu1 %vm631_vm1, %v26395_v38 }
 0x2c1   : > { %21599 = vmatmul.mubr.msk.f32.gmra.mrb[46].mxu0 %vm631_vm1, %v6546_v41  ;;  %v26398_v41 = vld [vmem:[%s24845_s24 + $0x148] sm:$0xff] }
 0x2c2   : > { %21601 = vmatprep.mubr.msk.f32.mxu0 %vm631_vm1, %v6547_v42  ;;  %v6576_v42 = vld [vmem:[%s24845_s24 + $0x28a] sm:$0xff]  ;;  %20862 = vmatmul.mubr.msk.f32.gmra.mrb[40].mxu1 %vm631_vm1, %v26398_v41 }
 0x2c5   : > { %21602 = vmatmul.mubr.msk.f32.gmra.mrb[48].mxu0 %vm631_vm1, %v6548_v46  ;;  %v6577_v46 = vld [vmem:[%s24845_s24 + $0x292] sm:$0xff] }
 0x2c6   : > { %21604 = vmatprep.mubr.msk.f32.mxu0 %vm631_vm1, %v6549_v48  ;;  %v26409_v48 = vld [vmem:[%s24845_s24 + $0x150] sm:$0xff] }
 0x2c7   : > { %20864 = vmatprep.mubr.msk.f32.mxu1 %vm631_vm1, %v26409_v48 }
 0x2c9   : > { %21605 = vmatmul.mubr.msk.f32.gmra.mrb[50].mxu0 %vm631_vm1, %v6550_v51  ;;  %v26412_v51 = vld [vmem:[%s24845_s24 + $0x158] sm:$0xff] }
 0x2ca   : > { %21607 = vmatprep.mubr.msk.f32.mxu0 %vm631_vm1, %v6551_v52  ;;  %v6578_v52 = vld [vmem:[%s24845_s24 + $0x29a] sm:$0xff]  ;;  %20865 = vmatmul.mubr.msk.f32.gmra.mrb[42].mxu1 %vm631_vm1, %v26412_v51 }
 0x2cd   : > { %21608 = vmatmul.mubr.msk.f32.gmra.mrb[52].mxu0 %vm631_vm1, %v6552_v47  ;;  %v6579_v47 = vld [vmem:[%s24845_s24 + $0x2a2] sm:$0xff] }
 0x2ce   : > { %21610 = vmatprep.mubr.msk.f32.mxu0 %vm631_vm1, %v6553_v54  ;;  %v26423_v54 = vld [vmem:[%s24845_s24 + $0x160] sm:$0xff] }
 0x2cf   : > { %20867 = vmatprep.mubr.msk.f32.mxu1 %vm631_vm1, %v26423_v54 }
 0x2d1   : > { %21611 = vmatmul.mubr.msk.f32.gmra.mrb[54].mxu0 %vm631_vm1, %v6554_v57  ;;  %v26426_v57 = vld [vmem:[%s24845_s24 + $0x168] sm:$0xff] }
 0x2d2   : > { %21613 = vmatprep.mubr.msk.f32.mxu0 %vm631_vm1, %v6555_v58  ;;  %v6580_v58 = vld [vmem:[%s24845_s24 + $0x2aa] sm:$0xff]  ;;  %20868 = vmatmul.mubr.msk.f32.gmra.mrb[44].mxu1 %vm631_vm1, %v26426_v57 }
 0x2d5   : > { %21614 = vmatmul.mubr.msk.f32.gmra.mrb[56].mxu0 %vm631_vm1, %v6556_v61  ;;  %v6581_v61 = vld [vmem:[%s24845_s24 + $0x2b2] sm:$0xff] }
 0x2d6   : > { %21616 = vmatprep.mubr.msk.f32.mxu0 %vm631_vm1, %v6557_v63  ;;  %v26437_v63 = vld [vmem:[%s24845_s24 + $0x170] sm:$0xff] }
 0x2d7   : > { %20870 = vmatprep.mubr.msk.f32.mxu1 %vm631_vm1, %v26437_v63 }
 0x2d9   : > { %21617 = vmatmul.mubr.msk.f32.gmra.mrb[58].mxu0 %vm631_vm1, %v6558_v0  ;;  %v26440_v0 = vld [vmem:[%s24845_s24 + $0x178] sm:$0xff] }
 0x2da   : > { %21619 = vmatprep.mubr.msk.f32.mxu0 %vm631_vm1, %v6559_v3  ;;  %v6582_v3 = vld [vmem:[%s24845_s24 + $0x2ba] sm:$0xff]  ;;  %20871 = vmatmul.mubr.msk.f32.gmra.mrb[46].mxu1 %vm631_vm1, %v26440_v0 }
 0x2dd   : > { %21620 = vmatmul.mubr.msk.f32.gmra.mrb[60].mxu0 %vm631_vm1, %v6560_v6  ;;  %v6583_v6 = vld [vmem:[%s24845_s24 + $0x2c2] sm:$0xff] }
 0x2de   : > { %21622 = vmatprep.mubr.msk.f32.mxu0 %vm631_vm1, %v6561_v7  ;;  %v26451_v7 = vld [vmem:[%s24845_s24 + $0x180] sm:$0xff] }
 0x2df   : > { %20873 = vmatprep.mubr.msk.f32.mxu1 %vm631_vm1, %v26451_v7 }
 0x2e1   : > { %21623 = vmatmul.mubr.msk.f32.gmra.mrb[62].mxu0 %vm631_vm1, %v6562_v10  ;;  %v26454_v10 = vld [vmem:[%s24845_s24 + $0x188] sm:$0xff] }
 0x2e2   : > { %21625 = vmatprep.mubr.msk.f32.mxu0 %vm631_vm1, %v6563_v11  ;;  %v6584_v11 = vld [vmem:[%s24845_s24 + $0x2ca] sm:$0xff]  ;;  %20874 = vmatmul.mubr.msk.f32.gmra.mrb[48].mxu1 %vm631_vm1, %v26454_v10 }
 0x2e5   : > { %21626 = vmatmul.mubr.msk.f32.gmra.mrb[64].mxu0 %vm631_vm1, %v6564_v14  ;;  %v6585_v14 = vld [vmem:[%s24845_s24 + $0x2d2] sm:$0xff] }
 0x2e6   : > { %21628 = vmatprep.mubr.msk.f32.mxu0 %vm631_vm1, %v6565_v15  ;;  %v26465_v15 = vld [vmem:[%s24845_s24 + $0x190] sm:$0xff] }
 0x2e7   : > { %20876 = vmatprep.mubr.msk.f32.mxu1 %vm631_vm1, %v26465_v15 }
 0x2e9   : > { %21629 = vmatmul.mubr.msk.f32.gmra.mrb[66].mxu0 %vm631_vm1, %v6566_v18  ;;  %v26468_v18 = vld [vmem:[%s24845_s24 + $0x198] sm:$0xff] }
 0x2ea   : > { %21631 = vmatprep.mubr.msk.f32.mxu0 %vm631_vm1, %v6567_v19  ;;  %v6586_v19 = vld [vmem:[%s24845_s24 + $0x2da] sm:$0xff]  ;;  %20877 = vmatmul.mubr.msk.f32.gmra.mrb[50].mxu1 %vm631_vm1, %v26468_v18 }
 0x2ed   : > { %21632 = vmatmul.mubr.msk.f32.gmra.mrb[68].mxu0 %vm631_vm1, %v6568_v22  ;;  %v6587_v22 = vld [vmem:[%s24845_s24 + $0x2e2] sm:$0xff] }
 0x2ee   : > { %21634 = vmatprep.mubr.msk.f32.mxu0 %vm631_vm1, %v6569_v23  ;;  %v26479_v23 = vld [vmem:[%s24845_s24 + $0x1a0] sm:$0xff] }
 0x2ef   : > { %20879 = vmatprep.mubr.msk.f32.mxu1 %vm631_vm1, %v26479_v23 }
 0x2f1   : > { %21635 = vmatmul.mubr.msk.f32.gmra.mrb[70].mxu0 %vm631_vm1, %v6570_v26  ;;  %v26482_v26 = vld [vmem:[%s24845_s24 + $0x1a8] sm:$0xff] }
 0x2f2   : > { %21637 = vmatprep.mubr.msk.f32.mxu0 %vm631_vm1, %v6571_v27  ;;  %v6588_v27 = vld [vmem:[%s24845_s24 + $0x2ea] sm:$0xff]  ;;  %20880 = vmatmul.mubr.msk.f32.gmra.mrb[52].mxu1 %vm631_vm1, %v26482_v26 }
 0x2f5   : > { %21638 = vmatmul.mubr.msk.f32.gmra.mrb[72].mxu0 %vm631_vm1, %v6572_v30  ;;  %v6589_v30 = vld [vmem:[%s24845_s24 + $0x2f2] sm:$0xff] }
 0x2f6   : > { %21640 = vmatprep.mubr.msk.f32.mxu0 %vm631_vm1, %v6573_v31  ;;  %v26493_v31 = vld [vmem:[%s24845_s24 + $0x1b0] sm:$0xff] }
 0x2f7   : > { %20882 = vmatprep.mubr.msk.f32.mxu1 %vm631_vm1, %v26493_v31 }
 0x2f9   : > { %21641 = vmatmul.mubr.msk.f32.gmra.mrb[74].mxu0 %vm631_vm1, %v6574_v34  ;;  %v26496_v34 = vld [vmem:[%s24845_s24 + $0x1b8] sm:$0xff] }
 0x2fa   : > { %21643 = vmatprep.mubr.msk.f32.mxu0 %vm631_vm1, %v6575_v37  ;;  %v6590_v37 = vld [vmem:[%s24845_s24 + $0x2fa] sm:$0xff]  ;;  %20883 = vmatmul.mubr.msk.f32.gmra.mrb[54].mxu1 %vm631_vm1, %v26496_v34 }
 0x2fd   : > { %21644 = vmatmul.mubr.msk.f32.gmra.mrb[76].mxu0 %vm631_vm1, %v6576_v42  ;;  %v6591_v42 = vld [vmem:[%s24845_s24 + $0x302] sm:$0xff] }
 0x2fe   : > { %21646 = vmatprep.mubr.msk.f32.mxu0 %vm631_vm1, %v6577_v46  ;;  %v26507_v46 = vld [vmem:[%s24845_s24 + $0x1c0] sm:$0xff] }
 0x2ff   : > { %20885 = vmatprep.mubr.msk.f32.mxu1 %vm631_vm1, %v26507_v46 }
 0x301   : > { %21647 = vmatmul.mubr.msk.f32.gmra.mrb[78].mxu0 %vm631_vm1, %v6578_v52  ;;  %v26510_v52 = vld [vmem:[%s24845_s24 + $0x1c8] sm:$0xff] }
 0x302   : > { %21649 = vmatprep.mubr.msk.f32.mxu0 %vm631_vm1, %v6579_v47  ;;  %v6592_v47 = vld [vmem:[%s24845_s24 + $0x30a] sm:$0xff]  ;;  %20886 = vmatmul.mubr.msk.f32.gmra.mrb[56].mxu1 %vm631_vm1, %v26510_v52 }
 0x305   : > { %21650 = vmatmul.mubr.msk.f32.gmra.mrb[80].mxu0 %vm631_vm1, %v6580_v58  ;;  %v6593_v58 = vld [vmem:[%s24845_s24 + $0x312] sm:$0xff] }
 0x306   : > { %21652 = vmatprep.mubr.msk.f32.mxu0 %vm631_vm1, %v6581_v61  ;;  %v26521_v61 = vld [vmem:[%s24845_s24 + $0x1d0] sm:$0xff] }
 0x307   : > { %20888 = vmatprep.mubr.msk.f32.mxu1 %vm631_vm1, %v26521_v61 }
 0x309   : > { %21653 = vmatmul.mubr.msk.f32.gmra.mrb[82].mxu0 %vm631_vm1, %v6582_v3  ;;  %v26524_v3 = vld [vmem:[%s24845_s24 + $0x1d8] sm:$0xff] }
 0x30a   : > { %21655 = vmatprep.mubr.msk.f32.mxu0 %vm631_vm1, %v6583_v6  ;;  %v6594_v6 = vld [vmem:[%s24845_s24 + $0x31a] sm:$0xff]  ;;  %20889 = vmatmul.mubr.msk.f32.gmra.mrb[58].mxu1 %vm631_vm1, %v26524_v3 }
 0x30d   : > { %21656 = vmatmul.mubr.msk.f32.gmra.mrb[84].mxu0 %vm631_vm1, %v6584_v11  ;;  %v6595_v11 = vld [vmem:[%s24845_s24 + $0x322] sm:$0xff] }
 0x30e   : > { %21658 = vmatprep.mubr.msk.f32.mxu0 %vm631_vm1, %v6585_v14  ;;  %v26535_v14 = vld [vmem:[%s24845_s24 + $0x1e0] sm:$0xff] }
 0x30f   : > { %20891 = vmatprep.mubr.msk.f32.mxu1 %vm631_vm1, %v26535_v14 }
 0x311   : > { %21659 = vmatmul.mubr.msk.f32.gmra.mrb[86].mxu0 %vm631_vm1, %v6586_v19  ;;  %v26538_v19 = vld [vmem:[%s24845_s24 + $0x1e8] sm:$0xff] }
 0x312   : > { %21661 = vmatprep.mubr.msk.f32.mxu0 %vm631_vm1, %v6587_v22  ;;  %v6596_v22 = vld [vmem:[%s24845_s24 + $0x32a] sm:$0xff]  ;;  %20892 = vmatmul.mubr.msk.f32.gmra.mrb[60].mxu1 %vm631_vm1, %v26538_v19 }
 0x315   : > { %21662 = vmatmul.mubr.msk.f32.gmra.mrb[88].mxu0 %vm631_vm1, %v6588_v27  ;;  %v6597_v27 = vld [vmem:[%s24845_s24 + $0x332] sm:$0xff] }
 0x316   : > { %21664 = vmatprep.mubr.msk.f32.mxu0 %vm631_vm1, %v6589_v30  ;;  %v26549_v30 = vld [vmem:[%s24845_s24 + $0x1f0] sm:$0xff] }
 0x317   : > { %20894 = vmatprep.mubr.msk.f32.mxu1 %vm631_vm1, %v26549_v30 }
 0x319   : > { %21665 = vmatmul.mubr.msk.f32.gmra.mrb[90].mxu0 %vm631_vm1, %v6590_v37  ;;  %v26552_v37 = vld [vmem:[%s24845_s24 + $0x1f8] sm:$0xff] }
 0x31a   : > { %21667 = vmatprep.mubr.msk.f32.mxu0 %vm631_vm1, %v6591_v42  ;;  %30499 = vst [vmem:[#allocation11_spill] sm:$0xff] %v26552_v37  ;;  %v6598_v42 = vld [vmem:[%s24845_s24 + $0x33a] sm:$0xff]  ;;  %20895 = vmatmul.mubr.msk.f32.gmra.mrb[62].mxu1 %vm631_vm1, %v26552_v37  ;;  %v6617_v37 = vld [vmem:[%s24845_s24 + $0x3d2] sm:$0xff] }
 0x31d   : > { %21668 = vmatmul.mubr.msk.f32.gmra.mrb[92].mxu0 %vm631_vm1, %v6592_v47  ;;  %v6599_v47 = vld [vmem:[%s24845_s24 + $0x342] sm:$0xff] }
 0x31e   : > { %21670 = vmatprep.mubr.msk.f32.mxu0 %vm631_vm1, %v6593_v58  ;;  %v26563_v58 = vld [vmem:[%s24845_s24 + $0x200] sm:$0xff] }
 0x31f   : > { %30500 = vst [vmem:[#allocation12_spill] sm:$0xff] %v26563_v58  ;;  %20897 = vmatprep.mubr.msk.f32.mxu1 %vm631_vm1, %v26563_v58  ;;  %v6603_v58 = vld [vmem:[%s24845_s24 + $0x362] sm:$0xff] }
 0x321   : > { %21671 = vmatmul.mubr.msk.f32.gmra.mrb[94].mxu0 %vm631_vm1, %v6594_v6  ;;  %v26566_v6 = vld [vmem:[%s24845_s24 + $0x208] sm:$0xff] }
 0x322   : > { %21673 = vmatprep.mubr.msk.f32.mxu0 %vm631_vm1, %v6595_v11  ;;  %30501 = vst [vmem:[#allocation13_spill] sm:$0xff] %v26566_v6  ;;  %v6600_v11 = vld [vmem:[%s24845_s24 + $0x34a] sm:$0xff]  ;;  %20898 = vmatmul.mubr.msk.f32.gmra.mrb[64].mxu1 %vm631_vm1, %v26566_v6 }
 0x323   : > { %v26594_v6 = vld [vmem:[%s24845_s24 + $0x228] sm:$0xff] }
 0x324   : > { %30505 = vst [vmem:[#allocation17_spill] sm:$0xff] %v26594_v6 }
 0x325   : > { %21674 = vmatmul.mubr.msk.f32.gmra.mrb[96].mxu0 %vm631_vm1, %v6596_v22  ;;  %v6601_v22 = vld [vmem:[%s24845_s24 + $0x352] sm:$0xff] }
 0x326   : > { %21676 = vmatprep.mubr.msk.f32.mxu0 %vm631_vm1, %v6597_v27  ;;  %v26577_v27 = vld [vmem:[%s24845_s24 + $0x210] sm:$0xff] }
 0x327   : > { %30502 = vst [vmem:[#allocation14_spill] sm:$0xff] %v26577_v27  ;;  %20900 = vmatprep.mubr.msk.f32.mxu1 %vm631_vm1, %v26577_v27  ;;  %v6605_v27 = vld [vmem:[%s24845_s24 + $0x372] sm:$0xff] }
 0x329   : > { %21677 = vmatmul.mubr.msk.f32.gmra.mrb[98].mxu0 %vm631_vm1, %v6598_v42  ;;  %v26580_v42 = vld [vmem:[%s24845_s24 + $0x218] sm:$0xff] }
 0x32a   : > { %21679 = vmatprep.mubr.msk.f32.mxu0 %vm631_vm1, %v6599_v47  ;;  %30503 = vst [vmem:[#allocation15_spill] sm:$0xff] %v26580_v42  ;;  %v6602_v47 = vld [vmem:[%s24845_s24 + $0x35a] sm:$0xff]  ;;  %20901 = vmatmul.mubr.msk.f32.gmra.mrb[66].mxu1 %vm631_vm1, %v26580_v42 }
 0x32b   : > { %v26608_v42 = vld [vmem:[%s24845_s24 + $0x238] sm:$0xff] }
 0x32c   : > { %30507 = vst [vmem:[#allocation19_spill] sm:$0xff] %v26608_v42 }
 0x32d   : > { %21680 = vmatmul.mubr.msk.f32.gmra.mrb[100].mxu0 %vm631_vm1, %v6600_v11  ;;  %v26591_v11 = vld [vmem:[%s24845_s24 + $0x220] sm:$0xff] }
 0x32e   : > { %21682 = vmatprep.mubr.msk.f32.mxu0 %vm631_vm1, %v6601_v22  ;;  %30504 = vst [vmem:[#allocation16_spill] sm:$0xff] %v26591_v11  ;;  %v6604_v22 = vld [vmem:[%s24845_s24 + $0x36a] sm:$0xff]  ;;  %20903 = vmatprep.mubr.msk.f32.mxu1 %vm631_vm1, %v26591_v11  ;;  %v6607_v11 = vld [vmem:[%s24845_s24 + $0x382] sm:$0xff] }
 0x32f   : > { %20904 = vmatmul.mubr.msk.f32.gmra.mrb[68].mxu1 %vm631_vm1, %v26594_v6  ;;  %v26622_v6 = vld [vmem:[%s24845_s24 + $0x248] sm:$0xff] }
 0x330   : > { %30509 = vst [vmem:[#allocation21_spill] sm:$0xff] %v26622_v6 }
 0x331   : > { %21683 = vmatmul.mubr.msk.f32.gmra.mrb[102].mxu0 %vm631_vm1, %v6602_v47  ;;  %v26605_v47 = vld [vmem:[%s24845_s24 + $0x230] sm:$0xff] }
 0x332   : > { %21685 = vmatprep.mubr.msk.f32.mxu0 %vm631_vm1, %v6603_v58  ;;  %30506 = vst [vmem:[#allocation18_spill] sm:$0xff] %v26605_v47  ;;  %v6606_v58 = vld [vmem:[%s24845_s24 + $0x37a] sm:$0xff]  ;;  %20906 = vmatprep.mubr.msk.f32.mxu1 %vm631_vm1, %v26605_v47  ;;  %v6609_v47 = vld [vmem:[%s24845_s24 + $0x392] sm:$0xff] }
 0x333   : > { %20907 = vmatmul.mubr.msk.f32.gmra.mrb[70].mxu1 %vm631_vm1, %v26608_v42  ;;  %v26636_v42 = vld [vmem:[%s24845_s24 + $0x258] sm:$0xff] }
 0x334   : > { %30511 = vst [vmem:[#allocation23_spill] sm:$0xff] %v26636_v42 }
 0x335   : > { %21686 = vmatmul.mubr.msk.f32.gmra.mrb[104].mxu0 %vm631_vm1, %v6604_v22  ;;  %v26619_v22 = vld [vmem:[%s24845_s24 + $0x240] sm:$0xff] }
 0x336   : > { %21688 = vmatprep.mubr.msk.f32.mxu0 %vm631_vm1, %v6605_v27  ;;  %30508 = vst [vmem:[#allocation20_spill] sm:$0xff] %v26619_v22  ;;  %v6608_v27 = vld [vmem:[%s24845_s24 + $0x38a] sm:$0xff]  ;;  %20909 = vmatprep.mubr.msk.f32.mxu1 %vm631_vm1, %v26619_v22  ;;  %v6611_v22 = vld [vmem:[%s24845_s24 + $0x3a2] sm:$0xff] }
 0x337   : > { %20910 = vmatmul.mubr.msk.f32.gmra.mrb[72].mxu1 %vm631_vm1, %v26622_v6  ;;  %v26650_v6 = vld [vmem:[%s24845_s24 + $0x268] sm:$0xff] }
 0x338   : > { %30513 = vst [vmem:[#allocation25_spill] sm:$0xff] %v26650_v6 }
 0x339   : > { %21689 = vmatmul.mubr.msk.f32.gmra.mrb[106].mxu0 %vm631_vm1, %v6606_v58  ;;  %v26633_v58 = vld [vmem:[%s24845_s24 + $0x250] sm:$0xff] }
 0x33a   : > { %21691 = vmatprep.mubr.msk.f32.mxu0 %vm631_vm1, %v6607_v11  ;;  %30510 = vst [vmem:[#allocation22_spill] sm:$0xff] %v26633_v58  ;;  %v6610_v11 = vld [vmem:[%s24845_s24 + $0x39a] sm:$0xff]  ;;  %20912 = vmatprep.mubr.msk.f32.mxu1 %vm631_vm1, %v26633_v58  ;;  %v6613_v58 = vld [vmem:[%s24845_s24 + $0x3b2] sm:$0xff] }
 0x33b   : > { %20913 = vmatmul.mubr.msk.f32.gmra.mrb[74].mxu1 %vm631_vm1, %v26636_v42  ;;  %v26664_v42 = vld [vmem:[%s24845_s24 + $0x278] sm:$0xff] }
 0x33c   : > { %30515 = vst [vmem:[#allocation27_spill] sm:$0xff] %v26664_v42 }
 0x33d   : > { %21692 = vmatmul.mubr.msk.f32.gmra.mrb[108].mxu0 %vm631_vm1, %v6608_v27  ;;  %v26647_v27 = vld [vmem:[%s24845_s24 + $0x260] sm:$0xff] }
 0x33e   : > { %21694 = vmatprep.mubr.msk.f32.mxu0 %vm631_vm1, %v6609_v47  ;;  %30512 = vst [vmem:[#allocation24_spill] sm:$0xff] %v26647_v27  ;;  %v6612_v47 = vld [vmem:[%s24845_s24 + $0x3aa] sm:$0xff]  ;;  %20915 = vmatprep.mubr.msk.f32.mxu1 %vm631_vm1, %v26647_v27  ;;  %v6615_v27 = vld [vmem:[%s24845_s24 + $0x3c2] sm:$0xff] }
 0x33f   : > { %20916 = vmatmul.mubr.msk.f32.gmra.mrb[76].mxu1 %vm631_vm1, %v26650_v6  ;;  %v26678_v6 = vld [vmem:[%s24845_s24 + $0x288] sm:$0xff] }
 0x341   : > { %21695 = vmatmul.mubr.msk.f32.gmra.mrb[110].mxu0 %vm631_vm1, %v6610_v11  ;;  %v26661_v11 = vld [vmem:[%s24845_s24 + $0x270] sm:$0xff] }
 0x342   : > { %21697 = vmatprep.mubr.msk.f32.mxu0 %vm631_vm1, %v6611_v22  ;;  %30514 = vst [vmem:[#allocation26_spill] sm:$0xff] %v26661_v11  ;;  %v6614_v22 = vld [vmem:[%s24845_s24 + $0x3ba] sm:$0xff]  ;;  %20918 = vmatprep.mubr.msk.f32.mxu1 %vm631_vm1, %v26661_v11 }
 0x343   : > { %20919 = vmatmul.mubr.msk.f32.gmra.mrb[78].mxu1 %vm631_vm1, %v26664_v42  ;;  %v26692_v42 = vld [vmem:[%s24845_s24 + $0x298] sm:$0xff] }
 0x344   : > { %v6618_v11 = vld [vmem:[%s24845_s24 + $0x3da] sm:$0xff] }
 0x345   : > { %21698 = vmatmul.mubr.msk.f32.gmra.mrb[112].mxu0 %vm631_vm1, %v6612_v47  ;;  %v26675_v47 = vld [vmem:[%s24845_s24 + $0x280] sm:$0xff] }
 0x346   : > { %21700 = vmatprep.mubr.msk.f32.mxu0 %vm631_vm1, %v6613_v58  ;;  %v6616_v58 = vld [vmem:[%s24845_s24 + $0x3ca] sm:$0xff]  ;;  %20921 = vmatprep.mubr.msk.f32.mxu1 %vm631_vm1, %v26675_v47 }
 0x347   : > { %20922 = vmatmul.mubr.msk.f32.gmra.mrb[80].mxu1 %vm631_vm1, %v26678_v6 }
 0x349   : > { %21701 = vmatmul.mubr.msk.f32.gmra.mrb[114].mxu0 %vm631_vm1, %v6614_v22  ;;  %v26689_v22 = vld [vmem:[%s24845_s24 + $0x290] sm:$0xff] }
 0x34a   : > { %21703 = vmatprep.mubr.msk.f32.mxu0 %vm631_vm1, %v6615_v27  ;;  %20924 = vmatprep.mubr.msk.f32.mxu1 %vm631_vm1, %v26689_v22  ;;  %v26702_v27 = vld [vmem:[%s24845_s24 + $0x2a0] sm:$0xff] }
 0x34b   : > { %20925 = vmatmul.mubr.msk.f32.gmra.mrb[82].mxu1 %vm631_vm1, %v26692_v42 }
 0x34c   : > { %20927 = vmatprep.mubr.msk.f32.mxu1 %vm631_vm1, %v26702_v27 }
 0x34d   : > { %21704 = vmatmul.mubr.msk.f32.gmra.mrb[116].mxu0 %vm631_vm1, %v6616_v58  ;;  %v26705_v58 = vld [vmem:[%s24845_s24 + $0x2a8] sm:$0xff] }
 0x34e   : > { %21706 = vmatprep.mubr.msk.f32.mxu0 %vm631_vm1, %v6617_v37  ;;  %v26716_v37 = vld [vmem:[%s24845_s24 + $0x2b0] sm:$0xff] }
 0x34f   : > { %20928 = vmatmul.mubr.msk.f32.gmra.mrb[84].mxu1 %vm631_vm1, %v26705_v58 }
 0x350   : > { %20930 = vmatprep.mubr.msk.f32.mxu1 %vm631_vm1, %v26716_v37 }
 0x351   : > { %21707 = vmatmul.mubr.msk.f32.gmra.mrb[118].mxu0 %vm631_vm1, %v6618_v11  ;;  %v26719_v11 = vld [vmem:[%s24845_s24 + $0x2b8] sm:$0xff] }
 0x352   : > { %21711 = vmatprep.mubr.msk.f32.mxu0 %vm631_vm1, %v26164_v35  ;;  %v26732_v35 = vld [vmem:[%s24845_s24 + $0x2c0] sm:$0xff] }
 0x353   : > { %20931 = vmatmul.mubr.msk.f32.gmra.mrb[86].mxu1 %vm631_vm1, %v26719_v11 }
 0x354   : > { %20933 = vmatprep.mubr.msk.f32.mxu1 %vm631_vm1, %v26732_v35 }
 0x355   : > { %21712 = vmatmul.mubr.msk.f32.vlgmr.msra.gmra.mrb[0].mxu0 %vm631_vm1, %v26167_v36  ;;  %v26735_v36 = vld [vmem:[%s24845_s24 + $0x2c8] sm:$0xff] }
 0x356   : > { %21892 = vmatpush3.msk.msra.mxu0 %vm992_vm0, %v26260_v62  ;;  %21714 = vmatprep.mubr.msk.f32.mxu0 %vm631_vm1, %v26178_v39  ;;  %v26746_v39 = vld [vmem:[%s24845_s24 + $0x2d0] sm:$0xff] }
 0x357   : > { %20934 = vmatmul.mubr.msk.f32.gmra.mrb[88].mxu1 %vm631_vm1, %v26735_v36  ;;  %v26830_v62 = vld [vmem:[%s24845_s24 + $0x330] sm:$0xff] }
 0x358   : > { %20936 = vmatprep.mubr.msk.f32.mxu1 %vm631_vm1, %v26746_v39 }
 0x359   : > { %21715 = vmatmul.mubr.msk.f32.gmra.mrb[2].mxu0 %vm631_vm1, %v26181_v40  ;;  %v26749_v40 = vld [vmem:[%s24845_s24 + $0x2d8] sm:$0xff] }
 0x35a   : > { %21717 = vmatprep.mubr.msk.f32.mxu0 %vm631_vm1, %v26192_v43  ;;  %v26760_v43 = vld [vmem:[%s24845_s24 + $0x2e0] sm:$0xff] }
 0x35b   : > { %20937 = vmatmul.mubr.msk.f32.gmra.mrb[90].mxu1 %vm631_vm1, %v26749_v40 }
 0x35c   : > { %20939 = vmatprep.mubr.msk.f32.mxu1 %vm631_vm1, %v26760_v43 }
 0x35d   : > { %21718 = vmatmul.mubr.msk.f32.gmra.mrb[4].mxu0 %vm631_vm1, %v26195_v44  ;;  %v26763_v44 = vld [vmem:[%s24845_s24 + $0x2e8] sm:$0xff] }
 0x35e   : > { %21720 = vmatprep.mubr.msk.f32.mxu0 %vm631_vm1, %v26206_v49  ;;  %v26774_v49 = vld [vmem:[%s24845_s24 + $0x2f0] sm:$0xff] }
 0x35f   : > { %20940 = vmatmul.mubr.msk.f32.gmra.mrb[92].mxu1 %vm631_vm1, %v26763_v44 }
 0x360   : > { %20942 = vmatprep.mubr.msk.f32.mxu1 %vm631_vm1, %v26774_v49 }
 0x361   : > { %21721 = vmatmul.mubr.msk.f32.gmra.mrb[6].mxu0 %vm631_vm1, %v26209_v50  ;;  %v26777_v50 = vld [vmem:[%s24845_s24 + $0x2f8] sm:$0xff] }
 0x362   : > { %21723 = vmatprep.mubr.msk.f32.mxu0 %vm631_vm1, %v26220_v45  ;;  %v26788_v45 = vld [vmem:[%s24845_s24 + $0x300] sm:$0xff] }
 0x363   : > { %20943 = vmatmul.mubr.msk.f32.gmra.mrb[94].mxu1 %vm631_vm1, %v26777_v50 }
 0x364   : > { %20945 = vmatprep.mubr.msk.f32.mxu1 %vm631_vm1, %v26788_v45 }
 0x365   : > { %21724 = vmatmul.mubr.msk.f32.gmra.mrb[8].mxu0 %vm631_vm1, %v26223_v53  ;;  %v26791_v53 = vld [vmem:[%s24845_s24 + $0x308] sm:$0xff] }
 0x366   : > { %21726 = vmatprep.mubr.msk.f32.mxu0 %vm631_vm1, %v26234_v55  ;;  %v26802_v55 = vld [vmem:[%s24845_s24 + $0x310] sm:$0xff] }
 0x367   : > { %20946 = vmatmul.mubr.msk.f32.gmra.mrb[96].mxu1 %vm631_vm1, %v26791_v53 }
 0x368   : > { %20948 = vmatprep.mubr.msk.f32.mxu1 %vm631_vm1, %v26802_v55 }
 0x369   : > { %21727 = vmatmul.mubr.msk.f32.gmra.mrb[10].mxu0 %vm631_vm1, %v26237_v56  ;;  %v26805_v56 = vld [vmem:[%s24845_s24 + $0x318] sm:$0xff] }
 0x36a   : > { %21729 = vmatprep.mubr.msk.f32.mxu0 %vm631_vm1, %v26248_v59  ;;  %v26816_v59 = vld [vmem:[%s24845_s24 + $0x320] sm:$0xff] }
 0x36b   : > { %20949 = vmatmul.mubr.msk.f32.gmra.mrb[98].mxu1 %vm631_vm1, %v26805_v56 }
 0x36c   : > { %20951 = vmatprep.mubr.msk.f32.mxu1 %vm631_vm1, %v26816_v59 }
 0x36d   : > { %21730 = vmatmul.mubr.msk.f32.gmra.mrb[12].mxu0 %vm631_vm1, %v26251_v60  ;;  %v26819_v60 = vld [vmem:[%s24845_s24 + $0x328] sm:$0xff] }
 0x36e   : > { %21732 = vmatprep.mubr.msk.f32.mxu0 %vm631_vm1, %v26271_v1  ;;  %v26833_v1 = vld [vmem:[%s24845_s24 + $0x338] sm:$0xff] }
 0x36f   : > { %20952 = vmatmul.mubr.msk.f32.gmra.mrb[100].mxu1 %vm631_vm1, %v26819_v60 }
 0x370   : > { %20954 = vmatprep.mubr.msk.f32.mxu1 %vm631_vm1, %v26830_v62 }
 0x371   : > { %21733 = vmatmul.mubr.msk.f32.gmra.mrb[14].mxu0 %vm631_vm1, %v26274_v2  ;;  %v26844_v2 = vld [vmem:[%s24845_s24 + $0x340] sm:$0xff] }
 0x372   : > { %21735 = vmatprep.mubr.msk.f32.mxu0 %vm631_vm1, %v26283_v4  ;;  %v26847_v4 = vld [vmem:[%s24845_s24 + $0x348] sm:$0xff] }
 0x373   : > { %20955 = vmatmul.mubr.msk.f32.gmra.mrb[102].mxu1 %vm631_vm1, %v26833_v1 }
 0x374   : > { %20957 = vmatprep.mubr.msk.f32.mxu1 %vm631_vm1, %v26844_v2 }
 0x375   : > { %21736 = vmatmul.mubr.msk.f32.gmra.mrb[16].mxu0 %vm631_vm1, %v26286_v5  ;;  %v26858_v5 = vld [vmem:[%s24845_s24 + $0x350] sm:$0xff] }
 0x376   : > { %21738 = vmatprep.mubr.msk.f32.mxu0 %vm631_vm1, %v26297_v8  ;;  %v26861_v8 = vld [vmem:[%s24845_s24 + $0x358] sm:$0xff] }
 0x377   : > { %20958 = vmatmul.mubr.msk.f32.gmra.mrb[104].mxu1 %vm631_vm1, %v26847_v4 }
 0x378   : > { %20960 = vmatprep.mubr.msk.f32.mxu1 %vm631_vm1, %v26858_v5 }
 0x379   : > { %21739 = vmatmul.mubr.msk.f32.gmra.mrb[18].mxu0 %vm631_vm1, %v26300_v9  ;;  %v26872_v9 = vld [vmem:[%s24845_s24 + $0x360] sm:$0xff] }
 0x37a   : > { %21741 = vmatprep.mubr.msk.f32.mxu0 %vm631_vm1, %v26311_v12  ;;  %v26875_v12 = vld [vmem:[%s24845_s24 + $0x368] sm:$0xff] }
 0x37b   : > { %20961 = vmatmul.mubr.msk.f32.gmra.mrb[106].mxu1 %vm631_vm1, %v26861_v8 }
 0x37c   : > { %20963 = vmatprep.mubr.msk.f32.mxu1 %vm631_vm1, %v26872_v9 }
 0x37d   : > { %21742 = vmatmul.mubr.msk.f32.gmra.mrb[20].mxu0 %vm631_vm1, %v26314_v13  ;;  %v26886_v13 = vld [vmem:[%s24845_s24 + $0x370] sm:$0xff] }
 0x37e   : > { %21744 = vmatprep.mubr.msk.f32.mxu0 %vm631_vm1, %v26325_v16  ;;  %v26889_v16 = vld [vmem:[%s24845_s24 + $0x378] sm:$0xff] }
 0x37f   : > { %20964 = vmatmul.mubr.msk.f32.gmra.mrb[108].mxu1 %vm631_vm1, %v26875_v12 }
 0x380   : > { %20966 = vmatprep.mubr.msk.f32.mxu1 %vm631_vm1, %v26886_v13 }
 0x381   : > { %21745 = vmatmul.mubr.msk.f32.gmra.mrb[22].mxu0 %vm631_vm1, %v26328_v17  ;;  %v26900_v17 = vld [vmem:[%s24845_s24 + $0x380] sm:$0xff] }
 0x382   : > { %21747 = vmatprep.mubr.msk.f32.mxu0 %vm631_vm1, %v26339_v20  ;;  %v26903_v20 = vld [vmem:[%s24845_s24 + $0x388] sm:$0xff] }
 0x383   : > { %20967 = vmatmul.mubr.msk.f32.gmra.mrb[110].mxu1 %vm631_vm1, %v26889_v16 }
 0x384   : > { %20969 = vmatprep.mubr.msk.f32.mxu1 %vm631_vm1, %v26900_v17 }
 0x385   : > { %21748 = vmatmul.mubr.msk.f32.gmra.mrb[24].mxu0 %vm631_vm1, %v26342_v21  ;;  %v26914_v21 = vld [vmem:[%s24845_s24 + $0x390] sm:$0xff] }
 0x386   : > { %21750 = vmatprep.mubr.msk.f32.mxu0 %vm631_vm1, %v26353_v24  ;;  %v26917_v24 = vld [vmem:[%s24845_s24 + $0x398] sm:$0xff] }
 0x387   : > { %20970 = vmatmul.mubr.msk.f32.gmra.mrb[112].mxu1 %vm631_vm1, %v26903_v20 }
 0x388   : > { %20972 = vmatprep.mubr.msk.f32.mxu1 %vm631_vm1, %v26914_v21 }
 0x389   : > { %21751 = vmatmul.mubr.msk.f32.gmra.mrb[26].mxu0 %vm631_vm1, %v26356_v25  ;;  %v26928_v25 = vld [vmem:[%s24845_s24 + $0x3a0] sm:$0xff] }
 0x38a   : > { %21753 = vmatprep.mubr.msk.f32.mxu0 %vm631_vm1, %v26367_v28  ;;  %v26931_v28 = vld [vmem:[%s24845_s24 + $0x3a8] sm:$0xff] }
 0x38b   : > { %20973 = vmatmul.mubr.msk.f32.gmra.mrb[114].mxu1 %vm631_vm1, %v26917_v24 }
 0x38c   : > { %20975 = vmatprep.mubr.msk.f32.mxu1 %vm631_vm1, %v26928_v25 }
 0x38d   : > { %21754 = vmatmul.mubr.msk.f32.gmra.mrb[28].mxu0 %vm631_vm1, %v26370_v29  ;;  %v26942_v29 = vld [vmem:[%s24845_s24 + $0x3b0] sm:$0xff] }
 0x38e   : > { %21756 = vmatprep.mubr.msk.f32.mxu0 %vm631_vm1, %v26381_v32  ;;  %v26945_v32 = vld [vmem:[%s24845_s24 + $0x3b8] sm:$0xff] }
 0x38f   : > { %20976 = vmatmul.mubr.msk.f32.gmra.mrb[116].mxu1 %vm631_vm1, %v26931_v28 }
 0x390   : > { %20978 = vmatprep.mubr.msk.f32.mxu1 %vm631_vm1, %v26942_v29 }
 0x391   : > { %21757 = vmatmul.mubr.msk.f32.gmra.mrb[30].mxu0 %vm631_vm1, %v26384_v33  ;;  %v2739_v33 = vld [vmem:[%s24845_s24 + $0x192] sm:$0xff] }
 0x392   : > { %21759 = vmatprep.mubr.msk.f32.mxu0 %vm631_vm1, %v26395_v38  ;;  %v2740_v38 = vld [vmem:[%s24845_s24 + $0x19a] sm:$0xff] }
 0x393   : > { %20979 = vmatmul.mubr.msk.f32.gmra.mrb[118].mxu1 %vm631_vm1, %v26945_v32 }
 0x394   : > { %21058 = vmatprep.mubr.msk.f32.mxu1 %vm631_vm1, %v2739_v33  ;;  %v2760_v33 = vld [vmem:[%s24845_s24 + $0x23a] sm:$0xff] }
 0x395   : > { %21760 = vmatmul.mubr.msk.f32.gmra.mrb[32].mxu0 %vm631_vm1, %v26398_v41  ;;  %v2741_v41 = vld [vmem:[%s24845_s24 + $0x1a2] sm:$0xff] }
 0x396   : > { %21762 = vmatprep.mubr.msk.f32.mxu0 %vm631_vm1, %v26409_v48  ;;  %v2742_v48 = vld [vmem:[%s24845_s24 + $0x1aa] sm:$0xff] }
 0x397   : > { %21059 = vmatmul.mubr.msk.f32.vlgmr.msra.gmra.mrb[50].mxu1 %vm631_vm1, %v2740_v38  ;;  %v30517_v38 = vld [vmem:[#allocation12_spill] sm:$0xff] }
 0x398   : > { %21061 = vmatprep.mubr.msk.f32.mxu1 %vm631_vm1, %v2741_v41  ;;  %v30519_v41 = vld [vmem:[#allocation14_spill] sm:$0xff] }
 0x399   : > { %21763 = vmatmul.mubr.msk.f32.gmra.mrb[34].mxu0 %vm631_vm1, %v26412_v51  ;;  %v2743_v51 = vld [vmem:[%s24845_s24 + $0x1b2] sm:$0xff] }
 0x39a   : > { %21765 = vmatprep.mubr.msk.f32.mxu0 %vm631_vm1, %v26423_v54  ;;  %v2744_v54 = vld [vmem:[%s24845_s24 + $0x1ba] sm:$0xff] }
 0x39b   : > { %21062 = vmatmul.mubr.msk.f32.gmra.mrb[52].mxu1 %vm631_vm1, %v2742_v48  ;;  %v2761_v48 = vld [vmem:[%s24845_s24 + $0x242] sm:$0xff] }
 0x39c   : > { %21064 = vmatprep.mubr.msk.f32.mxu1 %vm631_vm1, %v2743_v51  ;;  %v2762_v51 = vld [vmem:[%s24845_s24 + $0x24a] sm:$0xff] }
 0x39d   : > { %21766 = vmatmul.mubr.msk.f32.gmra.mrb[36].mxu0 %vm631_vm1, %v26426_v57  ;;  %v2745_v57 = vld [vmem:[%s24845_s24 + $0x1c2] sm:$0xff] }
 0x39e   : > { %21768 = vmatprep.mubr.msk.f32.mxu0 %vm631_vm1, %v26437_v63  ;;  %v2746_v63 = vld [vmem:[%s24845_s24 + $0x1ca] sm:$0xff] }
 0x39f   : > { %21065 = vmatmul.mubr.msk.f32.gmra.mrb[54].mxu1 %vm631_vm1, %v2744_v54  ;;  %v30520_v54 = vld [vmem:[#allocation15_spill] sm:$0xff] }
 0x3a0   : > { %21067 = vmatprep.mubr.msk.f32.mxu1 %vm631_vm1, %v2745_v57  ;;  %v2763_v57 = vld [vmem:[%s24845_s24 + $0x252] sm:$0xff] }
 0x3a1   : > { %21769 = vmatmul.mubr.msk.f32.gmra.mrb[38].mxu0 %vm631_vm1, %v26440_v0  ;;  %v2747_v0 = vld [vmem:[%s24845_s24 + $0x1d2] sm:$0xff] }
 0x3a2   : > { %21771 = vmatprep.mubr.msk.f32.mxu0 %vm631_vm1, %v26451_v7  ;;  %v2748_v7 = vld [vmem:[%s24845_s24 + $0x1da] sm:$0xff] }
 0x3a3   : > { %21068 = vmatmul.mubr.msk.f32.gmra.mrb[56].mxu1 %vm631_vm1, %v2746_v63  ;;  %v2764_v63 = vld [vmem:[%s24845_s24 + $0x25a] sm:$0xff] }
 0x3a4   : > { %21070 = vmatprep.mubr.msk.f32.mxu1 %vm631_vm1, %v2747_v0  ;;  %v30521_v0 = vld [vmem:[#allocation16_spill] sm:$0xff] }
 0x3a5   : > { %21772 = vmatmul.mubr.msk.f32.gmra.mrb[40].mxu0 %vm631_vm1, %v26454_v10  ;;  %v2749_v10 = vld [vmem:[%s24845_s24 + $0x1e2] sm:$0xff] }
 0x3a6   : > { %21774 = vmatprep.mubr.msk.f32.mxu0 %vm631_vm1, %v26465_v15  ;;  %v2750_v15 = vld [vmem:[%s24845_s24 + $0x1ea] sm:$0xff] }
 0x3a7   : > { %21071 = vmatmul.mubr.msk.f32.gmra.mrb[58].mxu1 %vm631_vm1, %v2748_v7  ;;  %v30522_v7 = vld [vmem:[#allocation17_spill] sm:$0xff] }
 0x3a8   : > { %21073 = vmatprep.mubr.msk.f32.mxu1 %vm631_vm1, %v2749_v10  ;;  %v2765_v10 = vld [vmem:[%s24845_s24 + $0x262] sm:$0xff] }
 0x3a9   : > { %21775 = vmatmul.mubr.msk.f32.gmra.mrb[42].mxu0 %vm631_vm1, %v26468_v18  ;;  %v2751_v18 = vld [vmem:[%s24845_s24 + $0x1f2] sm:$0xff] }
 0x3aa   : > { %21777 = vmatprep.mubr.msk.f32.mxu0 %vm631_vm1, %v26479_v23  ;;  %v2752_v23 = vld [vmem:[%s24845_s24 + $0x1fa] sm:$0xff] }
 0x3ab   : > { %21074 = vmatmul.mubr.msk.f32.gmra.mrb[60].mxu1 %vm631_vm1, %v2750_v15  ;;  %v2766_v15 = vld [vmem:[%s24845_s24 + $0x26a] sm:$0xff] }
 0x3ac   : > { %21076 = vmatprep.mubr.msk.f32.mxu1 %vm631_vm1, %v2751_v18  ;;  %v30523_v18 = vld [vmem:[#allocation18_spill] sm:$0xff] }
 0x3ad   : > { %21778 = vmatmul.mubr.msk.f32.gmra.mrb[44].mxu0 %vm631_vm1, %v26482_v26  ;;  %v2753_v26 = vld [vmem:[%s24845_s24 + $0x202] sm:$0xff] }
 0x3ae   : > { %21780 = vmatprep.mubr.msk.f32.mxu0 %vm631_vm1, %v26493_v31  ;;  %v2754_v31 = vld [vmem:[%s24845_s24 + $0x20a] sm:$0xff] }
 0x3af   : > { %21077 = vmatmul.mubr.msk.f32.gmra.mrb[62].mxu1 %vm631_vm1, %v2752_v23  ;;  %v30524_v23 = vld [vmem:[#allocation19_spill] sm:$0xff] }
 0x3b0   : > { %21079 = vmatprep.mubr.msk.f32.mxu1 %vm631_vm1, %v2753_v26  ;;  %v2767_v26 = vld [vmem:[%s24845_s24 + $0x272] sm:$0xff] }
 0x3b1   : > { %21781 = vmatmul.mubr.msk.f32.gmra.mrb[46].mxu0 %vm631_vm1, %v26496_v34  ;;  %v2755_v34 = vld [vmem:[%s24845_s24 + $0x212] sm:$0xff] }
 0x3b2   : > { %21783 = vmatprep.mubr.msk.f32.mxu0 %vm631_vm1, %v26507_v46  ;;  %v2756_v46 = vld [vmem:[%s24845_s24 + $0x21a] sm:$0xff] }
 0x3b3   : > { %21080 = vmatmul.mubr.msk.f32.gmra.mrb[64].mxu1 %vm631_vm1, %v2754_v31  ;;  %v2768_v31 = vld [vmem:[%s24845_s24 + $0x27a] sm:$0xff] }
 0x3b4   : > { %21082 = vmatprep.mubr.msk.f32.mxu1 %vm631_vm1, %v2755_v34  ;;  %v30525_v34 = vld [vmem:[#allocation20_spill] sm:$0xff] }
 0x3b5   : > { %21784 = vmatmul.mubr.msk.f32.gmra.mrb[48].mxu0 %vm631_vm1, %v26510_v52  ;;  %v2757_v52 = vld [vmem:[%s24845_s24 + $0x222] sm:$0xff] }
 0x3b6   : > { %21786 = vmatprep.mubr.msk.f32.mxu0 %vm631_vm1, %v26521_v61  ;;  %v2758_v61 = vld [vmem:[%s24845_s24 + $0x22a] sm:$0xff] }
 0x3b7   : > { %21083 = vmatmul.mubr.msk.f32.gmra.mrb[66].mxu1 %vm631_vm1, %v2756_v46  ;;  %v30526_v46 = vld [vmem:[#allocation21_spill] sm:$0xff] }
 0x3b8   : > { %21085 = vmatprep.mubr.msk.f32.mxu1 %vm631_vm1, %v2757_v52  ;;  %v2769_v52 = vld [vmem:[%s24845_s24 + $0x282] sm:$0xff] }
 0x3b9   : > { %21787 = vmatmul.mubr.msk.f32.gmra.mrb[50].mxu0 %vm631_vm1, %v26524_v3  ;;  %v30516_v3 = vld [vmem:[#allocation11_spill] sm:$0xff] }
 0x3ba   : > { %21789 = vmatprep.mubr.msk.f32.mxu0 %vm631_vm1, %v26535_v14  ;;  %v2759_v14 = vld [vmem:[%s24845_s24 + $0x232] sm:$0xff] }
 0x3bb   : > { %21086 = vmatmul.mubr.msk.f32.gmra.mrb[68].mxu1 %vm631_vm1, %v2758_v61  ;;  %v2770_v61 = vld [vmem:[%s24845_s24 + $0x28a] sm:$0xff] }
 0x3bc   : > { %21088 = vmatprep.mubr.msk.f32.mxu1 %vm631_vm1, %v2759_v14  ;;  %v30528_v14 = vld [vmem:[#allocation23_spill] sm:$0xff] }
 0x3bd   : > { %21790 = vmatmul.mubr.msk.f32.gmra.mrb[52].mxu0 %vm631_vm1, %v26538_v19  ;;  %v27043_v19 = vld [vmem:[%s30454_s1 + $0x20] sm:$0x7] }
 0x3be   : > { %21792 = vmatprep.mubr.msk.f32.mxu0 %vm631_vm1, %v26549_v30  ;;  %22073 = vmatprep.subr.msk.mxu0 %vm992_vm0, %v27043_v19  ;;  %v30518_v30 = vld [vmem:[#allocation13_spill] sm:$0xff] }
 0x3bf   : > { %21089 = vmatmul.mubr.msk.f32.gmra.mrb[70].mxu1 %vm631_vm1, %v2760_v33  ;;  %v2771_v33 = vld [vmem:[%s24845_s24 + $0x292] sm:$0xff] }
 0x3c0   : > { %21091 = vmatprep.mubr.msk.f32.mxu1 %vm631_vm1, %v2761_v48  ;;  %v2773_v48 = vld [vmem:[%s24845_s24 + $0x2a2] sm:$0xff] }
 0x3c1   : > { %21793 = vmatmul.mubr.msk.f32.gmra.mrb[54].mxu0 %vm631_vm1, %v30516_v3  ;;  %v30527_v3 = vld [vmem:[#allocation22_spill] sm:$0xff] }
 0x3c2   : > { %21795 = vmatprep.mubr.msk.f32.mxu0 %vm631_vm1, %v30517_v38  ;;  %v2772_v38 = vld [vmem:[%s24845_s24 + $0x29a] sm:$0xff] }
 0x3c3   : > { %21092 = vmatmul.mubr.msk.f32.gmra.mrb[72].mxu1 %vm631_vm1, %v2762_v51  ;;  %v2774_v51 = vld [vmem:[%s24845_s24 + $0x2aa] sm:$0xff] }
 0x3c4   : > { %21094 = vmatprep.mubr.msk.f32.mxu1 %vm631_vm1, %v2763_v57  ;;  %v30532_v57 = vld [vmem:[#allocation27_spill] sm:$0xff] }
 0x3c5   : > { %21796 = vmatmul.mubr.msk.f32.gmra.mrb[56].mxu0 %vm631_vm1, %v30518_v30  ;;  %v30529_v30 = vld [vmem:[#allocation24_spill] sm:$0xff] }
 0x3c6   : > { %21798 = vmatprep.mubr.msk.f32.mxu0 %vm631_vm1, %v30519_v41  ;;  %v30530_v41 = vld [vmem:[#allocation25_spill] sm:$0xff] }
 0x3c7   : > { %21095 = vmatmul.mubr.msk.f32.gmra.mrb[74].mxu1 %vm631_vm1, %v2764_v63  ;;  %v2775_v63 = vld [vmem:[%s24845_s24 + $0x2b2] sm:$0xff] }
 0x3c8   : > { %21097 = vmatprep.mubr.msk.f32.mxu1 %vm631_vm1, %v2765_v10  ;;  %v2778_v10 = vld [vmem:[%s24845_s24 + $0x2ca] sm:$0xff] }
 0x3c9   : > { %21799 = vmatmul.mubr.msk.f32.gmra.mrb[58].mxu0 %vm631_vm1, %v30520_v54  ;;  %v30531_v54 = vld [vmem:[#allocation26_spill] sm:$0xff] }
 0x3ca   : > { %21801 = vmatprep.mubr.msk.f32.mxu0 %vm631_vm1, %v30521_v0  ;;  %v2776_v0 = vld [vmem:[%s24845_s24 + $0x2ba] sm:$0xff] }
 0x3cb   : > { %21098 = vmatmul.mubr.msk.f32.gmra.mrb[76].mxu1 %vm631_vm1, %v2766_v15  ;;  %v2780_v15 = vld [vmem:[%s24845_s24 + $0x2da] sm:$0xff] }
 0x3cc   : > { %21100 = vmatprep.mubr.msk.f32.mxu1 %vm631_vm1, %v2767_v26 }
 0x3cd   : > { %21802 = vmatmul.mubr.msk.f32.gmra.mrb[60].mxu0 %vm631_vm1, %v30522_v7  ;;  %v2777_v7 = vld [vmem:[%s24845_s24 + $0x2c2] sm:$0xff] }
 0x3ce   : > { %21804 = vmatprep.mubr.msk.f32.mxu0 %vm631_vm1, %v30523_v18  ;;  %v2796_v18 = vld [vmem:[%s24845_s24 + $0x35a] sm:$0xff] }
 0x3cf   : > { %21101 = vmatmul.mubr.msk.f32.gmra.mrb[78].mxu1 %vm631_vm1, %v2768_v31  ;;  %v2800_v31 = vld [vmem:[%s24845_s24 + $0x37a] sm:$0xff] }
 0x3d0   : > { %21103 = vmatprep.mubr.msk.f32.mxu1 %vm631_vm1, %v2769_v52 }
 0x3d1   : > { %21805 = vmatmul.mubr.msk.f32.gmra.mrb[62].mxu0 %vm631_vm1, %v30524_v23  ;;  %v2798_v23 = vld [vmem:[%s24845_s24 + $0x36a] sm:$0xff] }
 0x3d2   : > { %21807 = vmatprep.mubr.msk.f32.mxu0 %vm631_vm1, %v30525_v34 }
 0x3d3   : > { %21104 = vmatmul.mubr.msk.f32.gmra.mrb[80].mxu1 %vm631_vm1, %v2770_v61  ;;  %v2804_v61 = vld [vmem:[%s24845_s24 + $0x39a] sm:$0xff] }
 0x3d4   : > { %21106 = vmatprep.mubr.msk.f32.mxu1 %vm631_vm1, %v2771_v33 }
 0x3d5   : > { %21808 = vmatmul.mubr.msk.f32.gmra.mrb[64].mxu0 %vm631_vm1, %v30526_v46  ;;  %v2802_v46 = vld [vmem:[%s24845_s24 + $0x38a] sm:$0xff] }
 0x3d6   : > { %21810 = vmatprep.mubr.msk.f32.mxu0 %vm631_vm1, %v30527_v3 }
 0x3d7   : > { %21107 = vmatmul.mubr.msk.f32.gmra.mrb[82].mxu1 %vm631_vm1, %v2772_v38  ;;  %v2807_v38 = vld [vmem:[%s24845_s24 + $0x3b2] sm:$0xff] }
 0x3d8   : > { %21109 = vmatprep.mubr.msk.f32.mxu1 %vm631_vm1, %v2773_v48  ;;  %v7882_v48 = vld [vmem:[%s24845_s24 + $0x3c8] sm:$0xff] }
 0x3d9   : > { %21811 = vmatmul.mubr.msk.f32.gmra.mrb[66].mxu0 %vm631_vm1, %v30528_v14  ;;  %v2806_v14 = vld [vmem:[%s24845_s24 + $0x3aa] sm:$0xff] }
 0x3da   : > { %21813 = vmatprep.mubr.msk.f32.mxu0 %vm631_vm1, %v30529_v30 }
 0x3db   : > { %21110 = vmatmul.mubr.msk.f32.gmra.mrb[84].mxu1 %vm631_vm1, %v2774_v51  ;;  %v7883_v51 = vld [vmem:[%s24845_s24 + $0x3d0] sm:$0xff] }
 0x3dc   : > { %21112 = vmatprep.mubr.msk.f32.mxu1 %vm631_vm1, %v2775_v63 }
 0x3dd   : > { %21814 = vmatmul.mubr.msk.f32.gmra.mrb[68].mxu0 %vm631_vm1, %v30530_v41 }
 0x3de   : > { %21816 = vmatprep.mubr.msk.f32.mxu0 %vm631_vm1, %v30531_v54  ;;  %v7884_v54 = vld [vmem:[%s24845_s24 + $0x3d8] sm:$0xff] }
 0x3df   : > { %21113 = vmatmul.mubr.msk.f32.gmra.mrb[86].mxu1 %vm631_vm1, %v2776_v0  ;;  %v7886_v0 = vld [vmem:[%s24845_s24 + $0x3e8] sm:$0xff] }
 0x3e0   : > { %21115 = vmatprep.mubr.msk.f32.mxu1 %vm631_vm1, %v2777_v7 }
 0x3e1   : > { %21817 = vmatmul.mubr.msk.f32.gmra.mrb[70].mxu0 %vm631_vm1, %v30532_v57 }
 0x3e2   : > { %21819 = vmatprep.mubr.msk.f32.mxu0 %vm631_vm1, %v26675_v47  ;;  %v2779_v47 = vld [vmem:[%s24845_s24 + $0x2d2] sm:$0xff] }
 0x3e3   : > { %21116 = vmatmul.mubr.msk.f32.gmra.mrb[88].mxu1 %vm631_vm1, %v2778_v10  ;;  %v7887_v10 = vld [vmem:[%s24845_s24 + $0x3f0] sm:$0xff] }
 0x3e4   : > { %21118 = vmatprep.mubr.msk.f32.mxu1 %vm631_vm1, %v2779_v47 }
 0x3e5   : > { %21820 = vmatmul.mubr.msk.f32.gmra.mrb[72].mxu0 %vm631_vm1, %v26678_v6  ;;  %v2781_v6 = vld [vmem:[%s24845_s24 + $0x2e2] sm:$0xff] }
 0x3e6   : > { %21822 = vmatprep.mubr.msk.f32.mxu0 %vm631_vm1, %v26689_v22  ;;  %v2782_v22 = vld [vmem:[%s24845_s24 + $0x2ea] sm:$0xff] }
 0x3e7   : > { %21119 = vmatmul.mubr.msk.f32.gmra.mrb[90].mxu1 %vm631_vm1, %v2780_v15  ;;  %v7888_v15 = vld [vmem:[%s24845_s24 + $0x3f8] sm:$0xff] }
 0x3e8   : > { %21121 = vmatprep.mubr.msk.f32.mxu1 %vm631_vm1, %v2781_v6 }
 0x3e9   : > { %21823 = vmatmul.mubr.msk.f32.gmra.mrb[74].mxu0 %vm631_vm1, %v26692_v42  ;;  %v2783_v42 = vld [vmem:[%s24845_s24 + $0x2f2] sm:$0xff] }
 0x3ea   : > { %21825 = vmatprep.mubr.msk.f32.mxu0 %vm631_vm1, %v26702_v27  ;;  %v2784_v27 = vld [vmem:[%s24845_s24 + $0x2fa] sm:$0xff] }
 0x3eb   : > { %21122 = vmatmul.mubr.msk.f32.gmra.mrb[92].mxu1 %vm631_vm1, %v2782_v22  ;;  %v9039_v22 = vld [vmem:[%s24845_s24 + $0x41] sm:$0xff] }
 0x3ec   : > { %21124 = vmatprep.mubr.msk.f32.mxu1 %vm631_vm1, %v2783_v42 }
 0x3ed   : > { %21826 = vmatmul.mubr.msk.f32.gmra.mrb[76].mxu0 %vm631_vm1, %v26705_v58  ;;  %v2785_v58 = vld [vmem:[%s24845_s24 + $0x302] sm:$0xff] }
 0x3ee   : > { %21828 = vmatprep.mubr.msk.f32.mxu0 %vm631_vm1, %v26716_v37  ;;  %v2786_v37 = vld [vmem:[%s24845_s24 + $0x30a] sm:$0xff] }
 0x3ef   : > { %21125 = vmatmul.mubr.msk.f32.gmra.mrb[94].mxu1 %vm631_vm1, %v2784_v27  ;;  %v9040_v27 = vld [vmem:[%s24845_s24 + $0x49] sm:$0xff] }
 0x3f0   : > { %21127 = vmatprep.mubr.msk.f32.mxu1 %vm631_vm1, %v2785_v58 }
 0x3f1   : > { %21829 = vmatmul.mubr.msk.f32.gmra.mrb[78].mxu0 %vm631_vm1, %v26719_v11  ;;  %v2787_v11 = vld [vmem:[%s24845_s24 + $0x312] sm:$0xff] }
 0x3f2   : > { %21831 = vmatprep.mubr.msk.f32.mxu0 %vm631_vm1, %v26732_v35  ;;  %v2788_v35 = vld [vmem:[%s24845_s24 + $0x31a] sm:$0xff] }
 0x3f3   : > { %21128 = vmatmul.mubr.msk.f32.gmra.mrb[96].mxu1 %vm631_vm1, %v2786_v37  ;;  %v9041_v37 = vld [vmem:[%s24845_s24 + $0x51] sm:$0xff] }
 0x3f4   : > { %21130 = vmatprep.mubr.msk.f32.mxu1 %vm631_vm1, %v2787_v11 }
 0x3f5   : > { %21832 = vmatmul.mubr.msk.f32.gmra.mrb[80].mxu0 %vm631_vm1, %v26735_v36  ;;  %v2789_v36 = vld [vmem:[%s24845_s24 + $0x322] sm:$0xff] }
 0x3f6   : > { %21834 = vmatprep.mubr.msk.f32.mxu0 %vm631_vm1, %v26746_v39  ;;  %v2790_v39 = vld [vmem:[%s24845_s24 + $0x32a] sm:$0xff] }
 0x3f7   : > { %21131 = vmatmul.mubr.msk.f32.gmra.mrb[98].mxu1 %vm631_vm1, %v2788_v35  ;;  %v9042_v35 = vld [vmem:[%s24845_s24 + $0x59] sm:$0xff] }
 0x3f8   : > { %21133 = vmatprep.mubr.msk.f32.mxu1 %vm631_vm1, %v2789_v36 }
 0x3f9   : > { %21835 = vmatmul.mubr.msk.f32.gmra.mrb[82].mxu0 %vm631_vm1, %v26749_v40  ;;  %v2791_v40 = vld [vmem:[%s24845_s24 + $0x332] sm:$0xff] }
 0x3fa   : > { %21837 = vmatprep.mubr.msk.f32.mxu0 %vm631_vm1, %v26760_v43  ;;  %v2792_v43 = vld [vmem:[%s24845_s24 + $0x33a] sm:$0xff] }
 0x3fb   : > { %21134 = vmatmul.mubr.msk.f32.gmra.mrb[100].mxu1 %vm631_vm1, %v2790_v39  ;;  %v9043_v39 = vld [vmem:[%s24845_s24 + $0x61] sm:$0xff] }
 0x3fc   : > { %21136 = vmatprep.mubr.msk.f32.mxu1 %vm631_vm1, %v2791_v40 }
 0x3fd   : > { %21838 = vmatmul.mubr.msk.f32.gmra.mrb[84].mxu0 %vm631_vm1, %v26763_v44  ;;  %v2793_v44 = vld [vmem:[%s24845_s24 + $0x342] sm:$0xff] }
 0x3fe   : > { %21840 = vmatprep.mubr.msk.f32.mxu0 %vm631_vm1, %v26774_v49  ;;  %v2794_v49 = vld [vmem:[%s24845_s24 + $0x34a] sm:$0xff] }
 0x3ff   : > { %21137 = vmatmul.mubr.msk.f32.gmra.mrb[102].mxu1 %vm631_vm1, %v2792_v43  ;;  %v9044_v43 = vld [vmem:[%s24845_s24 + $0x69] sm:$0xff] }
 0x400   : > { %21139 = vmatprep.mubr.msk.f32.mxu1 %vm631_vm1, %v2793_v44 }
 0x401   : > { %21841 = vmatmul.mubr.msk.f32.gmra.mrb[86].mxu0 %vm631_vm1, %v26777_v50  ;;  %v27186_v50 = vpop.f32.mrb[0].mxu1 }
 0x402   : > { %21843 = vmatprep.mubr.msk.f32.mxu0 %vm631_vm1, %v26788_v45  ;;  %v2795_v45 = vld [vmem:[%s24845_s24 + $0x352] sm:$0xff] }
 0x403   : > { %21140 = vmatmul.mubr.msk.f32.gmra.mrb[104].mxu1 %vm631_vm1, %v2794_v49  ;;  %v9045_v49 = vld [vmem:[%s24845_s24 + $0x71] sm:$0xff] }
 0x404   : > { %21142 = vmatprep.mubr.msk.f32.mxu1 %vm631_vm1, %v2795_v45  ;;  %v9046_v45 = vld [vmem:[%s24845_s24 + $0x79] sm:$0xff] }
 0x405   : > { %21844 = vmatmul.mubr.msk.f32.gmra.mrb[88].mxu0 %vm631_vm1, %v26791_v53  ;;  %v27193_v53 = vpop.f32.mrb[1].mxu1 }
 0x406   : > { %21846 = vmatprep.mubr.msk.f32.mxu0 %vm631_vm1, %v26802_v55  ;;  %v27198_v55 = vpop.f32.mrb[2].mxu1 }
 0x407   : > { %21143 = vmatmul.mubr.msk.f32.gmra.mrb[106].mxu1 %vm631_vm1, %v2796_v18 }
 0x409   : > { %21847 = vmatmul.mubr.msk.f32.gmra.mrb[90].mxu0 %vm631_vm1, %v26805_v56  ;;  %v2797_v56 = vld [vmem:[%s24845_s24 + $0x362] sm:$0xff] }
 0x40a   : > { %21849 = vmatprep.mubr.msk.f32.mxu0 %vm631_vm1, %v26816_v59  ;;  %21145 = vmatprep.mubr.msk.f32.mxu1 %vm631_vm1, %v2797_v56  ;;  %v27205_v59 = vpop.f32.mrb[3].mxu1  ;;  %v9047_v56 = vld [vmem:[%s24845_s24 + $0x81] sm:$0xff] }
 0x40b   : > { %21146 = vmatmul.mubr.msk.f32.gmra.mrb[108].mxu1 %vm631_vm1, %v2798_v23  ;;  %v27210_v26 = vpop.f32.mrb[4].mxu1 }
 0x40d   : > { %21850 = vmatmul.mubr.msk.f32.gmra.mrb[92].mxu0 %vm631_vm1, %v26819_v60  ;;  %v2799_v60 = vld [vmem:[%s24845_s24 + $0x372] sm:$0xff] }
 0x40e   : > { %21852 = vmatprep.mubr.msk.f32.mxu0 %vm631_vm1, %v26830_v62  ;;  %21148 = vmatprep.mubr.msk.f32.mxu1 %vm631_vm1, %v2799_v60  ;;  %v27217_v62 = vpop.f32.mrb[5].mxu1  ;;  %v9048_v60 = vld [vmem:[%s24845_s24 + $0x89] sm:$0xff] }
 0x40f   : > { %21149 = vmatmul.mubr.msk.f32.gmra.mrb[110].mxu1 %vm631_vm1, %v2800_v31  ;;  %v27222_v34 = vpop.f32.mrb[6].mxu1 }
 0x411   : > { %21853 = vmatmul.mubr.msk.f32.gmra.mrb[94].mxu0 %vm631_vm1, %v26833_v1  ;;  %v2801_v1 = vld [vmem:[%s24845_s24 + $0x382] sm:$0xff] }
 0x412   : > { %21855 = vmatprep.mubr.msk.f32.mxu0 %vm631_vm1, %v26844_v2  ;;  %21151 = vmatprep.mubr.msk.f32.mxu1 %vm631_vm1, %v2801_v1  ;;  %v27229_v2 = vpop.f32.mrb[7].mxu1  ;;  %v9049_v1 = vld [vmem:[%s24845_s24 + $0x91] sm:$0xff] }
 0x413   : > { %21152 = vmatmul.mubr.msk.f32.gmra.mrb[112].mxu1 %vm631_vm1, %v2802_v46  ;;  %v27234_v52 = vpop.f32.mrb[8].mxu1 }
 0x415   : > { %21856 = vmatmul.mubr.msk.f32.gmra.mrb[96].mxu0 %vm631_vm1, %v26847_v4  ;;  %v2803_v4 = vld [vmem:[%s24845_s24 + $0x392] sm:$0xff] }
 0x416   : > { %21858 = vmatprep.mubr.msk.f32.mxu0 %vm631_vm1, %v26858_v5  ;;  %21154 = vmatprep.mubr.msk.f32.mxu1 %vm631_vm1, %v2803_v4  ;;  %v27241_v5 = vpop.f32.mrb[9].mxu1  ;;  %v9050_v4 = vld [vmem:[%s24845_s24 + $0x99] sm:$0xff] }
 0x417   : > { %21155 = vmatmul.mubr.msk.f32.gmra.mrb[114].mxu1 %vm631_vm1, %v2804_v61  ;;  %v27246_v3 = vpop.f32.mrb[10].mxu1 }
 0x418   : > { %v27253_v33 = vpop.f32.mrb[11].mxu1 }
 0x419   : > { %21859 = vmatmul.mubr.msk.f32.gmra.mrb[98].mxu0 %vm631_vm1, %v26861_v8  ;;  %v2805_v8 = vld [vmem:[%s24845_s24 + $0x3a2] sm:$0xff] }
 0x41a   : > { %21861 = vmatprep.mubr.msk.f32.mxu0 %vm631_vm1, %v26872_v9  ;;  %21157 = vmatprep.mubr.msk.f32.mxu1 %vm631_vm1, %v2805_v8  ;;  %v27258_v9 = vpop.f32.mrb[12].mxu1  ;;  %v9051_v8 = vld [vmem:[%s24845_s24 + $0xa1] sm:$0xff] }
 0x41b   : > { %21158 = vmatmul.mubr.msk.f32.gmra.mrb[116].mxu1 %vm631_vm1, %v2806_v14 }
 0x41c   : > { %21160 = vmatprep.mubr.msk.f32.mxu1 %vm631_vm1, %v2807_v38  ;;  %v9052_v38 = vld [vmem:[%s24845_s24 + $0xa9] sm:$0xff] }
 0x41d   : > { %21862 = vmatmul.mubr.msk.f32.gmra.mrb[100].mxu0 %vm631_vm1, %v26875_v12  ;;  %v2808_v12 = vld [vmem:[%s24845_s24 + $0x3ba] sm:$0xff] }
 0x41e   : > { %21864 = vmatprep.mubr.msk.f32.mxu0 %vm631_vm1, %v26886_v13  ;;  %v27265_v13 = vpop.f32.mrb[13].mxu1 }
 0x41f   : > { %21161 = vmatmul.mubr.msk.f32.gmra.mrb[118].mxu1 %vm631_vm1, %v2808_v12  ;;  %v27270_v30 = vpop.f32.mrb[14].mxu1 }
 0x421   : > { %21865 = vmatmul.mubr.msk.f32.gmra.mrb[102].mxu0 %vm631_vm1, %v26889_v16  ;;  %v27274_v16 = vpop.f32.mrb[15].mxu1 }
 0x422   : > { %21867 = vmatprep.mubr.msk.f32.mxu0 %vm631_vm1, %v26900_v17  ;;  %v27278_v17 = vpop.f32.mrb[16].mxu1 }
 0x423   : > { %v27282_v41 = vpop.f32.mrb[17].mxu1 }
 0x425   : > { %21868 = vmatmul.mubr.msk.f32.gmra.mrb[104].mxu0 %vm631_vm1, %v26903_v20  ;;  %v27286_v20 = vpop.f32.mrb[18].mxu1 }
 0x426   : > { %21870 = vmatprep.mubr.msk.f32.mxu0 %vm631_vm1, %v26914_v21  ;;  %v27290_v21 = vpop.f32.mrb[19].mxu1 }
 0x429   : > { %21871 = vmatmul.mubr.msk.f32.gmra.mrb[106].mxu0 %vm631_vm1, %v26917_v24  ;;  %v7881_v24 = vld [vmem:[%s24845_s24 + $0x3c0] sm:$0xff] }
 0x42a   : > { %21873 = vmatprep.mubr.msk.f32.mxu0 %vm631_vm1, %v26928_v25  ;;  %v27295_v25 = vpop.f32.mrb[20].mxu1 }
 0x42d   : > { %21874 = vmatmul.mubr.msk.f32.gmra.mrb[108].mxu0 %vm631_vm1, %v26931_v28  ;;  %v27299_v28 = vpop.f32.mrb[21].mxu1 }
 0x42e   : > { %21876 = vmatprep.mubr.msk.f32.mxu0 %vm631_vm1, %v26942_v29  ;;  %v27303_v29 = vpop.f32.mrb[22].mxu1 }
 0x42f   : > { %v27307_v57 = vpop.f32.mrb[23].mxu1 }
 0x430   : > { %v27311_v63 = vpop.f32.mrb[24].mxu1 }
 0x431   : > { %21877 = vmatmul.mubr.msk.f32.gmra.mrb[110].mxu0 %vm631_vm1, %v26945_v32  ;;  %v7885_v32 = vld [vmem:[%s24845_s24 + $0x3e0] sm:$0xff]  ;;  %v27315_v7 = vpop.f32.mrb[25].mxu1 }
 0x432   : > { %21879 = vmatprep.mubr.msk.f32.mxu0 %vm631_vm1, %v7881_v24  ;;  %v27319_v47 = vpop.f32.mrb[26].mxu1  ;;  %v9053_v24 = vld [vmem:[%s24845_s24 + $0xb1] sm:$0xff] }
 0x433   : > { %v27323_v6 = vpop.f32.mrb[27].mxu1 }
 0x434   : > { %v27327_v42 = vpop.f32.mrb[28].mxu1 }
 0x435   : > { %21880 = vmatmul.mubr.msk.f32.gmra.mrb[112].mxu0 %vm631_vm1, %v7882_v48  ;;  %v27331_v58 = vpop.f32.mrb[29].mxu1 }
 0x436   : > { %21882 = vmatprep.mubr.msk.f32.mxu0 %vm631_vm1, %v7883_v51  ;;  %v27335_v11 = vpop.f32.mrb[30].mxu1  ;;  %v9054_v51 = vld [vmem:[%s24845_s24 + $0xb9] sm:$0xff] }
 0x437   : > { %v27341_v36 = vpop.f32.mrb[31].mxu1 }
 0x438   : > { %v27345_v40 = vpop.f32.mrb[32].mxu1 }
 0x439   : > { %21883 = vmatmul.mubr.msk.f32.gmra.mrb[114].mxu0 %vm631_vm1, %v7884_v54  ;;  %v27349_v44 = vpop.f32.mrb[33].mxu1 }
 0x43a   : > { %21885 = vmatprep.mubr.msk.f32.mxu0 %vm631_vm1, %v7885_v32  ;;  %v9055_v32 = vld [vmem:[%s24845_s24 + $0xc1] sm:$0xff] }
 0x43d   : > { %21886 = vmatmul.mubr.msk.f32.gmra.mrb[116].mxu0 %vm631_vm1, %v7886_v0 }
 0x43e   : > { %21888 = vmatprep.mubr.msk.f32.mxu0 %vm631_vm1, %v7887_v10  ;;  %v9056_v10 = vld [vmem:[%s24845_s24 + $0xc9] sm:$0xff] }
 0x441   : > { %21889 = vmatmul.mubr.msk.f32.gmra.mrb[118].mxu0 %vm631_vm1, %v7888_v15 }
 0x442   : > { %21893 = vmatprep.mubr.msk.f32.mxu0 %vm631_vm1, %v9039_v22  ;;  %v9057_v22 = vld [vmem:[%s24845_s24 + $0xd1] sm:$0xff] }
 0x445   : > { %21894 = vmatmul.mubr.msk.f32.vlgmr.msra.gmra.mrb[0].mxu0 %vm631_vm1, %v9040_v27 }
 0x446   : > { %22074 = vmatpush3.msk.msra.mxu0 %vm992_vm0, %v27043_v19  ;;  %21896 = vmatprep.mubr.msk.f32.mxu0 %vm631_vm1, %v9041_v37  ;;  %v27353_v19 = vpop.f32.mrb[34].mxu1  ;;  %v9058_v37 = vld [vmem:[%s24845_s24 + $0xd9] sm:$0xff] }
 0x447   : > { %v27357_v18 = vpop.f32.mrb[35].mxu1 }
 0x448   : > { %v27361_v23 = vpop.f32.mrb[36].mxu1 }
 0x449   : > { %21897 = vmatmul.mubr.msk.f32.gmra.mrb[2].mxu0 %vm631_vm1, %v9042_v35  ;;  %v27365_v31 = vpop.f32.mrb[37].mxu1 }
 0x44a   : > { %21899 = vmatprep.mubr.msk.f32.mxu0 %vm631_vm1, %v9043_v39  ;;  %v27369_v46 = vpop.f32.mrb[38].mxu1  ;;  %v9059_v39 = vld [vmem:[%s24845_s24 + $0xe1] sm:$0xff] }
 0x44b   : > { %v27373_v61 = vpop.f32.mrb[39].mxu1 }
 0x44c   : > { %v27377_v14 = vpop.f32.mrb[40].mxu1 }
 0x44d   : > { %21900 = vmatmul.mubr.msk.f32.gmra.mrb[4].mxu0 %vm631_vm1, %v9044_v43  ;;  %v27381_v12 = vpop.f32.mrb[41].mxu1 }
 0x44e   : > { %21902 = vmatprep.mubr.msk.f32.mxu0 %vm631_vm1, %v9045_v49  ;;  %v27385_v48 = vpop.f32.mrb[42].mxu1  ;;  %v9060_v49 = vld [vmem:[%s24845_s24 + $0xe9] sm:$0xff] }
 0x44f   : > { %v27389_v54 = vpop.f32.mrb[43].mxu1 }
 0x450   : > { %v27393_v0 = vpop.f32.mrb[44].mxu1 }
 0x451   : > { %21903 = vmatmul.mubr.msk.f32.gmra.mrb[6].mxu0 %vm631_vm1, %v9046_v45  ;;  %v27397_v15 = vpop.f32.mrb[45].mxu1 }
 0x452   : > { %21905 = vmatprep.mubr.msk.f32.mxu0 %vm631_vm1, %v9047_v56  ;;  %v27401_v27 = vpop.f32.mrb[46].mxu1  ;;  %v9061_v56 = vld [vmem:[%s24845_s24 + $0xf1] sm:$0xff] }
 0x453   : > { %v27405_v35 = vpop.f32.mrb[47].mxu1 }
 0x454   : > { %v27409_v43 = vpop.f32.mrb[48].mxu1 }
 0x455   : > { %21906 = vmatmul.mubr.msk.f32.gmra.mrb[8].mxu0 %vm631_vm1, %v9048_v60  ;;  %v27413_v45 = vpop.f32.mrb[49].mxu1  ;;  %v9062_v60 = vld [vmem:[%s24845_s24 + $0xf9] sm:$0xff] }
 0x456   : > { %21908 = vmatprep.mubr.msk.f32.mxu0 %vm631_vm1, %v9049_v1  ;;  %30533 = vst [vmem:[#allocation11_spill] sm:$0xff] %v27413_v45  ;;  %v9063_v1 = vld [vmem:[%s24845_s24 + $0x101] sm:$0xff] }
 0x459   : > { %21909 = vmatmul.mubr.msk.f32.gmra.mrb[10].mxu0 %vm631_vm1, %v9050_v4 }
 0x45a   : > { %21911 = vmatprep.mubr.msk.f32.mxu0 %vm631_vm1, %v9051_v8 }
 0x45d   : > { %21912 = vmatmul.mubr.msk.f32.gmra.mrb[12].mxu0 %vm631_vm1, %v9052_v38  ;;  %v9064_v38 = vld [vmem:[%s24845_s24 + $0x109] sm:$0xff] }
 0x45e   : > { %21914 = vmatprep.mubr.msk.f32.mxu0 %vm631_vm1, %v9053_v24  ;;  %v9065_v24 = vld [vmem:[%s24845_s24 + $0x111] sm:$0xff] }
 0x461   : > { %21915 = vmatmul.mubr.msk.f32.gmra.mrb[14].mxu0 %vm631_vm1, %v9054_v51 }
 0x462   : > { %21917 = vmatprep.mubr.msk.f32.mxu0 %vm631_vm1, %v9055_v32 }
 0x465   : > { %21918 = vmatmul.mubr.msk.f32.gmra.mrb[16].mxu0 %vm631_vm1, %v9056_v10  ;;  %v9066_v10 = vld [vmem:[%s24845_s24 + $0x119] sm:$0xff] }
 0x466   : > { %21920 = vmatprep.mubr.msk.f32.mxu0 %vm631_vm1, %v9057_v22  ;;  %v9067_v22 = vld [vmem:[%s24845_s24 + $0x121] sm:$0xff] }
 0x469   : > { %21921 = vmatmul.mubr.msk.f32.gmra.mrb[18].mxu0 %vm631_vm1, %v9058_v37 }
 0x46a   : > { %21923 = vmatprep.mubr.msk.f32.mxu0 %vm631_vm1, %v9059_v39  ;;  %v27420_v4 = vpop.f32.mrb[50].mxu1 }
 0x46b   : > { %30534 = vst [vmem:[#allocation12_spill] sm:$0xff] %v27420_v4  ;;  %v27422_v8 = vpop.f32.mrb[51].mxu1 }
 0x46c   : > { %30535 = vst [vmem:[#allocation13_spill] sm:$0xff] %v27422_v8 }
 0x46d   : > { %21924 = vmatmul.mubr.msk.f32.gmra.mrb[20].mxu0 %vm631_vm1, %v9060_v49  ;;  %v9068_v49 = vld [vmem:[%s24845_s24 + $0x129] sm:$0xff] }
 0x46e   : > { %21926 = vmatprep.mubr.msk.f32.mxu0 %vm631_vm1, %v9061_v56  ;;  %v27428_v51 = vpop.f32.mrb[52].mxu1  ;;  %v9069_v56 = vld [vmem:[%s24845_s24 + $0x131] sm:$0xff] }
 0x46f   : > { %30536 = vst [vmem:[#allocation14_spill] sm:$0xff] %v27428_v51  ;;  %v27430_v32 = vpop.f32.mrb[53].mxu1 }
 0x470   : > { %30537 = vst [vmem:[#allocation15_spill] sm:$0xff] %v27430_v32  ;;  %v24654_v32 = vld [vmem:[%s24845_s24 + $0x3ba] sm:$0xff] }
 0x471   : > { %21927 = vmatmul.mubr.msk.f32.gmra.mrb[22].mxu0 %vm631_vm1, %v9062_v60 }
 0x472   : > { %21929 = vmatprep.mubr.msk.f32.mxu0 %vm631_vm1, %v9063_v1  ;;  %v27436_v37 = vpop.f32.mrb[54].mxu1 }
 0x473   : > { %30538 = vst [vmem:[#allocation16_spill] sm:$0xff] %v27436_v37  ;;  %v27438_v39 = vpop.f32.mrb[55].mxu1 }
 0x474   : > { %30539 = vst [vmem:[#allocation17_spill] sm:$0xff] %v27438_v39 }
 0x475   : > { %21930 = vmatmul.mubr.msk.f32.gmra.mrb[24].mxu0 %vm631_vm1, %v9064_v38  ;;  %v9070_v38 = vld [vmem:[%s24845_s24 + $0x139] sm:$0xff] }
 0x476   : > { %21932 = vmatprep.mubr.msk.f32.mxu0 %vm631_vm1, %v9065_v24  ;;  %v27444_v60 = vpop.f32.mrb[56].mxu1  ;;  %v9071_v24 = vld [vmem:[%s24845_s24 + $0x141] sm:$0xff] }
 0x477   : > { %30540 = vst [vmem:[#allocation18_spill] sm:$0xff] %v27444_v60  ;;  %v27446_v1 = vpop.f32.mrb[57].mxu1  ;;  %v9073_v60 = vld [vmem:[%s24845_s24 + $0x151] sm:$0xff] }
 0x478   : > { %30541 = vst [vmem:[#allocation19_spill] sm:$0xff] %v27446_v1 }
 0x479   : > { %21933 = vmatmul.mubr.msk.f32.gmra.mrb[26].mxu0 %vm631_vm1, %v9066_v10 }
 0x47a   : > { %21935 = vmatprep.mubr.msk.f32.mxu0 %vm631_vm1, %v9067_v22  ;;  %v27452_v39 = vpop.f32.mrb[58].mxu1  ;;  %v9072_v22 = vld [vmem:[%s24845_s24 + $0x149] sm:$0xff] }
 0x47b   : > { %30542 = vst [vmem:[#allocation20_spill] sm:$0xff] %v27452_v39  ;;  %v27454_v10 = vpop.f32.mrb[59].mxu1  ;;  %v9075_v39 = vld [vmem:[%s24845_s24 + $0x161] sm:$0xff] }
 0x47c   : > { %30543 = vst [vmem:[#allocation21_spill] sm:$0xff] %v27454_v10 }
 0x47d   : > { %21936 = vmatmul.mubr.msk.f32.gmra.mrb[28].mxu0 %vm631_vm1, %v9068_v49 }
 0x47e   : > { %21938 = vmatprep.mubr.msk.f32.mxu0 %vm631_vm1, %v9069_v56  ;;  %v27460_v1 = vpop.f32.mrb[60].mxu1  ;;  %v9074_v56 = vld [vmem:[%s24845_s24 + $0x159] sm:$0xff] }
 0x47f   : > { %30544 = vst [vmem:[#allocation22_spill] sm:$0xff] %v27460_v1  ;;  %v27462_v49 = vpop.f32.mrb[61].mxu1  ;;  %v9077_v1 = vld [vmem:[%s24845_s24 + $0x171] sm:$0xff] }
 0x480   : > { %30545 = vst [vmem:[#allocation23_spill] sm:$0xff] %v27462_v49 }
 0x481   : > { %21939 = vmatmul.mubr.msk.f32.gmra.mrb[30].mxu0 %vm631_vm1, %v9070_v38 }
 0x482   : > { %21941 = vmatprep.mubr.msk.f32.mxu0 %vm631_vm1, %v9071_v24  ;;  %v27468_v10 = vpop.f32.mrb[62].mxu1  ;;  %v9076_v24 = vld [vmem:[%s24845_s24 + $0x169] sm:$0xff] }
 0x483   : > { %30546 = vst [vmem:[#allocation24_spill] sm:$0xff] %v27468_v10  ;;  %v27470_v38 = vpop.f32.mrb[63].mxu1  ;;  %v9079_v10 = vld [vmem:[%s24845_s24 + $0x181] sm:$0xff] }
 0x484   : > { %30547 = vst [vmem:[#allocation25_spill] sm:$0xff] %v27470_v38 }
 0x485   : > { %21942 = vmatmul.mubr.msk.f32.gmra.mrb[32].mxu0 %vm631_vm1, %v9072_v22 }
 0x486   : > { %21944 = vmatprep.mubr.msk.f32.mxu0 %vm631_vm1, %v9073_v60  ;;  %v27476_v49 = vpop.f32.mrb[64].mxu1  ;;  %v9078_v60 = vld [vmem:[%s24845_s24 + $0x179] sm:$0xff] }
 0x487   : > { %30548 = vst [vmem:[#allocation26_spill] sm:$0xff] %v27476_v49  ;;  %v27478_v22 = vpop.f32.mrb[65].mxu1  ;;  %v9081_v49 = vld [vmem:[%s24845_s24 + $0x191] sm:$0xff] }
 0x488   : > { %30549 = vst [vmem:[#allocation27_spill] sm:$0xff] %v27478_v22 }
 0x489   : > { %21945 = vmatmul.mubr.msk.f32.gmra.mrb[34].mxu0 %vm631_vm1, %v9074_v56 }
 0x48a   : > { %21947 = vmatprep.mubr.msk.f32.mxu0 %vm631_vm1, %v9075_v39  ;;  %v27484_v38 = vpop.f32.mrb[66].mxu1  ;;  %v9080_v39 = vld [vmem:[%s24845_s24 + $0x189] sm:$0xff] }
 0x48b   : > { %30550 = vst [vmem:[#allocation28_spill] sm:$0xff] %v27484_v38  ;;  %v27486_v56 = vpop.f32.mrb[67].mxu1  ;;  %v9083_v38 = vld [vmem:[%s24845_s24 + $0x1a1] sm:$0xff] }
 0x48c   : > { %30551 = vst [vmem:[#allocation29_spill] sm:$0xff] %v27486_v56 }
 0x48d   : > { %21948 = vmatmul.mubr.msk.f32.gmra.mrb[36].mxu0 %vm631_vm1, %v9076_v24 }
 0x48e   : > { %21950 = vmatprep.mubr.msk.f32.mxu0 %vm631_vm1, %v9077_v1  ;;  %v27492_v22 = vpop.f32.mrb[68].mxu1  ;;  %v9082_v1 = vld [vmem:[%s24845_s24 + $0x199] sm:$0xff] }
 0x48f   : > { %30552 = vst [vmem:[#allocation30_spill] sm:$0xff] %v27492_v22  ;;  %v27494_v24 = vpop.f32.mrb[69].mxu1  ;;  %v9085_v22 = vld [vmem:[%s24845_s24 + $0x1b1] sm:$0xff] }
 0x490   : > { %30553 = vst [vmem:[#allocation31_spill] sm:$0xff] %v27494_v24 }
 0x491   : > { %21951 = vmatmul.mubr.msk.f32.gmra.mrb[38].mxu0 %vm631_vm1, %v9078_v60 }
 0x492   : > { %21953 = vmatprep.mubr.msk.f32.mxu0 %vm631_vm1, %v9079_v10  ;;  %v27500_v56 = vpop.f32.mrb[70].mxu1  ;;  %v9084_v10 = vld [vmem:[%s24845_s24 + $0x1a9] sm:$0xff] }
 0x493   : > { %30554 = vst [vmem:[#allocation32_spill] sm:$0xff] %v27500_v56  ;;  %v27502_v60 = vpop.f32.mrb[71].mxu1  ;;  %v9087_v56 = vld [vmem:[%s24845_s24 + $0x1c1] sm:$0xff] }
 0x494   : > { %30555 = vst [vmem:[#allocation33_spill] sm:$0xff] %v27502_v60 }
 0x495   : > { %21954 = vmatmul.mubr.msk.f32.gmra.mrb[40].mxu0 %vm631_vm1, %v9080_v39 }
 0x496   : > { %21956 = vmatprep.mubr.msk.f32.mxu0 %vm631_vm1, %v9081_v49  ;;  %v27508_v24 = vpop.f32.mrb[72].mxu1  ;;  %v9086_v49 = vld [vmem:[%s24845_s24 + $0x1b9] sm:$0xff] }
 0x497   : > { %30556 = vst [vmem:[#allocation34_spill] sm:$0xff] %v27508_v24  ;;  %v27510_v39 = vpop.f32.mrb[73].mxu1  ;;  %v9089_v24 = vld [vmem:[%s24845_s24 + $0x1d1] sm:$0xff] }
 0x498   : > { %30557 = vst [vmem:[#allocation35_spill] sm:$0xff] %v27510_v39 }
 0x499   : > { %21957 = vmatmul.mubr.msk.f32.gmra.mrb[42].mxu0 %vm631_vm1, %v9082_v1 }
 0x49a   : > { %21959 = vmatprep.mubr.msk.f32.mxu0 %vm631_vm1, %v9083_v38  ;;  %v27516_v60 = vpop.f32.mrb[74].mxu1  ;;  %v9088_v38 = vld [vmem:[%s24845_s24 + $0x1c9] sm:$0xff] }
 0x49b   : > { %30558 = vst [vmem:[#allocation36_spill] sm:$0xff] %v27516_v60  ;;  %v27518_v1 = vpop.f32.mrb[75].mxu1  ;;  %v9091_v60 = vld [vmem:[%s24845_s24 + $0x1e1] sm:$0xff] }
 0x49c   : > { %30559 = vst [vmem:[#allocation37_spill] sm:$0xff] %v27518_v1 }
 0x49d   : > { %21960 = vmatmul.mubr.msk.f32.gmra.mrb[44].mxu0 %vm631_vm1, %v9084_v10 }
 0x49e   : > { %21962 = vmatprep.mubr.msk.f32.mxu0 %vm631_vm1, %v9085_v22  ;;  %v27524_v39 = vpop.f32.mrb[76].mxu1  ;;  %v9090_v22 = vld [vmem:[%s24845_s24 + $0x1d9] sm:$0xff] }
 0x49f   : > { %30560 = vst [vmem:[#allocation38_spill] sm:$0xff] %v27524_v39  ;;  %v27526_v10 = vpop.f32.mrb[77].mxu1  ;;  %v9093_v39 = vld [vmem:[%s24845_s24 + $0x1f1] sm:$0xff] }
 0x4a0   : > { %30561 = vst [vmem:[#allocation39_spill] sm:$0xff] %v27526_v10 }
 0x4a1   : > { %21963 = vmatmul.mubr.msk.f32.gmra.mrb[46].mxu0 %vm631_vm1, %v9086_v49 }
 0x4a2   : > { %21965 = vmatprep.mubr.msk.f32.mxu0 %vm631_vm1, %v9087_v56  ;;  %v27532_v1 = vpop.f32.mrb[78].mxu1  ;;  %v9092_v56 = vld [vmem:[%s24845_s24 + $0x1e9] sm:$0xff] }
 0x4a3   : > { %30562 = vst [vmem:[#allocation40_spill] sm:$0xff] %v27532_v1  ;;  %v27534_v49 = vpop.f32.mrb[79].mxu1  ;;  %v9095_v1 = vld [vmem:[%s24845_s24 + $0x201] sm:$0xff] }
 0x4a4   : > { %30563 = vst [vmem:[#allocation41_spill] sm:$0xff] %v27534_v49 }
 0x4a5   : > { %21966 = vmatmul.mubr.msk.f32.gmra.mrb[48].mxu0 %vm631_vm1, %v9088_v38 }
 0x4a6   : > { %21968 = vmatprep.mubr.msk.f32.mxu0 %vm631_vm1, %v9089_v24  ;;  %v27540_v10 = vpop.f32.mrb[80].mxu1  ;;  %v9094_v24 = vld [vmem:[%s24845_s24 + $0x1f9] sm:$0xff] }
 0x4a7   : > { %30564 = vst [vmem:[#allocation42_spill] sm:$0xff] %v27540_v10  ;;  %v27542_v38 = vpop.f32.mrb[81].mxu1  ;;  %v9097_v10 = vld [vmem:[%s24845_s24 + $0x211] sm:$0xff] }
 0x4a8   : > { %30565 = vst [vmem:[#allocation43_spill] sm:$0xff] %v27542_v38 }
 0x4a9   : > { %21969 = vmatmul.mubr.msk.f32.gmra.mrb[50].mxu0 %vm631_vm1, %v9090_v22 }
 0x4aa   : > { %21971 = vmatprep.mubr.msk.f32.mxu0 %vm631_vm1, %v9091_v60  ;;  %v27548_v49 = vpop.f32.mrb[82].mxu1  ;;  %v9096_v60 = vld [vmem:[%s24845_s24 + $0x209] sm:$0xff] }
 0x4ab   : > { %30566 = vst [vmem:[#allocation44_spill] sm:$0xff] %v27548_v49  ;;  %v27550_v22 = vpop.f32.mrb[83].mxu1  ;;  %v9099_v49 = vld [vmem:[%s24845_s24 + $0x221] sm:$0xff] }
 0x4ac   : > { %30567 = vst [vmem:[#allocation45_spill] sm:$0xff] %v27550_v22 }
 0x4ad   : > { %21972 = vmatmul.mubr.msk.f32.gmra.mrb[52].mxu0 %vm631_vm1, %v9092_v56 }
 0x4ae   : > { %21974 = vmatprep.mubr.msk.f32.mxu0 %vm631_vm1, %v9093_v39  ;;  %v27556_v38 = vpop.f32.mrb[84].mxu1  ;;  %v9098_v39 = vld [vmem:[%s24845_s24 + $0x219] sm:$0xff] }
 0x4af   : > { %30568 = vst [vmem:[#allocation46_spill] sm:$0xff] %v27556_v38  ;;  %v27558_v56 = vpop.f32.mrb[85].mxu1  ;;  %v9101_v38 = vld [vmem:[%s24845_s24 + $0x231] sm:$0xff] }
 0x4b0   : > { %30569 = vst [vmem:[#allocation47_spill] sm:$0xff] %v27558_v56 }
 0x4b1   : > { %21975 = vmatmul.mubr.msk.f32.gmra.mrb[54].mxu0 %vm631_vm1, %v9094_v24 }
 0x4b2   : > { %21977 = vmatprep.mubr.msk.f32.mxu0 %vm631_vm1, %v9095_v1  ;;  %v27564_v22 = vpop.f32.mrb[86].mxu1  ;;  %v9100_v1 = vld [vmem:[%s24845_s24 + $0x229] sm:$0xff] }
 0x4b3   : > { %30570 = vst [vmem:[#allocation48_spill] sm:$0xff] %v27564_v22  ;;  %v27566_v24 = vpop.f32.mrb[87].mxu1  ;;  %v9103_v22 = vld [vmem:[%s24845_s24 + $0x241] sm:$0xff] }
 0x4b4   : > { %30571 = vst [vmem:[#allocation49_spill] sm:$0xff] %v27566_v24 }
 0x4b5   : > { %21978 = vmatmul.mubr.msk.f32.gmra.mrb[56].mxu0 %vm631_vm1, %v9096_v60 }
 0x4b6   : > { %21980 = vmatprep.mubr.msk.f32.mxu0 %vm631_vm1, %v9097_v10  ;;  %v27572_v56 = vpop.f32.mrb[88].mxu1  ;;  %v9102_v10 = vld [vmem:[%s24845_s24 + $0x239] sm:$0xff] }
 0x4b7   : > { %30572 = vst [vmem:[#allocation50_spill] sm:$0xff] %v27572_v56  ;;  %v27574_v60 = vpop.f32.mrb[89].mxu1  ;;  %v9105_v56 = vld [vmem:[%s24845_s24 + $0x251] sm:$0xff] }
 0x4b8   : > { %30573 = vst [vmem:[#allocation51_spill] sm:$0xff] %v27574_v60 }
 0x4b9   : > { %21981 = vmatmul.mubr.msk.f32.gmra.mrb[58].mxu0 %vm631_vm1, %v9098_v39 }
 0x4ba   : > { %21983 = vmatprep.mubr.msk.f32.mxu0 %vm631_vm1, %v9099_v49  ;;  %v27580_v24 = vpop.f32.mrb[90].mxu1  ;;  %v9104_v49 = vld [vmem:[%s24845_s24 + $0x249] sm:$0xff] }
 0x4bb   : > { %30574 = vst [vmem:[#allocation52_spill] sm:$0xff] %v27580_v24  ;;  %v27582_v39 = vpop.f32.mrb[91].mxu1  ;;  %v9107_v24 = vld [vmem:[%s24845_s24 + $0x261] sm:$0xff] }
 0x4bc   : > { %30575 = vst [vmem:[#allocation53_spill] sm:$0xff] %v27582_v39 }
 0x4bd   : > { %21984 = vmatmul.mubr.msk.f32.gmra.mrb[60].mxu0 %vm631_vm1, %v9100_v1 }
 0x4be   : > { %21986 = vmatprep.mubr.msk.f32.mxu0 %vm631_vm1, %v9101_v38  ;;  %v27588_v60 = vpop.f32.mrb[92].mxu1  ;;  %v9106_v38 = vld [vmem:[%s24845_s24 + $0x259] sm:$0xff] }
 0x4bf   : > { %30576 = vst [vmem:[#allocation54_spill] sm:$0xff] %v27588_v60  ;;  %v27590_v1 = vpop.f32.mrb[93].mxu1  ;;  %v9109_v60 = vld [vmem:[%s24845_s24 + $0x271] sm:$0xff] }
 0x4c0   : > { %30577 = vst [vmem:[#allocation55_spill] sm:$0xff] %v27590_v1 }
 0x4c1   : > { %21987 = vmatmul.mubr.msk.f32.gmra.mrb[62].mxu0 %vm631_vm1, %v9102_v10 }
 0x4c2   : > { %21989 = vmatprep.mubr.msk.f32.mxu0 %vm631_vm1, %v9103_v22  ;;  %v27596_v39 = vpop.f32.mrb[94].mxu1  ;;  %v9108_v22 = vld [vmem:[%s24845_s24 + $0x269] sm:$0xff] }
 0x4c3   : > { %30578 = vst [vmem:[#allocation56_spill] sm:$0xff] %v27596_v39  ;;  %v27598_v10 = vpop.f32.mrb[95].mxu1  ;;  %v9111_v39 = vld [vmem:[%s24845_s24 + $0x281] sm:$0xff] }
 0x4c4   : > { %30579 = vst [vmem:[#allocation57_spill] sm:$0xff] %v27598_v10 }
 0x4c5   : > { %21990 = vmatmul.mubr.msk.f32.gmra.mrb[64].mxu0 %vm631_vm1, %v9104_v49 }
 0x4c6   : > { %21992 = vmatprep.mubr.msk.f32.mxu0 %vm631_vm1, %v9105_v56  ;;  %v27604_v1 = vpop.f32.mrb[96].mxu1  ;;  %v9110_v56 = vld [vmem:[%s24845_s24 + $0x279] sm:$0xff] }
 0x4c7   : > { %30580 = vst [vmem:[#allocation58_spill] sm:$0xff] %v27604_v1  ;;  %v27606_v49 = vpop.f32.mrb[97].mxu1  ;;  %v9113_v1 = vld [vmem:[%s24845_s24 + $0x291] sm:$0xff] }
 0x4c8   : > { %30581 = vst [vmem:[#allocation59_spill] sm:$0xff] %v27606_v49 }
 0x4c9   : > { %21993 = vmatmul.mubr.msk.f32.gmra.mrb[66].mxu0 %vm631_vm1, %v9106_v38 }
 0x4ca   : > { %21995 = vmatprep.mubr.msk.f32.mxu0 %vm631_vm1, %v9107_v24  ;;  %v27612_v10 = vpop.f32.mrb[98].mxu1  ;;  %v9112_v24 = vld [vmem:[%s24845_s24 + $0x289] sm:$0xff] }
 0x4cb   : > { %30582 = vst [vmem:[#allocation60_spill] sm:$0xff] %v27612_v10  ;;  %v27614_v38 = vpop.f32.mrb[99].mxu1  ;;  %v9115_v10 = vld [vmem:[%s24845_s24 + $0x2a1] sm:$0xff] }
 0x4cc   : > { %30583 = vst [vmem:[#allocation61_spill] sm:$0xff] %v27614_v38 }
 0x4cd   : > { %21996 = vmatmul.mubr.msk.f32.gmra.mrb[68].mxu0 %vm631_vm1, %v9108_v22 }
 0x4ce   : > { %21998 = vmatprep.mubr.msk.f32.mxu0 %vm631_vm1, %v9109_v60  ;;  %v27620_v49 = vpop.f32.mrb[100].mxu1  ;;  %v9114_v60 = vld [vmem:[%s24845_s24 + $0x299] sm:$0xff] }
 0x4cf   : > { %30584 = vst [vmem:[#allocation62_spill] sm:$0xff] %v27620_v49  ;;  %v27622_v22 = vpop.f32.mrb[101].mxu1  ;;  %v9117_v49 = vld [vmem:[%s24845_s24 + $0x2b1] sm:$0xff] }
 0x4d0   : > { %30585 = vst [vmem:[#allocation63_spill] sm:$0xff] %v27622_v22 }
 0x4d1   : > { %21999 = vmatmul.mubr.msk.f32.gmra.mrb[70].mxu0 %vm631_vm1, %v9110_v56 }
 0x4d2   : > { %22001 = vmatprep.mubr.msk.f32.mxu0 %vm631_vm1, %v9111_v39  ;;  %v27628_v38 = vpop.f32.mrb[102].mxu1  ;;  %v9116_v39 = vld [vmem:[%s24845_s24 + $0x2a9] sm:$0xff] }
 0x4d3   : > { %30586 = vst [vmem:[#allocation64_spill] sm:$0xff] %v27628_v38  ;;  %v27630_v56 = vpop.f32.mrb[103].mxu1  ;;  %v9119_v38 = vld [vmem:[%s24845_s24 + $0x2c1] sm:$0xff] }
 0x4d4   : > { %30587 = vst [vmem:[#allocation65_spill] sm:$0xff] %v27630_v56 }
 0x4d5   : > { %22002 = vmatmul.mubr.msk.f32.gmra.mrb[72].mxu0 %vm631_vm1, %v9112_v24 }
 0x4d6   : > { %22004 = vmatprep.mubr.msk.f32.mxu0 %vm631_vm1, %v9113_v1  ;;  %v27636_v22 = vpop.f32.mrb[104].mxu1  ;;  %v9118_v1 = vld [vmem:[%s24845_s24 + $0x2b9] sm:$0xff] }
 0x4d7   : > { %30588 = vst [vmem:[#allocation66_spill] sm:$0xff] %v27636_v22  ;;  %v27638_v24 = vpop.f32.mrb[105].mxu1  ;;  %v9121_v22 = vld [vmem:[%s24845_s24 + $0x2d1] sm:$0xff] }
 0x4d8   : > { %30589 = vst [vmem:[#allocation67_spill] sm:$0xff] %v27638_v24 }
 0x4d9   : > { %22005 = vmatmul.mubr.msk.f32.gmra.mrb[74].mxu0 %vm631_vm1, %v9114_v60 }
 0x4da   : > { %22007 = vmatprep.mubr.msk.f32.mxu0 %vm631_vm1, %v9115_v10  ;;  %v27644_v56 = vpop.f32.mrb[106].mxu1  ;;  %v9120_v10 = vld [vmem:[%s24845_s24 + $0x2c9] sm:$0xff] }
 0x4db   : > { %30590 = vst [vmem:[#allocation68_spill] sm:$0xff] %v27644_v56  ;;  %v27646_v60 = vpop.f32.mrb[107].mxu1  ;;  %v9123_v56 = vld [vmem:[%s24845_s24 + $0x2e1] sm:$0xff] }
 0x4dc   : > { %30591 = vst [vmem:[#allocation69_spill] sm:$0xff] %v27646_v60 }
 0x4dd   : > { %22008 = vmatmul.mubr.msk.f32.gmra.mrb[76].mxu0 %vm631_vm1, %v9116_v39 }
 0x4de   : > { %22010 = vmatprep.mubr.msk.f32.mxu0 %vm631_vm1, %v9117_v49  ;;  %v27652_v24 = vpop.f32.mrb[108].mxu1  ;;  %v9122_v49 = vld [vmem:[%s24845_s24 + $0x2d9] sm:$0xff] }
 0x4df   : > { %30592 = vst [vmem:[#allocation70_spill] sm:$0xff] %v27652_v24  ;;  %v27654_v39 = vpop.f32.mrb[109].mxu1  ;;  %v9125_v24 = vld [vmem:[%s24845_s24 + $0x2f1] sm:$0xff] }
 0x4e0   : > { %30593 = vst [vmem:[#allocation71_spill] sm:$0xff] %v27654_v39 }
 0x4e1   : > { %22011 = vmatmul.mubr.msk.f32.gmra.mrb[78].mxu0 %vm631_vm1, %v9118_v1 }
 0x4e2   : > { %22013 = vmatprep.mubr.msk.f32.mxu0 %vm631_vm1, %v9119_v38  ;;  %v27660_v60 = vpop.f32.mrb[110].mxu1  ;;  %v9124_v38 = vld [vmem:[%s24845_s24 + $0x2e9] sm:$0xff] }
 0x4e3   : > { %30594 = vst [vmem:[#allocation72_spill] sm:$0xff] %v27660_v60  ;;  %v27662_v1 = vpop.f32.mrb[111].mxu1  ;;  %v9127_v60 = vld [vmem:[%s24845_s24 + $0x301] sm:$0xff] }
 0x4e4   : > { %30595 = vst [vmem:[#allocation73_spill] sm:$0xff] %v27662_v1 }
 0x4e5   : > { %22014 = vmatmul.mubr.msk.f32.gmra.mrb[80].mxu0 %vm631_vm1, %v9120_v10 }
 0x4e6   : > { %22016 = vmatprep.mubr.msk.f32.mxu0 %vm631_vm1, %v9121_v22  ;;  %v27668_v39 = vpop.f32.mrb[112].mxu1  ;;  %v9126_v22 = vld [vmem:[%s24845_s24 + $0x2f9] sm:$0xff] }
 0x4e7   : > { %30596 = vst [vmem:[#allocation74_spill] sm:$0xff] %v27668_v39  ;;  %v27670_v10 = vpop.f32.mrb[113].mxu1 }
 0x4e8   : > { %30597 = vst [vmem:[#allocation75_spill] sm:$0xff] %v27670_v10  ;;  %v9129_v10 = vld [vmem:[%s24845_s24 + $0x311] sm:$0xff] }
 0x4e9   : > { %22017 = vmatmul.mubr.msk.f32.gmra.mrb[82].mxu0 %vm631_vm1, %v9122_v49 }
 0x4ea   : > { %22019 = vmatprep.mubr.msk.f32.mxu0 %vm631_vm1, %v9123_v56  ;;  %v27676_v1 = vpop.f32.mrb[114].mxu1  ;;  %v9128_v56 = vld [vmem:[%s24845_s24 + $0x309] sm:$0xff] }
 0x4eb   : > { %30598 = vst [vmem:[#allocation76_spill] sm:$0xff] %v27676_v1  ;;  %v27678_v49 = vpop.f32.mrb[115].mxu1 }
 0x4ec   : > { %30599 = vst [vmem:[#allocation77_spill] sm:$0xff] %v27678_v49  ;;  %v9131_v49 = vld [vmem:[%s24845_s24 + $0x321] sm:$0xff] }
 0x4ed   : > { %22020 = vmatmul.mubr.msk.f32.gmra.mrb[84].mxu0 %vm631_vm1, %v9124_v38 }
 0x4ee   : > { %22022 = vmatprep.mubr.msk.f32.mxu0 %vm631_vm1, %v9125_v24  ;;  %v27684_v39 = vpop.f32.mrb[116].mxu1  ;;  %v9130_v24 = vld [vmem:[%s24845_s24 + $0x319] sm:$0xff] }
 0x4ef   : > { %30600 = vst [vmem:[#allocation78_spill] sm:$0xff] %v27684_v39  ;;  %v27686_v38 = vpop.f32.mrb[117].mxu1  ;;  %v24651_v39 = vld [vmem:[%s24845_s24 + $0x3a2] sm:$0xff] }
 0x4f0   : > { %30601 = vst [vmem:[#allocation79_spill] sm:$0xff] %v27686_v38  ;;  %v9133_v38 = vld [vmem:[%s24845_s24 + $0x331] sm:$0xff] }
 0x4f1   : > { %22023 = vmatmul.mubr.msk.f32.gmra.mrb[86].mxu0 %vm631_vm1, %v9126_v22  ;;  %v9132_v22 = vld [vmem:[%s24845_s24 + $0x329] sm:$0xff] }
 0x4f2   : > { %22025 = vmatprep.mubr.msk.f32.mxu0 %vm631_vm1, %v9127_v60  ;;  %v27692_v1 = vpop.f32.mrb[118].mxu1 }
 0x4f3   : > { %30602 = vst [vmem:[#allocation80_spill] sm:$0xff] %v27692_v1  ;;  %v27694_v60 = vpop.f32.mrb[119].mxu1  ;;  %v10371_v1 = vld [vmem:[%s24845_s24 + $0x232] sm:$0xff] }
 0x4f4   : > { %30603 = vst [vmem:[#allocation81_spill] sm:$0xff] %v27694_v60  ;;  %v9136_v60 = vld [vmem:[%s24845_s24 + $0x349] sm:$0xff] }
 0x4f5   : > { %22026 = vmatmul.mubr.msk.f32.gmra.mrb[88].mxu0 %vm631_vm1, %v9128_v56  ;;  %v9135_v56 = vld [vmem:[%s24845_s24 + $0x341] sm:$0xff] }
 0x4f6   : > { %22028 = vmatprep.mubr.msk.f32.mxu0 %vm631_vm1, %v9129_v10  ;;  %v9134_v10 = vld [vmem:[%s24845_s24 + $0x339] sm:$0xff] }
 0x4f9   : > { %22029 = vmatmul.mubr.msk.f32.gmra.mrb[90].mxu0 %vm631_vm1, %v9130_v24  ;;  %v9137_v24 = vld [vmem:[%s24845_s24 + $0x351] sm:$0xff] }
 0x4fa   : > { %22031 = vmatprep.mubr.msk.f32.mxu0 %vm631_vm1, %v9131_v49  ;;  %v9138_v49 = vld [vmem:[%s24845_s24 + $0x359] sm:$0xff] }
 0x4fd   : > { %22032 = vmatmul.mubr.msk.f32.gmra.mrb[92].mxu0 %vm631_vm1, %v9132_v22  ;;  %v9139_v22 = vld [vmem:[%s24845_s24 + $0x361] sm:$0xff] }
 0x4fe   : > { %22034 = vmatprep.mubr.msk.f32.mxu0 %vm631_vm1, %v9133_v38  ;;  %v9140_v38 = vld [vmem:[%s24845_s24 + $0x369] sm:$0xff] }
 0x501   : > { %22035 = vmatmul.mubr.msk.f32.gmra.mrb[94].mxu0 %vm631_vm1, %v9134_v10  ;;  %v9141_v10 = vld [vmem:[%s24845_s24 + $0x371] sm:$0xff] }
 0x502   : > { %22037 = vmatprep.mubr.msk.f32.mxu0 %vm631_vm1, %v9135_v56  ;;  %v9142_v56 = vld [vmem:[%s24845_s24 + $0x379] sm:$0xff] }
 0x505   : > { %22038 = vmatmul.mubr.msk.f32.gmra.mrb[96].mxu0 %vm631_vm1, %v9136_v60  ;;  %v9143_v60 = vld [vmem:[%s24845_s24 + $0x381] sm:$0xff] }
 0x506   : > { %22040 = vmatprep.mubr.msk.f32.mxu0 %vm631_vm1, %v9137_v24  ;;  %v9144_v24 = vld [vmem:[%s24845_s24 + $0x389] sm:$0xff] }
 0x509   : > { %22041 = vmatmul.mubr.msk.f32.gmra.mrb[98].mxu0 %vm631_vm1, %v9138_v49  ;;  %v9145_v49 = vld [vmem:[%s24845_s24 + $0x391] sm:$0xff] }
 0x50a   : > { %22043 = vmatprep.mubr.msk.f32.mxu0 %vm631_vm1, %v9139_v22  ;;  %v9146_v22 = vld [vmem:[%s24845_s24 + $0x399] sm:$0xff] }
 0x50d   : > { %22044 = vmatmul.mubr.msk.f32.gmra.mrb[100].mxu0 %vm631_vm1, %v9140_v38  ;;  %v9147_v38 = vld [vmem:[%s24845_s24 + $0x3a1] sm:$0xff] }
 0x50e   : > { %22046 = vmatprep.mubr.msk.f32.mxu0 %vm631_vm1, %v9141_v10  ;;  %v9148_v10 = vld [vmem:[%s24845_s24 + $0x3a9] sm:$0xff] }
 0x511   : > { %22047 = vmatmul.mubr.msk.f32.gmra.mrb[102].mxu0 %vm631_vm1, %v9142_v56  ;;  %v9149_v56 = vld [vmem:[%s24845_s24 + $0x3b1] sm:$0xff] }
 0x512   : > { %22049 = vmatprep.mubr.msk.f32.mxu0 %vm631_vm1, %v9143_v60  ;;  %v9150_v60 = vld [vmem:[%s24845_s24 + $0x3b9] sm:$0xff] }
 0x515   : > { %22050 = vmatmul.mubr.msk.f32.gmra.mrb[104].mxu0 %vm631_vm1, %v9144_v24  ;;  %v9151_v24 = vld [vmem:[%s24845_s24 + $0x3c1] sm:$0xff] }
 0x516   : > { %22052 = vmatprep.mubr.msk.f32.mxu0 %vm631_vm1, %v9145_v49  ;;  %v9152_v49 = vld [vmem:[%s24845_s24 + $0x3c9] sm:$0xff] }
 0x519   : > { %22053 = vmatmul.mubr.msk.f32.gmra.mrb[106].mxu0 %vm631_vm1, %v9146_v22  ;;  %v9153_v22 = vld [vmem:[%s24845_s24 + $0x3d1] sm:$0xff] }
 0x51a   : > { %22055 = vmatprep.mubr.msk.f32.mxu0 %vm631_vm1, %v9147_v38  ;;  %v9154_v38 = vld [vmem:[%s24845_s24 + $0x3d9] sm:$0xff] }
 0x51d   : > { %22056 = vmatmul.mubr.msk.f32.gmra.mrb[108].mxu0 %vm631_vm1, %v9148_v10  ;;  %v9155_v10 = vld [vmem:[%s24845_s24 + $0x3e1] sm:$0xff] }
 0x51e   : > { %22058 = vmatprep.mubr.msk.f32.mxu0 %vm631_vm1, %v9149_v56  ;;  %v9156_v56 = vld [vmem:[%s24845_s24 + $0x3e9] sm:$0xff] }
 0x521   : > { %22059 = vmatmul.mubr.msk.f32.gmra.mrb[110].mxu0 %vm631_vm1, %v9150_v60  ;;  %v9157_v60 = vld [vmem:[%s24845_s24 + $0x3f1] sm:$0xff] }
 0x522   : > { %22061 = vmatprep.mubr.msk.f32.mxu0 %vm631_vm1, %v9151_v24  ;;  %v9158_v24 = vld [vmem:[%s24845_s24 + $0x3f9] sm:$0xff] }
 0x525   : > { %22062 = vmatmul.mubr.msk.f32.gmra.mrb[112].mxu0 %vm631_vm1, %v9152_v49  ;;  %v10309_v49 = vld [vmem:[%s24845_s24 + $0x42] sm:$0xff] }
 0x526   : > { %22064 = vmatprep.mubr.msk.f32.mxu0 %vm631_vm1, %v9153_v22  ;;  %v10310_v22 = vld [vmem:[%s24845_s24 + $0x4a] sm:$0xff] }
 0x529   : > { %22065 = vmatmul.mubr.msk.f32.gmra.mrb[114].mxu0 %vm631_vm1, %v9154_v38  ;;  %v10311_v38 = vld [vmem:[%s24845_s24 + $0x52] sm:$0xff] }
 0x52a   : > { %22067 = vmatprep.mubr.msk.f32.mxu0 %vm631_vm1, %v9155_v10  ;;  %v10312_v10 = vld [vmem:[%s24845_s24 + $0x5a] sm:$0xff] }
 0x52d   : > { %22068 = vmatmul.mubr.msk.f32.gmra.mrb[116].mxu0 %vm631_vm1, %v9156_v56  ;;  %v10313_v56 = vld [vmem:[%s24845_s24 + $0x62] sm:$0xff] }
 0x52e   : > { %22070 = vmatprep.mubr.msk.f32.mxu0 %vm631_vm1, %v9157_v60  ;;  %v10314_v60 = vld [vmem:[%s24845_s24 + $0x6a] sm:$0xff] }
 0x531   : > { %22071 = vmatmul.mubr.msk.f32.gmra.mrb[118].mxu0 %vm631_vm1, %v9158_v24  ;;  %v10315_v24 = vld [vmem:[%s24845_s24 + $0x72] sm:$0xff] }
 0x532   : > { %22075 = vmatprep.mubr.msk.f32.mxu0 %vm631_vm1, %v10309_v49  ;;  %v10316_v49 = vld [vmem:[%s24845_s24 + $0x7a] sm:$0xff] }
 0x535   : > { %22076 = vmatmul.mubr.msk.f32.vlgmr.msra.gmra.mrb[0].mxu0 %vm631_vm1, %v10310_v22  ;;  %v10317_v22 = vld [vmem:[%s24845_s24 + $0x82] sm:$0xff] }
 0x536   : > { %22078 = vmatprep.mubr.msk.f32.mxu0 %vm631_vm1, %v10311_v38  ;;  %v10318_v38 = vld [vmem:[%s24845_s24 + $0x8a] sm:$0xff] }
 0x539   : > { %22079 = vmatmul.mubr.msk.f32.gmra.mrb[2].mxu0 %vm631_vm1, %v10312_v10  ;;  %v10319_v10 = vld [vmem:[%s24845_s24 + $0x92] sm:$0xff] }
 0x53a   : > { %22081 = vmatprep.mubr.msk.f32.mxu0 %vm631_vm1, %v10313_v56  ;;  %v10320_v56 = vld [vmem:[%s24845_s24 + $0x9a] sm:$0xff] }
 0x53d   : > { %22082 = vmatmul.mubr.msk.f32.gmra.mrb[4].mxu0 %vm631_vm1, %v10314_v60  ;;  %v10321_v60 = vld [vmem:[%s24845_s24 + $0xa2] sm:$0xff] }
 0x53e   : > { %22084 = vmatprep.mubr.msk.f32.mxu0 %vm631_vm1, %v10315_v24  ;;  %v10322_v24 = vld [vmem:[%s24845_s24 + $0xaa] sm:$0xff] }
 0x541   : > { %22085 = vmatmul.mubr.msk.f32.gmra.mrb[6].mxu0 %vm631_vm1, %v10316_v49  ;;  %v10323_v49 = vld [vmem:[%s24845_s24 + $0xb2] sm:$0xff] }
 0x542   : > { %22087 = vmatprep.mubr.msk.f32.mxu0 %vm631_vm1, %v10317_v22  ;;  %v10324_v22 = vld [vmem:[%s24845_s24 + $0xba] sm:$0xff] }
 0x545   : > { %22088 = vmatmul.mubr.msk.f32.gmra.mrb[8].mxu0 %vm631_vm1, %v10318_v38  ;;  %v10325_v38 = vld [vmem:[%s24845_s24 + $0xc2] sm:$0xff] }
 0x546   : > { %22090 = vmatprep.mubr.msk.f32.mxu0 %vm631_vm1, %v10319_v10  ;;  %v10326_v10 = vld [vmem:[%s24845_s24 + $0xca] sm:$0xff] }
 0x549   : > { %22091 = vmatmul.mubr.msk.f32.gmra.mrb[10].mxu0 %vm631_vm1, %v10320_v56  ;;  %v10327_v56 = vld [vmem:[%s24845_s24 + $0xd2] sm:$0xff] }
 0x54a   : > { %22093 = vmatprep.mubr.msk.f32.mxu0 %vm631_vm1, %v10321_v60  ;;  %v10328_v60 = vld [vmem:[%s24845_s24 + $0xda] sm:$0xff] }
 0x54d   : > { %22094 = vmatmul.mubr.msk.f32.gmra.mrb[12].mxu0 %vm631_vm1, %v10322_v24  ;;  %v10329_v24 = vld [vmem:[%s24845_s24 + $0xe2] sm:$0xff] }
 0x54e   : > { %22096 = vmatprep.mubr.msk.f32.mxu0 %vm631_vm1, %v10323_v49  ;;  %v10330_v49 = vld [vmem:[%s24845_s24 + $0xea] sm:$0xff] }
 0x551   : > { %22097 = vmatmul.mubr.msk.f32.gmra.mrb[14].mxu0 %vm631_vm1, %v10324_v22  ;;  %v10331_v22 = vld [vmem:[%s24845_s24 + $0xf2] sm:$0xff] }
 0x552   : > { %22099 = vmatprep.mubr.msk.f32.mxu0 %vm631_vm1, %v10325_v38  ;;  %v10332_v38 = vld [vmem:[%s24845_s24 + $0xfa] sm:$0xff] }
 0x555   : > { %22100 = vmatmul.mubr.msk.f32.gmra.mrb[16].mxu0 %vm631_vm1, %v10326_v10  ;;  %v10333_v10 = vld [vmem:[%s24845_s24 + $0x102] sm:$0xff] }
 0x556   : > { %22102 = vmatprep.mubr.msk.f32.mxu0 %vm631_vm1, %v10327_v56  ;;  %v10334_v56 = vld [vmem:[%s24845_s24 + $0x10a] sm:$0xff] }
 0x559   : > { %22103 = vmatmul.mubr.msk.f32.gmra.mrb[18].mxu0 %vm631_vm1, %v10328_v60  ;;  %v10335_v60 = vld [vmem:[%s24845_s24 + $0x112] sm:$0xff] }
 0x55a   : > { %22105 = vmatprep.mubr.msk.f32.mxu0 %vm631_vm1, %v10329_v24  ;;  %v10336_v24 = vld [vmem:[%s24845_s24 + $0x11a] sm:$0xff] }
 0x55d   : > { %22106 = vmatmul.mubr.msk.f32.gmra.mrb[20].mxu0 %vm631_vm1, %v10330_v49  ;;  %v10337_v49 = vld [vmem:[%s24845_s24 + $0x122] sm:$0xff] }
 0x55e   : > { %22108 = vmatprep.mubr.msk.f32.mxu0 %vm631_vm1, %v10331_v22  ;;  %v10338_v22 = vld [vmem:[%s24845_s24 + $0x12a] sm:$0xff] }
 0x561   : > { %22109 = vmatmul.mubr.msk.f32.gmra.mrb[22].mxu0 %vm631_vm1, %v10332_v38  ;;  %v10339_v38 = vld [vmem:[%s24845_s24 + $0x132] sm:$0xff] }
 0x562   : > { %22111 = vmatprep.mubr.msk.f32.mxu0 %vm631_vm1, %v10333_v10  ;;  %v10340_v10 = vld [vmem:[%s24845_s24 + $0x13a] sm:$0xff] }
 0x565   : > { %22112 = vmatmul.mubr.msk.f32.gmra.mrb[24].mxu0 %vm631_vm1, %v10334_v56  ;;  %v10341_v56 = vld [vmem:[%s24845_s24 + $0x142] sm:$0xff] }
 0x566   : > { %22114 = vmatprep.mubr.msk.f32.mxu0 %vm631_vm1, %v10335_v60  ;;  %v10342_v60 = vld [vmem:[%s24845_s24 + $0x14a] sm:$0xff] }
 0x569   : > { %22115 = vmatmul.mubr.msk.f32.gmra.mrb[26].mxu0 %vm631_vm1, %v10336_v24  ;;  %v10343_v24 = vld [vmem:[%s24845_s24 + $0x152] sm:$0xff] }
 0x56a   : > { %22117 = vmatprep.mubr.msk.f32.mxu0 %vm631_vm1, %v10337_v49  ;;  %v10344_v49 = vld [vmem:[%s24845_s24 + $0x15a] sm:$0xff] }
 0x56d   : > { %22118 = vmatmul.mubr.msk.f32.gmra.mrb[28].mxu0 %vm631_vm1, %v10338_v22  ;;  %v10345_v22 = vld [vmem:[%s24845_s24 + $0x162] sm:$0xff] }
 0x56e   : > { %22120 = vmatprep.mubr.msk.f32.mxu0 %vm631_vm1, %v10339_v38  ;;  %v10346_v38 = vld [vmem:[%s24845_s24 + $0x16a] sm:$0xff] }
 0x571   : > { %22121 = vmatmul.mubr.msk.f32.gmra.mrb[30].mxu0 %vm631_vm1, %v10340_v10  ;;  %v10347_v10 = vld [vmem:[%s24845_s24 + $0x172] sm:$0xff] }
 0x572   : > { %22123 = vmatprep.mubr.msk.f32.mxu0 %vm631_vm1, %v10341_v56  ;;  %v10348_v56 = vld [vmem:[%s24845_s24 + $0x17a] sm:$0xff] }
 0x575   : > { %22124 = vmatmul.mubr.msk.f32.gmra.mrb[32].mxu0 %vm631_vm1, %v10342_v60  ;;  %v10349_v60 = vld [vmem:[%s24845_s24 + $0x182] sm:$0xff] }
 0x576   : > { %22126 = vmatprep.mubr.msk.f32.mxu0 %vm631_vm1, %v10343_v24  ;;  %v10350_v24 = vld [vmem:[%s24845_s24 + $0x18a] sm:$0xff] }
 0x579   : > { %22127 = vmatmul.mubr.msk.f32.gmra.mrb[34].mxu0 %vm631_vm1, %v10344_v49  ;;  %v10351_v49 = vld [vmem:[%s24845_s24 + $0x192] sm:$0xff] }
 0x57a   : > { %22129 = vmatprep.mubr.msk.f32.mxu0 %vm631_vm1, %v10345_v22  ;;  %v10352_v22 = vld [vmem:[%s24845_s24 + $0x19a] sm:$0xff] }
 0x57d   : > { %22130 = vmatmul.mubr.msk.f32.gmra.mrb[36].mxu0 %vm631_vm1, %v10346_v38  ;;  %v10353_v38 = vld [vmem:[%s24845_s24 + $0x1a2] sm:$0xff] }
 0x57e   : > { %22132 = vmatprep.mubr.msk.f32.mxu0 %vm631_vm1, %v10347_v10  ;;  %v10354_v10 = vld [vmem:[%s24845_s24 + $0x1aa] sm:$0xff] }
 0x581   : > { %22133 = vmatmul.mubr.msk.f32.gmra.mrb[38].mxu0 %vm631_vm1, %v10348_v56  ;;  %v10355_v56 = vld [vmem:[%s24845_s24 + $0x1b2] sm:$0xff] }
 0x582   : > { %22135 = vmatprep.mubr.msk.f32.mxu0 %vm631_vm1, %v10349_v60  ;;  %v10356_v60 = vld [vmem:[%s24845_s24 + $0x1ba] sm:$0xff] }
 0x585   : > { %22136 = vmatmul.mubr.msk.f32.gmra.mrb[40].mxu0 %vm631_vm1, %v10350_v24  ;;  %v10357_v24 = vld [vmem:[%s24845_s24 + $0x1c2] sm:$0xff] }
 0x586   : > { %22138 = vmatprep.mubr.msk.f32.mxu0 %vm631_vm1, %v10351_v49  ;;  %v10358_v49 = vld [vmem:[%s24845_s24 + $0x1ca] sm:$0xff] }
 0x589   : > { %22139 = vmatmul.mubr.msk.f32.gmra.mrb[42].mxu0 %vm631_vm1, %v10352_v22  ;;  %v10359_v22 = vld [vmem:[%s24845_s24 + $0x1d2] sm:$0xff] }
 0x58a   : > { %22141 = vmatprep.mubr.msk.f32.mxu0 %vm631_vm1, %v10353_v38  ;;  %v10360_v38 = vld [vmem:[%s24845_s24 + $0x1da] sm:$0xff] }
 0x58d   : > { %22142 = vmatmul.mubr.msk.f32.gmra.mrb[44].mxu0 %vm631_vm1, %v10354_v10  ;;  %v10361_v10 = vld [vmem:[%s24845_s24 + $0x1e2] sm:$0xff] }
 0x58e   : > { %22144 = vmatprep.mubr.msk.f32.mxu0 %vm631_vm1, %v10355_v56  ;;  %v10362_v56 = vld [vmem:[%s24845_s24 + $0x1ea] sm:$0xff] }
 0x591   : > { %22145 = vmatmul.mubr.msk.f32.gmra.mrb[46].mxu0 %vm631_vm1, %v10356_v60  ;;  %v10363_v60 = vld [vmem:[%s24845_s24 + $0x1f2] sm:$0xff] }
 0x592   : > { %22147 = vmatprep.mubr.msk.f32.mxu0 %vm631_vm1, %v10357_v24  ;;  %v10364_v24 = vld [vmem:[%s24845_s24 + $0x1fa] sm:$0xff] }
 0x595   : > { %22148 = vmatmul.mubr.msk.f32.gmra.mrb[48].mxu0 %vm631_vm1, %v10358_v49  ;;  %v10365_v49 = vld [vmem:[%s24845_s24 + $0x202] sm:$0xff] }
 0x596   : > { %22150 = vmatprep.mubr.msk.f32.mxu0 %vm631_vm1, %v10359_v22  ;;  %v10366_v22 = vld [vmem:[%s24845_s24 + $0x20a] sm:$0xff] }
 0x599   : > { %22151 = vmatmul.mubr.msk.f32.gmra.mrb[50].mxu0 %vm631_vm1, %v10360_v38  ;;  %v10367_v38 = vld [vmem:[%s24845_s24 + $0x212] sm:$0xff] }
 0x59a   : > { %22153 = vmatprep.mubr.msk.f32.mxu0 %vm631_vm1, %v10361_v10  ;;  %v10368_v10 = vld [vmem:[%s24845_s24 + $0x21a] sm:$0xff] }
 0x59d   : > { %22154 = vmatmul.mubr.msk.f32.gmra.mrb[52].mxu0 %vm631_vm1, %v10362_v56  ;;  %v10369_v56 = vld [vmem:[%s24845_s24 + $0x222] sm:$0xff] }
 0x59e   : > { %22156 = vmatprep.mubr.msk.f32.mxu0 %vm631_vm1, %v10363_v60  ;;  %v10370_v60 = vld [vmem:[%s24845_s24 + $0x22a] sm:$0xff] }
 0x5a1   : > { %22157 = vmatmul.mubr.msk.f32.gmra.mrb[54].mxu0 %vm631_vm1, %v10364_v24  ;;  %v10372_v24 = vld [vmem:[%s24845_s24 + $0x23a] sm:$0xff] }
 0x5a2   : > { %22159 = vmatprep.mubr.msk.f32.mxu0 %vm631_vm1, %v10365_v49  ;;  %v10373_v49 = vld [vmem:[%s24845_s24 + $0x242] sm:$0xff] }
 0x5a5   : > { %22160 = vmatmul.mubr.msk.f32.gmra.mrb[56].mxu0 %vm631_vm1, %v10366_v22  ;;  %v18517_v22 = vld [vmem:[%s30456_s3 + $0x20] sm:$0xff] }
 0x5a6   : > { %22162 = vmatprep.mubr.msk.f32.mxu0 %vm631_vm1, %v10367_v38  ;;  %v18518_v38 = vld [vmem:[%s30456_s3 + $0x28] sm:$0xff] }
 0x5a9   : > { %22163 = vmatmul.mubr.msk.f32.gmra.mrb[58].mxu0 %vm631_vm1, %v10368_v10  ;;  %v10374_v10 = vld [vmem:[%s24845_s24 + $0x24a] sm:$0xff] }
 0x5aa   : > { %22165 = vmatprep.mubr.msk.f32.mxu0 %vm631_vm1, %v10369_v56  ;;  %v22876_v56 = vpack.c.bf16 %v18518_v38, %v18517_v22  ;;  %v10377_v38 = vld [vmem:[%s24845_s24 + $0x262] sm:$0xff] }
 0x5ac   : > { %22877 = vmatprep.subr.bf16.mxu1 %v22876_v56 }
 0x5ad   : > { %22166 = vmatmul.mubr.msk.f32.gmra.mrb[60].mxu0 %vm631_vm1, %v10370_v60  ;;  %22879 = vmatpush3.bf16.msra.mxu1 %v22876_v56  ;;  %v18519_v60 = vld [vmem:[%s30456_s3 + $0x30] sm:$0xff] }
 0x5ae   : > { %22168 = vmatprep.mubr.msk.f32.mxu0 %vm631_vm1, %v10371_v1  ;;  %v10375_v1 = vld [vmem:[%s24845_s24 + $0x252] sm:$0xff] }
 0x5af   : > { %v10379_v56 = vld [vmem:[%s24845_s24 + $0x272] sm:$0xff] }
 0x5b1   : > { %22169 = vmatmul.mubr.msk.f32.gmra.mrb[62].mxu0 %vm631_vm1, %v10372_v24  ;;  %v18520_v24 = vld [vmem:[%s30456_s3 + $0x38] sm:$0xff] }
 0x5b2   : > { %22171 = vmatprep.mubr.msk.f32.mxu0 %vm631_vm1, %v10373_v49  ;;  %v10376_v49 = vld [vmem:[%s24845_s24 + $0x25a] sm:$0xff]  ;;  %v22880_v22 = vpack.c.bf16 %v18520_v24, %v18519_v60  ;;  %v10381_v60 = vld [vmem:[%s24845_s24 + $0x282] sm:$0xff]  ;;  %v10382_v24 = vld [vmem:[%s24845_s24 + $0x28a] sm:$0xff] }
 0x5b4   : > { %22881 = vmatprep.subr.bf16.mxu1 %v22880_v22 }
 0x5b5   : > { %22172 = vmatmul.mubr.msk.f32.gmra.mrb[64].mxu0 %vm631_vm1, %v10374_v10  ;;  %22883 = vmatpush3.bf16.msra.mxu1 %v22880_v22  ;;  %v10378_v10 = vld [vmem:[%s24845_s24 + $0x26a] sm:$0xff]  ;;  %v10384_v22 = vld [vmem:[%s24845_s24 + $0x29a] sm:$0xff] }
 0x5b6   : > { %22174 = vmatprep.mubr.msk.f32.mxu0 %vm631_vm1, %v10375_v1  ;;  %v10380_v1 = vld [vmem:[%s24845_s24 + $0x27a] sm:$0xff] }
 0x5b9   : > { %22175 = vmatmul.mubr.msk.f32.gmra.mrb[66].mxu0 %vm631_vm1, %v10376_v49  ;;  %v10383_v49 = vld [vmem:[%s24845_s24 + $0x292] sm:$0xff] }
 0x5ba   : > { %22177 = vmatprep.mubr.msk.f32.mxu0 %vm631_vm1, %v10377_v38  ;;  %v10385_v38 = vld [vmem:[%s24845_s24 + $0x2a2] sm:$0xff] }
 0x5bd   : > { %22178 = vmatmul.mubr.msk.f32.gmra.mrb[68].mxu0 %vm631_vm1, %v10378_v10  ;;  %v10386_v10 = vld [vmem:[%s24845_s24 + $0x2aa] sm:$0xff] }
 0x5be   : > { %22180 = vmatprep.mubr.msk.f32.mxu0 %vm631_vm1, %v10379_v56  ;;  %v10387_v56 = vld [vmem:[%s24845_s24 + $0x2b2] sm:$0xff] }
 0x5c1   : > { %22181 = vmatmul.mubr.msk.f32.gmra.mrb[70].mxu0 %vm631_vm1, %v10380_v1  ;;  %v10388_v1 = vld [vmem:[%s24845_s24 + $0x2ba] sm:$0xff] }
 0x5c2   : > { %22183 = vmatprep.mubr.msk.f32.mxu0 %vm631_vm1, %v10381_v60  ;;  %v10389_v60 = vld [vmem:[%s24845_s24 + $0x2c2] sm:$0xff] }
 0x5c5   : > { %22184 = vmatmul.mubr.msk.f32.gmra.mrb[72].mxu0 %vm631_vm1, %v10382_v24  ;;  %v10390_v24 = vld [vmem:[%s24845_s24 + $0x2ca] sm:$0xff] }
 0x5c6   : > { %22186 = vmatprep.mubr.msk.f32.mxu0 %vm631_vm1, %v10383_v49  ;;  %v10391_v49 = vld [vmem:[%s24845_s24 + $0x2d2] sm:$0xff] }
 0x5c9   : > { %22187 = vmatmul.mubr.msk.f32.gmra.mrb[74].mxu0 %vm631_vm1, %v10384_v22  ;;  %v10392_v22 = vld [vmem:[%s24845_s24 + $0x2da] sm:$0xff] }
 0x5ca   : > { %22189 = vmatprep.mubr.msk.f32.mxu0 %vm631_vm1, %v10385_v38  ;;  %v10393_v38 = vld [vmem:[%s24845_s24 + $0x2e2] sm:$0xff] }
 0x5cd   : > { %22190 = vmatmul.mubr.msk.f32.gmra.mrb[76].mxu0 %vm631_vm1, %v10386_v10  ;;  %v10394_v10 = vld [vmem:[%s24845_s24 + $0x2ea] sm:$0xff] }
 0x5ce   : > { %22192 = vmatprep.mubr.msk.f32.mxu0 %vm631_vm1, %v10387_v56  ;;  %v10395_v56 = vld [vmem:[%s24845_s24 + $0x2f2] sm:$0xff] }
 0x5d1   : > { %22193 = vmatmul.mubr.msk.f32.gmra.mrb[78].mxu0 %vm631_vm1, %v10388_v1  ;;  %v10396_v1 = vld [vmem:[%s24845_s24 + $0x2fa] sm:$0xff] }
 0x5d2   : > { %22195 = vmatprep.mubr.msk.f32.mxu0 %vm631_vm1, %v10389_v60  ;;  %v10397_v60 = vld [vmem:[%s24845_s24 + $0x302] sm:$0xff] }
 0x5d5   : > { %22196 = vmatmul.mubr.msk.f32.gmra.mrb[80].mxu0 %vm631_vm1, %v10390_v24  ;;  %v10398_v24 = vld [vmem:[%s24845_s24 + $0x30a] sm:$0xff] }
 0x5d6   : > { %22198 = vmatprep.mubr.msk.f32.mxu0 %vm631_vm1, %v10391_v49  ;;  %v10399_v49 = vld [vmem:[%s24845_s24 + $0x312] sm:$0xff] }
 0x5d9   : > { %22199 = vmatmul.mubr.msk.f32.gmra.mrb[82].mxu0 %vm631_vm1, %v10392_v22  ;;  %v10400_v22 = vld [vmem:[%s24845_s24 + $0x31a] sm:$0xff] }
 0x5da   : > { %22201 = vmatprep.mubr.msk.f32.mxu0 %vm631_vm1, %v10393_v38  ;;  %v10401_v38 = vld [vmem:[%s24845_s24 + $0x322] sm:$0xff] }
 0x5dd   : > { %22202 = vmatmul.mubr.msk.f32.gmra.mrb[84].mxu0 %vm631_vm1, %v10394_v10  ;;  %v10402_v10 = vld [vmem:[%s24845_s24 + $0x32a] sm:$0xff] }
 0x5de   : > { %22204 = vmatprep.mubr.msk.f32.mxu0 %vm631_vm1, %v10395_v56  ;;  %v10403_v56 = vld [vmem:[%s24845_s24 + $0x332] sm:$0xff] }
 0x5e1   : > { %22205 = vmatmul.mubr.msk.f32.gmra.mrb[86].mxu0 %vm631_vm1, %v10396_v1  ;;  %v10404_v1 = vld [vmem:[%s24845_s24 + $0x33a] sm:$0xff] }
 0x5e2   : > { %22207 = vmatprep.mubr.msk.f32.mxu0 %vm631_vm1, %v10397_v60  ;;  %v10405_v60 = vld [vmem:[%s24845_s24 + $0x342] sm:$0xff] }
 0x5e5   : > { %22208 = vmatmul.mubr.msk.f32.gmra.mrb[88].mxu0 %vm631_vm1, %v10398_v24  ;;  %v10406_v24 = vld [vmem:[%s24845_s24 + $0x34a] sm:$0xff] }
 0x5e6   : > { %22210 = vmatprep.mubr.msk.f32.mxu0 %vm631_vm1, %v10399_v49  ;;  %v24641_v49 = vld [vmem:[%s24845_s24 + $0x352] sm:$0xff] }
 0x5e9   : > { %22211 = vmatmul.mubr.msk.f32.gmra.mrb[90].mxu0 %vm631_vm1, %v10400_v22  ;;  %v24642_v22 = vld [vmem:[%s24845_s24 + $0x35a] sm:$0xff] }
 0x5ea   : > { %22213 = vmatprep.mubr.msk.f32.mxu0 %vm631_vm1, %v10401_v38  ;;  %v24643_v38 = vld [vmem:[%s24845_s24 + $0x362] sm:$0xff] }
 0x5ed   : > { %22214 = vmatmul.mubr.msk.f32.gmra.mrb[92].mxu0 %vm631_vm1, %v10402_v10  ;;  %v24644_v10 = vld [vmem:[%s24845_s24 + $0x36a] sm:$0xff] }
 0x5ee   : > { %22216 = vmatprep.mubr.msk.f32.mxu0 %vm631_vm1, %v10403_v56  ;;  %v24645_v56 = vld [vmem:[%s24845_s24 + $0x372] sm:$0xff] }
 0x5f1   : > { %22217 = vmatmul.mubr.msk.f32.gmra.mrb[94].mxu0 %vm631_vm1, %v10404_v1  ;;  %v24646_v1 = vld [vmem:[%s24845_s24 + $0x37a] sm:$0xff] }
 0x5f2   : > { %22219 = vmatprep.mubr.msk.f32.mxu0 %vm631_vm1, %v10405_v60  ;;  %v24647_v60 = vld [vmem:[%s24845_s24 + $0x382] sm:$0xff] }
 0x5f5   : > { %22220 = vmatmul.mubr.msk.f32.gmra.mrb[96].mxu0 %vm631_vm1, %v10406_v24  ;;  %v24648_v24 = vld [vmem:[%s24845_s24 + $0x38a] sm:$0xff] }
 0x5f6   : > { %22222 = vmatprep.mubr.msk.f32.mxu0 %vm631_vm1, %v24641_v49  ;;  %v24649_v49 = vld [vmem:[%s24845_s24 + $0x392] sm:$0xff] }
 0x5f9   : > { %22223 = vmatmul.mubr.msk.f32.gmra.mrb[98].mxu0 %vm631_vm1, %v24642_v22 }
 0x5fa   : > { %22225 = vmatprep.mubr.msk.f32.mxu0 %vm631_vm1, %v24643_v38 }
 0x5fd   : > { %22226 = vmatmul.mubr.msk.f32.gmra.mrb[100].mxu0 %vm631_vm1, %v24644_v10 }
 0x5fe   : > { %22228 = vmatprep.mubr.msk.f32.mxu0 %vm631_vm1, %v24645_v56  ;;  %v24650_v56 = vld [vmem:[%s24845_s24 + $0x39a] sm:$0xff] }
 0x601   : > { %22229 = vmatmul.mubr.msk.f32.gmra.mrb[102].mxu0 %vm631_vm1, %v24646_v1 }
 0x602   : > { %22231 = vmatprep.mubr.msk.f32.mxu0 %vm631_vm1, %v24647_v60 }
 0x605   : > { %22232 = vmatmul.mubr.msk.f32.gmra.mrb[104].mxu0 %vm631_vm1, %v24648_v24 }
 0x606   : > { %22234 = vmatprep.mubr.msk.f32.mxu0 %vm631_vm1, %v24649_v49  ;;  %v24652_v49 = vld [vmem:[%s24845_s24 + $0x3aa] sm:$0xff] }
 0x608   : > { %v22077_v22 = vpop.f32.mrb[0].mxu0 }
 0x609   : > { %v23414_v38 = vadd.f32 %v22077_v22, %v27186_v50  ;;  %v10860_v10 = vpop.f32.mrb[1].mxu0  ;;  %22235 = vmatmul.mubr.msk.f32.gmra.mrb[106].mxu0 %vm631_vm1, %v24650_v56  ;;  %v27990_v50 = vld [vmem:[%s30455_s2] ss:$0 sm:$0xff]  ;;  %v24653_v22 = vld [vmem:[%s24845_s24 + $0x3b2] sm:$0xff] }
 0x60a   : > { %v23415_v1 = vadd.f32 %v10860_v10, %v27193_v53  ;;  %22237 = vmatprep.mubr.msk.f32.mxu0 %vm631_vm1, %v24651_v39  ;;  %v10421_v39 = vld [vmem:[%s24845_s24 + $0x3c2] sm:$0xff] }
 0x60c   : > { %v22080_v60 = vpop.f32.mrb[2].mxu0 }
 0x60d   : > { %v23416_v24 = vadd.f32 %v22080_v60, %v27198_v55  ;;  %v10870_v37 = vpop.f32.mrb[3].mxu0  ;;  %22238 = vmatmul.mubr.msk.f32.gmra.mrb[108].mxu0 %vm631_vm1, %v24652_v49  ;;  %v11587_v55 = vadd.f32 %v23414_v38, %v27990_v50  ;;  %v11586_v49 = vadd.f32 %v23415_v1, %v27990_v50 }
 0x60e   : > { %v23417_v53 = vadd.f32 %v10870_v37, %v27205_v59  ;;  %22240 = vmatprep.mubr.msk.f32.mxu0 %vm631_vm1, %v24653_v22  ;;  %v10422_v59 = vld [vmem:[%s24845_s24 + $0x3ca] sm:$0xff]  ;;  %v10423_v22 = vld [vmem:[%s24845_s24 + $0x3d2] sm:$0xff] }
 0x60f   : > { %v11589_v8 = vadd.f32 %v23416_v24, %v27990_v50  ;;  %v10425_v24 = vld [vmem:[%s24845_s24 + $0x3e2] sm:$0xff] }
 0x610   : > { %v22083_v10 = vpop.f32.mrb[4].mxu0 }
 0x611   : > { %v23418_v56 = vadd.f32 %v22083_v10, %v27210_v26  ;;  %v10880_v60 = vpop.f32.mrb[5].mxu0  ;;  %22241 = vmatmul.mubr.msk.f32.gmra.mrb[110].mxu0 %vm631_vm1, %v24654_v32  ;;  %v11707_v10 = vmax.f32 %v11587_v55, 0.0 }
 0x612   : > { %v23419_v51 = vadd.f32 %v10880_v60, %v27217_v62  ;;  %22243 = vmatprep.mubr.msk.f32.mxu0 %vm631_vm1, %v10421_v39  ;;  %v11706_v62 = vmax.f32 %v11586_v49, 0.0  ;;  %v11588_v39 = vadd.f32 %v23417_v53, %v27990_v50 }
 0x613   : > { %v11591_v37 = vadd.f32 %v23418_v56, %v27990_v50 }
 0x614   : > { %v11590_v38 = vadd.f32 %v23419_v51, %v27990_v50  ;;  %v22086_v26 = vpop.f32.mrb[6].mxu0  ;;  %v10424_v51 = vld [vmem:[%s24845_s24 + $0x3da] sm:$0xff] }
 0x615   : > { %v11711_v32 = vmax.f32 %v11591_v37, 0.0  ;;  %v23420_v1 = vadd.f32 %v22086_v26, %v27222_v34  ;;  %v10890_v4 = vpop.f32.mrb[7].mxu0  ;;  %22244 = vmatmul.mubr.msk.f32.gmra.mrb[112].mxu0 %vm631_vm1, %v10422_v59  ;;  %v11709_v59 = vmax.f32 %v11589_v8, 0.0  ;;  %v10427_v8 = vld [vmem:[%s24845_s24 + $0x3f2] sm:$0xff] }
 0x616   : > { %v11710_v56 = vmax.f32 %v11590_v38, 0.0  ;;  %v23421_v60 = vadd.f32 %v10890_v4, %v27229_v2  ;;  %22246 = vmatprep.mubr.msk.f32.mxu0 %vm631_vm1, %v10423_v22  ;;  %v11708_v4 = vmax.f32 %v11588_v39, 0.0 }
 0x617   : > { %v11827_v45 = vmax.f32 %v11707_v10, %v11711_v32  ;;  %v11593_v55 = vadd.f32 %v23420_v1, %v27990_v50  ;;  %v10426_v10 = vld [vmem:[%s24845_s24 + $0x3ea] sm:$0xff] }
 0x618   : > { %v11826_v37 = vmax.f32 %v11706_v62, %v11710_v56  ;;  %v11592_v34 = vadd.f32 %v23421_v60, %v27990_v50  ;;  %v22089_v26 = vpop.f32.mrb[8].mxu0 }
 0x619   : > { %11831 = vst.msk [vmem:[#allocation2 + $0x8] sm:$0xff] %vm384_vm2, %v11827_v45  ;;  %v11713_v53 = vmax.f32 %v11593_v55, 0.0  ;;  %v23422_v49 = vadd.f32 %v22089_v26, %v27234_v52  ;;  %v10900_v2 = vpop.f32.mrb[9].mxu0  ;;  %22247 = vmatmul.mubr.msk.f32.gmra.mrb[114].mxu0 %vm631_vm1, %v10424_v51 }
 0x61a   : > { %11830 = vst.msk [vmem:[#allocation2] sm:$0xff] %vm384_vm2, %v11826_v37  ;;  %v11712_v22 = vmax.f32 %v11592_v34, 0.0  ;;  %v23423_v38 = vadd.f32 %v10900_v2, %v27241_v5  ;;  %22249 = vmatprep.mubr.msk.f32.mxu0 %vm631_vm1, %v10425_v24  ;;  %v10428_v5 = vld [vmem:[%s24845_s24 + $0x3fa] sm:$0xff]  ;;  %s30411_s24 = scalar_lea.hbm %s30464_s11, %s19077_s12 }
 0x61b   : > { %v11829_v32 = vmax.f32 %v11709_v59, %v11713_v53  ;;  %v11595_v56 = vadd.f32 %v23422_v49, %v27990_v50 }
 0x61c   : > { %v11828_v1 = vmax.f32 %v11708_v4, %v11712_v22  ;;  %v22092_v45 = vpop.f32.mrb[10].mxu0  ;;  %v11594_v60 = vadd.f32 %v23423_v38, %v27990_v50 }
 0x61d   : > { %11833 = vst.msk [vmem:[#allocation2 + $0x18] sm:$0xff] %vm384_vm2, %v11829_v32  ;;  %v23424_v52 = vadd.f32 %v22092_v45, %v27246_v3  ;;  %v10910_v62 = vpop.f32.mrb[11].mxu0  ;;  %22250 = vmatmul.mubr.msk.f32.gmra.mrb[116].mxu0 %vm631_vm1, %v10426_v10  ;;  %v11715_v59 = vmax.f32 %v11595_v56, 0.0 }
 0x61e   : > { %11832 = vst.msk [vmem:[#allocation2 + $0x10] sm:$0xff] %vm384_vm2, %v11828_v1  ;;  %v23425_v39 = vadd.f32 %v10910_v62, %v27253_v33  ;;  %22252 = vmatprep.mubr.msk.f32.mxu0 %vm631_vm1, %v10427_v8  ;;  %v11714_v53 = vmax.f32 %v11594_v60, 0.0 }
 0x61f   : > { %v11597_v4 = vadd.f32 %v23424_v52, %v27990_v50 }
 0x620   : > { %v22095_v51 = vpop.f32.mrb[12].mxu0 }
 0x621   : > { %v23426_v55 = vadd.f32 %v22095_v51, %v27258_v9  ;;  %v10920_v24 = vpop.f32.mrb[13].mxu0  ;;  %22253 = vmatmul.mubr.msk.f32.gmra.mrb[118].mxu0 %vm631_vm1, %v10428_v5  ;;  %v11946_v3 = vld [vmem:[#allocation2] ss:$2 sm:$0xff]  ;;  %v12006_v37 = vld [vmem:[#allocation2 + $0x1] ss:$2 sm:$0xff]  ;;  %v11717_v52 = vmax.f32 %v11597_v4, 0.0 }
 0x622   : > { %v23427_v34 = vadd.f32 %v10920_v24, %v27265_v13  ;;  %v12065_v26 = vmax.f32 %v11946_v3, %v12006_v37  ;;  %v11596_v13 = vadd.f32 %v23425_v39, %v27990_v50 }
 0x623   : > { %v11599_v33 = vadd.f32 %v23426_v55, %v27990_v50 }
 0x624   : > { %v11598_v2 = vadd.f32 %v23427_v34, %v27990_v50  ;;  %v22098_v49 = vpop.f32.mrb[14].mxu0  ;;  %12095 = vst.msk [vmem:[#allocation3] sm:$0xff] %vm384_vm2, %v12065_v26  ;;  %v11716_v24 = vmax.f32 %v11596_v13, 0.0 }
 0x625   : > { %v11719_v9 = vmax.f32 %v11599_v33, 0.0  ;;  %v23428_v22 = vadd.f32 %v22098_v49, %v27270_v30  ;;  %v10930_v38 = vpop.f32.mrb[15].mxu0  ;;  %v11948_v10 = vld [vmem:[#allocation2 + $0x10] ss:$2 sm:$0xff]  ;;  %v12008_v32 = vld [vmem:[#allocation2 + $0x11] ss:$2 sm:$0xff] }
 0x626   : > { %v11718_v8 = vmax.f32 %v11598_v2, 0.0  ;;  %v23429_v1 = vadd.f32 %v10930_v38, %v27274_v16  ;;  %v12066_v45 = vmax.f32 %v11948_v10, %v12008_v32 }
 0x627   : > { %v11835_v62 = vmax.f32 %v11715_v59, %v11719_v9  ;;  %v11601_v5 = vadd.f32 %v23428_v22, %v27990_v50 }
 0x628   : > { %v11834_v56 = vmax.f32 %v11714_v53, %v11718_v8  ;;  %v11600_v60 = vadd.f32 %v23429_v1, %v27990_v50  ;;  %v22101_v51 = vpop.f32.mrb[16].mxu0  ;;  %12096 = vst.msk [vmem:[#allocation3 + $0x8] sm:$0xff] %vm384_vm2, %v12066_v45 }
 0x629   : > { %11839 = vst.msk [vmem:[#allocation2 + $0x28] sm:$0xff] %vm384_vm2, %v11835_v62  ;;  %v11721_v30 = vmax.f32 %v11601_v5, 0.0  ;;  %v23430_v55 = vadd.f32 %v22101_v51, %v27278_v17  ;;  %v10940_v39 = vpop.f32.mrb[17].mxu0 }
 0x62a   : > { %11838 = vst.msk [vmem:[#allocation2 + $0x20] sm:$0xff] %vm384_vm2, %v11834_v56  ;;  %v11720_v16 = vmax.f32 %v11600_v60, 0.0  ;;  %v23431_v3 = vadd.f32 %v10940_v39, %v27282_v41 }
 0x62b   : > { %v11837_v37 = vmax.f32 %v11717_v52, %v11721_v30  ;;  %v11603_v2 = vadd.f32 %v23430_v55, %v27990_v50 }
 0x62c   : > { %v11836_v34 = vmax.f32 %v11716_v24, %v11720_v16  ;;  %v22104_v26 = vpop.f32.mrb[18].mxu0  ;;  %v11602_v49 = vadd.f32 %v23431_v3, %v27990_v50 }
 0x62d   : > { %11841 = vst.msk [vmem:[#allocation2 + $0x38] sm:$0xff] %vm384_vm2, %v11837_v37  ;;  %v23432_v33 = vadd.f32 %v22104_v26, %v27286_v20  ;;  %v10950_v59 = vpop.f32.mrb[19].mxu0 }
 0x62e   : > { %11840 = vst.msk [vmem:[#allocation2 + $0x30] sm:$0xff] %vm384_vm2, %v11836_v34  ;;  %v23433_v53 = vadd.f32 %v10950_v59, %v27290_v21  ;;  %v11723_v21 = vmax.f32 %v11603_v2, 0.0  ;;  %v11722_v13 = vmax.f32 %v11602_v49, 0.0 }
 0x62f   : > { %v12155_v17 = vld [vmem:[#allocation3 + $0x1] sm:$0xff]  ;;  %v11605_v45 = vadd.f32 %v23432_v33, %v27990_v50 }
 0x630   : > { %v22107_v4 = vpop.f32.mrb[20].mxu0  ;;  %22263 = vmatprep.mubr.msk.f32.mxu1 %vm384_vm2, %v12155_v17  ;;  %v11604_v51 = vadd.f32 %v23433_v53, %v27990_v50 }
 0x631   : > { %v11950_v41 = vld [vmem:[#allocation2 + $0x20] ss:$2 sm:$0xff]  ;;  %v12010_v9 = vld [vmem:[#allocation2 + $0x21] ss:$2 sm:$0xff]  ;;  %v23434_v22 = vadd.f32 %v22107_v4, %v27295_v25  ;;  %v10960_v38 = vpop.f32.mrb[21].mxu0  ;;  %v11725_v37 = vmax.f32 %v11605_v45, 0.0 }
 0x632   : > { %v12067_v10 = vmax.f32 %v11950_v41, %v12010_v9  ;;  %v23435_v20 = vadd.f32 %v10960_v38, %v27299_v28  ;;  %v11724_v33 = vmax.f32 %v11604_v51, 0.0 }
 0x633   : > { %v11607_v32 = vadd.f32 %v23434_v22, %v27990_v50 }
 0x634   : > { %12097 = vst.msk [vmem:[#allocation3 + $0x10] sm:$0xff] %vm384_vm2, %v12067_v10  ;;  %v11606_v8 = vadd.f32 %v23435_v20, %v27990_v50  ;;  %v22110_v1 = vpop.f32.mrb[22].mxu0 }
 0x635   : > { %v11727_v62 = vmax.f32 %v11607_v32, 0.0  ;;  %v23436_v5 = vadd.f32 %v22110_v1, %v27303_v29  ;;  %v10970_v56 = vpop.f32.mrb[23].mxu0  ;;  %v11952_v25 = vld [vmem:[#allocation2 + $0x30] ss:$2 sm:$0xff]  ;;  %v12012_v60 = vld [vmem:[#allocation2 + $0x31] ss:$2 sm:$0xff] }
 0x636   : > { %v11726_v28 = vmax.f32 %v11606_v8, 0.0  ;;  %v23437_v52 = vadd.f32 %v10970_v56, %v27307_v57  ;;  %v12068_v30 = vmax.f32 %v11952_v25, %v12012_v60 }
 0x637   : > { %v11843_v55 = vmax.f32 %v11723_v21, %v11727_v62  ;;  %v11609_v39 = vadd.f32 %v23436_v5, %v27990_v50 }
 0x638   : > { %v11842_v24 = vmax.f32 %v11722_v13, %v11726_v28  ;;  %v11608_v16 = vadd.f32 %v23437_v52, %v27990_v50  ;;  %v22113_v3 = vpop.f32.mrb[24].mxu0  ;;  %12098 = vst.msk [vmem:[#allocation3 + $0x18] sm:$0xff] %vm384_vm2, %v12068_v30 }
 0x639   : > { %11847 = vst.msk [vmem:[#allocation2 + $0x48] sm:$0xff] %vm384_vm2, %v11843_v55  ;;  %v11729_v29 = vmax.f32 %v11609_v39, 0.0  ;;  %v23438_v34 = vadd.f32 %v22113_v3, %v27311_v63  ;;  %v10980_v26 = vpop.f32.mrb[25].mxu0 }
 0x63a   : > { %11846 = vst.msk [vmem:[#allocation2 + $0x40] sm:$0xff] %vm384_vm2, %v11842_v24  ;;  %v11728_v57 = vmax.f32 %v11608_v16, 0.0  ;;  %v23439_v59 = vadd.f32 %v10980_v26, %v27315_v7 }
 0x63b   : > { %v11845_v53 = vmax.f32 %v11725_v37, %v11729_v29  ;;  %v12156_v17 = vld [vmem:[#allocation3 + $0x9] sm:$0xff]  ;;  %v11611_v22 = vadd.f32 %v23438_v34, %v27990_v50 }
 0x63c   : > { %v11844_v2 = vmax.f32 %v11724_v33, %v11728_v57  ;;  %v22116_v49 = vpop.f32.mrb[26].mxu0  ;;  %22264 = vmatmul.mubr.msk.f32.vlgmr.msra.gmra.mrb[120].mxu1 %vm384_vm2, %v12156_v17  ;;  %v11610_v7 = vadd.f32 %v23439_v59, %v27990_v50 }
 0x63d   : > { %11849 = vst.msk [vmem:[#allocation2 + $0x58] sm:$0xff] %vm384_vm2, %v11845_v53  ;;  %v23440_v4 = vadd.f32 %v22116_v49, %v27319_v47  ;;  %v10990_v41 = vpop.f32.mrb[27].mxu0  ;;  %v11731_v1 = vmax.f32 %v11611_v22, 0.0 }
 0x63e   : > { %11848 = vst.msk [vmem:[#allocation2 + $0x50] sm:$0xff] %vm384_vm2, %v11844_v2  ;;  %v23441_v63 = vadd.f32 %v10990_v41, %v27323_v6  ;;  %v11730_v6 = vmax.f32 %v11610_v7, 0.0 }
 0x63f   : > { %v12157_v9 = vld [vmem:[#allocation3 + $0x11] sm:$0xff]  ;;  %v11613_v5 = vadd.f32 %v23440_v4, %v27990_v50  ;;  %v12151_v4 = vld [vmem:[%s30456_s3] sm:$0xff] }
 0x640   : > { %v22119_v38 = vpop.f32.mrb[28].mxu0  ;;  %22266 = vmatprep.mubr.msk.f32.mxu1 %vm384_vm2, %v12157_v9 }
 0x641   : > { %v23442_v10 = vadd.f32 %v22119_v38, %v27327_v42  ;;  %v11000_v20 = vpop.f32.mrb[29].mxu0  ;;  %v11954_v32 = vld [vmem:[#allocation2 + $0x40] ss:$2 sm:$0xff]  ;;  %v12014_v21 = vld [vmem:[#allocation2 + $0x41] ss:$2 sm:$0xff]  ;;  %v11733_v37 = vmax.f32 %v11613_v5, 0.0 }
 0x642   : > { %v23443_v47 = vadd.f32 %v11000_v20, %v27331_v58  ;;  %v12069_v13 = vmax.f32 %v11954_v32, %v12014_v21  ;;  %v11612_v58 = vadd.f32 %v23441_v63, %v27990_v50 }
 0x643   : > { %v11615_v8 = vadd.f32 %v23442_v10, %v27990_v50 }
 0x644   : > { %v11614_v45 = vadd.f32 %v23443_v47, %v27990_v50  ;;  %v22122_v62 = vpop.f32.mrb[30].mxu0  ;;  %12099 = vst.msk [vmem:[#allocation3 + $0x20] sm:$0xff] %vm384_vm2, %v12069_v13  ;;  %v11732_v26 = vmax.f32 %v11612_v58, 0.0 }
 0x645   : > { %v11735_v56 = vmax.f32 %v11615_v8, 0.0  ;;  %v23444_v42 = vadd.f32 %v22122_v62, %v27335_v11  ;;  %v11010_v25 = vpop.f32.mrb[31].mxu0  ;;  %v11956_v60 = vld [vmem:[#allocation2 + $0x50] ss:$2 sm:$0xff]  ;;  %v12016_v51 = vld [vmem:[#allocation2 + $0x51] ss:$2 sm:$0xff] }
 0x646   : > { %v11734_v28 = vmax.f32 %v11614_v45, 0.0  ;;  %v23445_v52 = vadd.f32 %v11010_v25, %v27341_v36  ;;  %v12070_v30 = vmax.f32 %v11956_v60, %v12016_v51 }
 0x647   : > { %v11851_v55 = vmax.f32 %v11731_v1, %v11735_v56  ;;  %v11617_v39 = vadd.f32 %v23444_v42, %v27990_v50 }
 0x648   : > { %v11850_v24 = vmax.f32 %v11730_v6, %v11734_v28  ;;  %v11616_v16 = vadd.f32 %v23445_v52, %v27990_v50  ;;  %v22125_v3 = vpop.f32.mrb[32].mxu0  ;;  %12100 = vst.msk [vmem:[#allocation3 + $0x28] sm:$0xff] %vm384_vm2, %v12070_v30 }
 0x649   : > { %11855 = vst.msk [vmem:[#allocation2 + $0x68] sm:$0xff] %vm384_vm2, %v11851_v55  ;;  %v11737_v11 = vmax.f32 %v11617_v39, 0.0  ;;  %v23446_v29 = vadd.f32 %v22125_v3, %v27345_v40  ;;  %v11020_v34 = vpop.f32.mrb[33].mxu0 }
 0x64a   : > { %11854 = vst.msk [vmem:[#allocation2 + $0x60] sm:$0xff] %vm384_vm2, %v11850_v24  ;;  %v11736_v36 = vmax.f32 %v11616_v16, 0.0  ;;  %v23447_v33 = vadd.f32 %v11020_v34, %v27349_v44  ;;  %v12152_v44 = vld [vmem:[%s30456_s3 + $0x8] sm:$0xff] }
 0x64b   : > { %v11853_v57 = vmax.f32 %v11733_v37, %v11737_v11  ;;  %v12158_v59 = vld [vmem:[#allocation3 + $0x19] sm:$0xff]  ;;  %v22884_v63 = vpack.c.bf16 %v12152_v44, %v12151_v4  ;;  %v11619_v9 = vadd.f32 %v23446_v29, %v27990_v50 }
 0x64c   : > { %v11852_v53 = vmax.f32 %v11732_v26, %v11736_v36  ;;  %v22128_v17 = vpop.f32.mrb[34].mxu0  ;;  %22267 = vmatmul.mubr.msk.f32.gmra.mrb[122].mxu1 %vm384_vm2, %v12158_v59  ;;  %v11618_v22 = vadd.f32 %v23447_v33, %v27990_v50 }
 0x64d   : > { %11857 = vst.msk [vmem:[#allocation2 + $0x78] sm:$0xff] %vm384_vm2, %v11853_v57  ;;  %v23448_v2 = vadd.f32 %v22128_v17, %v27353_v19  ;;  %v11030_v49 = vpop.f32.mrb[35].mxu0  ;;  %22885 = vmatprep.subr.bf16.mxu1 %v22884_v63  ;;  %v11739_v47 = vmax.f32 %v11619_v9, 0.0 }
 0x64e   : > { %11856 = vst.msk [vmem:[#allocation2 + $0x70] sm:$0xff] %vm384_vm2, %v11852_v53  ;;  %v23449_v40 = vadd.f32 %v11030_v49, %v27357_v18  ;;  %22887 = vmatpush3.bf16.msra.mxu1 %v22884_v63  ;;  %v11738_v13 = vmax.f32 %v11618_v22, 0.0 }
 0x64f   : > { %v12159_v41 = vld [vmem:[#allocation3 + $0x21] sm:$0xff]  ;;  %v11621_v6 = vadd.f32 %v23448_v2, %v27990_v50 }
 0x650   : > { %v22131_v19 = vpop.f32.mrb[36].mxu0  ;;  %22269 = vmatprep.mubr.msk.f32.mxu1 %vm384_vm2, %v12159_v41 }
 0x651   : > { %v23450_v7 = vadd.f32 %v22131_v19, %v27361_v23  ;;  %v11040_v18 = vpop.f32.mrb[37].mxu0  ;;  %v11958_v38 = vld [vmem:[#allocation2 + $0x60] ss:$2 sm:$0xff]  ;;  %v12018_v10 = vld [vmem:[#allocation2 + $0x61] ss:$2 sm:$0xff]  ;;  %v11741_v55 = vmax.f32 %v11621_v6, 0.0 }
 0x652   : > { %v23451_v20 = vadd.f32 %v11040_v18, %v27365_v31  ;;  %v12071_v32 = vmax.f32 %v11958_v38, %v12018_v10  ;;  %v11620_v31 = vadd.f32 %v23449_v40, %v27990_v50 }
 0x653   : > { %v11623_v21 = vadd.f32 %v23450_v7, %v27990_v50 }
 0x654   : > { %v11622_v8 = vadd.f32 %v23451_v20, %v27990_v50  ;;  %v22134_v1 = vpop.f32.mrb[38].mxu0  ;;  %12101 = vst.msk [vmem:[#allocation3 + $0x30] sm:$0xff] %vm384_vm2, %v12071_v32  ;;  %v11740_v16 = vmax.f32 %v11620_v31, 0.0 }
 0x655   : > { %v11743_v23 = vmax.f32 %v11623_v21, 0.0  ;;  %v23452_v45 = vadd.f32 %v22134_v1, %v27369_v46  ;;  %v11050_v62 = vpop.f32.mrb[39].mxu0  ;;  %v11960_v5 = vld [vmem:[#allocation2 + $0x70] ss:$2 sm:$0xff]  ;;  %v12020_v56 = vld [vmem:[#allocation2 + $0x71] ss:$2 sm:$0xff] }
 0x656   : > { %v11742_v42 = vmax.f32 %v11622_v8, 0.0  ;;  %v23453_v25 = vadd.f32 %v11050_v62, %v27373_v61  ;;  %v12072_v60 = vmax.f32 %v11960_v5, %v12020_v56  ;;  %v30604_v62 = vld [vmem:[#allocation11_spill] sm:$0xff] }
 0x657   : > { %v11859_v51 = vmax.f32 %v11739_v47, %v11743_v23  ;;  %v11625_v58 = vadd.f32 %v23452_v45, %v27990_v50 }
 0x658   : > { %v11858_v28 = vmax.f32 %v11738_v13, %v11742_v42  ;;  %v11624_v52 = vadd.f32 %v23453_v25, %v27990_v50  ;;  %v22137_v30 = vpop.f32.mrb[40].mxu0  ;;  %12102 = vst.msk [vmem:[#allocation3 + $0x38] sm:$0xff] %vm384_vm2, %v12072_v60  ;;  %v30605_v60 = vld [vmem:[#allocation12_spill] sm:$0xff] }
 0x659   : > { %11863 = vst.msk [vmem:[#allocation2 + $0x88] sm:$0xff] %vm384_vm2, %v11859_v51  ;;  %v11745_v46 = vmax.f32 %v11625_v58, 0.0  ;;  %v23454_v39 = vadd.f32 %v22137_v30, %v27377_v14  ;;  %v11060_v24 = vpop.f32.mrb[41].mxu0  ;;  %v12154_v30 = vld [vmem:[%s30456_s3 + $0x18] sm:$0xff] }
 0x65a   : > { %11862 = vst.msk [vmem:[#allocation2 + $0x80] sm:$0xff] %vm384_vm2, %v11858_v28  ;;  %v11744_v61 = vmax.f32 %v11624_v52, 0.0  ;;  %v23455_v3 = vadd.f32 %v11060_v24, %v27381_v12  ;;  %v12153_v52 = vld [vmem:[%s30456_s3 + $0x10] sm:$0xff] }
 0x65b   : > { %v11861_v37 = vmax.f32 %v11741_v55, %v11745_v46  ;;  %v12160_v11 = vld [vmem:[#allocation3 + $0x29] sm:$0xff]  ;;  %v11627_v57 = vadd.f32 %v23454_v39, %v27990_v50  ;;  %v22888_v46 = vpack.c.bf16 %v12154_v30, %v12153_v52 }
 0x65c   : > { %v11860_v29 = vmax.f32 %v11740_v16, %v11744_v61  ;;  %v22140_v34 = vpop.f32.mrb[42].mxu0  ;;  %22270 = vmatmul.mubr.msk.f32.gmra.mrb[124].mxu1 %vm384_vm2, %v12160_v11  ;;  %v11626_v12 = vadd.f32 %v23455_v3, %v27990_v50  ;;  %v30607_v61 = vld [vmem:[#allocation14_spill] sm:$0xff] }
 0x65d   : > { %11865 = vst.msk [vmem:[#allocation2 + $0x98] sm:$0xff] %vm384_vm2, %v11861_v37  ;;  %v23456_v26 = vadd.f32 %v22140_v34, %v27385_v48  ;;  %v11070_v36 = vpop.f32.mrb[43].mxu0  ;;  %v11747_v44 = vmax.f32 %v11627_v57, 0.0  ;;  %22889 = vmatprep.subr.bf16.mxu1 %v22888_v46  ;;  %v30608_v34 = vld [vmem:[#allocation15_spill] sm:$0xff] }
 0x65e   : > { %11864 = vst.msk [vmem:[#allocation2 + $0x90] sm:$0xff] %vm384_vm2, %v11860_v29  ;;  %v23457_v14 = vadd.f32 %v11070_v36, %v27389_v54  ;;  %v11746_v54 = vmax.f32 %v11626_v12, 0.0  ;;  %22891 = vmatpush3.bf16.msra.mxu1 %v22888_v46 }
 0x65f   : > { %v12161_v33 = vld [vmem:[#allocation3 + $0x31] sm:$0xff]  ;;  %v11629_v9 = vadd.f32 %v23456_v26, %v27990_v50 }
 0x660   : > { %v22143_v59 = vpop.f32.mrb[44].mxu0  ;;  %22272 = vmatprep.mubr.msk.f32.mxu1 %vm384_vm2, %v12161_v33 }
 0x661   : > { %v23458_v53 = vadd.f32 %v22143_v59, %v27393_v0  ;;  %v11080_v17 = vpop.f32.mrb[45].mxu0  ;;  %v11962_v2 = vld [vmem:[#allocation2 + $0x80] ss:$2 sm:$0xff]  ;;  %v12022_v49 = vld [vmem:[#allocation2 + $0x81] ss:$2 sm:$0xff]  ;;  %v11749_v1 = vmax.f32 %v11629_v9, 0.0 }
 0x662   : > { %v23459_v48 = vadd.f32 %v11080_v17, %v27397_v15  ;;  %v12073_v40 = vmax.f32 %v11962_v2, %v12022_v49  ;;  %v11628_v15 = vadd.f32 %v23457_v14, %v27990_v50  ;;  %v30609_v2 = vld [vmem:[#allocation16_spill] sm:$0xff] }
 0x663   : > { %v11631_v4 = vadd.f32 %v23458_v53, %v27990_v50 }
 0x664   : > { %v11630_v41 = vadd.f32 %v23459_v48, %v27990_v50  ;;  %v22146_v63 = vpop.f32.mrb[46].mxu0  ;;  %12103 = vst.msk [vmem:[#allocation3 + $0x40] sm:$0xff] %vm384_vm2, %v12073_v40  ;;  %v11748_v45 = vmax.f32 %v11628_v15, 0.0 }
 0x665   : > { %v11751_v22 = vmax.f32 %v11631_v4, 0.0  ;;  %v23460_v0 = vadd.f32 %v22146_v63, %v27401_v27  ;;  %v11090_v19 = vpop.f32.mrb[47].mxu0  ;;  %v11964_v7 = vld [vmem:[#allocation2 + $0x90] ss:$2 sm:$0xff]  ;;  %v12024_v18 = vld [vmem:[#allocation2 + $0x91] ss:$2 sm:$0xff] }
 0x666   : > { %v11750_v38 = vmax.f32 %v11630_v41, 0.0  ;;  %v23461_v10 = vadd.f32 %v11090_v19, %v27405_v35  ;;  %v12074_v20 = vmax.f32 %v11964_v7, %v12024_v18  ;;  %v30610_v41 = vld [vmem:[#allocation17_spill] sm:$0xff] }
 0x667   : > { %v11867_v32 = vmax.f32 %v11747_v44, %v11751_v22  ;;  %v11633_v21 = vadd.f32 %v23460_v0, %v27990_v50 }
 0x668   : > { %v11866_v47 = vmax.f32 %v11746_v54, %v11750_v38  ;;  %v11632_v13 = vadd.f32 %v23461_v10, %v27990_v50  ;;  %v22149_v8 = vpop.f32.mrb[48].mxu0  ;;  %12104 = vst.msk [vmem:[#allocation3 + $0x48] sm:$0xff] %vm384_vm2, %v12074_v20  ;;  %v30611_v10 = vld [vmem:[#allocation18_spill] sm:$0xff] }
 0x669   : > { %11871 = vst.msk [vmem:[#allocation2 + $0xa8] sm:$0xff] %vm384_vm2, %v11867_v32  ;;  %v11753_v27 = vmax.f32 %v11633_v21, 0.0  ;;  %v23462_v6 = vadd.f32 %v22149_v8, %v27409_v43  ;;  %v11100_v23 = vpop.f32.mrb[49].mxu0  ;;  %v30606_v43 = vld [vmem:[#allocation13_spill] sm:$0xff] }
 0x66a   : > { %11870 = vst.msk [vmem:[#allocation2 + $0xa0] sm:$0xff] %vm384_vm2, %v11866_v47  ;;  %v11752_v35 = vmax.f32 %v11632_v13, 0.0  ;;  %v23463_v5 = vadd.f32 %v11100_v23, %v30604_v62  ;;  %v30612_v13 = vld [vmem:[#allocation19_spill] sm:$0xff] }
 0x66b   : > { %v11869_v56 = vmax.f32 %v11749_v1, %v11753_v27  ;;  %v12162_v31 = vld [vmem:[#allocation3 + $0x39] sm:$0xff]  ;;  %v11635_v39 = vadd.f32 %v23462_v6, %v27990_v50 }
 0x66c   : > { %v11868_v42 = vmax.f32 %v11748_v45, %v11752_v35  ;;  %v22152_v25 = vpop.f32.mrb[50].mxu0  ;;  %22273 = vmatmul.mubr.msk.f32.gmra.mrb[126].mxu1 %vm384_vm2, %v12162_v31  ;;  %v11634_v24 = vadd.f32 %v23463_v5, %v27990_v50  ;;  %v30613_v45 = vld [vmem:[#allocation20_spill] sm:$0xff]  ;;  %v30614_v5 = vld [vmem:[#allocation21_spill] sm:$0xff] }
 0x66d   : > { %11873 = vst.msk [vmem:[#allocation2 + $0xb8] sm:$0xff] %vm384_vm2, %v11869_v56  ;;  %v23464_v51 = vadd.f32 %v22152_v25, %v30605_v60  ;;  %v11110_v58 = vpop.f32.mrb[51].mxu0  ;;  %v11755_v33 = vmax.f32 %v11635_v39, 0.0  ;;  %v18573_v31 = vld [vmem:[%s30456_s3 + $0x40] sm:$0xff]  ;;  %v30616_v39 = vld [vmem:[#allocation23_spill] sm:$0xff] }
 0x66e   : > { %11872 = vst.msk [vmem:[#allocation2 + $0xb0] sm:$0xff] %vm384_vm2, %v11868_v42  ;;  %v23465_v28 = vadd.f32 %v11110_v58, %v30606_v43  ;;  %v11754_v57 = vmax.f32 %v11634_v24, 0.0  ;;  %v18574_v42 = vld [vmem:[%s30456_s3 + $0x48] sm:$0xff] }
 0x66f   : > { %v12163_v55 = vld [vmem:[#allocation3 + $0x41] sm:$0xff]  ;;  %v11637_v53 = vadd.f32 %v23464_v51, %v27990_v50  ;;  %v28193_v60 = vpack.c.bf16 %v18574_v42, %v18573_v31 }
 0x670   : > { %v22155_v16 = vpop.f32.mrb[52].mxu0  ;;  %22275 = vmatprep.mubr.msk.f32.mxu1 %vm384_vm2, %v12163_v55  ;;  %v11636_v44 = vadd.f32 %v23465_v28, %v27990_v50  ;;  %v30615_v28 = vld [vmem:[#allocation22_spill] sm:$0xff] }
 0x671   : > { %v23466_v3 = vadd.f32 %v22155_v16, %v30607_v61  ;;  %v11120_v37 = vpop.f32.mrb[53].mxu0  ;;  %v11966_v11 = vld [vmem:[#allocation2 + $0xa0] ss:$2 sm:$0xff]  ;;  %v12026_v29 = vld [vmem:[#allocation2 + $0xa1] ss:$2 sm:$0xff]  ;;  %v11757_v15 = vmax.f32 %v11637_v53, 0.0  ;;  %22893 = vmatprep.subr.bf16.mxu1 %v28193_v60 }
 0x672   : > { %v23467_v26 = vadd.f32 %v11120_v37, %v30608_v34  ;;  %v12075_v36 = vmax.f32 %v11966_v11, %v12026_v29  ;;  %v11756_v21 = vmax.f32 %v11636_v44, 0.0 }
 0x673   : > { %v11639_v14 = vadd.f32 %v23466_v3, %v27990_v50 }
 0x674   : > { %v11638_v12 = vadd.f32 %v23467_v26, %v27990_v50  ;;  %v22158_v59 = vpop.f32.mrb[54].mxu0  ;;  %12105 = vst.msk [vmem:[#allocation3 + $0x50] sm:$0xff] %vm384_vm2, %v12075_v36  ;;  %v30617_v36 = vld [vmem:[#allocation24_spill] sm:$0xff] }
 0x675   : > { %v11759_v17 = vmax.f32 %v11639_v14, 0.0  ;;  %v23468_v49 = vadd.f32 %v22158_v59, %v30609_v2  ;;  %v11130_v48 = vpop.f32.mrb[55].mxu0  ;;  %v11968_v40 = vld [vmem:[#allocation2 + $0xb0] ss:$2 sm:$0xff]  ;;  %v12028_v4 = vld [vmem:[#allocation2 + $0xb1] ss:$2 sm:$0xff] }
 0x676   : > { %v11758_v54 = vmax.f32 %v11638_v12, 0.0  ;;  %v23469_v63 = vadd.f32 %v11130_v48, %v30610_v41  ;;  %v12076_v9 = vmax.f32 %v11968_v40, %v12028_v4 }
 0x677   : > { %v11875_v22 = vmax.f32 %v11755_v33, %v11759_v17  ;;  %v11641_v0 = vadd.f32 %v23468_v49, %v27990_v50  ;;  %v30618_v17 = vld [vmem:[#allocation25_spill] sm:$0xff] }
 0x678   : > { %v11874_v19 = vmax.f32 %v11754_v57, %v11758_v54  ;;  %v11640_v7 = vadd.f32 %v23469_v63, %v27990_v50  ;;  %v22161_v18 = vpop.f32.mrb[56].mxu0  ;;  %12106 = vst.msk [vmem:[#allocation3 + $0x58] sm:$0xff] %vm384_vm2, %v12076_v9  ;;  %v30619_v9 = vld [vmem:[#allocation26_spill] sm:$0xff] }
 0x679   : > { %11879 = vst.msk [vmem:[#allocation2 + $0xc8] sm:$0xff] %vm384_vm2, %v11875_v22  ;;  %v11761_v38 = vmax.f32 %v11641_v0, 0.0  ;;  %v23470_v20 = vadd.f32 %v22161_v18, %v30611_v10  ;;  %v11140_v32 = vpop.f32.mrb[57].mxu0 }
 0x67a   : > { %11878 = vst.msk [vmem:[#allocation2 + $0xc0] sm:$0xff] %vm384_vm2, %v11874_v19  ;;  %v11760_v47 = vmax.f32 %v11640_v7, 0.0  ;;  %v23471_v8 = vadd.f32 %v11140_v32, %v30612_v13  ;;  %v30482_v19 = vmov 0.0  }
 0x67b   : > { %v11877_v1 = vmax.f32 %v11757_v15, %v11761_v38  ;;  %v12164_v27 = vld [vmem:[#allocation3 + $0x49] sm:$0xff]  ;;  %v11643_v51 = vadd.f32 %v23470_v20, %v27990_v50  ;;  %385 = vst.msk [vmem:[#allocation3 + $0xf0] sm:$0xff] %vm384_vm2, %v30482_v19  ;;  %v18663_v19 = vld [vmem:[%s30456_s3 + $0xa0] sm:$0xff] }
 0x67c   : > { %v11876_v6 = vmax.f32 %v11756_v21, %v11760_v47  ;;  %v22164_v23 = vpop.f32.mrb[58].mxu0  ;;  %22276 = vmatmul.mubr.msk.f32.gmra.mrb[128].mxu1 %vm384_vm2, %v12164_v27  ;;  %v11642_v58 = vadd.f32 %v23471_v8, %v27990_v50  ;;  %v30620_v15 = vld [vmem:[#allocation27_spill] sm:$0xff]  ;;  %v30621_v47 = vld [vmem:[#allocation28_spill] sm:$0xff] }
 0x67d   : > { %11881 = vst.msk [vmem:[#allocation2 + $0xd8] sm:$0xff] %vm384_vm2, %v11877_v1  ;;  %v23472_v35 = vadd.f32 %v22164_v23, %v30613_v45  ;;  %v11150_v62 = vpop.f32.mrb[59].mxu0  ;;  %v11763_v3 = vmax.f32 %v11643_v51, 0.0  ;;  %v30622_v1 = vld [vmem:[#allocation29_spill] sm:$0xff] }
 0x67e   : > { %11880 = vst.msk [vmem:[#allocation2 + $0xd0] sm:$0xff] %vm384_vm2, %v11876_v6  ;;  %v23473_v56 = vadd.f32 %v11150_v62, %v30614_v5  ;;  %v11762_v37 = vmax.f32 %v11642_v58, 0.0  ;;  %v30623_v62 = vld [vmem:[#allocation30_spill] sm:$0xff] }
 0x67f   : > { %v12165_v25 = vld [vmem:[#allocation3 + $0x51] sm:$0xff]  ;;  %v11645_v34 = vadd.f32 %v23472_v35, %v27990_v50 }
 0x680   : > { %v22167_v43 = vpop.f32.mrb[60].mxu0  ;;  %22278 = vmatprep.mubr.msk.f32.mxu1 %vm384_vm2, %v12165_v25  ;;  %v11644_v59 = vadd.f32 %v23473_v56, %v27990_v50  ;;  %v30624_v25 = vld [vmem:[#allocation31_spill] sm:$0xff] }
 0x681   : > { %v23474_v52 = vadd.f32 %v22167_v43, %v30615_v28  ;;  %v11160_v30 = vpop.f32.mrb[61].mxu0  ;;  %v11970_v55 = vld [vmem:[#allocation2 + $0xc0] ss:$2 sm:$0xff]  ;;  %v12030_v46 = vld [vmem:[#allocation2 + $0xc1] ss:$2 sm:$0xff]  ;;  %v11765_v41 = vmax.f32 %v11645_v34, 0.0 }
 0x682   : > { %v23475_v24 = vadd.f32 %v11160_v30, %v30616_v39  ;;  %v12077_v16 = vmax.f32 %v11970_v55, %v12030_v46  ;;  %v11764_v7 = vmax.f32 %v11644_v59, 0.0  ;;  %v30626_v34 = vld [vmem:[#allocation33_spill] sm:$0xff] }
 0x683   : > { %v11647_v61 = vadd.f32 %v23474_v52, %v27990_v50 }
 0x684   : > { %v11646_v11 = vadd.f32 %v23475_v24, %v27990_v50  ;;  %v22170_v29 = vpop.f32.mrb[62].mxu0  ;;  %12107 = vst.msk [vmem:[#allocation3 + $0x60] sm:$0xff] %vm384_vm2, %v12077_v16  ;;  %v30625_v24 = vld [vmem:[#allocation32_spill] sm:$0xff] }
 0x685   : > { %v11767_v26 = vmax.f32 %v11647_v61, 0.0  ;;  %v23476_v14 = vadd.f32 %v22170_v29, %v30617_v36  ;;  %v11170_v33 = vpop.f32.mrb[63].mxu0  ;;  %v11972_v57 = vld [vmem:[#allocation2 + $0xd0] ss:$2 sm:$0xff]  ;;  %v12032_v12 = vld [vmem:[#allocation2 + $0xd1] ss:$2 sm:$0xff] }
 0x686   : > { %v11766_v53 = vmax.f32 %v11646_v11, 0.0  ;;  %v23477_v2 = vadd.f32 %v11170_v33, %v30618_v17  ;;  %v12078_v49 = vmax.f32 %v11972_v57, %v12032_v12 }
 0x687   : > { %v11883_v48 = vmax.f32 %v11763_v3, %v11767_v26  ;;  %v11649_v40 = vadd.f32 %v23476_v14, %v27990_v50 }
 0x688   : > { %v11882_v4 = vmax.f32 %v11762_v37, %v11766_v53  ;;  %v11648_v44 = vadd.f32 %v23477_v2, %v27990_v50  ;;  %v22173_v54 = vpop.f32.mrb[64].mxu0  ;;  %12108 = vst.msk [vmem:[#allocation3 + $0x68] sm:$0xff] %vm384_vm2, %v12078_v49  ;;  %v30627_v2 = vld [vmem:[#allocation34_spill] sm:$0xff] }
 0x689   : > { %11887 = vst.msk [vmem:[#allocation2 + $0xe8] sm:$0xff] %vm384_vm2, %v11883_v48  ;;  %v11769_v63 = vmax.f32 %v11649_v40, 0.0  ;;  %v23478_v22 = vadd.f32 %v22173_v54, %v30619_v9  ;;  %v11180_v0 = vpop.f32.mrb[65].mxu0 }
 0x68a   : > { %11886 = vst.msk [vmem:[#allocation2 + $0xe0] sm:$0xff] %vm384_vm2, %v11882_v4  ;;  %v11768_v18 = vmax.f32 %v11648_v44, 0.0  ;;  %v23479_v38 = vadd.f32 %v11180_v0, %v30620_v15  ;;  %v30628_v44 = vld [vmem:[#allocation35_spill] sm:$0xff]  ;;  %v30629_v0 = vld [vmem:[#allocation36_spill] sm:$0xff]  ;;  %v30630_v15 = vld [vmem:[#allocation37_spill] sm:$0xff] }
 0x68b   : > { %v11885_v10 = vmax.f32 %v11765_v41, %v11769_v63  ;;  %v12166_v20 = vld [vmem:[#allocation3 + $0x59] sm:$0xff]  ;;  %v11651_v23 = vadd.f32 %v23478_v22, %v27990_v50 }
 0x68c   : > { %v11884_v32 = vmax.f32 %v11764_v7, %v11768_v18  ;;  %v22176_v21 = vpop.f32.mrb[66].mxu0  ;;  %22279 = vmatmul.mubr.msk.f32.gmra.mrb[130].mxu1 %vm384_vm2, %v12166_v20  ;;  %v11650_v45 = vadd.f32 %v23479_v38, %v27990_v50 }
 0x68d   : > { %11889 = vst.msk [vmem:[#allocation2 + $0xf8] sm:$0xff] %vm384_vm2, %v11885_v10  ;;  %v23480_v13 = vadd.f32 %v22176_v21, %v30621_v47  ;;  %v11190_v8 = vpop.f32.mrb[67].mxu0  ;;  %v11771_v28 = vmax.f32 %v11651_v23, 0.0  ;;  %v30631_v47 = vld [vmem:[#allocation38_spill] sm:$0xff] }
 0x68e   : > { %11888 = vst.msk [vmem:[#allocation2 + $0xf0] sm:$0xff] %vm384_vm2, %v11884_v32  ;;  %v23481_v27 = vadd.f32 %v11190_v8, %v30622_v1  ;;  %v11770_v52 = vmax.f32 %v11650_v45, 0.0 }
 0x68f   : > { %v12167_v6 = vld [vmem:[#allocation3 + $0x61] sm:$0xff]  ;;  %v11653_v46 = vadd.f32 %v23480_v13, %v27990_v50 }
 0x690   : > { %v22179_v35 = vpop.f32.mrb[68].mxu0  ;;  %22281 = vmatprep.mubr.msk.f32.mxu1 %vm384_vm2, %v12167_v6  ;;  %v11652_v11 = vadd.f32 %v23481_v27, %v27990_v50  ;;  %v30632_v6 = vld [vmem:[#allocation39_spill] sm:$0xff] }
 0x691   : > { %v23482_v5 = vadd.f32 %v22179_v35, %v30623_v62  ;;  %v11200_v56 = vpop.f32.mrb[69].mxu0  ;;  %v11974_v31 = vld [vmem:[#allocation2 + $0xe0] ss:$2 sm:$0xff]  ;;  %v12034_v42 = vld [vmem:[#allocation2 + $0xe1] ss:$2 sm:$0xff]  ;;  %v11773_v53 = vmax.f32 %v11653_v46, 0.0 }
 0x692   : > { %v23483_v51 = vadd.f32 %v11200_v56, %v30624_v25  ;;  %v12079_v58 = vmax.f32 %v11974_v31, %v12034_v42  ;;  %v11772_v40 = vmax.f32 %v11652_v11, 0.0 }
 0x693   : > { %v11655_v43 = vadd.f32 %v23482_v5, %v27990_v50 }
 0x694   : > { %v11654_v30 = vadd.f32 %v23483_v51, %v27990_v50  ;;  %v22182_v55 = vpop.f32.mrb[70].mxu0  ;;  %12109 = vst.msk [vmem:[#allocation3 + $0x70] sm:$0xff] %vm384_vm2, %v12079_v58  ;;  %v30633_v51 = vld [vmem:[#allocation40_spill] sm:$0xff] }
 0x695   : > { %v11775_v39 = vmax.f32 %v11655_v43, 0.0  ;;  %v23484_v16 = vadd.f32 %v22182_v55, %v30625_v24  ;;  %v11210_v61 = vpop.f32.mrb[71].mxu0  ;;  %v11976_v3 = vld [vmem:[#allocation2 + $0xf0] ss:$2 sm:$0xff]  ;;  %v12036_v37 = vld [vmem:[#allocation2 + $0xf1] ss:$2 sm:$0xff] }
 0x696   : > { %v11774_v29 = vmax.f32 %v11654_v30, 0.0  ;;  %v23485_v26 = vadd.f32 %v11210_v61, %v30626_v34  ;;  %v12080_v36 = vmax.f32 %v11976_v3, %v12036_v37  ;;  %v28259_v30 = vld [vmem:[%s30455_s2] ss:$0 sm:$0xff] }
 0x697   : > { %v11891_v14 = vmax.f32 %v11771_v28, %v11775_v39  ;;  %v11657_v33 = vadd.f32 %v23484_v16, %v27990_v50  ;;  %v30634_v39 = vld [vmem:[#allocation41_spill] sm:$0xff] }
 0x698   : > { %v11890_v57 = vmax.f32 %v11770_v52, %v11774_v29  ;;  %v11656_v12 = vadd.f32 %v23485_v26, %v27990_v50  ;;  %v22185_v59 = vpop.f32.mrb[72].mxu0  ;;  %12110 = vst.msk [vmem:[#allocation3 + $0x78] sm:$0xff] %vm384_vm2, %v12080_v36  ;;  %v30635_v26 = vld [vmem:[#allocation42_spill] sm:$0xff] }
 0x699   : > { %11895 = vst.msk [vmem:[#allocation2 + $0x108] sm:$0xff] %vm384_vm2, %v11891_v14  ;;  %v11777_v17 = vmax.f32 %v11657_v33, 0.0  ;;  %v23486_v49 = vadd.f32 %v22185_v59, %v30627_v2  ;;  %v11220_v48 = vpop.f32.mrb[73].mxu0 }
 0x69a   : > { %11894 = vst.msk [vmem:[#allocation2 + $0x100] sm:$0xff] %vm384_vm2, %v11890_v57  ;;  %v11776_v4 = vmax.f32 %v11656_v12, 0.0  ;;  %v23487_v54 = vadd.f32 %v11220_v48, %v30628_v44  ;;  %v30636_v12 = vld [vmem:[#allocation43_spill] sm:$0xff]  ;;  %v30637_v48 = vld [vmem:[#allocation44_spill] sm:$0xff]  ;;  %v30638_v44 = vld [vmem:[#allocation45_spill] sm:$0xff] }
 0x69b   : > { %v11893_v41 = vmax.f32 %v11773_v53, %v11777_v17  ;;  %v12168_v63 = vld [vmem:[#allocation3 + $0x69] sm:$0xff]  ;;  %v11659_v20 = vadd.f32 %v23486_v49, %v27990_v50 }
 0x69c   : > { %v11892_v9 = vmax.f32 %v11772_v40, %v11776_v4  ;;  %v22188_v22 = vpop.f32.mrb[74].mxu0  ;;  %22282 = vmatmul.mubr.msk.f32.gmra.mrb[132].mxu1 %vm384_vm2, %v12168_v63  ;;  %v11658_v32 = vadd.f32 %v23487_v54, %v27990_v50 }
 0x69d   : > { %11897 = vst.msk [vmem:[#allocation2 + $0x118] sm:$0xff] %vm384_vm2, %v11893_v41  ;;  %v23488_v7 = vadd.f32 %v22188_v22, %v30629_v0  ;;  %v11230_v18 = vpop.f32.mrb[75].mxu0  ;;  %v11779_v62 = vmax.f32 %v11659_v20, 0.0  ;;  %v30639_v0 = vld [vmem:[#allocation46_spill] sm:$0xff] }
 0x69e   : > { %11896 = vst.msk [vmem:[#allocation2 + $0x110] sm:$0xff] %vm384_vm2, %v11892_v9  ;;  %v23489_v38 = vadd.f32 %v11230_v18, %v30630_v15  ;;  %v11778_v5 = vmax.f32 %v11658_v32, 0.0 }
 0x69f   : > { %v12169_v10 = vld [vmem:[#allocation3 + $0x71] sm:$0xff]  ;;  %v11661_v42 = vadd.f32 %v23488_v7, %v27990_v50 }
 0x6a0   : > { %v22191_v21 = vpop.f32.mrb[76].mxu0  ;;  %22284 = vmatprep.mubr.msk.f32.mxu1 %vm384_vm2, %v12169_v10  ;;  %v11660_v55 = vadd.f32 %v28259_v30, %v23489_v38  ;;  %v30640_v10 = vld [vmem:[#allocation47_spill] sm:$0xff] }
 0x6a1   : > { %v23490_v13 = vadd.f32 %v22191_v21, %v30631_v47  ;;  %v11240_v8 = vpop.f32.mrb[77].mxu0  ;;  %v11978_v1 = vld [vmem:[#allocation2 + $0x100] ss:$2 sm:$0xff]  ;;  %v12038_v27 = vld [vmem:[#allocation2 + $0x101] ss:$2 sm:$0xff]  ;;  %v11781_v29 = vmax.f32 %v11661_v42, 0.0 }
 0x6a2   : > { %v23491_v23 = vadd.f32 %v11240_v8, %v30632_v6  ;;  %v12081_v45 = vmax.f32 %v11978_v1, %v12038_v27  ;;  %v11780_v33 = vmax.f32 %v11660_v55, 0.0  ;;  %v30642_v42 = vld [vmem:[#allocation49_spill] sm:$0xff] }
 0x6a3   : > { %v11663_v35 = vadd.f32 %v23490_v13, %v27990_v50 }
 0x6a4   : > { %v11662_v56 = vadd.f32 %v23491_v23, %v27990_v50  ;;  %v22194_v31 = vpop.f32.mrb[78].mxu0  ;;  %12111 = vst.msk [vmem:[#allocation3 + $0x80] sm:$0xff] %vm384_vm2, %v12081_v45  ;;  %v30641_v23 = vld [vmem:[#allocation48_spill] sm:$0xff] }
 0x6a5   : > { %v11783_v25 = vmax.f32 %v11663_v35, 0.0  ;;  %v23492_v58 = vadd.f32 %v22194_v31, %v30633_v51  ;;  %v11250_v43 = vpop.f32.mrb[79].mxu0  ;;  %v11980_v28 = vld [vmem:[#allocation2 + $0x110] ss:$2 sm:$0xff]  ;;  %v12040_v52 = vld [vmem:[#allocation2 + $0x111] ss:$2 sm:$0xff] }
 0x6a6   : > { %v11782_v46 = vmax.f32 %v11662_v56, 0.0  ;;  %v23493_v24 = vadd.f32 %v11250_v43, %v30634_v39  ;;  %v12082_v16 = vmax.f32 %v11980_v28, %v12040_v52 }
 0x6a7   : > { %v11899_v61 = vmax.f32 %v11779_v62, %v11783_v25  ;;  %v11665_v50 = vadd.f32 %v28259_v30, %v23492_v58 }
 0x6a8   : > { %v11898_v3 = vmax.f32 %v11778_v5, %v11782_v46  ;;  %v11664_v37 = vadd.f32 %v28259_v30, %v23493_v24  ;;  %v22197_v11 = vpop.f32.mrb[80].mxu0  ;;  %12112 = vst.msk [vmem:[#allocation3 + $0x88] sm:$0xff] %vm384_vm2, %v12082_v16  ;;  %v30643_v24 = vld [vmem:[#allocation50_spill] sm:$0xff] }
 0x6a9   : > { %11903 = vst.msk [vmem:[#allocation2 + $0x128] sm:$0xff] %vm384_vm2, %v11899_v61  ;;  %v11785_v34 = vmax.f32 %v11665_v50, 0.0  ;;  %v23494_v36 = vadd.f32 %v22197_v11, %v30635_v26  ;;  %v11260_v14 = vpop.f32.mrb[81].mxu0 }
 0x6aa   : > { %11902 = vst.msk [vmem:[#allocation2 + $0x120] sm:$0xff] %vm384_vm2, %v11898_v3  ;;  %v11784_v57 = vmax.f32 %v11664_v37, 0.0  ;;  %v23495_v59 = vadd.f32 %v11260_v14, %v30636_v12  ;;  %v30644_v37 = vld [vmem:[#allocation51_spill] sm:$0xff]  ;;  %v30645_v14 = vld [vmem:[#allocation52_spill] sm:$0xff]  ;;  %v30646_v12 = vld [vmem:[#allocation53_spill] sm:$0xff] }
 0x6ab   : > { %v11901_v53 = vmax.f32 %v11781_v29, %v11785_v34  ;;  %v28270_v17 = vld [vmem:[#allocation3 + $0x79] sm:$0xff]  ;;  %v11667_v63 = vadd.f32 %v28259_v30, %v23494_v36 }
 0x6ac   : > { %v11900_v2 = vmax.f32 %v11780_v33, %v11784_v57  ;;  %v22200_v49 = vpop.f32.mrb[82].mxu0  ;;  %22285 = vmatmul.mubr.msk.f32.gmra.mrb[134].mxu1 %vm384_vm2, %v28270_v17  ;;  %v11666_v9 = vadd.f32 %v28259_v30, %v23495_v59 }
 0x6ad   : > { %11905 = vst.msk [vmem:[#allocation2 + $0x138] sm:$0xff] %vm384_vm2, %v11901_v53  ;;  %v23496_v40 = vadd.f32 %v22200_v49, %v30637_v48  ;;  %v11270_v4 = vpop.f32.mrb[83].mxu0  ;;  %v11787_v47 = vmax.f32 %v11667_v63, 0.0 }
 0x6ae   : > { %11904 = vst.msk [vmem:[#allocation2 + $0x130] sm:$0xff] %vm384_vm2, %v11900_v2  ;;  %v23497_v54 = vadd.f32 %v11270_v4, %v30638_v44  ;;  %v11786_v13 = vmax.f32 %v11666_v9, 0.0  ;;  %v30648_v9 = vld [vmem:[#allocation55_spill] sm:$0xff] }
 0x6af   : > { %v28278_v41 = vld [vmem:[#allocation3 + $0x81] sm:$0xff]  ;;  %v11669_v27 = vadd.f32 %v28259_v30, %v23496_v40 }
 0x6b0   : > { %v22203_v22 = vpop.f32.mrb[84].mxu0  ;;  %22287 = vmatprep.mubr.msk.f32.mxu1 %vm384_vm2, %v28278_v41  ;;  %v11668_v56 = vadd.f32 %v28259_v30, %v23497_v54  ;;  %v30647_v40 = vld [vmem:[#allocation54_spill] sm:$0xff] }
 0x6b1   : > { %v23498_v7 = vadd.f32 %v22203_v22, %v30639_v0  ;;  %v11280_v18 = vpop.f32.mrb[85].mxu0  ;;  %v11982_v15 = vld [vmem:[#allocation2 + $0x120] ss:$2 sm:$0xff]  ;;  %v12042_v38 = vld [vmem:[#allocation2 + $0x121] ss:$2 sm:$0xff]  ;;  %v11789_v46 = vmax.f32 %v11669_v27, 0.0 }
 0x6b2   : > { %v23499_v20 = vadd.f32 %v11280_v18, %v30640_v10  ;;  %v12083_v32 = vmax.f32 %v11982_v15, %v12042_v38  ;;  %v11788_v50 = vmax.f32 %v11668_v56, 0.0 }
 0x6b3   : > { %v11671_v21 = vadd.f32 %v28259_v30, %v23498_v7 }
 0x6b4   : > { %v11670_v8 = vadd.f32 %v28259_v30, %v23499_v20  ;;  %v22206_v1 = vpop.f32.mrb[86].mxu0  ;;  %12113 = vst.msk [vmem:[#allocation3 + $0x90] sm:$0xff] %vm384_vm2, %v12083_v32 }
 0x6b5   : > { %v11791_v6 = vmax.f32 %v11671_v21, 0.0  ;;  %v23500_v45 = vadd.f32 %v22206_v1, %v30641_v23  ;;  %v11290_v35 = vpop.f32.mrb[87].mxu0  ;;  %v11984_v62 = vld [vmem:[#allocation2 + $0x130] ss:$2 sm:$0xff]  ;;  %v12044_v5 = vld [vmem:[#allocation2 + $0x131] ss:$2 sm:$0xff] }
 0x6b6   : > { %v11790_v31 = vmax.f32 %v11670_v8, 0.0  ;;  %v23501_v25 = vadd.f32 %v11290_v35, %v30642_v42  ;;  %v12084_v51 = vmax.f32 %v11984_v62, %v12044_v5  ;;  %v30649_v21 = vld [vmem:[#allocation56_spill] sm:$0xff]  ;;  %v30650_v23 = vld [vmem:[#allocation57_spill] sm:$0xff] }
 0x6b7   : > { %v11907_v58 = vmax.f32 %v11787_v47, %v11791_v6  ;;  %v11673_v43 = vadd.f32 %v28259_v30, %v23500_v45 }
 0x6b8   : > { %v11906_v28 = vmax.f32 %v11786_v13, %v11790_v31  ;;  %v11672_v52 = vadd.f32 %v28259_v30, %v23501_v25  ;;  %v22209_v55 = vpop.f32.mrb[88].mxu0  ;;  %12114 = vst.msk [vmem:[#allocation3 + $0x98] sm:$0xff] %vm384_vm2, %v12084_v51 }
 0x6b9   : > { %11911 = vst.msk [vmem:[#allocation2 + $0x148] sm:$0xff] %vm384_vm2, %v11907_v58  ;;  %v11793_v39 = vmax.f32 %v11673_v43, 0.0  ;;  %v23502_v16 = vadd.f32 %v22209_v55, %v30643_v24  ;;  %v11300_v61 = vpop.f32.mrb[89].mxu0  ;;  %v30651_v58 = vld [vmem:[#allocation58_spill] sm:$0xff] }
 0x6ba   : > { %11910 = vst.msk [vmem:[#allocation2 + $0x140] sm:$0xff] %vm384_vm2, %v11906_v28  ;;  %v11792_v3 = vmax.f32 %v11672_v52, 0.0  ;;  %v23503_v11 = vadd.f32 %v11300_v61, %v30644_v37 }
 0x6bb   : > { %v11909_v29 = vmax.f32 %v11789_v46, %v11793_v39  ;;  %v28300_v34 = vld [vmem:[#allocation3 + $0x89] sm:$0xff]  ;;  %v11675_v2 = vadd.f32 %v28259_v30, %v23502_v16 }
 0x6bc   : > { %v11908_v26 = vmax.f32 %v11788_v50, %v11792_v3  ;;  %v22212_v36 = vpop.f32.mrb[90].mxu0  ;;  %22288 = vmatmul.mubr.msk.f32.gmra.mrb[136].mxu1 %vm384_vm2, %v28300_v34  ;;  %v11674_v49 = vadd.f32 %v28259_v30, %v23503_v11  ;;  %v30652_v46 = vld [vmem:[#allocation59_spill] sm:$0xff]  ;;  %v30653_v3 = vld [vmem:[#allocation60_spill] sm:$0xff] }
 0x6bd   : > { %11913 = vst.msk [vmem:[#allocation2 + $0x158] sm:$0xff] %vm384_vm2, %v11909_v29  ;;  %v23504_v33 = vadd.f32 %v22212_v36, %v30645_v14  ;;  %v11310_v57 = vpop.f32.mrb[91].mxu0  ;;  %v11795_v18 = vmax.f32 %v11675_v2, 0.0  ;;  %v30654_v29 = vld [vmem:[#allocation61_spill] sm:$0xff] }
 0x6be   : > { %11912 = vst.msk [vmem:[#allocation2 + $0x150] sm:$0xff] %vm384_vm2, %v11908_v26  ;;  %v23505_v59 = vadd.f32 %v11310_v57, %v30646_v12  ;;  %v11794_v15 = vmax.f32 %v11674_v49, 0.0  ;;  %v30655_v12 = vld [vmem:[#allocation62_spill] sm:$0xff] }
 0x6bf   : > { %v28308_v53 = vld [vmem:[#allocation3 + $0x91] sm:$0xff]  ;;  %v11677_v20 = vadd.f32 %v28259_v30, %v23504_v33 }
 0x6c0   : > { %v22215_v48 = vpop.f32.mrb[92].mxu0  ;;  %22290 = vmatprep.mubr.msk.f32.mxu1 %vm384_vm2, %v28308_v53  ;;  %v11676_v27 = vadd.f32 %v28259_v30, %v23505_v59 }
 0x6c1   : > { %v23506_v4 = vadd.f32 %v22215_v48, %v30647_v40  ;;  %v11320_v44 = vpop.f32.mrb[93].mxu0  ;;  %v11986_v54 = vld [vmem:[#allocation2 + $0x140] ss:$2 sm:$0xff]  ;;  %v12046_v63 = vld [vmem:[#allocation2 + $0x141] ss:$2 sm:$0xff]  ;;  %v11797_v25 = vmax.f32 %v11677_v20, 0.0 }
 0x6c2   : > { %v23507_v22 = vadd.f32 %v11320_v44, %v30648_v9  ;;  %v12085_v0 = vmax.f32 %v11986_v54, %v12046_v63  ;;  %v11796_v52 = vmax.f32 %v11676_v27, 0.0  ;;  %v30656_v40 = vld [vmem:[#allocation63_spill] sm:$0xff] }
 0x6c3   : > { %v11679_v7 = vadd.f32 %v28259_v30, %v23506_v4 }
 0x6c4   : > { %v11678_v38 = vadd.f32 %v28259_v30, %v23507_v22  ;;  %v22218_v10 = vpop.f32.mrb[94].mxu0  ;;  %12115 = vst.msk [vmem:[#allocation3 + $0xa0] sm:$0xff] %vm384_vm2, %v12085_v0 }
 0x6c5   : > { %v11799_v32 = vmax.f32 %v11679_v7, 0.0  ;;  %v23508_v47 = vadd.f32 %v22218_v10, %v30649_v21  ;;  %v11330_v13 = vpop.f32.mrb[95].mxu0  ;;  %v11988_v8 = vld [vmem:[#allocation2 + $0x150] ss:$2 sm:$0xff]  ;;  %v12048_v1 = vld [vmem:[#allocation2 + $0x151] ss:$2 sm:$0xff] }
 0x6c6   : > { %v11798_v6 = vmax.f32 %v11678_v38, 0.0  ;;  %v23509_v45 = vadd.f32 %v11330_v13, %v30650_v23  ;;  %v12086_v35 = vmax.f32 %v11988_v8, %v12048_v1  ;;  %v30658_v13 = vld [vmem:[#allocation65_spill] sm:$0xff] }
 0x6c7   : > { %v11915_v62 = vmax.f32 %v11795_v18, %v11799_v32  ;;  %v11681_v5 = vadd.f32 %v28259_v30, %v23508_v47 }
 0x6c8   : > { %v11914_v56 = vmax.f32 %v11794_v15, %v11798_v6  ;;  %v11680_v31 = vadd.f32 %v28259_v30, %v23509_v45  ;;  %v22221_v42 = vpop.f32.mrb[96].mxu0  ;;  %12116 = vst.msk [vmem:[#allocation3 + $0xa8] sm:$0xff] %vm384_vm2, %v12086_v35  ;;  %v30657_v15 = vld [vmem:[#allocation64_spill] sm:$0xff] }
 0x6c9   : > { %11919 = vst.msk [vmem:[#allocation2 + $0x168] sm:$0xff] %vm384_vm2, %v11915_v62  ;;  %v11801_v51 = vmax.f32 %v11681_v5, 0.0  ;;  %v23510_v43 = vadd.f32 %v22221_v42, %v30651_v58  ;;  %v11340_v28 = vpop.f32.mrb[97].mxu0  ;;  %v30660_v58 = vld [vmem:[#allocation67_spill] sm:$0xff] }
 0x6ca   : > { %11918 = vst.msk [vmem:[#allocation2 + $0x160] sm:$0xff] %vm384_vm2, %v11914_v56  ;;  %v11800_v55 = vmax.f32 %v11680_v31, 0.0  ;;  %v23511_v39 = vadd.f32 %v11340_v28, %v30652_v46  ;;  %v30659_v56 = vld [vmem:[#allocation66_spill] sm:$0xff] }
 0x6cb   : > { %v11917_v24 = vmax.f32 %v11797_v25, %v11801_v51  ;;  %v28330_v16 = vld [vmem:[#allocation3 + $0x99] sm:$0xff]  ;;  %v11683_v14 = vadd.f32 %v28259_v30, %v23510_v43 }
 0x6cc   : > { %v11916_v61 = vmax.f32 %v11796_v52, %v11800_v55  ;;  %v22224_v50 = vpop.f32.mrb[98].mxu0  ;;  %22291 = vmatmul.mubr.msk.f32.gmra.mrb[138].mxu1 %vm384_vm2, %v28330_v16  ;;  %v11682_v33 = vadd.f32 %v28259_v30, %v23511_v39  ;;  %v30661_v39 = vld [vmem:[#allocation68_spill] sm:$0xff] }
 0x6cd   : > { %11921 = vst.msk [vmem:[#allocation2 + $0x178] sm:$0xff] %vm384_vm2, %v11917_v24  ;;  %v23512_v37 = vadd.f32 %v22224_v50, %v30653_v3  ;;  %v11350_v11 = vpop.f32.mrb[99].mxu0  ;;  %v11803_v63 = vmax.f32 %v11683_v14, 0.0  ;;  %v30662_v50 = vld [vmem:[#allocation69_spill] sm:$0xff]  ;;  %v30663_v14 = vld [vmem:[#allocation70_spill] sm:$0xff] }
 0x6ce   : > { %11920 = vst.msk [vmem:[#allocation2 + $0x170] sm:$0xff] %vm384_vm2, %v11916_v61  ;;  %v23513_v26 = vadd.f32 %v11350_v11, %v30654_v29  ;;  %v11802_v9 = vmax.f32 %v11682_v33, 0.0 }
 0x6cf   : > { %v28338_v36 = vld [vmem:[#allocation3 + $0xa1] sm:$0xff]  ;;  %v11685_v7 = vadd.f32 %v28259_v30, %v23512_v37 }
 0x6d0   : > { %v22227_v57 = vpop.f32.mrb[100].mxu0  ;;  %22293 = vmatprep.mubr.msk.f32.mxu1 %vm384_vm2, %v28338_v36  ;;  %v11684_v21 = vadd.f32 %v28259_v30, %v23513_v26 }
 0x6d1   : > { %v23514_v59 = vadd.f32 %v22227_v57, %v30655_v12  ;;  %v11360_v2 = vpop.f32.mrb[101].mxu0  ;;  %v11990_v49 = vld [vmem:[#allocation2 + $0x160] ss:$2 sm:$0xff]  ;;  %v12050_v48 = vld [vmem:[#allocation2 + $0x161] ss:$2 sm:$0xff]  ;;  %v11805_v62 = vmax.f32 %v11685_v7, 0.0 }
 0x6d2   : > { %v23515_v4 = vadd.f32 %v11360_v2, %v30656_v40  ;;  %v12087_v44 = vmax.f32 %v11990_v49, %v12050_v48  ;;  %v11804_v25 = vmax.f32 %v11684_v21, 0.0  ;;  %v30664_v2 = vld [vmem:[#allocation71_spill] sm:$0xff] }
 0x6d3   : > { %v11687_v54 = vadd.f32 %v28259_v30, %v23514_v59 }
 0x6d4   : > { %v11686_v22 = vadd.f32 %v28259_v30, %v23515_v4  ;;  %v22230_v0 = vpop.f32.mrb[102].mxu0  ;;  %12117 = vst.msk [vmem:[#allocation3 + $0xb0] sm:$0xff] %vm384_vm2, %v12087_v44 }
 0x6d5   : > { %v11807_v18 = vmax.f32 %v11687_v54, 0.0  ;;  %v23516_v38 = vadd.f32 %v22230_v0, %v30657_v15  ;;  %v11370_v10 = vpop.f32.mrb[103].mxu0  ;;  %v11992_v20 = vld [vmem:[#allocation2 + $0x170] ss:$2 sm:$0xff]  ;;  %v12052_v32 = vld [vmem:[#allocation2 + $0x171] ss:$2 sm:$0xff] }
 0x6d6   : > { %v11806_v47 = vmax.f32 %v11686_v22, 0.0  ;;  %v23517_v8 = vadd.f32 %v11370_v10, %v30658_v13  ;;  %v12088_v1 = vmax.f32 %v11992_v20, %v12052_v32  ;;  %v30665_v0 = vld [vmem:[#allocation72_spill] sm:$0xff]  ;;  %v30666_v32 = vld [vmem:[#allocation73_spill] sm:$0xff] }
 0x6d7   : > { %v11923_v27 = vmax.f32 %v11803_v63, %v11807_v18  ;;  %v11689_v6 = vadd.f32 %v28259_v30, %v23516_v38 }
 0x6d8   : > { %v11922_v23 = vmax.f32 %v11802_v9, %v11806_v47  ;;  %v11688_v45 = vadd.f32 %v28259_v30, %v23517_v8  ;;  %v22233_v35 = vpop.f32.mrb[104].mxu0  ;;  %12118 = vst.msk [vmem:[#allocation3 + $0xb8] sm:$0xff] %vm384_vm2, %v12088_v1 }
 0x6d9   : > { %11927 = vst.msk [vmem:[#allocation2 + $0x188] sm:$0xff] %vm384_vm2, %v11923_v27  ;;  %v11809_v5 = vmax.f32 %v11689_v6, 0.0  ;;  %v23518_v31 = vadd.f32 %v22233_v35, %v30659_v56  ;;  %v11380_v42 = vpop.f32.mrb[105].mxu0  ;;  %v30667_v35 = vld [vmem:[#allocation74_spill] sm:$0xff] }
 0x6da   : > { %11926 = vst.msk [vmem:[#allocation2 + $0x180] sm:$0xff] %vm384_vm2, %v11922_v23  ;;  %v11808_v51 = vmax.f32 %v11688_v45, 0.0  ;;  %v23519_v43 = vadd.f32 %v11380_v42, %v30660_v58  ;;  %v30668_v42 = vld [vmem:[#allocation75_spill] sm:$0xff] }
 0x6db   : > { %v11925_v28 = vmax.f32 %v11805_v62, %v11809_v5  ;;  %v28360_v52 = vld [vmem:[#allocation3 + $0xa9] sm:$0xff]  ;;  %v11691_v11 = vadd.f32 %v28259_v30, %v23518_v31 }
 0x6dc   : > { %v11924_v55 = vmax.f32 %v11804_v25, %v11808_v51  ;;  %v22236_v46 = vpop.f32.mrb[106].mxu0  ;;  %22294 = vmatmul.mubr.msk.f32.gmra.mrb[140].mxu1 %vm384_vm2, %v28360_v52  ;;  %v11690_v29 = vadd.f32 %v28259_v30, %v23519_v43 }
 0x6dd   : > { %11929 = vst.msk [vmem:[#allocation2 + $0x198] sm:$0xff] %vm384_vm2, %v11925_v28  ;;  %v23520_v24 = vadd.f32 %v22236_v46, %v30661_v39  ;;  %v11390_v61 = vpop.f32.mrb[107].mxu0  ;;  %v11811_v4 = vmax.f32 %v11691_v11, 0.0 }
 0x6de   : > { %11928 = vst.msk [vmem:[#allocation2 + $0x190] sm:$0xff] %vm384_vm2, %v11924_v55  ;;  %v23521_v3 = vadd.f32 %v11390_v61, %v30662_v50  ;;  %v11810_v44 = vmax.f32 %v11690_v29, 0.0  ;;  %v30669_v55 = vld [vmem:[#allocation76_spill] sm:$0xff] }
 0x6df   : > { %v28368_v37 = vld [vmem:[#allocation3 + $0xb1] sm:$0xff]  ;;  %v11693_v9 = vadd.f32 %v28259_v30, %v23520_v24  ;;  %v30670_v24 = vld [vmem:[#allocation77_spill] sm:$0xff] }
 0x6e0   : > { %v22239_v26 = vpop.f32.mrb[108].mxu0  ;;  %22296 = vmatprep.mubr.msk.f32.mxu1 %vm384_vm2, %v28368_v37  ;;  %v11692_v10 = vadd.f32 %v28259_v30, %v23521_v3 }
 0x6e1   : > { %v23522_v33 = vadd.f32 %v22239_v26, %v30663_v14  ;;  %v11400_v57 = vpop.f32.mrb[109].mxu0  ;;  %v11994_v12 = vld [vmem:[#allocation2 + $0x180] ss:$2 sm:$0xff]  ;;  %v12054_v59 = vld [vmem:[#allocation2 + $0x181] ss:$2 sm:$0xff]  ;;  %v11813_v23 = vmax.f32 %v11693_v9, 0.0 }
 0x6e2   : > { %v23523_v49 = vadd.f32 %v11400_v57, %v30664_v2  ;;  %v12089_v48 = vmax.f32 %v11994_v12, %v12054_v59  ;;  %v11812_v56 = vmax.f32 %v11692_v10, 0.0  ;;  %v30671_v26 = vld [vmem:[#allocation78_spill] sm:$0xff]  ;;  %v30672_v59 = vld [vmem:[#allocation79_spill] sm:$0xff] }
 0x6e3   : > { %v11695_v40 = vadd.f32 %v28259_v30, %v23522_v33 }
 0x6e4   : > { %v11694_v54 = vadd.f32 %v28259_v30, %v23523_v49  ;;  %v22242_v63 = vpop.f32.mrb[110].mxu0  ;;  %12119 = vst.msk [vmem:[#allocation3 + $0xc0] sm:$0xff] %vm384_vm2, %v12089_v48 }
 0x6e5   : > { %v11815_v22 = vmax.f32 %v11695_v40, 0.0  ;;  %v23524_v7 = vadd.f32 %v22242_v63, %v30665_v0  ;;  %v11410_v18 = vpop.f32.mrb[111].mxu0  ;;  %v11996_v15 = vld [vmem:[#allocation2 + $0x190] ss:$2 sm:$0xff]  ;;  %v12056_v38 = vld [vmem:[#allocation2 + $0x191] ss:$2 sm:$0xff] }
 0x6e6   : > { %v11814_v20 = vmax.f32 %v11694_v54, 0.0  ;;  %v23525_v21 = vadd.f32 %v11410_v18, %v30666_v32  ;;  %v12090_v47 = vmax.f32 %v11996_v15, %v12056_v38 }
 0x6e7   : > { %v11931_v13 = vmax.f32 %v11811_v4, %v11815_v22  ;;  %v11697_v8 = vadd.f32 %v28259_v30, %v23524_v7  ;;  %v30673_v22 = vld [vmem:[#allocation80_spill] sm:$0xff] }
 0x6e8   : > { %v11930_v1 = vmax.f32 %v11810_v44, %v11814_v20  ;;  %v11696_v27 = vadd.f32 %v28259_v30, %v23525_v21  ;;  %v22245_v6 = vpop.f32.mrb[112].mxu0  ;;  %12120 = vst.msk [vmem:[#allocation3 + $0xc8] sm:$0xff] %vm384_vm2, %v12090_v47  ;;  %v30674_v20 = vld [vmem:[#allocation81_spill] sm:$0xff] }
 0x6e9   : > { %11935 = vst.msk [vmem:[#allocation2 + $0x1a8] sm:$0xff] %vm384_vm2, %v11931_v13  ;;  %v11817_v45 = vmax.f32 %v11697_v8, 0.0  ;;  %v23526_v62 = vadd.f32 %v22245_v6, %v30667_v35  ;;  %v11420_v5 = vpop.f32.mrb[113].mxu0 }
 0x6ea   : > { %11934 = vst.msk [vmem:[#allocation2 + $0x1a0] sm:$0xff] %vm384_vm2, %v11930_v1  ;;  %v11816_v31 = vmax.f32 %v11696_v27, 0.0  ;;  %v23527_v25 = vadd.f32 %v11420_v5, %v30668_v42  ;;  %v18575_v5 = vld [vmem:[%s30456_s3 + $0x50] sm:$0xff] }
 0x6eb   : > { %v11933_v51 = vmax.f32 %v11813_v23, %v11817_v45  ;;  %v28390_v58 = vld [vmem:[#allocation3 + $0xb9] sm:$0xff]  ;;  %v11699_v3 = vadd.f32 %v28259_v30, %v23526_v62 }
 0x6ec   : > { %v11932_v43 = vmax.f32 %v11812_v56, %v11816_v31  ;;  %v22248_v28 = vpop.f32.mrb[114].mxu0  ;;  %22297 = vmatmul.mubr.msk.f32.gmra.mrb[142].mxu1 %vm384_vm2, %v28390_v58  ;;  %v11698_v11 = vadd.f32 %v28259_v30, %v23527_v25  ;;  %v12125_v31 = vld [vmem:[#allocation3] sm:$0xff]  ;;  %v12126_v25 = vld [vmem:[#allocation3 + $0x8] sm:$0xff] }
 0x6ed   : > { %11937 = vst.msk [vmem:[#allocation2 + $0x1b8] sm:$0xff] %vm384_vm2, %v11933_v51  ;;  %v23528_v46 = vadd.f32 %v22248_v28, %v30669_v55  ;;  %v11430_v39 = vpop.f32.mrb[115].mxu0  ;;  %v11819_v40 = vmax.f32 %v11699_v3, 0.0  ;;  %v18603_v51 = vld [vmem:[%s30456_s3 + $0x60] sm:$0xff]  ;;  %v28438_v28 = vld [vmem:[#allocation3 + $0x10] sm:$0xff] }
 0x6ee   : > { %11936 = vst.msk [vmem:[#allocation2 + $0x1b0] sm:$0xff] %vm384_vm2, %v11932_v43  ;;  %v23529_v61 = vadd.f32 %v11430_v39, %v30670_v24  ;;  %v11818_v4 = vmax.f32 %v11698_v11, 0.0  ;;  %v18604_v43 = vld [vmem:[%s30456_s3 + $0x68] sm:$0xff]  ;;  %v28445_v24 = vld [vmem:[#allocation3 + $0x18] sm:$0xff]  ;;  %v28449_v3 = vld [vmem:[#allocation3 + $0x20] sm:$0xff] }
 0x6ef   : > { %v28398_v50 = vld [vmem:[#allocation3 + $0xc1] sm:$0xff]  ;;  %v11701_v63 = vadd.f32 %v28259_v30, %v23528_v46  ;;  %v28443_v46 = vpack.c.bf16 %v18604_v43, %v18603_v51  ;;  %v28599_v51 = vld [vmem:[#allocation3 + $0x6a] sm:$0xff]  ;;  %v28603_v43 = vld [vmem:[#allocation3 + $0x72] sm:$0xff] }
 0x6f0   : > { %v22251_v29 = vpop.f32.mrb[116].mxu0  ;;  %22299 = vmatprep.mubr.msk.f32.mxu1 %vm384_vm2, %v28398_v50  ;;  %v11700_v38 = vadd.f32 %v28259_v30, %v23529_v61 }
 0x6f1   : > { %v23530_v14 = vadd.f32 %v22251_v29, %v30671_v26  ;;  %v11440_v33 = vpop.f32.mrb[117].mxu0  ;;  %v11998_v57 = vld [vmem:[#allocation2 + $0x1a0] ss:$2 sm:$0xff]  ;;  %v12058_v12 = vld [vmem:[#allocation2 + $0x1a1] ss:$2 sm:$0xff]  ;;  %v11821_v27 = vmax.f32 %v11701_v63, 0.0 }
 0x6f2   : > { %v23531_v2 = vadd.f32 %v11440_v33, %v30672_v59  ;;  %v12091_v49 = vmax.f32 %v11998_v57, %v12058_v12  ;;  %v11820_v23 = vmax.f32 %v11700_v38, 0.0  ;;  %v28455_v26 = vld [vmem:[#allocation3 + $0x28] sm:$0xff]  ;;  %v28464_v33 = vld [vmem:[#allocation3 + $0x38] sm:$0xff]  ;;  %v28468_v57 = vld [vmem:[#allocation3 + $0x40] sm:$0xff] }
 0x6f3   : > { %v11703_v48 = vadd.f32 %v28259_v30, %v23530_v14  ;;  %v28459_v14 = vld [vmem:[#allocation3 + $0x30] sm:$0xff]  ;;  %v28472_v12 = vld [vmem:[#allocation3 + $0x48] sm:$0xff] }
 0x6f4   : > { %v11702_v44 = vadd.f32 %v28259_v30, %v23531_v2  ;;  %v22254_v54 = vpop.f32.mrb[118].mxu0  ;;  %12121 = vst.msk [vmem:[#allocation3 + $0xd0] sm:$0xff] %vm384_vm2, %v12091_v49  ;;  %v28476_v59 = vld [vmem:[#allocation3 + $0x50] sm:$0xff]  ;;  %v28480_v2 = vld [vmem:[#allocation3 + $0x58] sm:$0xff]  ;;  %v28484_v49 = vld [vmem:[#allocation3 + $0x60] sm:$0xff] }
 0x6f5   : > { %v11823_v9 = vmax.f32 %v11703_v48, 0.0  ;;  %v23532_v0 = vadd.f32 %v22254_v54, %v30673_v22  ;;  %v11450_v7 = vpop.f32.mrb[119].mxu0  ;;  %v12000_v18 = vld [vmem:[#allocation2 + $0x1b0] ss:$2 sm:$0xff]  ;;  %v12060_v15 = vld [vmem:[#allocation2 + $0x1b1] ss:$2 sm:$0xff] }
 0x6f6   : > { %v11822_v10 = vmax.f32 %v11702_v44, 0.0  ;;  %v23533_v32 = vadd.f32 %v11450_v7, %v30674_v20  ;;  %v12092_v21 = vmax.f32 %v12000_v18, %v12060_v15  ;;  %v28488_v48 = vld [vmem:[#allocation3 + $0x68] sm:$0xff]  ;;  %v28500_v44 = vld [vmem:[#allocation3 + $0x80] sm:$0xff]  ;;  %v28508_v63 = vld [vmem:[#allocation3 + $0x90] sm:$0xff] }
 0x6f7   : > { %v11939_v47 = vmax.f32 %v11819_v40, %v11823_v9  ;;  %v11705_v13 = vadd.f32 %v28259_v30, %v23532_v0  ;;  %v28492_v40 = vld [vmem:[#allocation3 + $0x70] sm:$0xff]  ;;  %v28504_v54 = vld [vmem:[#allocation3 + $0x88] sm:$0xff]  ;;  %v28512_v9 = vld [vmem:[#allocation3 + $0x98] sm:$0xff] }
 0x6f8   : > { %v11938_v8 = vmax.f32 %v11818_v4, %v11822_v10  ;;  %v11704_v1 = vadd.f32 %v28259_v30, %v23533_v32  ;;  %12122 = vst.msk [vmem:[#allocation3 + $0xd8] sm:$0xff] %vm384_vm2, %v12092_v21  ;;  %v18576_v30 = vld [vmem:[%s30456_s3 + $0x58] sm:$0xff]  ;;  %v28516_v22 = vld [vmem:[#allocation3 + $0xa0] sm:$0xff]  ;;  %v28520_v0 = vld [vmem:[#allocation3 + $0xa8] sm:$0xff] }
 0x6f9   : > { %11943 = vst.msk [vmem:[#allocation2 + $0x1c8] sm:$0xff] %vm384_vm2, %v11939_v47  ;;  %v11825_v6 = vmax.f32 %v11705_v13, 0.0  ;;  %v22896_v42 = vpack.c.bf16 %v18576_v30, %v18575_v5  ;;  %v28496_v4 = vld [vmem:[#allocation3 + $0x78] sm:$0xff]  ;;  %v28524_v7 = vld [vmem:[#allocation3 + $0xb0] sm:$0xff]  ;;  %v28532_v15 = vld [vmem:[#allocation3 + $0xc0] sm:$0xff] }
 0x6fa   : > { %11942 = vst.msk [vmem:[#allocation2 + $0x1c0] sm:$0xff] %vm384_vm2, %v11938_v8  ;;  %v11824_v45 = vmax.f32 %v11704_v1, 0.0  ;;  %v28528_v18 = vld [vmem:[#allocation3 + $0xb8] sm:$0xff]  ;;  %v28536_v38 = vld [vmem:[#allocation3 + $0xc8] sm:$0xff]  ;;  %v18605_v10 = vld [vmem:[%s30456_s3 + $0x70] sm:$0xff] }
 0x6fb   : > { %v11941_v35 = vmax.f32 %v11821_v27, %v11825_v6  ;;  %v28418_v62 = vld [vmem:[#allocation3 + $0xc9] sm:$0xff]  ;;  %30675 = vst [vmem:[#allocation11_spill] sm:$0xff] %v28536_v38  ;;  %v18606_v20 = vld [vmem:[%s30456_s3 + $0x78] sm:$0xff]  ;;  %v18633_v13 = vld [vmem:[%s30456_s3 + $0x80] sm:$0xff] }
 0x6fc   : > { %v11940_v56 = vmax.f32 %v11820_v23, %v11824_v45  ;;  %22300 = vmatmul.mubr.msk.f32.gmra.mrb[144].mxu1 %vm384_vm2, %v28418_v62  ;;  %v12728_v32 = vld [vmem:[#allocation3 + $0x2] sm:$0xff]  ;;  %v22904_v21 = vpack.c.bf16 %v18606_v20, %v18605_v10  ;;  %v12729_v47 = vld [vmem:[#allocation3 + $0xa] sm:$0xff]  ;;  %v28554_v1 = vld [vmem:[#allocation3 + $0x12] sm:$0xff] }
 0x6fd   : > { %11945 = vst.msk [vmem:[#allocation2 + $0x1d8] sm:$0xff] %vm384_vm2, %v11941_v35  ;;  %22310 = vmatprep.mubr.msk.f32.mxu1 %vm384_vm2, %v12125_v31  ;;  %v18634_v8 = vld [vmem:[%s30456_s3 + $0x88] sm:$0xff]  ;;  %v28559_v6 = vld [vmem:[#allocation3 + $0x1a] sm:$0xff]  ;;  %v28571_v35 = vld [vmem:[#allocation3 + $0x32] sm:$0xff] }
 0x6fe   : > { %11944 = vst.msk [vmem:[#allocation2 + $0x1d0] sm:$0xff] %vm384_vm2, %v11940_v56  ;;  %v22908_v27 = vpack.c.bf16 %v18634_v8, %v18633_v13  ;;  %v28563_v23 = vld [vmem:[#allocation3 + $0x22] sm:$0xff]  ;;  %v28567_v45 = vld [vmem:[#allocation3 + $0x2a] sm:$0xff]  ;;  %v28575_v5 = vld [vmem:[#allocation3 + $0x3a] sm:$0xff] }
 0x6ff   : > { %v28579_v30 = vld [vmem:[#allocation3 + $0x42] sm:$0xff]  ;;  %v28583_v56 = vld [vmem:[#allocation3 + $0x4a] sm:$0xff]  ;;  %v28587_v31 = vld [vmem:[#allocation3 + $0x52] sm:$0xff] }
 0x700   : > { %22311 = vmatmul.mubr.msk.f32.vlgmr.msra.gmra.mrb[120].mxu1 %vm384_vm2, %v12126_v25  ;;  %v28595_v25 = vld [vmem:[#allocation3 + $0x62] sm:$0xff]  ;;  %v28635_v10 = vld [vmem:[#allocation3 + $0xb2] sm:$0xff]  ;;  %v28639_v20 = vld [vmem:[#allocation3 + $0xba] sm:$0xff] }
 0x701   : > { %22895 = vmatpush3.bf16.msra.mxu1 %v28193_v60  ;;  %22313 = vmatprep.mubr.msk.f32.mxu1 %vm384_vm2, %v28438_v28  ;;  %v12002_v55 = vld [vmem:[#allocation2 + $0x1c0] ss:$2 sm:$0xff]  ;;  %v12062_v39 = vld [vmem:[#allocation2 + $0x1c1] ss:$2 sm:$0xff]  ;;  %v18636_v13 = vld [vmem:[%s30456_s3 + $0x98] sm:$0xff] }
 0x702   : > { %22897 = vmatprep.subr.bf16.mxu1 %v22896_v42  ;;  %v12093_v61 = vmax.f32 %v12002_v55, %v12062_v39  ;;  %v28607_v55 = vld [vmem:[#allocation3 + $0x7a] sm:$0xff]  ;;  %v28615_v39 = vld [vmem:[#allocation3 + $0x8a] sm:$0xff] }
 0x704   : > { %22314 = vmatmul.mubr.msk.f32.gmra.mrb[122].mxu1 %vm384_vm2, %v28445_v24  ;;  %12123 = vst.msk [vmem:[#allocation3 + $0xe0] sm:$0xff] %vm384_vm2, %v12093_v61  ;;  %v28619_v61 = vld [vmem:[#allocation3 + $0x92] sm:$0xff] }
 0x705   : > { %22316 = vmatprep.mubr.msk.f32.mxu1 %vm384_vm2, %v28449_v3  ;;  %22899 = vmatpush3.bf16.msra.mxu1 %v22896_v42  ;;  %v12004_v60 = vld [vmem:[#allocation2 + $0x1d0] ss:$2 sm:$0xff]  ;;  %v12064_v11 = vld [vmem:[#allocation2 + $0x1d1] ss:$2 sm:$0xff] }
 0x706   : > { %22901 = vmatprep.subr.bf16.mxu1 %v28443_v46  ;;  %v12094_v29 = vmax.f32 %v12004_v60, %v12064_v11  ;;  %v28591_v42 = vld [vmem:[#allocation3 + $0x5a] sm:$0xff]  ;;  %v28627_v11 = vld [vmem:[#allocation3 + $0xa2] sm:$0xff] }
 0x707   : > { %v28623_v60 = vld [vmem:[#allocation3 + $0x9a] sm:$0xff] }
 0x708   : > { %22317 = vmatmul.mubr.msk.f32.gmra.mrb[124].mxu1 %vm384_vm2, %v28455_v26  ;;  %12124 = vst.msk [vmem:[#allocation3 + $0xe8] sm:$0xff] %vm384_vm2, %v12094_v29  ;;  %v28631_v29 = vld [vmem:[#allocation3 + $0xaa] sm:$0xff] }
 0x709   : > { %22319 = vmatprep.mubr.msk.f32.mxu1 %vm384_vm2, %v28459_v14 }
 0x70c   : > { %22320 = vmatmul.mubr.msk.f32.gmra.mrb[126].mxu1 %vm384_vm2, %v28464_v33 }
 0x70d   : > { %22322 = vmatprep.mubr.msk.f32.mxu1 %vm384_vm2, %v28468_v57 }
 0x710   : > { %22323 = vmatmul.mubr.msk.f32.gmra.mrb[128].mxu1 %vm384_vm2, %v28472_v12 }
 0x711   : > { %22325 = vmatprep.mubr.msk.f32.mxu1 %vm384_vm2, %v28476_v59 }
 0x714   : > { %22326 = vmatmul.mubr.msk.f32.gmra.mrb[130].mxu1 %vm384_vm2, %v28480_v2 }
 0x715   : > { %22328 = vmatprep.mubr.msk.f32.mxu1 %vm384_vm2, %v28484_v49 }
 0x718   : > { %22329 = vmatmul.mubr.msk.f32.gmra.mrb[132].mxu1 %vm384_vm2, %v28488_v48 }
 0x719   : > { %22331 = vmatprep.mubr.msk.f32.mxu1 %vm384_vm2, %v28492_v40 }
 0x71c   : > { %22332 = vmatmul.mubr.msk.f32.gmra.mrb[134].mxu1 %vm384_vm2, %v28496_v4 }
 0x71d   : > { %22334 = vmatprep.mubr.msk.f32.mxu1 %vm384_vm2, %v28500_v44 }
 0x720   : > { %22335 = vmatmul.mubr.msk.f32.gmra.mrb[136].mxu1 %vm384_vm2, %v28504_v54 }
 0x721   : > { %22337 = vmatprep.mubr.msk.f32.mxu1 %vm384_vm2, %v28508_v63 }
 0x724   : > { %22338 = vmatmul.mubr.msk.f32.gmra.mrb[138].mxu1 %vm384_vm2, %v28512_v9 }
 0x725   : > { %22340 = vmatprep.mubr.msk.f32.mxu1 %vm384_vm2, %v28516_v22 }
 0x728   : > { %22341 = vmatmul.mubr.msk.f32.gmra.mrb[140].mxu1 %vm384_vm2, %v28520_v0 }
 0x729   : > { %22343 = vmatprep.mubr.msk.f32.mxu1 %vm384_vm2, %v28524_v7 }
 0x72c   : > { %22344 = vmatmul.mubr.msk.f32.gmra.mrb[142].mxu1 %vm384_vm2, %v28528_v18 }
 0x72d   : > { %22346 = vmatprep.mubr.msk.f32.mxu1 %vm384_vm2, %v28532_v15 }
 0x730   : > { %22347 = vmatmul.mubr.msk.f32.gmra.mrb[146].mxu1 %vm384_vm2, %v28536_v38 }
 0x731   : > { %22357 = vmatprep.mubr.msk.f32.mxu1 %vm384_vm2, %v12728_v32  ;;  %v28643_v32 = vld [vmem:[#allocation3 + $0xc2] sm:$0xff] }
 0x732   : > { %30676 = vst [vmem:[#allocation12_spill] sm:$0xff] %v28643_v32 }
 0x734   : > { %22358 = vmatmul.mubr.msk.f32.vlgmr.msra.gmra.mrb[120].mxu1 %vm384_vm2, %v12729_v47  ;;  %v18635_v47 = vld [vmem:[%s30456_s3 + $0x90] sm:$0xff] }
 0x735   : > { %22903 = vmatpush3.bf16.msra.mxu1 %v28443_v46  ;;  %22360 = vmatprep.mubr.msk.f32.mxu1 %vm384_vm2, %v28554_v1  ;;  %v28611_v46 = vld [vmem:[#allocation3 + $0x82] sm:$0xff]  ;;  %v22912_v8 = vpack.c.bf16 %v18636_v13, %v18635_v47  ;;  %v13381_v13 = vld [vmem:[#allocation3 + $0x19] sm:$0xff] }
 0x736   : > { %22905 = vmatprep.subr.bf16.mxu1 %v22904_v21 }
 0x738   : > { %22361 = vmatmul.mubr.msk.f32.gmra.mrb[122].mxu1 %vm384_vm2, %v28559_v6 }
 0x739   : > { %22363 = vmatprep.mubr.msk.f32.mxu1 %vm384_vm2, %v28563_v23  ;;  %22907 = vmatpush3.bf16.msra.mxu1 %v22904_v21  ;;  %v28647_v21 = vld [vmem:[#allocation3 + $0xca] sm:$0xff] }
 0x73a   : > { %22909 = vmatprep.subr.bf16.mxu1 %v22908_v27  ;;  %30677 = vst [vmem:[#allocation13_spill] sm:$0xff] %v28647_v21 }
 0x73c   : > { %22364 = vmatmul.mubr.msk.f32.gmra.mrb[124].mxu1 %vm384_vm2, %v28567_v45 }
 0x73d   : > { %22366 = vmatprep.mubr.msk.f32.mxu1 %vm384_vm2, %v28571_v35 }
 0x740   : > { %22367 = vmatmul.mubr.msk.f32.gmra.mrb[126].mxu1 %vm384_vm2, %v28575_v5 }
 0x741   : > { %22369 = vmatprep.mubr.msk.f32.mxu1 %vm384_vm2, %v28579_v30 }
 0x744   : > { %22370 = vmatmul.mubr.msk.f32.gmra.mrb[128].mxu1 %vm384_vm2, %v28583_v56 }
 0x745   : > { %22372 = vmatprep.mubr.msk.f32.mxu1 %vm384_vm2, %v28587_v31 }
 0x748   : > { %22373 = vmatmul.mubr.msk.f32.gmra.mrb[130].mxu1 %vm384_vm2, %v28591_v42 }
 0x749   : > { %22375 = vmatprep.mubr.msk.f32.mxu1 %vm384_vm2, %v28595_v25 }
 0x74c   : > { %22376 = vmatmul.mubr.msk.f32.gmra.mrb[132].mxu1 %vm384_vm2, %v28599_v51 }
 0x74d   : > { %22378 = vmatprep.mubr.msk.f32.mxu1 %vm384_vm2, %v28603_v43 }
 0x750   : > { %22379 = vmatmul.mubr.msk.f32.gmra.mrb[134].mxu1 %vm384_vm2, %v28607_v55 }
 0x751   : > { %22381 = vmatprep.mubr.msk.f32.mxu1 %vm384_vm2, %v28611_v46 }
 0x754   : > { %22382 = vmatmul.mubr.msk.f32.gmra.mrb[136].mxu1 %vm384_vm2, %v28615_v39 }
 0x755   : > { %22384 = vmatprep.mubr.msk.f32.mxu1 %vm384_vm2, %v28619_v61 }
 0x758   : > { %22385 = vmatmul.mubr.msk.f32.gmra.mrb[138].mxu1 %vm384_vm2, %v28623_v60 }
 0x759   : > { %22387 = vmatprep.mubr.msk.f32.mxu1 %vm384_vm2, %v28627_v11 }
 0x75c   : > { %22388 = vmatmul.mubr.msk.f32.gmra.mrb[140].mxu1 %vm384_vm2, %v28631_v29 }
 0x75d   : > { %22390 = vmatprep.mubr.msk.f32.mxu1 %vm384_vm2, %v28635_v10 }
 0x760   : > { %22391 = vmatmul.mubr.msk.f32.gmra.mrb[142].mxu1 %vm384_vm2, %v28639_v20 }
 0x761   : > { %22393 = vmatprep.mubr.msk.f32.mxu1 %vm384_vm2, %v28643_v32  ;;  %v18664_v32 = vld [vmem:[%s30456_s3 + $0xa8] sm:$0xff] }
 0x764   : > { %22394 = vmatmul.mubr.msk.f32.gmra.mrb[148].mxu1 %vm384_vm2, %v28647_v21  ;;  %v22916_v21 = vpack.c.bf16 %v18664_v32, %v18663_v19  ;;  %v28711_v19 = vld [vmem:[#allocation3 + $0xd0] sm:$0xff] }
 0x765   : > { %22404 = vmatprep.mubr.msk.f32.mxu1 %vm384_vm2, %v28438_v28  ;;  %30678 = vst [vmem:[#allocation14_spill] sm:$0xff] %v28711_v19  ;;  %v28715_v28 = vld [vmem:[#allocation3 + $0xd8] sm:$0xff] }
 0x766   : > { %v13380_v32 = vld [vmem:[#allocation3 + $0x11] sm:$0xff] }
 0x768   : > { %22405 = vmatmul.mubr.msk.f32.vlgmr.msra.gmra.mrb[120].mxu1 %vm384_vm2, %v28445_v24  ;;  %v18665_v24 = vld [vmem:[%s30456_s3 + $0xb0] sm:$0xff] }
 0x769   : > { %22911 = vmatpush3.bf16.msra.mxu1 %v22908_v27  ;;  %22407 = vmatprep.mubr.msk.f32.mxu1 %vm384_vm2, %v28449_v3  ;;  %v18666_v27 = vld [vmem:[%s30456_s3 + $0xb8] sm:$0xff] }
 0x76a   : > { %22913 = vmatprep.subr.bf16.mxu1 %v22912_v8  ;;  %v22920_v47 = vpack.c.bf16 %v18666_v27, %v18665_v24  ;;  %v28737_v24 = vld [vmem:[#allocation3 + $0x29] sm:$0xff]  ;;  %v28741_v27 = vld [vmem:[#allocation3 + $0x31] sm:$0xff] }
 0x76c   : > { %22408 = vmatmul.mubr.msk.f32.gmra.mrb[122].mxu1 %vm384_vm2, %v28455_v26 }
 0x76d   : > { %22410 = vmatprep.mubr.msk.f32.mxu1 %vm384_vm2, %v28459_v14  ;;  %22915 = vmatpush3.bf16.msra.mxu1 %v22912_v8  ;;  %v18693_v8 = vld [vmem:[%s30456_s3 + $0xc0] sm:$0xff] }
 0x76e   : > { %22917 = vmatprep.subr.bf16.mxu1 %v22916_v21 }
 0x770   : > { %22411 = vmatmul.mubr.msk.f32.gmra.mrb[124].mxu1 %vm384_vm2, %v28464_v33 }
 0x771   : > { %22413 = vmatprep.mubr.msk.f32.mxu1 %vm384_vm2, %v28468_v57 }
 0x774   : > { %22414 = vmatmul.mubr.msk.f32.gmra.mrb[126].mxu1 %vm384_vm2, %v28472_v12 }
 0x775   : > { %22416 = vmatprep.mubr.msk.f32.mxu1 %vm384_vm2, %v28476_v59 }
 0x778   : > { %22417 = vmatmul.mubr.msk.f32.gmra.mrb[128].mxu1 %vm384_vm2, %v28480_v2 }
 0x779   : > { %22419 = vmatprep.mubr.msk.f32.mxu1 %vm384_vm2, %v28484_v49 }
 0x77c   : > { %22420 = vmatmul.mubr.msk.f32.gmra.mrb[130].mxu1 %vm384_vm2, %v28488_v48 }
 0x77d   : > { %22422 = vmatprep.mubr.msk.f32.mxu1 %vm384_vm2, %v28492_v40 }
 0x780   : > { %22423 = vmatmul.mubr.msk.f32.gmra.mrb[132].mxu1 %vm384_vm2, %v28496_v4 }
 0x781   : > { %22425 = vmatprep.mubr.msk.f32.mxu1 %vm384_vm2, %v28500_v44 }
 0x784   : > { %22426 = vmatmul.mubr.msk.f32.gmra.mrb[134].mxu1 %vm384_vm2, %v28504_v54 }
 0x785   : > { %22428 = vmatprep.mubr.msk.f32.mxu1 %vm384_vm2, %v28508_v63 }
 0x788   : > { %22429 = vmatmul.mubr.msk.f32.gmra.mrb[136].mxu1 %vm384_vm2, %v28512_v9 }
 0x789   : > { %22431 = vmatprep.mubr.msk.f32.mxu1 %vm384_vm2, %v28516_v22 }
 0x78c   : > { %22432 = vmatmul.mubr.msk.f32.gmra.mrb[138].mxu1 %vm384_vm2, %v28520_v0 }
 0x78d   : > { %22434 = vmatprep.mubr.msk.f32.mxu1 %vm384_vm2, %v28524_v7 }
 0x790   : > { %22435 = vmatmul.mubr.msk.f32.gmra.mrb[140].mxu1 %vm384_vm2, %v28528_v18 }
 0x791   : > { %22437 = vmatprep.mubr.msk.f32.mxu1 %vm384_vm2, %v28532_v15 }
 0x794   : > { %22438 = vmatmul.mubr.msk.f32.gmra.mrb[142].mxu1 %vm384_vm2, %v28536_v38  ;;  %v28733_v38 = vld [vmem:[#allocation3 + $0x21] sm:$0xff] }
 0x795   : > { %22440 = vmatprep.mubr.msk.f32.mxu1 %vm384_vm2, %v28711_v19  ;;  %v18694_v19 = vld [vmem:[%s30456_s3 + $0xc8] sm:$0xff] }
 0x798   : > { %22441 = vmatmul.mubr.msk.f32.gmra.mrb[150].mxu1 %vm384_vm2, %v28715_v28 }
 0x799   : > { %22451 = vmatprep.mubr.msk.f32.mxu1 %vm384_vm2, %v13380_v32  ;;  %v22924_v32 = vpack.c.bf16 %v18694_v19, %v18693_v8  ;;  %v28753_v19 = vld [vmem:[#allocation3 + $0x49] sm:$0xff]  ;;  %v28757_v8 = vld [vmem:[#allocation3 + $0x51] sm:$0xff] }
 0x79a   : > { %30681 = vst [vmem:[#allocation17_spill] sm:$0xff] %v28753_v19 }
 0x79c   : > { %22452 = vmatmul.mubr.msk.f32.vlgmr.msra.gmra.mrb[120].mxu1 %vm384_vm2, %v13381_v13  ;;  %v28745_v13 = vld [vmem:[#allocation3 + $0x39] sm:$0xff] }
 0x79d   : > { %22919 = vmatpush3.bf16.msra.mxu1 %v22916_v21  ;;  %22454 = vmatprep.mubr.msk.f32.mxu1 %vm384_vm2, %v28733_v38  ;;  %30679 = vst [vmem:[#allocation15_spill] sm:$0xff] %v28745_v13  ;;  %v28749_v21 = vld [vmem:[#allocation3 + $0x41] sm:$0xff] }
 0x79e   : > { %22921 = vmatprep.subr.bf16.mxu1 %v22920_v47  ;;  %30680 = vst [vmem:[#allocation16_spill] sm:$0xff] %v28749_v21 }
 0x7a0   : > { %22455 = vmatmul.mubr.msk.f32.gmra.mrb[122].mxu1 %vm384_vm2, %v28737_v24 }
 0x7a1   : > { %22457 = vmatprep.mubr.msk.f32.mxu1 %vm384_vm2, %v28741_v27  ;;  %22923 = vmatpush3.bf16.msra.mxu1 %v22920_v47  ;;  %v28761_v47 = vld [vmem:[#allocation3 + $0x59] sm:$0xff] }
 0x7a2   : > { %22925 = vmatprep.subr.bf16.mxu1 %v22924_v32 }
 0x7a4   : > { %22458 = vmatmul.mubr.msk.f32.gmra.mrb[124].mxu1 %vm384_vm2, %v28745_v13  ;;  %v28765_v13 = vld [vmem:[#allocation3 + $0x61] sm:$0xff] }
 0x7a5   : > { %22460 = vmatprep.mubr.msk.f32.mxu1 %vm384_vm2, %v28749_v21  ;;  %v28769_v21 = vld [vmem:[#allocation3 + $0x69] sm:$0xff] }
 0x7a8   : > { %22461 = vmatmul.mubr.msk.f32.gmra.mrb[126].mxu1 %vm384_vm2, %v28753_v19  ;;  %v28773_v19 = vld [vmem:[#allocation3 + $0x71] sm:$0xff] }
 0x7a9   : > { %22463 = vmatprep.mubr.msk.f32.mxu1 %vm384_vm2, %v28757_v8 }
 0x7ac   : > { %22464 = vmatmul.mubr.msk.f32.gmra.mrb[128].mxu1 %vm384_vm2, %v28761_v47 }
 0x7ad   : > { %22466 = vmatprep.mubr.msk.f32.mxu1 %vm384_vm2, %v28765_v13 }
 0x7b0   : > { %22467 = vmatmul.mubr.msk.f32.gmra.mrb[130].mxu1 %vm384_vm2, %v28769_v21 }
 0x7b1   : > { %22469 = vmatprep.mubr.msk.f32.mxu1 %vm384_vm2, %v28773_v19 }
 0x7b4   : > { %22470 = vmatmul.mubr.msk.f32.gmra.mrb[132].mxu1 %vm384_vm2, %v28270_v17  ;;  %v28799_v17 = vld [vmem:[#allocation3 + $0xd1] sm:$0xff] }
 0x7b5   : > { %22472 = vmatprep.mubr.msk.f32.mxu1 %vm384_vm2, %v28278_v41  ;;  %30682 = vst [vmem:[#allocation18_spill] sm:$0xff] %v28799_v17  ;;  %v28803_v41 = vld [vmem:[#allocation3 + $0xd9] sm:$0xff] }
 0x7b8   : > { %22473 = vmatmul.mubr.msk.f32.gmra.mrb[134].mxu1 %vm384_vm2, %v28300_v34  ;;  %v18695_v34 = vld [vmem:[%s30456_s3 + $0xd0] sm:$0xff] }
 0x7b9   : > { %22475 = vmatprep.mubr.msk.f32.mxu1 %vm384_vm2, %v28308_v53  ;;  %v18696_v53 = vld [vmem:[%s30456_s3 + $0xd8] sm:$0xff] }
 0x7bc   : > { %22476 = vmatmul.mubr.msk.f32.gmra.mrb[136].mxu1 %vm384_vm2, %v28330_v16  ;;  %v22928_v16 = vpack.c.bf16 %v18696_v53, %v18695_v34  ;;  %v28871_v34 = vld [vmem:[#allocation3 + $0xda] sm:$0xff]  ;;  %v18725_v53 = vld [vmem:[%s30456_s3 + $0xf0] sm:$0xff] }
 0x7bd   : > { %22478 = vmatprep.mubr.msk.f32.mxu1 %vm384_vm2, %v28338_v36 }
 0x7c0   : > { %22479 = vmatmul.mubr.msk.f32.gmra.mrb[138].mxu1 %vm384_vm2, %v28360_v52  ;;  %v18723_v52 = vld [vmem:[%s30456_s3 + $0xe0] sm:$0xff] }
 0x7c1   : > { %22481 = vmatprep.mubr.msk.f32.mxu1 %vm384_vm2, %v28368_v37  ;;  %v18724_v37 = vld [vmem:[%s30456_s3 + $0xe8] sm:$0xff] }
 0x7c4   : > { %22482 = vmatmul.mubr.msk.f32.gmra.mrb[140].mxu1 %vm384_vm2, %v28390_v58 }
 0x7c5   : > { %22484 = vmatprep.mubr.msk.f32.mxu1 %vm384_vm2, %v28398_v50 }
 0x7c8   : > { %22485 = vmatmul.mubr.msk.f32.gmra.mrb[142].mxu1 %vm384_vm2, %v28418_v62 }
 0x7c9   : > { %22487 = vmatprep.mubr.msk.f32.mxu1 %vm384_vm2, %v28799_v17 }
 0x7cc   : > { %22488 = vmatmul.mubr.msk.f32.gmra.mrb[152].mxu1 %vm384_vm2, %v28803_v41 }
 0x7cd   : > { %22498 = vmatprep.mubr.msk.f32.mxu1 %vm384_vm2, %v28554_v1  ;;  %v22932_v1 = vpack.c.bf16 %v18724_v37, %v18723_v52  ;;  %v18753_v37 = vld [vmem:[%s30456_s3 + $0x100] sm:$0xff] }
 0x7cf   : > { %v22301_v36 = vpop.f32.mrb[144].mxu1 }
 0x7d0   : > { %v12450_v17 = vpop.f32.mrb[145].mxu1  ;;  %22499 = vmatmul.mubr.msk.f32.vlgmr.msra.gmra.mrb[120].mxu1 %vm384_vm2, %v28559_v6  ;;  %v30683_v6 = vld [vmem:[#allocation12_spill] sm:$0xff] }
 0x7d1   : > { %22927 = vmatpush3.bf16.msra.mxu1 %v22924_v32  ;;  %22501 = vmatprep.mubr.msk.f32.mxu1 %vm384_vm2, %v28563_v23  ;;  %v30684_v32 = vld [vmem:[#allocation13_spill] sm:$0xff]  ;;  %v28867_v17 = vld [vmem:[#allocation3 + $0xd2] sm:$0xff] }
 0x7d2   : > { %22929 = vmatprep.subr.bf16.mxu1 %v22928_v16  ;;  %30685 = vst [vmem:[#allocation19_spill] sm:$0xff] %v28867_v17 }
 0x7d4   : > { %22502 = vmatmul.mubr.msk.f32.gmra.mrb[122].mxu1 %vm384_vm2, %v28567_v45 }
 0x7d5   : > { %22504 = vmatprep.mubr.msk.f32.mxu1 %vm384_vm2, %v28571_v35  ;;  %22931 = vmatpush3.bf16.msra.mxu1 %v22928_v16  ;;  %v18726_v16 = vld [vmem:[%s30456_s3 + $0xf8] sm:$0xff] }
 0x7d6   : > { %22933 = vmatprep.subr.bf16.mxu1 %v22932_v1  ;;  %v22936_v36 = vpack.c.bf16 %v18726_v16, %v18725_v53 }
 0x7d8   : > { %22505 = vmatmul.mubr.msk.f32.gmra.mrb[124].mxu1 %vm384_vm2, %v28575_v5 }
 0x7d9   : > { %22507 = vmatprep.mubr.msk.f32.mxu1 %vm384_vm2, %v28579_v30 }
 0x7dc   : > { %22508 = vmatmul.mubr.msk.f32.gmra.mrb[126].mxu1 %vm384_vm2, %v28583_v56 }
 0x7dd   : > { %22510 = vmatprep.mubr.msk.f32.mxu1 %vm384_vm2, %v28587_v31 }
 0x7e0   : > { %22511 = vmatmul.mubr.msk.f32.gmra.mrb[128].mxu1 %vm384_vm2, %v28591_v42 }
 0x7e1   : > { %22513 = vmatprep.mubr.msk.f32.mxu1 %vm384_vm2, %v28595_v25 }
 0x7e4   : > { %22514 = vmatmul.mubr.msk.f32.gmra.mrb[130].mxu1 %vm384_vm2, %v28599_v51 }
 0x7e5   : > { %22516 = vmatprep.mubr.msk.f32.mxu1 %vm384_vm2, %v28603_v43 }
 0x7e8   : > { %22517 = vmatmul.mubr.msk.f32.gmra.mrb[132].mxu1 %vm384_vm2, %v28607_v55 }
 0x7e9   : > { %22519 = vmatprep.mubr.msk.f32.mxu1 %vm384_vm2, %v28611_v46 }
 0x7ec   : > { %22520 = vmatmul.mubr.msk.f32.gmra.mrb[134].mxu1 %vm384_vm2, %v28615_v39 }
 0x7ed   : > { %22522 = vmatprep.mubr.msk.f32.mxu1 %vm384_vm2, %v28619_v61 }
 0x7f0   : > { %22523 = vmatmul.mubr.msk.f32.gmra.mrb[136].mxu1 %vm384_vm2, %v28623_v60 }
 0x7f1   : > { %22525 = vmatprep.mubr.msk.f32.mxu1 %vm384_vm2, %v28627_v11 }
 0x7f4   : > { %22526 = vmatmul.mubr.msk.f32.gmra.mrb[138].mxu1 %vm384_vm2, %v28631_v29 }
 0x7f5   : > { %22528 = vmatprep.mubr.msk.f32.mxu1 %vm384_vm2, %v28635_v10 }
 0x7f8   : > { %22529 = vmatmul.mubr.msk.f32.gmra.mrb[140].mxu1 %vm384_vm2, %v28639_v20 }
 0x7f9   : > { %22531 = vmatprep.mubr.msk.f32.mxu1 %vm384_vm2, %v30683_v6 }
 0x7fc   : > { %22532 = vmatmul.mubr.msk.f32.gmra.mrb[142].mxu1 %vm384_vm2, %v30684_v32 }
 0x7fd   : > { %22534 = vmatprep.mubr.msk.f32.mxu1 %vm384_vm2, %v28867_v17  ;;  %v18754_v17 = vld [vmem:[%s30456_s3 + $0x108] sm:$0xff] }
 0x800   : > { %22535 = vmatmul.mubr.msk.f32.gmra.mrb[154].mxu1 %vm384_vm2, %v28871_v34 }
 0x801   : > { %22545 = vmatprep.mubr.msk.f32.mxu1 %vm384_vm2, %v28449_v3  ;;  %v22940_v3 = vpack.c.bf16 %v18754_v17, %v18753_v37 }
 0x803   : > { %v22348_v52 = vpop.f32.mrb[146].mxu1 }
 0x804   : > { %v12721_v32 = vpop.f32.mrb[147].mxu1  ;;  %22546 = vmatmul.mubr.msk.f32.vlgmr.msra.gmra.mrb[120].mxu1 %vm384_vm2, %v28455_v26  ;;  %v30686_v26 = vld [vmem:[#allocation11_spill] sm:$0xff] }
 0x805   : > { %22935 = vmatpush3.bf16.msra.mxu1 %v22932_v1  ;;  %22548 = vmatprep.mubr.msk.f32.mxu1 %vm384_vm2, %v28459_v14  ;;  %v30687_v14 = vld [vmem:[#allocation14_spill] sm:$0xff] }
 0x806   : > { %22937 = vmatprep.subr.bf16.mxu1 %v22936_v36 }
 0x808   : > { %22549 = vmatmul.mubr.msk.f32.gmra.mrb[122].mxu1 %vm384_vm2, %v28464_v33  ;;  %v14056_v33 = vld [vmem:[#allocation3 + $0xe0] sm:$0xff] }
 0x809   : > { %22551 = vmatprep.mubr.msk.f32.mxu1 %vm384_vm2, %v28468_v57  ;;  %22939 = vmatpush3.bf16.msra.mxu1 %v22936_v36  ;;  %v14057_v57 = vld [vmem:[#allocation3 + $0xe8] sm:$0xff] }
 0x80a   : > { %22941 = vmatprep.subr.bf16.mxu1 %v22940_v3 }
 0x80c   : > { %22552 = vmatmul.mubr.msk.f32.gmra.mrb[124].mxu1 %vm384_vm2, %v28472_v12  ;;  %v18755_v12 = vld [vmem:[%s30456_s3 + $0x110] sm:$0xff] }
 0x80d   : > { %22554 = vmatprep.mubr.msk.f32.mxu1 %vm384_vm2, %v28476_v59  ;;  %v18756_v59 = vld [vmem:[%s30456_s3 + $0x118] sm:$0xff] }
 0x810   : > { %22555 = vmatmul.mubr.msk.f32.gmra.mrb[126].mxu1 %vm384_vm2, %v28480_v2  ;;  %v22944_v2 = vpack.c.bf16 %v18756_v59, %v18755_v12 }
 0x811   : > { %22557 = vmatprep.mubr.msk.f32.mxu1 %vm384_vm2, %v28484_v49 }
 0x814   : > { %22558 = vmatmul.mubr.msk.f32.gmra.mrb[128].mxu1 %vm384_vm2, %v28488_v48 }
 0x815   : > { %22560 = vmatprep.mubr.msk.f32.mxu1 %vm384_vm2, %v28492_v40  ;;  %v30688_v40 = vld [vmem:[#allocation15_spill] sm:$0xff] }
 0x818   : > { %22561 = vmatmul.mubr.msk.f32.gmra.mrb[130].mxu1 %vm384_vm2, %v28496_v4  ;;  %v30689_v4 = vld [vmem:[#allocation16_spill] sm:$0xff] }
 0x819   : > { %22563 = vmatprep.mubr.msk.f32.mxu1 %vm384_vm2, %v28500_v44  ;;  %v30690_v44 = vld [vmem:[#allocation17_spill] sm:$0xff] }
 0x81c   : > { %22564 = vmatmul.mubr.msk.f32.gmra.mrb[132].mxu1 %vm384_vm2, %v28504_v54  ;;  %v14369_v54 = vld [vmem:[#allocation3 + $0x79] sm:$0xff] }
 0x81d   : > { %22566 = vmatprep.mubr.msk.f32.mxu1 %vm384_vm2, %v28508_v63  ;;  %v14370_v63 = vld [vmem:[#allocation3 + $0x81] sm:$0xff] }
 0x820   : > { %22567 = vmatmul.mubr.msk.f32.gmra.mrb[134].mxu1 %vm384_vm2, %v28512_v9  ;;  %v14371_v9 = vld [vmem:[#allocation3 + $0x89] sm:$0xff] }
 0x821   : > { %22569 = vmatprep.mubr.msk.f32.mxu1 %vm384_vm2, %v28516_v22  ;;  %v14372_v22 = vld [vmem:[#allocation3 + $0x91] sm:$0xff] }
 0x824   : > { %22570 = vmatmul.mubr.msk.f32.gmra.mrb[136].mxu1 %vm384_vm2, %v28520_v0  ;;  %v14373_v0 = vld [vmem:[#allocation3 + $0x99] sm:$0xff] }
 0x825   : > { %22572 = vmatprep.mubr.msk.f32.mxu1 %vm384_vm2, %v28524_v7  ;;  %v14374_v7 = vld [vmem:[#allocation3 + $0xa1] sm:$0xff] }
 0x828   : > { %22573 = vmatmul.mubr.msk.f32.gmra.mrb[138].mxu1 %vm384_vm2, %v28528_v18  ;;  %v14375_v18 = vld [vmem:[#allocation3 + $0xa9] sm:$0xff] }
 0x829   : > { %22575 = vmatprep.mubr.msk.f32.mxu1 %vm384_vm2, %v28532_v15  ;;  %v14376_v15 = vld [vmem:[#allocation3 + $0xb1] sm:$0xff] }
 0x82c   : > { %22576 = vmatmul.mubr.msk.f32.gmra.mrb[140].mxu1 %vm384_vm2, %v30686_v26 }
 0x82d   : > { %22578 = vmatprep.mubr.msk.f32.mxu1 %vm384_vm2, %v30687_v14 }
 0x830   : > { %22579 = vmatmul.mubr.msk.f32.gmra.mrb[142].mxu1 %vm384_vm2, %v28715_v28  ;;  %v14382_v28 = vld [vmem:[#allocation3 + $0xe1] sm:$0xff] }
 0x831   : > { %22581 = vmatprep.mubr.msk.f32.mxu1 %vm384_vm2, %v14056_v33 }
 0x834   : > { %22582 = vmatmul.mubr.msk.f32.gmra.mrb[156].mxu1 %vm384_vm2, %v14057_v57 }
 0x835   : > { %22592 = vmatprep.mubr.msk.f32.mxu1 %vm384_vm2, %v28733_v38  ;;  %v30691_v38 = vld [vmem:[#allocation18_spill] sm:$0xff] }
 0x837   : > { %v22395_v49 = vpop.f32.mrb[148].mxu1 }
 0x838   : > { %v13023_v48 = vpop.f32.mrb[149].mxu1  ;;  %22593 = vmatmul.mubr.msk.f32.vlgmr.msra.gmra.mrb[120].mxu1 %vm384_vm2, %v28737_v24  ;;  %v14383_v24 = vld [vmem:[#allocation3 + $0xe9] sm:$0xff] }
 0x839   : > { %22943 = vmatpush3.bf16.msra.mxu1 %v22940_v3  ;;  %22595 = vmatprep.mubr.msk.f32.mxu1 %vm384_vm2, %v28741_v27  ;;  %v15128_v27 = vld [vmem:[%s30458_s5] sm:$0xff] }
 0x83a   : > { %22945 = vmatprep.subr.bf16.mxu1 %v22944_v2 }
 0x83c   : > { %22596 = vmatmul.mubr.msk.f32.gmra.mrb[122].mxu1 %vm384_vm2, %v30688_v40 }
 0x83d   : > { %22598 = vmatprep.mubr.msk.f32.mxu1 %vm384_vm2, %v30689_v4  ;;  %22947 = vmatpush3.bf16.msra.mxu1 %v22944_v2 }
 0x840   : > { %22599 = vmatmul.mubr.msk.f32.gmra.mrb[124].mxu1 %vm384_vm2, %v30690_v44 }
 0x841   : > { %22601 = vmatprep.mubr.msk.f32.mxu1 %vm384_vm2, %v28757_v8 }
 0x844   : > { %22602 = vmatmul.mubr.msk.f32.gmra.mrb[126].mxu1 %vm384_vm2, %v28761_v47 }
 0x845   : > { %22604 = vmatprep.mubr.msk.f32.mxu1 %vm384_vm2, %v28765_v13  ;;  %v15129_v13 = vld [vmem:[%s30458_s5 + $0x8] sm:$0xff] }
 0x848   : > { %22605 = vmatmul.mubr.msk.f32.gmra.mrb[128].mxu1 %vm384_vm2, %v28769_v21  ;;  %v29067_v21 = vpack.c.bf16 %v15129_v13, %v15128_v27 }
 0x849   : > { %22607 = vmatprep.mubr.msk.f32.mxu1 %vm384_vm2, %v28773_v19 }
 0x84c   : > { %22608 = vmatmul.mubr.msk.f32.gmra.mrb[130].mxu1 %vm384_vm2, %v14369_v54 }
 0x84d   : > { %22610 = vmatprep.mubr.msk.f32.mxu1 %vm384_vm2, %v14370_v63 }
 0x850   : > { %22611 = vmatmul.mubr.msk.f32.gmra.mrb[132].mxu1 %vm384_vm2, %v14371_v9 }
 0x851   : > { %22613 = vmatprep.mubr.msk.f32.mxu1 %vm384_vm2, %v14372_v22 }
 0x854   : > { %22614 = vmatmul.mubr.msk.f32.gmra.mrb[134].mxu1 %vm384_vm2, %v14373_v0 }
 0x855   : > { %22616 = vmatprep.mubr.msk.f32.mxu1 %vm384_vm2, %v14374_v7 }
 0x858   : > { %22617 = vmatmul.mubr.msk.f32.gmra.mrb[136].mxu1 %vm384_vm2, %v14375_v18 }
 0x859   : > { %22619 = vmatprep.mubr.msk.f32.mxu1 %vm384_vm2, %v14376_v15 }
 0x85c   : > { %22620 = vmatmul.mubr.msk.f32.gmra.mrb[138].mxu1 %vm384_vm2, %v28390_v58 }
 0x85d   : > { %22622 = vmatprep.mubr.msk.f32.mxu1 %vm384_vm2, %v28398_v50 }
 0x860   : > { %22623 = vmatmul.mubr.msk.f32.gmra.mrb[140].mxu1 %vm384_vm2, %v28418_v62  ;;  %v30692_v62 = vld [vmem:[#allocation13_spill] sm:$0xff] }
 0x861   : > { %22625 = vmatprep.mubr.msk.f32.mxu1 %vm384_vm2, %v30691_v38 }
 0x864   : > { %22626 = vmatmul.mubr.msk.f32.gmra.mrb[142].mxu1 %vm384_vm2, %v28803_v41 }
 0x865   : > { %22628 = vmatprep.mubr.msk.f32.mxu1 %vm384_vm2, %v14382_v28 }
 0x868   : > { %22629 = vmatmul.mubr.msk.f32.gmra.mrb[158].mxu1 %vm384_vm2, %v14383_v24 }
 0x869   : > { %22639 = vmatprep.mubr.msk.f32.mxu1 %vm384_vm2, %v28563_v23  ;;  %v30693_v23 = vld [vmem:[#allocation19_spill] sm:$0xff] }
 0x86b   : > { %v22442_v58 = vpop.f32.mrb[150].mxu1 }
 0x86c   : > { %v13349_v50 = vpop.f32.mrb[151].mxu1  ;;  %22640 = vmatmul.mubr.msk.f32.vlgmr.msra.gmra.mrb[120].mxu1 %vm384_vm2, %v28567_v45  ;;  %v14708_v45 = vld [vmem:[#allocation3 + $0xe2] sm:$0xff] }
 0x86d   : > { %22642 = vmatprep.mubr.msk.f32.mxu1 %vm384_vm2, %v28571_v35  ;;  %v14709_v35 = vld [vmem:[#allocation3 + $0xea] sm:$0xff] }
 0x870   : > { %22643 = vmatmul.mubr.msk.f32.gmra.mrb[122].mxu1 %vm384_vm2, %v28575_v5 }
 0x871   : > { %22645 = vmatprep.mubr.msk.f32.mxu1 %vm384_vm2, %v28579_v30 }
 0x874   : > { %22646 = vmatmul.mubr.msk.f32.gmra.mrb[124].mxu1 %vm384_vm2, %v28583_v56  ;;  %v18784_v56 = vld [vmem:[%s30458_s5 + $0x40] sm:$0xff] }
 0x875   : > { %22648 = vmatprep.mubr.msk.f32.mxu1 %vm384_vm2, %v28587_v31  ;;  %v18785_v31 = vld [vmem:[%s30458_s5 + $0x48] sm:$0xff] }
 0x878   : > { %22649 = vmatmul.mubr.msk.f32.gmra.mrb[126].mxu1 %vm384_vm2, %v28591_v42  ;;  %v22948_v42 = vpack.c.bf16 %v18785_v31, %v18784_v56 }
 0x879   : > { %22651 = vmatprep.mubr.msk.f32.mxu1 %vm384_vm2, %v28595_v25  ;;  %v30694_v25 = vmov 0.0  }
 0x87a   : > { %22949 = vmatprep.subr.bf16.mxu1 %v22948_v42  ;;  %387 = vst.msk [vmem:[#allocation5 + $0x30] sm:$0xff] %vm386_vm3, %v30694_v25 }
 0x87b   : > { %22951 = vmatpush3.bf16.msra.mxu1 %v22948_v42 }
 0x87c   : > { %22652 = vmatmul.mubr.msk.f32.gmra.mrb[128].mxu1 %vm384_vm2, %v28599_v51  ;;  %v18786_v51 = vld [vmem:[%s30458_s5 + $0x50] sm:$0xff] }
 0x87d   : > { %22654 = vmatprep.mubr.msk.f32.mxu1 %vm384_vm2, %v28603_v43  ;;  %v18787_v43 = vld [vmem:[%s30458_s5 + $0x58] sm:$0xff] }
 0x880   : > { %22655 = vmatmul.mubr.msk.f32.gmra.mrb[130].mxu1 %vm384_vm2, %v28607_v55 }
 0x881   : > { %22657 = vmatprep.mubr.msk.f32.mxu1 %vm384_vm2, %v28611_v46  ;;  %v22952_v46 = vpack.c.bf16 %v18787_v43, %v18786_v51 }
 0x883   : > { %22953 = vmatprep.subr.bf16.mxu1 %v22952_v46 }
 0x884   : > { %22658 = vmatmul.mubr.msk.f32.gmra.mrb[132].mxu1 %vm384_vm2, %v28615_v39 }
 0x885   : > { %22660 = vmatprep.mubr.msk.f32.mxu1 %vm384_vm2, %v28619_v61  ;;  %22955 = vmatpush3.bf16.msra.mxu1 %v22952_v46  ;;  %v18788_v61 = vld [vmem:[%s30458_s5 + $0x60] sm:$0xff] }
 0x888   : > { %22661 = vmatmul.mubr.msk.f32.gmra.mrb[134].mxu1 %vm384_vm2, %v28623_v60  ;;  %v18789_v60 = vld [vmem:[%s30458_s5 + $0x68] sm:$0xff] }
 0x889   : > { %22663 = vmatprep.mubr.msk.f32.mxu1 %vm384_vm2, %v28627_v11  ;;  %v22956_v11 = vpack.c.bf16 %v18789_v60, %v18788_v61 }
 0x88b   : > { %22957 = vmatprep.subr.bf16.mxu1 %v22956_v11 }
 0x88c   : > { %22664 = vmatmul.mubr.msk.f32.gmra.mrb[136].mxu1 %vm384_vm2, %v28631_v29  ;;  %v18790_v29 = vld [vmem:[%s30458_s5 + $0x70] sm:$0xff] }
 0x88d   : > { %22666 = vmatprep.mubr.msk.f32.mxu1 %vm384_vm2, %v28635_v10  ;;  %22959 = vmatpush3.bf16.msra.mxu1 %v22956_v11  ;;  %v18791_v10 = vld [vmem:[%s30458_s5 + $0x78] sm:$0xff] }
 0x890   : > { %22667 = vmatmul.mubr.msk.f32.gmra.mrb[138].mxu1 %vm384_vm2, %v28639_v20  ;;  %v22960_v20 = vpack.c.bf16 %v18791_v10, %v18790_v29 }
 0x891   : > { %22669 = vmatprep.mubr.msk.f32.mxu1 %vm384_vm2, %v30683_v6  ;;  %v29073_v6 = vld [vmem:[%s30457_s4] ss:$0 sm:$0xff] }
 0x892   : > { %22961 = vmatprep.subr.bf16.mxu1 %v22960_v20 }
 0x893   : > { %22963 = vmatpush3.bf16.msra.mxu1 %v22960_v20 }
 0x894   : > { %22670 = vmatmul.mubr.msk.f32.gmra.mrb[140].mxu1 %vm384_vm2, %v30692_v62  ;;  %22965 = vmatprep.subr.bf16.mxu1 %v29067_v21 }
 0x895   : > { %22672 = vmatprep.mubr.msk.f32.mxu1 %vm384_vm2, %v30693_v23 }
 0x898   : > { %22673 = vmatmul.mubr.msk.f32.gmra.mrb[142].mxu1 %vm384_vm2, %v28871_v34 }
 0x899   : > { %22675 = vmatprep.mubr.msk.f32.mxu1 %vm384_vm2, %v14708_v45 }
 0x89c   : > { %22676 = vmatmul.mubr.msk.f32.gmra.mrb[160].mxu1 %vm384_vm2, %v14709_v35 }
 0x89f   : > { %v22489_v5 = vpop.f32.mrb[152].mxu1 }
 0x8a0   : > { %v13675_v30 = vpop.f32.mrb[153].mxu1 }
 0x8d3   : > { %v22536_v55 = vpop.f32.mrb[154].mxu1 }
 0x8d4   : > { %v14001_v39 = vpop.f32.mrb[155].mxu1 }
 0x907   : > { %v22583_v19 = vpop.f32.mrb[156].mxu1 }
 0x908   : > { %v14327_v8 = vpop.f32.mrb[157].mxu1 }
 0x93b   : > { %v22630_v47 = vpop.f32.mrb[158].mxu1 }
 0x93c   : > { %v14653_v41 = vpop.f32.mrb[159].mxu1 }
 0x93f   : > { %v22641_v1 = vpop.f32.mrb[120].mxu1 }
 0x940   : > { %v14859_v32 = vpop.f32.mrb[121].mxu1  ;;  %v15018_v17 = vadd.f32 %v22641_v1, %v29073_v6 }
 0x941   : > { %v15017_v34 = vadd.f32 %v29073_v6, %v14859_v32 }
 0x942   : > { %v15042_v37 = vmax.f32 %v15018_v17, 0.0 }
 0x943   : > { %v22644_v53 = vpop.f32.mrb[122].mxu1  ;;  %v15041_v26 = vmax.f32 %v15017_v34, 0.0 }
 0x944   : > { %v15020_v16 = vadd.f32 %v22644_v53, %v29073_v6  ;;  %v14869_v36 = vpop.f32.mrb[123].mxu1 }
 0x945   : > { %v15019_v52 = vadd.f32 %v29073_v6, %v14869_v36 }
 0x946   : > { %v15044_v3 = vmax.f32 %v15020_v16, 0.0 }
 0x947   : > { %v15043_v14 = vmax.f32 %v15019_v52, 0.0  ;;  %v22647_v33 = vpop.f32.mrb[124].mxu1 }
 0x948   : > { %v15066_v57 = vmax.f32 %v15042_v37, %v15044_v3  ;;  %v14879_v12 = vpop.f32.mrb[125].mxu1  ;;  %v15022_v2 = vadd.f32 %v22647_v33, %v29073_v6 }
 0x949   : > { %v15065_v59 = vmax.f32 %v15041_v26, %v15043_v14  ;;  %v15021_v49 = vadd.f32 %v29073_v6, %v14879_v12 }
 0x94a   : > { %15068 = vst.msk [vmem:[#allocation4 + $0x8] sm:$0xff] %vm386_vm3, %v15066_v57  ;;  %v15046_v54 = vmax.f32 %v15022_v2, 0.0 }
 0x94b   : > { %15067 = vst.msk [vmem:[#allocation4] sm:$0xff] %vm386_vm3, %v15065_v59  ;;  %v22650_v48 = vpop.f32.mrb[126].mxu1  ;;  %v15045_v9 = vmax.f32 %v15021_v49, 0.0 }
 0x94c   : > { %v15024_v40 = vadd.f32 %v22650_v48, %v29073_v6  ;;  %v14889_v4 = vpop.f32.mrb[127].mxu1 }
 0x94d   : > { %v15023_v44 = vadd.f32 %v29073_v6, %v14889_v4  ;;  %v15130_v4 = vld [vmem:[%s30458_s5 + $0x10] sm:$0xff] }
 0x94e   : > { %v15048_v63 = vmax.f32 %v15024_v40, 0.0 }
 0x94f   : > { %v15047_v22 = vmax.f32 %v15023_v44, 0.0  ;;  %v22653_v0 = vpop.f32.mrb[128].mxu1  ;;  %v15131_v44 = vld [vmem:[%s30458_s5 + $0x18] sm:$0xff] }
 0x950   : > { %v15070_v7 = vmax.f32 %v15046_v54, %v15048_v63  ;;  %v14899_v18 = vpop.f32.mrb[129].mxu1  ;;  %v15026_v24 = vadd.f32 %v22653_v0, %v29073_v6 }
 0x951   : > { %v15069_v15 = vmax.f32 %v15045_v9, %v15047_v22  ;;  %v15025_v58 = vadd.f32 %v29073_v6, %v14899_v18  ;;  %v22968_v18 = vpack.c.bf16 %v15131_v44, %v15130_v4 }
 0x952   : > { %v15089_v38 = vld [vmem:[#allocation4] ss:$2 sm:$0xff]  ;;  %v15101_v28 = vld [vmem:[#allocation4 + $0x1] ss:$2 sm:$0xff]  ;;  %15072 = vst.msk [vmem:[#allocation4 + $0x18] sm:$0xff] %vm386_vm3, %v15070_v7  ;;  %v15050_v5 = vmax.f32 %v15026_v24, 0.0 }
 0x953   : > { %15071 = vst.msk [vmem:[#allocation4 + $0x10] sm:$0xff] %vm386_vm3, %v15069_v15  ;;  %v22656_v50 = vpop.f32.mrb[130].mxu1  ;;  %v15112_v62 = vmax.f32 %v15089_v38, %v15101_v28  ;;  %v15049_v56 = vmax.f32 %v15025_v58, 0.0  ;;  %v15132_v58 = vld [vmem:[%s30458_s5 + $0x20] sm:$0xff] }
 0x954   : > { %v15028_v23 = vadd.f32 %v22656_v50, %v29073_v6  ;;  %v14909_v45 = vpop.f32.mrb[131].mxu1  ;;  %v15133_v50 = vld [vmem:[%s30458_s5 + $0x28] sm:$0xff] }
 0x955   : > { %v15027_v35 = vadd.f32 %v29073_v6, %v14909_v45  ;;  %15118 = vst.msk [vmem:[#allocation5] sm:$0xff] %vm386_vm3, %v15112_v62 }
 0x956   : > { %v15052_v30 = vmax.f32 %v15028_v23, 0.0 }
 0x957   : > { %v15051_v31 = vmax.f32 %v15027_v35, 0.0  ;;  %v22659_v42 = vpop.f32.mrb[132].mxu1 }
 0x958   : > { %v15074_v51 = vmax.f32 %v15050_v5, %v15052_v30  ;;  %v14919_v43 = vpop.f32.mrb[133].mxu1  ;;  %v15030_v61 = vadd.f32 %v22659_v42, %v29073_v6 }
 0x959   : > { %v15073_v55 = vmax.f32 %v15049_v56, %v15051_v31  ;;  %v15029_v60 = vadd.f32 %v29073_v6, %v14919_v43  ;;  %v22972_v56 = vpack.c.bf16 %v15133_v50, %v15132_v58  ;;  %v18829_v58 = vld [vmem:[%s30458_s5 + $0x128] sm:$0xff] }
 0x95a   : > { %v15091_v46 = vld [vmem:[#allocation4 + $0x10] ss:$2 sm:$0xff]  ;;  %v15103_v39 = vld [vmem:[#allocation4 + $0x11] ss:$2 sm:$0xff]  ;;  %15076 = vst.msk [vmem:[#allocation4 + $0x28] sm:$0xff] %vm386_vm3, %v15074_v51  ;;  %v15054_v13 = vmax.f32 %v15030_v61, 0.0 }
 0x95b   : > { %15075 = vst.msk [vmem:[#allocation4 + $0x20] sm:$0xff] %vm386_vm3, %v15073_v55  ;;  %v22662_v11 = vpop.f32.mrb[134].mxu1  ;;  %v15113_v29 = vmax.f32 %v15091_v46, %v15103_v39  ;;  %v15053_v8 = vmax.f32 %v15029_v60, 0.0  ;;  %v15135_v51 = vld [vmem:[%s30458_s5 + $0x38] sm:$0xff]  ;;  %v18800_v60 = vld [vmem:[%s30458_s5 + $0x80] sm:$0xff] }
 0x95c   : > { %v15032_v10 = vadd.f32 %v22662_v11, %v29073_v6  ;;  %v14929_v20 = vpop.f32.mrb[135].mxu1  ;;  %v18801_v11 = vld [vmem:[%s30458_s5 + $0x88] sm:$0xff] }
 0x95d   : > { %v15031_v27 = vadd.f32 %v29073_v6, %v14929_v20  ;;  %15119 = vst.msk [vmem:[#allocation5 + $0x8] sm:$0xff] %vm386_vm3, %v15113_v29  ;;  %v22980_v29 = vpack.c.bf16 %v18801_v11, %v18800_v60  ;;  %v18848_v60 = vld [vmem:[%s30458_s5 + $0x180] sm:$0xff]  ;;  %v18849_v11 = vld [vmem:[%s30458_s5 + $0x188] sm:$0xff] }
 0x95e   : > { %v15056_v19 = vmax.f32 %v15032_v10, 0.0 }
 0x95f   : > { %v15055_v47 = vmax.f32 %v15031_v27, 0.0  ;;  %v22665_v41 = vpop.f32.mrb[136].mxu1 }
 0x960   : > { %v15078_v1 = vmax.f32 %v15054_v13, %v15056_v19  ;;  %v14939_v32 = vpop.f32.mrb[137].mxu1  ;;  %v15034_v16 = vadd.f32 %v22665_v41, %v29073_v6  ;;  %v18802_v19 = vld [vmem:[%s30458_s5 + $0x90] sm:$0xff] }
 0x961   : > { %v15077_v17 = vmax.f32 %v15053_v8, %v15055_v47  ;;  %v15033_v52 = vadd.f32 %v29073_v6, %v14939_v32  ;;  %v18803_v8 = vld [vmem:[%s30458_s5 + $0x98] sm:$0xff]  ;;  %v18804_v32 = vld [vmem:[%s30458_s5 + $0xa0] sm:$0xff] }
 0x962   : > { %v15093_v34 = vld [vmem:[#allocation4 + $0x20] ss:$2 sm:$0xff]  ;;  %v15105_v53 = vld [vmem:[#allocation4 + $0x21] ss:$2 sm:$0xff]  ;;  %15080 = vst.msk [vmem:[#allocation4 + $0x38] sm:$0xff] %vm386_vm3, %v15078_v1  ;;  %v15058_v57 = vmax.f32 %v15034_v16, 0.0  ;;  %v22984_v41 = vpack.c.bf16 %v18803_v8, %v18802_v19 }
 0x963   : > { %v15114_v36 = vmax.f32 %v15093_v34, %v15105_v53  ;;  %15079 = vst.msk [vmem:[#allocation4 + $0x30] sm:$0xff] %vm386_vm3, %v15077_v17  ;;  %v22668_v37 = vpop.f32.mrb[138].mxu1  ;;  %v15057_v59 = vmax.f32 %v15033_v52, 0.0  ;;  %v15124_v47 = vld [vmem:[#allocation5] sm:$0xff]  ;;  %v18805_v17 = vld [vmem:[%s30458_s5 + $0xa8] sm:$0xff]  ;;  %v18852_v19 = vld [vmem:[%s30458_s5 + $0x1a0] sm:$0xff] }
 0x964   : > { %v15036_v3 = vadd.f32 %v22668_v37, %v29073_v6  ;;  %v14949_v26 = vpop.f32.mrb[139].mxu1  ;;  %v15136_v14 = vld [vmem:[#allocation5 + $0x1] sm:$0xff]  ;;  %v22988_v53 = vpack.c.bf16 %v18805_v17, %v18804_v32  ;;  %v18853_v8 = vld [vmem:[%s30458_s5 + $0x1a8] sm:$0xff] }
 0x965   : > { %15120 = vst.msk [vmem:[#allocation5 + $0x10] sm:$0xff] %vm386_vm3, %v15114_v36  ;;  %v15035_v33 = vadd.f32 %v29073_v6, %v14949_v26  ;;  %22694 = vmatprep.mubr.msk.f32.mxu1 %vm386_vm3, %v15136_v14  ;;  %v15125_v1 = vld [vmem:[#allocation5 + $0x8] sm:$0xff]  ;;  %v18806_v36 = vld [vmem:[%s30458_s5 + $0xb0] sm:$0xff]  ;;  %v18807_v52 = vld [vmem:[%s30458_s5 + $0xb8] sm:$0xff] }
 0x966   : > { %v15060_v12 = vmax.f32 %v15036_v3, 0.0  ;;  %v15343_v37 = vld [vmem:[#allocation5 + $0x2] sm:$0xff]  ;;  %v22992_v3 = vpack.c.bf16 %v18807_v52, %v18806_v36  ;;  %v18813_v14 = vld [vmem:[%s30458_s5 + $0xc8] sm:$0xff] }
 0x967   : > { %v15059_v2 = vmax.f32 %v15035_v33, 0.0  ;;  %v22671_v49 = vpop.f32.mrb[140].mxu1  ;;  %v18812_v26 = vld [vmem:[%s30458_s5 + $0xc0] sm:$0xff]  ;;  %v18855_v32 = vld [vmem:[%s30458_s5 + $0x1b8] sm:$0xff]  ;;  %v18861_v36 = vld [vmem:[%s30458_s5 + $0x1c8] sm:$0xff] }
 0x968   : > { %v15082_v48 = vmax.f32 %v15058_v57, %v15060_v12  ;;  %v14959_v40 = vpop.f32.mrb[141].mxu1  ;;  %v15038_v22 = vadd.f32 %v22671_v49, %v29073_v6  ;;  %v22996_v33 = vpack.c.bf16 %v18813_v14, %v18812_v26  ;;  %v18814_v57 = vld [vmem:[%s30458_s5 + $0xd0] sm:$0xff]  ;;  %v18815_v12 = vld [vmem:[%s30458_s5 + $0xd8] sm:$0xff]  ;;  %v18816_v49 = vld [vmem:[%s30458_s5 + $0xe0] sm:$0xff] }
 0x969   : > { %v15081_v54 = vmax.f32 %v15057_v59, %v15059_v2  ;;  %v15037_v0 = vadd.f32 %v29073_v6, %v14959_v40  ;;  %v23000_v59 = vpack.c.bf16 %v18815_v12, %v18814_v57  ;;  %v18864_v26 = vld [vmem:[%s30458_s5 + $0x1e0] sm:$0xff]  ;;  %v18865_v14 = vld [vmem:[%s30458_s5 + $0x1e8] sm:$0xff]  ;;  %v18866_v12 = vld [vmem:[%s30458_s5 + $0x1f0] sm:$0xff] }
 0x96a   : > { %v15095_v63 = vld [vmem:[#allocation4 + $0x30] ss:$2 sm:$0xff]  ;;  %v15107_v9 = vld [vmem:[#allocation4 + $0x31] ss:$2 sm:$0xff]  ;;  %15084 = vst.msk [vmem:[#allocation4 + $0x48] sm:$0xff] %vm386_vm3, %v15082_v48  ;;  %v15062_v23 = vmax.f32 %v15038_v22, 0.0 }
 0x96b   : > { %15083 = vst.msk [vmem:[#allocation4 + $0x40] sm:$0xff] %vm386_vm3, %v15081_v54  ;;  %v22674_v7 = vpop.f32.mrb[142].mxu1  ;;  %v15115_v15 = vmax.f32 %v15095_v63, %v15107_v9  ;;  %v15061_v35 = vmax.f32 %v15037_v0, 0.0  ;;  %v18817_v48 = vld [vmem:[%s30458_s5 + $0xe8] sm:$0xff]  ;;  %v18818_v54 = vld [vmem:[%s30458_s5 + $0xf0] sm:$0xff]  ;;  %v18819_v63 = vld [vmem:[%s30458_s5 + $0xf8] sm:$0xff] }
 0x96c   : > { %v15040_v38 = vadd.f32 %v22674_v7, %v29073_v6  ;;  %v14969_v28 = vpop.f32.mrb[143].mxu1  ;;  %v29118_v24 = vld [vmem:[#allocation5 + $0x9] sm:$0xff]  ;;  %v23004_v4 = vpack.c.bf16 %v18817_v48, %v18816_v49  ;;  %v23008_v9 = vpack.c.bf16 %v18819_v63, %v18818_v54 }
 0x96d   : > { %v15039_v62 = vadd.f32 %v29073_v6, %v14969_v28  ;;  %22695 = vmatmul.mubr.msk.f32.vlgmr.msra.gmra.mrb[162].mxu1 %vm386_vm3, %v29118_v24  ;;  %15121 = vst.msk [vmem:[#allocation5 + $0x18] sm:$0xff] %vm386_vm3, %v15115_v15  ;;  %v15134_v6 = vld [vmem:[%s30458_s5 + $0x30] sm:$0xff]  ;;  %v29169_v34 = vld [vmem:[#allocation5 + $0x10] sm:$0xff]  ;;  %v18824_v22 = vld [vmem:[%s30458_s5 + $0x100] sm:$0xff] }
 0x96e   : > { %v15064_v45 = vmax.f32 %v15040_v38, 0.0  ;;  %22967 = vmatpush3.bf16.msra.mxu1 %v29067_v21  ;;  %v22976_v21 = vpack.c.bf16 %v15135_v51, %v15134_v6  ;;  %v29196_v2 = vld [vmem:[#allocation5 + $0xa] sm:$0xff]  ;;  %v18827_v15 = vld [vmem:[%s30458_s5 + $0x118] sm:$0xff] }
 0x96f   : > { %v15063_v5 = vmax.f32 %v15039_v62, 0.0  ;;  %v22677_v30 = vpop.f32.mrb[160].mxu1  ;;  %22969 = vmatprep.subr.bf16.mxu1 %v22968_v18  ;;  %v18825_v0 = vld [vmem:[%s30458_s5 + $0x108] sm:$0xff]  ;;  %v18828_v28 = vld [vmem:[%s30458_s5 + $0x120] sm:$0xff] }
 0x970   : > { %v15086_v31 = vmax.f32 %v15062_v23, %v15064_v45  ;;  %v14979_v42 = vpop.f32.mrb[161].mxu1  ;;  %v23012_v7 = vpack.c.bf16 %v18825_v0, %v18824_v22  ;;  %v23020_v50 = vpack.c.bf16 %v18829_v58, %v18828_v28  ;;  %v18830_v23 = vld [vmem:[%s30458_s5 + $0x130] sm:$0xff]  ;;  %v18831_v45 = vld [vmem:[%s30458_s5 + $0x138] sm:$0xff]  ;;  %v18837_v30 = vld [vmem:[%s30458_s5 + $0x148] sm:$0xff] }
 0x971   : > { %v15085_v43 = vmax.f32 %v15061_v35, %v15063_v5  ;;  %v23024_v35 = vpack.c.bf16 %v18831_v45, %v18830_v23  ;;  %v18836_v5 = vld [vmem:[%s30458_s5 + $0x140] sm:$0xff]  ;;  %v18841_v51 = vld [vmem:[%s30458_s5 + $0x168] sm:$0xff] }
 0x972   : > { %v15097_v55 = vld [vmem:[#allocation4 + $0x40] ss:$2 sm:$0xff]  ;;  %v15109_v46 = vld [vmem:[#allocation4 + $0x41] ss:$2 sm:$0xff]  ;;  %15088 = vst.msk [vmem:[#allocation4 + $0x58] sm:$0xff] %vm386_vm3, %v15086_v31  ;;  %22971 = vmatpush3.bf16.msra.mxu1 %v22968_v18  ;;  %v18826_v18 = vld [vmem:[%s30458_s5 + $0x110] sm:$0xff] }
 0x973   : > { %15087 = vst.msk [vmem:[#allocation4 + $0x50] sm:$0xff] %vm386_vm3, %v15085_v43  ;;  %22973 = vmatprep.subr.bf16.mxu1 %v22972_v56  ;;  %v15116_v39 = vmax.f32 %v15097_v55, %v15109_v46  ;;  %v23016_v38 = vpack.c.bf16 %v18827_v15, %v18826_v18  ;;  %v18838_v31 = vld [vmem:[%s30458_s5 + $0x150] sm:$0xff]  ;;  %v18840_v6 = vld [vmem:[%s30458_s5 + $0x160] sm:$0xff]  ;;  %v18873_v49 = vld [vmem:[%s30458_s5 + $0x208] sm:$0xff] }
 0x974   : > { %v29139_v61 = vld [vmem:[#allocation5 + $0x11] sm:$0xff]  ;;  %v23036_v43 = vpack.c.bf16 %v18841_v51, %v18840_v6  ;;  %v18876_v63 = vld [vmem:[%s30458_s5 + $0x220] sm:$0xff]  ;;  %v18879_v18 = vld [vmem:[%s30458_s5 + $0x238] sm:$0xff] }
 0x975   : > { %22697 = vmatprep.mubr.msk.f32.mxu1 %vm386_vm3, %v29139_v61  ;;  %15122 = vst.msk [vmem:[#allocation5 + $0x20] sm:$0xff] %vm386_vm3, %v15116_v39  ;;  %v29173_v16 = vld [vmem:[#allocation5 + $0x18] sm:$0xff]  ;;  %v16168_v15 = vld [vmem:[%s30460_s7 + $0x8] sm:$0xff]  ;;  %v16167_v58 = vld [vmem:[%s30460_s7] sm:$0xff] }
 0x976   : > { %22975 = vmatpush3.bf16.msra.mxu1 %v22972_v56  ;;  %v29206_v40 = vld [vmem:[#allocation5 + $0x12] sm:$0xff]  ;;  %v23028_v56 = vpack.c.bf16 %v18837_v30, %v18836_v5  ;;  %v16179_v5 = vld [vmem:[%s30460_s7 + $0x60] sm:$0xff] }
 0x977   : > { %22977 = vmatprep.subr.bf16.mxu1 %v22976_v21  ;;  %v18842_v46 = vld [vmem:[%s30458_s5 + $0x170] sm:$0xff]  ;;  %v16176_v23 = vld [vmem:[%s30460_s7 + $0x48] sm:$0xff]  ;;  %v16187_v6 = vld [vmem:[%s30460_s7 + $0xa0] sm:$0xff] }
 0x978   : > { %v16180_v45 = vld [vmem:[%s30460_s7 + $0x68] sm:$0xff] }
 0x97a   : > { %v15099_v10 = vld [vmem:[#allocation4 + $0x50] ss:$2 sm:$0xff]  ;;  %v15111_v20 = vld [vmem:[#allocation4 + $0x51] ss:$2 sm:$0xff]  ;;  %22979 = vmatpush3.bf16.msra.mxu1 %v22976_v21  ;;  %v18843_v21 = vld [vmem:[%s30458_s5 + $0x178] sm:$0xff] }
 0x97b   : > { %22981 = vmatprep.subr.bf16.mxu1 %v22980_v29  ;;  %v15117_v27 = vmax.f32 %v15099_v10, %v15111_v20  ;;  %v23040_v39 = vpack.c.bf16 %v18843_v21, %v18842_v46  ;;  %v18850_v10 = vld [vmem:[%s30458_s5 + $0x190] sm:$0xff]  ;;  %v18851_v20 = vld [vmem:[%s30458_s5 + $0x198] sm:$0xff]  ;;  %v16191_v21 = vld [vmem:[%s30460_s7 + $0xc0] sm:$0xff] }
 0x97c   : > { %v29150_v13 = vld [vmem:[#allocation5 + $0x19] sm:$0xff] }
 0x97d   : > { %22698 = vmatmul.mubr.msk.f32.gmra.mrb[164].mxu1 %vm386_vm3, %v29150_v13  ;;  %15123 = vst.msk [vmem:[#allocation5 + $0x28] sm:$0xff] %vm386_vm3, %v15117_v27  ;;  %v29210_v44 = vld [vmem:[#allocation5 + $0x1a] sm:$0xff]  ;;  %v23048_v27 = vpack.c.bf16 %v18851_v20, %v18850_v10  ;;  %v16199_v20 = vld [vmem:[%s30460_s7 + $0x100] sm:$0xff] }
 0x97e   : > { %22716 = vmatprep.mubr.msk.f32.mxu1 %vm386_vm3, %v15124_v47  ;;  %v29243_v62 = vld [vmem:[#allocation5 + $0x20] sm:$0xff]  ;;  %v23052_v47 = vpack.c.bf16 %v18853_v8, %v18852_v19  ;;  %v16208_v8 = vld [vmem:[%s30460_s7 + $0x148] sm:$0xff] }
 0x981   : > { %22717 = vmatmul.mubr.msk.f32.vlgmr.msra.gmra.mrb[162].mxu1 %vm386_vm3, %v15125_v1 }
 0x982   : > { %22983 = vmatpush3.bf16.msra.mxu1 %v22980_v29  ;;  %22719 = vmatprep.mubr.msk.f32.mxu1 %vm386_vm3, %v29169_v34  ;;  %v23044_v29 = vpack.c.bf16 %v18849_v11, %v18848_v60  ;;  %v16200_v11 = vld [vmem:[%s30460_s7 + $0x108] sm:$0xff] }
 0x983   : > { %22985 = vmatprep.subr.bf16.mxu1 %v22984_v41 }
 0x984   : > { %v29277_v55 = vld [vmem:[#allocation5 + $0x21] sm:$0xff]  ;;  %v15916_v0 = vld [vmem:[#allocation5 + $0x29] sm:$0xff] }
 0x985   : > { %22720 = vmatmul.mubr.msk.f32.gmra.mrb[164].mxu1 %vm386_vm3, %v29173_v16  ;;  %v15802_v57 = vld [vmem:[#allocation5 + $0x28] sm:$0xff] }
 0x986   : > { %22987 = vmatpush3.bf16.msra.mxu1 %v22984_v41  ;;  %22738 = vmatprep.mubr.msk.f32.mxu1 %vm386_vm3, %v15343_v37  ;;  %v29311_v41 = vld [vmem:[#allocation5 + $0x22] sm:$0xff]  ;;  %v18862_v37 = vld [vmem:[%s30458_s5 + $0x1d0] sm:$0xff] }
 0x987   : > { %22989 = vmatprep.subr.bf16.mxu1 %v22988_v53 }
 0x98a   : > { %22991 = vmatpush3.bf16.msra.mxu1 %v22988_v53  ;;  %v18860_v53 = vld [vmem:[%s30458_s5 + $0x1c0] sm:$0xff] }
 0x98b   : > { %22993 = vmatprep.subr.bf16.mxu1 %v22992_v3  ;;  %v23060_v52 = vpack.c.bf16 %v18861_v36, %v18860_v53  ;;  %v16216_v53 = vld [vmem:[%s30460_s7 + $0x188] sm:$0xff] }
 0x98c   : > { %v16220_v36 = vld [vmem:[%s30460_s7 + $0x1a8] sm:$0xff] }
 0x98e   : > { %22995 = vmatpush3.bf16.msra.mxu1 %v22992_v3 }
 0x98f   : > { %22997 = vmatprep.subr.bf16.mxu1 %v22996_v33 }
 0x991   : > { %22739 = vmatmul.mubr.msk.f32.vlgmr.msra.gmra.mrb[162].mxu1 %vm386_vm3, %v29196_v2 }
 0x992   : > { %22741 = vmatprep.mubr.msk.f32.mxu1 %vm386_vm3, %v29206_v40  ;;  %22999 = vmatpush3.bf16.msra.mxu1 %v22996_v33  ;;  %v23068_v33 = vpack.c.bf16 %v18865_v14, %v18864_v26  ;;  %v16224_v26 = vld [vmem:[%s30460_s7 + $0x1c8] sm:$0xff] }
 0x993   : > { %23001 = vmatprep.subr.bf16.mxu1 %v23000_v59  ;;  %v16228_v14 = vld [vmem:[%s30460_s7 + $0x1e8] sm:$0xff] }
 0x995   : > { %22742 = vmatmul.mubr.msk.f32.gmra.mrb[164].mxu1 %vm386_vm3, %v29210_v44 }
 0x996   : > { %23003 = vmatpush3.bf16.msra.mxu1 %v23000_v59  ;;  %22760 = vmatprep.mubr.msk.f32.mxu1 %vm386_vm3, %v15125_v1  ;;  %v18854_v1 = vld [vmem:[%s30458_s5 + $0x1b0] sm:$0xff]  ;;  %v18867_v59 = vld [vmem:[%s30458_s5 + $0x1f8] sm:$0xff] }
 0x997   : > { %23005 = vmatprep.subr.bf16.mxu1 %v23004_v4  ;;  %v23056_v17 = vpack.c.bf16 %v18855_v32, %v18854_v1  ;;  %v16207_v1 = vld [vmem:[%s30460_s7 + $0x140] sm:$0xff] }
 0x998   : > { %v16211_v32 = vld [vmem:[%s30460_s7 + $0x160] sm:$0xff] }
 0x99a   : > { %23007 = vmatpush3.bf16.msra.mxu1 %v23004_v4  ;;  %v18874_v4 = vld [vmem:[%s30458_s5 + $0x210] sm:$0xff] }
 0x99b   : > { %23009 = vmatprep.subr.bf16.mxu1 %v23008_v9 }
 0x99e   : > { %23011 = vmatpush3.bf16.msra.mxu1 %v23008_v9  ;;  %v18877_v9 = vld [vmem:[%s30458_s5 + $0x228] sm:$0xff] }
 0x99f   : > { %23013 = vmatprep.subr.bf16.mxu1 %v23012_v7  ;;  %v23084_v22 = vpack.c.bf16 %v18877_v9, %v18876_v63 }
 0x9a1   : > { %22761 = vmatmul.mubr.msk.f32.vlgmr.msra.gmra.mrb[162].mxu1 %vm386_vm3, %v29169_v34 }
 0x9a2   : > { %22763 = vmatprep.mubr.msk.f32.mxu1 %vm386_vm3, %v29173_v16  ;;  %23015 = vmatpush3.bf16.msra.mxu1 %v23012_v7  ;;  %v18878_v7 = vld [vmem:[%s30458_s5 + $0x230] sm:$0xff] }
 0x9a3   : > { %23017 = vmatprep.subr.bf16.mxu1 %v23016_v38 }
 0x9a5   : > { %22764 = vmatmul.mubr.msk.f32.gmra.mrb[164].mxu1 %vm386_vm3, %v29243_v62 }
 0x9a6   : > { %23019 = vmatpush3.bf16.msra.mxu1 %v23016_v38  ;;  %22782 = vmatprep.mubr.msk.f32.mxu1 %vm386_vm3, %v29118_v24  ;;  %v18839_v24 = vld [vmem:[%s30458_s5 + $0x158] sm:$0xff]  ;;  %v16172_v38 = vld [vmem:[%s30460_s7 + $0x28] sm:$0xff] }
 0x9a7   : > { %23021 = vmatprep.subr.bf16.mxu1 %v23020_v50  ;;  %v23032_v42 = vpack.c.bf16 %v18839_v24, %v18838_v31  ;;  %v23092_v28 = vpack.c.bf16 %v16172_v38, %v16168_v15  ;;  %v16188_v31 = vld [vmem:[%s30460_s7 + $0xa8] sm:$0xff] }
 0x9aa   : > { %23023 = vmatpush3.bf16.msra.mxu1 %v23020_v50 }
 0x9ab   : > { %23025 = vmatprep.subr.bf16.mxu1 %v23024_v35 }
 0x9ae   : > { %23027 = vmatpush3.bf16.msra.mxu1 %v23024_v35  ;;  %v23096_v35 = vpack.c.bf16 %v16180_v45, %v16176_v23  ;;  %v16169_v23 = vld [vmem:[%s30460_s7 + $0x10] sm:$0xff] }
 0x9af   : > { %23029 = vmatprep.subr.bf16.mxu1 %v23028_v56  ;;  %v16173_v45 = vld [vmem:[%s30460_s7 + $0x30] sm:$0xff] }
 0x9b1   : > { %22783 = vmatmul.mubr.msk.f32.vlgmr.msra.gmra.mrb[162].mxu1 %vm386_vm3, %v29139_v61 }
 0x9b2   : > { %22785 = vmatprep.mubr.msk.f32.mxu1 %vm386_vm3, %v29150_v13  ;;  %23031 = vmatpush3.bf16.msra.mxu1 %v23028_v56  ;;  %v16184_v56 = vld [vmem:[%s30460_s7 + $0x88] sm:$0xff] }
 0x9b3   : > { %23033 = vmatprep.subr.bf16.mxu1 %v23032_v42  ;;  %v23100_v24 = vpack.c.bf16 %v16188_v31, %v16184_v56  ;;  %v16177_v56 = vld [vmem:[%s30460_s7 + $0x50] sm:$0xff] }
 0x9b4   : > { %v16181_v31 = vld [vmem:[%s30460_s7 + $0x70] sm:$0xff] }
 0x9b5   : > { %22786 = vmatmul.mubr.msk.f32.gmra.mrb[164].mxu1 %vm386_vm3, %v29277_v55 }
 0x9b6   : > { %23035 = vmatpush3.bf16.msra.mxu1 %v23032_v42  ;;  %22804 = vmatprep.mubr.msk.f32.mxu1 %vm386_vm3, %v29196_v2  ;;  %v18872_v2 = vld [vmem:[%s30458_s5 + $0x200] sm:$0xff] }
 0x9b7   : > { %23037 = vmatprep.subr.bf16.mxu1 %v23036_v43  ;;  %v23076_v48 = vpack.c.bf16 %v18873_v49, %v18872_v2  ;;  %v16183_v42 = vld [vmem:[%s30460_s7 + $0x80] sm:$0xff] }
 0x9b8   : > { %v23102_v51 = vpack.c.bf16 %v16187_v6, %v16183_v42  ;;  %v16186_v42 = vld [vmem:[%s30460_s7 + $0x98] sm:$0xff] }
 0x9b9   : > { %v16190_v6 = vld [vmem:[%s30460_s7 + $0xb8] sm:$0xff] }
 0x9ba   : > { %23039 = vmatpush3.bf16.msra.mxu1 %v23036_v43  ;;  %v16192_v43 = vld [vmem:[%s30460_s7 + $0xc8] sm:$0xff] }
 0x9bb   : > { %23041 = vmatprep.subr.bf16.mxu1 %v23040_v39 }
 0x9be   : > { %23043 = vmatpush3.bf16.msra.mxu1 %v23040_v39  ;;  %v16195_v39 = vld [vmem:[%s30460_s7 + $0xe0] sm:$0xff] }
 0x9bf   : > { %23045 = vmatprep.subr.bf16.mxu1 %v23044_v29  ;;  %v23106_v60 = vpack.c.bf16 %v16195_v39, %v16191_v21  ;;  %v16194_v21 = vld [vmem:[%s30460_s7 + $0xd8] sm:$0xff] }
 0x9c0   : > { %v16198_v39 = vld [vmem:[%s30460_s7 + $0xf8] sm:$0xff] }
 0x9c1   : > { %22805 = vmatmul.mubr.msk.f32.vlgmr.msra.gmra.mrb[162].mxu1 %vm386_vm3, %v29206_v40 }
 0x9c2   : > { %22807 = vmatprep.mubr.msk.f32.mxu1 %vm386_vm3, %v29210_v44  ;;  %23047 = vmatpush3.bf16.msra.mxu1 %v23044_v29  ;;  %v16204_v29 = vld [vmem:[%s30460_s7 + $0x128] sm:$0xff] }
 0x9c3   : > { %23049 = vmatprep.subr.bf16.mxu1 %v23048_v27  ;;  %v23108_v10 = vpack.c.bf16 %v16204_v29, %v16200_v11  ;;  %v23136_v11 = vpack.c.bf16 %v16198_v39, %v16194_v21  ;;  %v16193_v29 = vld [vmem:[%s30460_s7 + $0xd0] sm:$0xff]  ;;  %v18925_v39 = vld [vmem:[%s30460_s7 + $0x340] sm:$0xff] }
 0x9c5   : > { %22808 = vmatmul.mubr.msk.f32.gmra.mrb[164].mxu1 %vm386_vm3, %v29311_v41 }
 0x9c6   : > { %23051 = vmatpush3.bf16.msra.mxu1 %v23048_v27  ;;  %22826 = vmatprep.mubr.msk.f32.mxu1 %vm386_vm3, %v29169_v34  ;;  %v18863_v34 = vld [vmem:[%s30458_s5 + $0x1d8] sm:$0xff]  ;;  %v16203_v27 = vld [vmem:[%s30460_s7 + $0x120] sm:$0xff] }
 0x9c7   : > { %23053 = vmatprep.subr.bf16.mxu1 %v23052_v47  ;;  %v23064_v3 = vpack.c.bf16 %v18863_v34, %v18862_v37  ;;  %v23110_v19 = vpack.c.bf16 %v16203_v27, %v16199_v20  ;;  %v16215_v37 = vld [vmem:[%s30460_s7 + $0x180] sm:$0xff]  ;;  %v16202_v20 = vld [vmem:[%s30460_s7 + $0x118] sm:$0xff] }
 0x9c8   : > { %v16219_v34 = vld [vmem:[%s30460_s7 + $0x1a0] sm:$0xff]  ;;  %v16206_v27 = vld [vmem:[%s30460_s7 + $0x138] sm:$0xff] }
 0x9ca   : > { %23055 = vmatpush3.bf16.msra.mxu1 %v23052_v47  ;;  %v16212_v47 = vld [vmem:[%s30460_s7 + $0x168] sm:$0xff] }
 0x9cb   : > { %23057 = vmatprep.subr.bf16.mxu1 %v23056_v17 }
 0x9ce   : > { %23059 = vmatpush3.bf16.msra.mxu1 %v23056_v17  ;;  %v23114_v17 = vpack.c.bf16 %v16211_v32, %v16207_v1  ;;  %v16210_v1 = vld [vmem:[%s30460_s7 + $0x158] sm:$0xff] }
 0x9cf   : > { %23061 = vmatprep.subr.bf16.mxu1 %v23060_v52  ;;  %v16214_v32 = vld [vmem:[%s30460_s7 + $0x178] sm:$0xff] }
 0x9d1   : > { %22827 = vmatmul.mubr.msk.f32.vlgmr.msra.gmra.mrb[162].mxu1 %vm386_vm3, %v29173_v16  ;;  %v23072_v16 = vpack.c.bf16 %v18867_v59, %v18866_v12  ;;  %v16227_v12 = vld [vmem:[%s30460_s7 + $0x1e0] sm:$0xff]  ;;  %v16170_v59 = vld [vmem:[%s30460_s7 + $0x18] sm:$0xff] }
 0x9d2   : > { %22829 = vmatprep.mubr.msk.f32.mxu1 %vm386_vm3, %v29243_v62  ;;  %23063 = vmatpush3.bf16.msra.mxu1 %v23060_v52  ;;  %v16030_v62 = vld [vmem:[#allocation5 + $0x2a] sm:$0xff]  ;;  %v23116_v52 = vpack.c.bf16 %v16220_v36, %v16216_v53  ;;  %v23144_v53 = vpack.c.bf16 %v16214_v32, %v16210_v1  ;;  %v16209_v36 = vld [vmem:[%s30460_s7 + $0x150] sm:$0xff] }
 0x9d3   : > { %23065 = vmatprep.subr.bf16.mxu1 %v23064_v3  ;;  %v18941_v32 = vld [vmem:[%s30460_s7 + $0x3c0] sm:$0xff] }
 0x9d5   : > { %22830 = vmatmul.mubr.msk.f32.gmra.mrb[164].mxu1 %vm386_vm3, %v15802_v57  ;;  %v23120_v57 = vpack.c.bf16 %v16228_v14, %v16224_v26  ;;  %v16217_v14 = vld [vmem:[%s30460_s7 + $0x190] sm:$0xff] }
 0x9d6   : > { %23067 = vmatpush3.bf16.msra.mxu1 %v23064_v3  ;;  %22848 = vmatprep.mubr.msk.f32.mxu1 %vm386_vm3, %v29139_v61  ;;  %v18875_v61 = vld [vmem:[%s30458_s5 + $0x218] sm:$0xff]  ;;  %v23118_v3 = vpack.c.bf16 %v16219_v34, %v16215_v37 }
 0x9d7   : > { %23069 = vmatprep.subr.bf16.mxu1 %v23068_v33  ;;  %v23080_v54 = vpack.c.bf16 %v18875_v61, %v18874_v4  ;;  %v16218_v37 = vld [vmem:[%s30460_s7 + $0x198] sm:$0xff] }
 0x9d8   : > { %v16222_v34 = vld [vmem:[%s30460_s7 + $0x1b8] sm:$0xff] }
 0x9d9   : > { %v23148_v26 = vpack.c.bf16 %v16222_v34, %v16218_v37  ;;  %v18887_v34 = vld [vmem:[%s30460_s7 + $0x210] sm:$0xff] }
 0x9da   : > { %23071 = vmatpush3.bf16.msra.mxu1 %v23068_v33  ;;  %v16223_v33 = vld [vmem:[%s30460_s7 + $0x1c0] sm:$0xff] }
 0x9db   : > { %23073 = vmatprep.subr.bf16.mxu1 %v23072_v16  ;;  %v23122_v2 = vpack.c.bf16 %v16227_v12, %v16223_v33  ;;  %v16221_v33 = vld [vmem:[%s30460_s7 + $0x1b0] sm:$0xff]  ;;  %v16230_v12 = vld [vmem:[%s30460_s7 + $0x1f8] sm:$0xff] }
 0x9de   : > { %23075 = vmatpush3.bf16.msra.mxu1 %v23072_v16  ;;  %v16174_v16 = vld [vmem:[%s30460_s7 + $0x38] sm:$0xff] }
 0x9df   : > { %23077 = vmatprep.subr.bf16.mxu1 %v23076_v48  ;;  %v23124_v49 = vpack.c.bf16 %v16174_v16, %v16170_v59  ;;  %v23150_v59 = vpack.c.bf16 %v16221_v33, %v16217_v14  ;;  %v18900_v14 = vld [vmem:[%s30460_s7 + $0x278] sm:$0xff] }
 0x9e1   : > { %22849 = vmatmul.mubr.msk.f32.vlgmr.msra.gmra.mrb[162].mxu1 %vm386_vm3, %v29150_v13  ;;  %v23088_v13 = vpack.c.bf16 %v18879_v18, %v18878_v7 }
 0x9e2   : > { %22851 = vmatprep.mubr.msk.f32.mxu1 %vm386_vm3, %v29277_v55  ;;  %23079 = vmatpush3.bf16.msra.mxu1 %v23076_v48  ;;  %v16196_v55 = vld [vmem:[%s30460_s7 + $0xe8] sm:$0xff]  ;;  %v18884_v48 = vld [vmem:[%s30459_s6] ss:$0 sm:$0xff] }
 0x9e3   : > { %23081 = vmatprep.subr.bf16.mxu1 %v23080_v54  ;;  %v23104_v46 = vpack.c.bf16 %v16196_v55, %v16192_v43  ;;  %v23132_v43 = vpack.c.bf16 %v16190_v6, %v16186_v42  ;;  %v16185_v55 = vld [vmem:[%s30460_s7 + $0x90] sm:$0xff]  ;;  %v18917_v6 = vld [vmem:[%s30460_s7 + $0x300] sm:$0xff] }
 0x9e5   : > { %22852 = vmatmul.mubr.msk.f32.gmra.mrb[164].mxu1 %vm386_vm3, %v15916_v0 }
 0x9e6   : > { %23083 = vmatpush3.bf16.msra.mxu1 %v23080_v54  ;;  %22870 = vmatprep.mubr.msk.f32.mxu1 %vm386_vm3, %v29206_v40  ;;  %v16171_v40 = vld [vmem:[%s30460_s7 + $0x20] sm:$0xff] }
 0x9e7   : > { %23085 = vmatprep.subr.bf16.mxu1 %v23084_v22  ;;  %v23094_v50 = vpack.c.bf16 %v16171_v40, %v16167_v58 }
 0x9ea   : > { %23087 = vmatpush3.bf16.msra.mxu1 %v23084_v22 }
 0x9eb   : > { %23089 = vmatprep.subr.bf16.mxu1 %v23088_v13 }
 0x9ee   : > { %23091 = vmatpush3.bf16.msra.mxu1 %v23088_v13 }
 0x9ef   : > { %23093 = vmatprep.subr.bf16.mxu1 %v23092_v28 }
 0x9f1   : > { %22871 = vmatmul.mubr.msk.f32.vlgmr.msra.gmra.mrb[162].mxu1 %vm386_vm3, %v29210_v44  ;;  %v16175_v44 = vld [vmem:[%s30460_s7 + $0x40] sm:$0xff] }
 0x9f2   : > { %22873 = vmatprep.mubr.msk.f32.mxu1 %vm386_vm3, %v29311_v41  ;;  %23095 = vmatpush1.bf16.msra.mxu1 %v23094_v50  ;;  %v23098_v30 = vpack.c.bf16 %v16179_v5, %v16175_v44  ;;  %v23112_v41 = vpack.c.bf16 %v16212_v47, %v16208_v8  ;;  %v16182_v44 = vld [vmem:[%s30460_s7 + $0x78] sm:$0xff]  ;;  %v23126_v5 = vpack.c.bf16 %v16173_v45, %v16169_v23  ;;  %v16201_v47 = vld [vmem:[%s30460_s7 + $0x110] sm:$0xff]  ;;  %v18910_v23 = vld [vmem:[%s30460_s7 + $0x2c8] sm:$0xff] }
 0x9f3   : > { %23097 = vmatprep.subr.bf16.mxu1 %v23096_v35  ;;  %v16178_v35 = vld [vmem:[%s30460_s7 + $0x58] sm:$0xff]  ;;  %v23140_v8 = vpack.c.bf16 %v16206_v27, %v16202_v20  ;;  %v18914_v45 = vld [vmem:[%s30460_s7 + $0x2e8] sm:$0xff]  ;;  %v18933_v27 = vld [vmem:[%s30460_s7 + $0x380] sm:$0xff] }
 0x9f5   : > { %22874 = vmatmul.mubr.msk.f32.gmra.mrb[164].mxu1 %vm386_vm3, %v16030_v62 }
 0x9f6   : > { %16295 = vmatprep.mubr.f32.mxu1 %v30694_v25  ;;  %23099 = vmatpush1.bf16.msra.mxu1 %v23098_v30  ;;  %v23128_v30 = vpack.c.bf16 %v16182_v44, %v16178_v35  ;;  %v23168_v44 = vpack.c.bf16 %v18914_v45, %v18910_v23 }
 0x9f7   : > { %23101 = vmatprep.subr.bf16.mxu1 %v23100_v24 }
 0x9fa   : > { %23103 = vmatpush1.bf16.msra.mxu1 %v23102_v51  ;;  %v23130_v51 = vpack.c.bf16 %v16181_v31, %v16177_v56  ;;  %v18918_v56 = vld [vmem:[%s30460_s7 + $0x308] sm:$0xff] }
 0x9fb   : > { %23105 = vmatprep.subr.bf16.mxu1 %v23104_v46  ;;  %v16189_v46 = vld [vmem:[%s30460_s7 + $0xb0] sm:$0xff]  ;;  %v18922_v31 = vld [vmem:[%s30460_s7 + $0x328] sm:$0xff] }
 0x9fc   : > { %v23172_v42 = vpack.c.bf16 %v18922_v31, %v18918_v56 }
 0x9fe   : > { %23107 = vmatpush1.bf16.msra.mxu1 %v23106_v60  ;;  %v23134_v60 = vpack.c.bf16 %v16189_v46, %v16185_v55  ;;  %v18930_v55 = vld [vmem:[%s30460_s7 + $0x368] sm:$0xff] }
 0x9ff   : > { %23109 = vmatprep.subr.bf16.mxu1 %v23108_v10  ;;  %v16197_v10 = vld [vmem:[%s30460_s7 + $0xf0] sm:$0xff] }
 0xa02   : > { %23111 = vmatpush1.bf16.msra.mxu1 %v23110_v19  ;;  %v23138_v19 = vpack.c.bf16 %v16197_v10, %v16193_v29  ;;  %v18938_v29 = vld [vmem:[%s30460_s7 + $0x3a8] sm:$0xff] }
 0xa03   : > { %23113 = vmatprep.subr.bf16.mxu1 %v23112_v41  ;;  %v16205_v41 = vld [vmem:[%s30460_s7 + $0x130] sm:$0xff] }
 0xa06   : > { %23115 = vmatpush1.bf16.msra.mxu1 %v23114_v17  ;;  %v23142_v17 = vpack.c.bf16 %v16205_v41, %v16201_v47  ;;  %v18946_v47 = vld [vmem:[%s30460_s7 + $0x3e8] sm:$0xff] }
 0xa07   : > { %23117 = vmatprep.subr.bf16.mxu1 %v23116_v52  ;;  %v16213_v52 = vld [vmem:[%s30460_s7 + $0x170] sm:$0xff] }
 0xa0a   : > { %23119 = vmatpush1.bf16.msra.mxu1 %v23118_v3  ;;  %v23146_v3 = vpack.c.bf16 %v16213_v52, %v16209_v36  ;;  %v18892_v36 = vld [vmem:[%s30460_s7 + $0x238] sm:$0xff] }
 0xa0b   : > { %23121 = vmatprep.subr.bf16.mxu1 %v23120_v57  ;;  %v16226_v57 = vld [vmem:[%s30460_s7 + $0x1d8] sm:$0xff] }
 0xa0c   : > { %v23152_v16 = vpack.c.bf16 %v16230_v12, %v16226_v57  ;;  %v18895_v12 = vld [vmem:[%s30460_s7 + $0x250] sm:$0xff] }
 0xa0e   : > { %23123 = vmatpush1.bf16.msra.mxu1 %v23122_v2  ;;  %v16225_v2 = vld [vmem:[%s30460_s7 + $0x1d0] sm:$0xff] }
 0xa0f   : > { %23125 = vmatprep.subr.bf16.mxu1 %v23124_v49  ;;  %v16229_v49 = vld [vmem:[%s30460_s7 + $0x1f0] sm:$0xff] }
 0xac4   : > { %v22872_v4 = vpop.f32.mrb[162].mxu1 }
 0xac5   : > { %v16149_v61 = vadd.f32 %v22872_v4, %v18884_v48  ;;  %v16118_v54 = vpop.f32.mrb[163].mxu1  ;;  %v18890_v4 = vld [vmem:[%s30460_s7 + $0x228] sm:$0xff] }
 0xac6   : > { %v16148_v63 = vadd.f32 %v18884_v48, %v16118_v54 }
 0xac7   : > { %v16153_v9 = vmax.f32 %v16149_v61, 0.0  ;;  %v23154_v61 = vpack.c.bf16 %v16229_v49, %v16225_v2  ;;  %v18904_v2 = vld [vmem:[%s30460_s7 + $0x298] sm:$0xff] }
 0xac8   : > { %v16152_v22 = vmax.f32 %v16148_v63, 0.0  ;;  %v22875_v0 = vpop.f32.mrb[164].mxu1  ;;  %v18885_v63 = vld [vmem:[%s30460_s7 + $0x200] sm:$0xff]  ;;  %v18908_v49 = vld [vmem:[%s30460_s7 + $0x2b8] sm:$0xff] }
 0xac9   : > { %v16151_v7 = vadd.f32 %v22875_v0, %v18884_v48  ;;  %v16128_v18 = vpop.f32.mrb[165].mxu1  ;;  %v18898_v0 = vld [vmem:[%s30460_s7 + $0x268] sm:$0xff] }
 0xaca   : > { %v16156_v13 = vmax.f32 %v16152_v22, %v16153_v9  ;;  %v16150_v15 = vadd.f32 %v18884_v48, %v16128_v18  ;;  %v18886_v48 = vld [vmem:[%s30460_s7 + $0x208] sm:$0xff]  ;;  %v18889_v9 = vld [vmem:[%s30460_s7 + $0x220] sm:$0xff] }
 0xacb   : > { %v16155_v38 = vmax.f32 %v16151_v7, 0.0  ;;  %v23156_v54 = vpack.c.bf16 %v18890_v4, %v18886_v48  ;;  %v18894_v22 = vld [vmem:[%s30460_s7 + $0x248] sm:$0xff]  ;;  %v23158_v7 = vpack.c.bf16 %v18889_v9, %v18885_v63  ;;  %v23196_v4 = vpack.c.bf16 %v18908_v49, %v18904_v2  ;;  %v18912_v63 = vld [vmem:[%s30460_s7 + $0x2d8] sm:$0xff]  ;;  %v18981_v49 = vld [vmem:[%s30460_s7 + $0x500] sm:$0xff] }
 0xacc   : > { %16157 = vst [vmem:[#allocation6] sm:$0xff] %v16156_v13  ;;  %v16154_v28 = vmax.f32 %v16150_v15, 0.0  ;;  %v23160_v18 = vpack.c.bf16 %v18898_v0, %v18894_v22  ;;  %v18893_v13 = vld [vmem:[%s30460_s7 + $0x240] sm:$0xff]  ;;  %v18916_v9 = vld [vmem:[%s30460_s7 + $0x2f8] sm:$0xff] }
 0xacd   : > { %v18897_v15 = vld [vmem:[%s30460_s7 + $0x260] sm:$0xff]  ;;  %v23200_v0 = vpack.c.bf16 %v18916_v9, %v18912_v63 }
 0xace   : > { %v16158_v58 = vmax.f32 %v16154_v28, %v16155_v38  ;;  %v18902_v38 = vld [vmem:[%s30460_s7 + $0x288] sm:$0xff]  ;;  %v18989_v9 = vld [vmem:[%s30460_s7 + $0x540] sm:$0xff] }
 0xacf   : > { %v18906_v28 = vld [vmem:[%s30460_s7 + $0x2a8] sm:$0xff] }
 0xad0   : > { %16159 = vst [vmem:[#allocation6 + $0x8] sm:$0xff] %v16158_v58  ;;  %v23162_v58 = vpack.c.bf16 %v18897_v15, %v18893_v13  ;;  %v18920_v13 = vld [vmem:[%s30460_s7 + $0x318] sm:$0xff] }
 0xad1   : > { %v18924_v15 = vld [vmem:[%s30460_s7 + $0x338] sm:$0xff] }
 0xad7   : > { %v16160_v40 = vld [vmem:[#allocation6] ss:$2 sm:$0xff]  ;;  %v16162_v50 = vld [vmem:[#allocation6 + $0x1] ss:$2 sm:$0xff] }
 0xad8   : > { %v16163_v62 = vmax.f32 %v16160_v40, %v16162_v50  ;;  %v23164_v40 = vpack.c.bf16 %v18906_v28, %v18902_v38  ;;  %v18901_v50 = vld [vmem:[%s30460_s7 + $0x280] sm:$0xff]  ;;  %v23204_v28 = vpack.c.bf16 %v18924_v15, %v18920_v13 }
 0xad9   : > { %v18997_v15 = vld [vmem:[%s30460_s7 + $0x580] sm:$0xff] }
 0xada   : > { %16164 = vst [vmem:[#allocation7] sm:$0xff] %v16163_v62  ;;  %v18905_v62 = vld [vmem:[%s30460_s7 + $0x2a0] sm:$0xff] }
 0xadb   : > { %v23166_v35 = vpack.c.bf16 %v18905_v62, %v18901_v50  ;;  %v18928_v50 = vld [vmem:[%s30460_s7 + $0x358] sm:$0xff] }
 0xadc   : > { %v18932_v62 = vld [vmem:[%s30460_s7 + $0x378] sm:$0xff] }
 0xadd   : > { %v23208_v45 = vpack.c.bf16 %v18932_v62, %v18928_v50  ;;  %v19005_v62 = vld [vmem:[%s30460_s7 + $0x5c0] sm:$0xff] }
 0xae1   : > { %v29514_v24 = vld [vmem:[#allocation7] sm:$0x1] }
 0xae2   : > { %16296 = vmatmul.mubr.f32.vlgmr.msra.gmra.mrb[166].mxu1 %v29514_v24 }
 0xae3   : > { %23127 = vmatpush1.bf16.msra.mxu1 %v23126_v5  ;;  %16366 = vmatprep.mubr.f32.mxu1 %v30694_v25  ;;  %v18909_v5 = vld [vmem:[%s30460_s7 + $0x2c0] sm:$0xff] }
 0xae4   : > { %23129 = vmatprep.subr.bf16.mxu1 %v23128_v30  ;;  %v18913_v30 = vld [vmem:[%s30460_s7 + $0x2e0] sm:$0xff] }
 0xae7   : > { %23131 = vmatpush1.bf16.msra.mxu1 %v23130_v51  ;;  %v18921_v51 = vld [vmem:[%s30460_s7 + $0x320] sm:$0xff] }
 0xae8   : > { %23133 = vmatprep.subr.bf16.mxu1 %v23132_v43  ;;  %v18926_v43 = vld [vmem:[%s30460_s7 + $0x348] sm:$0xff]  ;;  %v23174_v46 = vpack.c.bf16 %v18921_v51, %v18917_v6  ;;  %v18944_v6 = vld [vmem:[%s30460_s7 + $0x3d8] sm:$0xff] }
 0xae9   : > { %v23176_v21 = vpack.c.bf16 %v18930_v55, %v18926_v43  ;;  %v18948_v51 = vld [vmem:[%s30460_s7 + $0x3f8] sm:$0xff] }
 0xaea   : > { %v23216_v55 = vpack.c.bf16 %v18948_v51, %v18944_v6  ;;  %v18959_v51 = vld [vmem:[%s30460_s7 + $0x450] sm:$0xff] }
 0xaeb   : > { %23135 = vmatpush1.bf16.msra.mxu1 %v23134_v60  ;;  %v18929_v60 = vld [vmem:[%s30460_s7 + $0x360] sm:$0xff] }
 0xaec   : > { %23137 = vmatprep.subr.bf16.mxu1 %v23136_v11  ;;  %v18934_v11 = vld [vmem:[%s30460_s7 + $0x388] sm:$0xff]  ;;  %v23178_v10 = vpack.c.bf16 %v18929_v60, %v18925_v39 }
 0xaed   : > { %v23180_v20 = vpack.c.bf16 %v18938_v29, %v18934_v11  ;;  %v18950_v39 = vld [vmem:[%s30460_s7 + $0x408] sm:$0xff] }
 0xaee   : > { %v18954_v60 = vld [vmem:[%s30460_s7 + $0x428] sm:$0xff] }
 0xaef   : > { %23139 = vmatpush1.bf16.msra.mxu1 %v23138_v19  ;;  %v18937_v19 = vld [vmem:[%s30460_s7 + $0x3a0] sm:$0xff]  ;;  %v23220_v29 = vpack.c.bf16 %v18954_v60, %v18950_v39 }
 0xaf0   : > { %23141 = vmatprep.subr.bf16.mxu1 %v23140_v8  ;;  %v18942_v8 = vld [vmem:[%s30460_s7 + $0x3c8] sm:$0xff]  ;;  %v23182_v41 = vpack.c.bf16 %v18937_v19, %v18933_v27 }
 0xaf1   : > { %v23184_v1 = vpack.c.bf16 %v18946_v47, %v18942_v8  ;;  %v18958_v27 = vld [vmem:[%s30460_s7 + $0x448] sm:$0xff] }
 0xaf2   : > { %v18962_v19 = vld [vmem:[%s30460_s7 + $0x468] sm:$0xff] }
 0xaf3   : > { %23143 = vmatpush1.bf16.msra.mxu1 %v23142_v17  ;;  %v18945_v17 = vld [vmem:[%s30460_s7 + $0x3e0] sm:$0xff]  ;;  %v23224_v47 = vpack.c.bf16 %v18962_v19, %v18958_v27 }
 0xaf4   : > { %23145 = vmatprep.subr.bf16.mxu1 %v23144_v53  ;;  %v18888_v53 = vld [vmem:[%s30460_s7 + $0x218] sm:$0xff]  ;;  %v23186_v52 = vpack.c.bf16 %v18945_v17, %v18941_v32  ;;  %v18966_v32 = vld [vmem:[%s30460_s7 + $0x488] sm:$0xff] }
 0xaf5   : > { %v23188_v37 = vpack.c.bf16 %v18892_v36, %v18888_v53  ;;  %v18970_v17 = vld [vmem:[%s30460_s7 + $0x4a8] sm:$0xff] }
 0xaf6   : > { %v23228_v36 = vpack.c.bf16 %v18970_v17, %v18966_v32 }
 0xaf7   : > { %23147 = vmatpush1.bf16.msra.mxu1 %v23146_v3  ;;  %v18891_v3 = vld [vmem:[%s30460_s7 + $0x230] sm:$0xff] }
 0xaf8   : > { %23149 = vmatprep.subr.bf16.mxu1 %v23148_v26  ;;  %v18896_v26 = vld [vmem:[%s30460_s7 + $0x258] sm:$0xff]  ;;  %v23190_v33 = vpack.c.bf16 %v18891_v3, %v18887_v34  ;;  %v18974_v34 = vld [vmem:[%s30460_s7 + $0x4c8] sm:$0xff] }
 0xaf9   : > { %v23192_v57 = vpack.c.bf16 %v18900_v14, %v18896_v26  ;;  %v18978_v3 = vld [vmem:[%s30460_s7 + $0x4e8] sm:$0xff] }
 0xafa   : > { %v23232_v14 = vpack.c.bf16 %v18978_v3, %v18974_v34 }
 0xafb   : > { %23151 = vmatpush1.bf16.msra.mxu1 %v23150_v59  ;;  %v18899_v59 = vld [vmem:[%s30460_s7 + $0x270] sm:$0xff] }
 0xafc   : > { %23153 = vmatprep.subr.bf16.mxu1 %v23152_v16  ;;  %v29712_v16 = vld [vmem:[#allocation7 + $0x1] sm:$0x1]  ;;  %v23194_v48 = vpack.c.bf16 %v18899_v59, %v18895_v12  ;;  %v18982_v12 = vld [vmem:[%s30460_s7 + $0x508] sm:$0xff] }
 0xafd   : > { %v18986_v59 = vld [vmem:[%s30460_s7 + $0x528] sm:$0xff] }
 0xafe   : > { %v23236_v2 = vpack.c.bf16 %v18986_v59, %v18982_v12 }
 0xaff   : > { %23155 = vmatpush1.bf16.msra.mxu1 %v23154_v61  ;;  %v18903_v61 = vld [vmem:[%s30460_s7 + $0x290] sm:$0xff] }
 0xb00   : > { %23157 = vmatprep.subr.bf16.mxu1 %v23156_v54  ;;  %v18907_v54 = vld [vmem:[%s30460_s7 + $0x2b0] sm:$0xff] }
 0xb01   : > { %v23198_v22 = vpack.c.bf16 %v18907_v54, %v18903_v61  ;;  %v18994_v61 = vld [vmem:[%s30460_s7 + $0x568] sm:$0xff] }
 0xb02   : > { %16367 = vmatmul.mubr.f32.vlgmr.msra.gmra.mrb[168].mxu1 %v29514_v24  ;;  %v23170_v24 = vpack.c.bf16 %v18913_v30, %v18909_v5  ;;  %v18936_v5 = vld [vmem:[%s30460_s7 + $0x398] sm:$0xff] }
 0xb03   : > { %23159 = vmatpush1.bf16.msra.mxu1 %v23158_v7  ;;  %16533 = vmatprep.mubr.f32.mxu1 %v30694_v25  ;;  %v18911_v7 = vld [vmem:[%s30460_s7 + $0x2d0] sm:$0xff]  ;;  %v18940_v30 = vld [vmem:[%s30460_s7 + $0x3b8] sm:$0xff] }
 0xb04   : > { %23161 = vmatprep.subr.bf16.mxu1 %v23160_v18  ;;  %v18915_v18 = vld [vmem:[%s30460_s7 + $0x2f0] sm:$0xff]  ;;  %v23212_v31 = vpack.c.bf16 %v18940_v30, %v18936_v5 }
 0xb05   : > { %v23202_v38 = vpack.c.bf16 %v18915_v18, %v18911_v7  ;;  %v19002_v7 = vld [vmem:[%s30460_s7 + $0x5a8] sm:$0xff]  ;;  %v18951_v30 = vld [vmem:[%s30460_s7 + $0x410] sm:$0xff] }
 0xb07   : > { %23163 = vmatpush1.bf16.msra.mxu1 %v23162_v58  ;;  %v18919_v58 = vld [vmem:[%s30460_s7 + $0x310] sm:$0xff] }
 0xb08   : > { %23165 = vmatprep.subr.bf16.mxu1 %v23164_v40  ;;  %v18923_v40 = vld [vmem:[%s30460_s7 + $0x330] sm:$0xff] }
 0xb09   : > { %v23206_v23 = vpack.c.bf16 %v18923_v40, %v18919_v58  ;;  %v19010_v58 = vld [vmem:[%s30460_s7 + $0x5e8] sm:$0xff] }
 0xb0b   : > { %23167 = vmatpush1.bf16.msra.mxu1 %v23166_v35  ;;  %v18927_v35 = vld [vmem:[%s30460_s7 + $0x350] sm:$0xff] }
 0xb0c   : > { %23169 = vmatprep.subr.bf16.mxu1 %v23168_v44  ;;  %v18931_v44 = vld [vmem:[%s30460_s7 + $0x370] sm:$0xff] }
 0xb0d   : > { %v23210_v56 = vpack.c.bf16 %v18931_v44, %v18927_v35  ;;  %v18956_v35 = vld [vmem:[%s30460_s7 + $0x438] sm:$0xff] }
 0xb0f   : > { %23171 = vmatpush1.bf16.msra.mxu1 %v23170_v24  ;;  %v18935_v24 = vld [vmem:[%s30460_s7 + $0x390] sm:$0xff] }
 0xb10   : > { %23173 = vmatprep.subr.bf16.mxu1 %v23172_v42  ;;  %v18939_v42 = vld [vmem:[%s30460_s7 + $0x3b0] sm:$0xff] }
 0xb11   : > { %v23214_v43 = vpack.c.bf16 %v18939_v42, %v18935_v24  ;;  %v18964_v24 = vld [vmem:[%s30460_s7 + $0x478] sm:$0xff] }
 0xb13   : > { %23175 = vmatpush1.bf16.msra.mxu1 %v23174_v46  ;;  %v18943_v46 = vld [vmem:[%s30460_s7 + $0x3d0] sm:$0xff] }
 0xb14   : > { %23177 = vmatprep.subr.bf16.mxu1 %v23176_v21  ;;  %v18947_v21 = vld [vmem:[%s30460_s7 + $0x3f0] sm:$0xff] }
 0xb15   : > { %v23218_v11 = vpack.c.bf16 %v18947_v21, %v18943_v46  ;;  %v18968_v46 = vld [vmem:[%s30460_s7 + $0x498] sm:$0xff] }
 0xb16   : > { %v18972_v21 = vld [vmem:[%s30460_s7 + $0x4b8] sm:$0xff] }
 0xb17   : > { %23179 = vmatpush1.bf16.msra.mxu1 %v23178_v10  ;;  %v18949_v10 = vld [vmem:[%s30460_s7 + $0x400] sm:$0xff]  ;;  %v23260_v60 = vpack.c.bf16 %v18972_v21, %v18968_v46 }
 0xb18   : > { %23181 = vmatprep.subr.bf16.mxu1 %v23180_v20  ;;  %v18953_v20 = vld [vmem:[%s30460_s7 + $0x420] sm:$0xff] }
 0xb19   : > { %v23222_v8 = vpack.c.bf16 %v18953_v20, %v18949_v10  ;;  %v18976_v10 = vld [vmem:[%s30460_s7 + $0x4d8] sm:$0xff]  ;;  %v19045_v21 = vld [vmem:[%s30460_s7 + $0x700] sm:$0xff] }
 0xb1a   : > { %v18980_v20 = vld [vmem:[%s30460_s7 + $0x4f8] sm:$0xff] }
 0xb1b   : > { %23183 = vmatpush1.bf16.msra.mxu1 %v23182_v41  ;;  %v18957_v41 = vld [vmem:[%s30460_s7 + $0x440] sm:$0xff]  ;;  %v23264_v19 = vpack.c.bf16 %v18980_v20, %v18976_v10 }
 0xb1c   : > { %23185 = vmatprep.subr.bf16.mxu1 %v23184_v1  ;;  %v18961_v1 = vld [vmem:[%s30460_s7 + $0x460] sm:$0xff] }
 0xb1d   : > { %v23226_v53 = vpack.c.bf16 %v18961_v1, %v18957_v41  ;;  %v18984_v41 = vld [vmem:[%s30460_s7 + $0x518] sm:$0xff]  ;;  %v19053_v20 = vld [vmem:[%s30460_s7 + $0x740] sm:$0xff] }
 0xb1e   : > { %v18988_v1 = vld [vmem:[%s30460_s7 + $0x538] sm:$0xff] }
 0xb1f   : > { %23187 = vmatpush1.bf16.msra.mxu1 %v23186_v52  ;;  %v18965_v52 = vld [vmem:[%s30460_s7 + $0x480] sm:$0xff]  ;;  %v23268_v17 = vpack.c.bf16 %v18988_v1, %v18984_v41 }
 0xb20   : > { %23189 = vmatprep.subr.bf16.mxu1 %v23188_v37  ;;  %v18969_v37 = vld [vmem:[%s30460_s7 + $0x4a0] sm:$0xff] }
 0xb21   : > { %v23230_v26 = vpack.c.bf16 %v18969_v37, %v18965_v52  ;;  %v18992_v52 = vld [vmem:[%s30460_s7 + $0x558] sm:$0xff]  ;;  %v19061_v1 = vld [vmem:[%s30460_s7 + $0x780] sm:$0xff] }
 0xb22   : > { %16534 = vmatmul.mubr.f32.vlgmr.msra.gmra.mrb[170].mxu1 %v29712_v16  ;;  %v18996_v37 = vld [vmem:[%s30460_s7 + $0x578] sm:$0xff] }
 0xb23   : > { %23191 = vmatpush1.bf16.msra.mxu1 %v23190_v33  ;;  %16604 = vmatprep.mubr.f32.mxu1 %v30694_v25  ;;  %v18973_v33 = vld [vmem:[%s30460_s7 + $0x4c0] sm:$0xff]  ;;  %v23272_v3 = vpack.c.bf16 %v18996_v37, %v18992_v52 }
 0xb24   : > { %23193 = vmatprep.subr.bf16.mxu1 %v23192_v57  ;;  %v18977_v57 = vld [vmem:[%s30460_s7 + $0x4e0] sm:$0xff] }
 0xb25   : > { %v19069_v37 = vld [vmem:[%s30460_s7 + $0x7c0] sm:$0xff] }
 0xb27   : > { %23195 = vmatpush1.bf16.msra.mxu1 %v23194_v48  ;;  %v18985_v48 = vld [vmem:[%s30460_s7 + $0x520] sm:$0xff] }
 0xb28   : > { %23197 = vmatprep.subr.bf16.mxu1 %v23196_v4  ;;  %v18990_v4 = vld [vmem:[%s30460_s7 + $0x548] sm:$0xff]  ;;  %v23238_v54 = vpack.c.bf16 %v18985_v48, %v18981_v49  ;;  %v19008_v49 = vld [vmem:[%s30460_s7 + $0x5d8] sm:$0xff] }
 0xb29   : > { %v23240_v63 = vpack.c.bf16 %v18994_v61, %v18990_v4  ;;  %v19012_v48 = vld [vmem:[%s30460_s7 + $0x5f8] sm:$0xff] }
 0xb2a   : > { %v23280_v61 = vpack.c.bf16 %v19012_v48, %v19008_v49  ;;  %v19023_v48 = vld [vmem:[%s30460_s7 + $0x650] sm:$0xff] }
 0xb2b   : > { %23199 = vmatpush1.bf16.msra.mxu1 %v23198_v22  ;;  %v18993_v22 = vld [vmem:[%s30460_s7 + $0x560] sm:$0xff] }
 0xb2c   : > { %23201 = vmatprep.subr.bf16.mxu1 %v23200_v0  ;;  %v18998_v0 = vld [vmem:[%s30460_s7 + $0x588] sm:$0xff]  ;;  %v23242_v18 = vpack.c.bf16 %v18993_v22, %v18989_v9 }
 0xb2d   : > { %v23244_v13 = vpack.c.bf16 %v19002_v7, %v18998_v0  ;;  %v19014_v9 = vld [vmem:[%s30460_s7 + $0x608] sm:$0xff] }
 0xb2e   : > { %v19018_v22 = vld [vmem:[%s30460_s7 + $0x628] sm:$0xff] }
 0xb2f   : > { %23203 = vmatpush1.bf16.msra.mxu1 %v23202_v38  ;;  %v19001_v38 = vld [vmem:[%s30460_s7 + $0x5a0] sm:$0xff]  ;;  %v23284_v7 = vpack.c.bf16 %v19018_v22, %v19014_v9 }
 0xb30   : > { %23205 = vmatprep.subr.bf16.mxu1 %v23204_v28  ;;  %v19006_v28 = vld [vmem:[%s30460_s7 + $0x5c8] sm:$0xff]  ;;  %v23246_v40 = vpack.c.bf16 %v19001_v38, %v18997_v15 }
 0xb31   : > { %v23248_v50 = vpack.c.bf16 %v19010_v58, %v19006_v28  ;;  %v19022_v15 = vld [vmem:[%s30460_s7 + $0x648] sm:$0xff] }
 0xb32   : > { %v19026_v38 = vld [vmem:[%s30460_s7 + $0x668] sm:$0xff] }
 0xb33   : > { %23207 = vmatpush1.bf16.msra.mxu1 %v23206_v23  ;;  %v19009_v23 = vld [vmem:[%s30460_s7 + $0x5e0] sm:$0xff]  ;;  %v23288_v58 = vpack.c.bf16 %v19026_v38, %v19022_v15  ;;  %v19039_v38 = vld [vmem:[%s30460_s7 + $0x6d0] sm:$0xff] }
 0xb34   : > { %23209 = vmatprep.subr.bf16.mxu1 %v23208_v45  ;;  %v18952_v45 = vld [vmem:[%s30460_s7 + $0x418] sm:$0xff]  ;;  %v23250_v44 = vpack.c.bf16 %v19009_v23, %v19005_v62  ;;  %v19030_v62 = vld [vmem:[%s30460_s7 + $0x688] sm:$0xff] }
 0xb35   : > { %v23252_v5 = vpack.c.bf16 %v18956_v35, %v18952_v45  ;;  %v19034_v23 = vld [vmem:[%s30460_s7 + $0x6a8] sm:$0xff] }
 0xb36   : > { %v23292_v35 = vpack.c.bf16 %v19034_v23, %v19030_v62  ;;  %v19047_v23 = vld [vmem:[%s30460_s7 + $0x710] sm:$0xff] }
 0xb37   : > { %23211 = vmatpush1.bf16.msra.mxu1 %v23210_v56  ;;  %v18955_v56 = vld [vmem:[%s30460_s7 + $0x430] sm:$0xff] }
 0xb38   : > { %23213 = vmatprep.subr.bf16.mxu1 %v23212_v31  ;;  %v18960_v31 = vld [vmem:[%s30460_s7 + $0x458] sm:$0xff]  ;;  %v23254_v42 = vpack.c.bf16 %v18955_v56, %v18951_v30  ;;  %v19038_v30 = vld [vmem:[%s30460_s7 + $0x6c8] sm:$0xff] }
 0xb39   : > { %v23256_v6 = vpack.c.bf16 %v18964_v24, %v18960_v31  ;;  %v19042_v56 = vld [vmem:[%s30460_s7 + $0x6e8] sm:$0xff] }
 0xb3a   : > { %v23296_v24 = vpack.c.bf16 %v19042_v56, %v19038_v30  ;;  %v19055_v56 = vld [vmem:[%s30460_s7 + $0x750] sm:$0xff] }
 0xb3b   : > { %23215 = vmatpush1.bf16.msra.mxu1 %v23214_v43  ;;  %v18963_v43 = vld [vmem:[%s30460_s7 + $0x470] sm:$0xff] }
 0xb3c   : > { %23217 = vmatprep.subr.bf16.mxu1 %v23216_v55  ;;  %v29910_v55 = vld [vmem:[#allocation7 + $0x4] sm:$0x1]  ;;  %v23258_v39 = vpack.c.bf16 %v18963_v43, %v18959_v51  ;;  %v19046_v51 = vld [vmem:[%s30460_s7 + $0x708] sm:$0xff] }
 0xb3d   : > { %v19050_v43 = vld [vmem:[%s30460_s7 + $0x728] sm:$0xff] }
 0xb3e   : > { %v23300_v46 = vpack.c.bf16 %v19050_v43, %v19046_v51  ;;  %v19063_v43 = vld [vmem:[%s30460_s7 + $0x790] sm:$0xff] }
 0xb3f   : > { %23219 = vmatpush1.bf16.msra.mxu1 %v23218_v11  ;;  %v18967_v11 = vld [vmem:[%s30460_s7 + $0x490] sm:$0xff] }
 0xb40   : > { %23221 = vmatprep.subr.bf16.mxu1 %v23220_v29  ;;  %v18971_v29 = vld [vmem:[%s30460_s7 + $0x4b0] sm:$0xff] }
 0xb41   : > { %v23262_v27 = vpack.c.bf16 %v18971_v29, %v18967_v11  ;;  %v19058_v11 = vld [vmem:[%s30460_s7 + $0x768] sm:$0xff] }
 0xb42   : > { %16605 = vmatmul.mubr.f32.vlgmr.msra.gmra.mrb[172].mxu1 %v29712_v16  ;;  %v23234_v16 = vpack.c.bf16 %v18977_v57, %v18973_v33  ;;  %v19000_v33 = vld [vmem:[%s30460_s7 + $0x598] sm:$0xff] }
 0xb43   : > { %23223 = vmatpush1.bf16.msra.mxu1 %v23222_v8  ;;  %16771 = vmatprep.mubr.f32.mxu1 %v30694_v25  ;;  %v18975_v8 = vld [vmem:[%s30460_s7 + $0x4d0] sm:$0xff]  ;;  %v19004_v57 = vld [vmem:[%s30460_s7 + $0x5b8] sm:$0xff] }
 0xb44   : > { %23225 = vmatprep.subr.bf16.mxu1 %v23224_v47  ;;  %v18979_v47 = vld [vmem:[%s30460_s7 + $0x4f0] sm:$0xff]  ;;  %v23276_v59 = vpack.c.bf16 %v19004_v57, %v19000_v33 }
 0xb45   : > { %v23266_v32 = vpack.c.bf16 %v18979_v47, %v18975_v8  ;;  %v19066_v8 = vld [vmem:[%s30460_s7 + $0x7a8] sm:$0xff]  ;;  %v19015_v57 = vld [vmem:[%s30460_s7 + $0x610] sm:$0xff] }
 0xb47   : > { %23227 = vmatpush1.bf16.msra.mxu1 %v23226_v53  ;;  %v18983_v53 = vld [vmem:[%s30460_s7 + $0x510] sm:$0xff] }
 0xb48   : > { %23229 = vmatprep.subr.bf16.mxu1 %v23228_v36  ;;  %v18987_v36 = vld [vmem:[%s30460_s7 + $0x530] sm:$0xff] }
 0xb49   : > { %v23270_v34 = vpack.c.bf16 %v18987_v36, %v18983_v53  ;;  %v19074_v53 = vld [vmem:[%s30460_s7 + $0x7e8] sm:$0xff] }
 0xb4b   : > { %23231 = vmatpush1.bf16.msra.mxu1 %v23230_v26  ;;  %v18991_v26 = vld [vmem:[%s30460_s7 + $0x550] sm:$0xff] }
 0xb4c   : > { %23233 = vmatprep.subr.bf16.mxu1 %v23232_v14  ;;  %v18995_v14 = vld [vmem:[%s30460_s7 + $0x570] sm:$0xff] }
 0xb4d   : > { %v23274_v12 = vpack.c.bf16 %v18995_v14, %v18991_v26  ;;  %v19020_v26 = vld [vmem:[%s30460_s7 + $0x638] sm:$0xff] }
 0xb4f   : > { %23235 = vmatpush1.bf16.msra.mxu1 %v23234_v16  ;;  %v18999_v16 = vld [vmem:[%s30460_s7 + $0x590] sm:$0xff] }
 0xb50   : > { %23237 = vmatprep.subr.bf16.mxu1 %v23236_v2  ;;  %v19003_v2 = vld [vmem:[%s30460_s7 + $0x5b0] sm:$0xff] }
 0xb51   : > { %v23278_v4 = vpack.c.bf16 %v19003_v2, %v18999_v16  ;;  %v19028_v16 = vld [vmem:[%s30460_s7 + $0x678] sm:$0xff] }
 0xb53   : > { %23239 = vmatpush1.bf16.msra.mxu1 %v23238_v54  ;;  %v19007_v54 = vld [vmem:[%s30460_s7 + $0x5d0] sm:$0xff] }
 0xb54   : > { %23241 = vmatprep.subr.bf16.mxu1 %v23240_v63  ;;  %v19011_v63 = vld [vmem:[%s30460_s7 + $0x5f0] sm:$0xff] }
 0xb55   : > { %v23282_v0 = vpack.c.bf16 %v19011_v63, %v19007_v54  ;;  %v19032_v54 = vld [vmem:[%s30460_s7 + $0x698] sm:$0xff] }
 0xb56   : > { %v19036_v63 = vld [vmem:[%s30460_s7 + $0x6b8] sm:$0xff] }
 0xb57   : > { %23243 = vmatpush1.bf16.msra.mxu1 %v23242_v18  ;;  %v19013_v18 = vld [vmem:[%s30460_s7 + $0x600] sm:$0xff]  ;;  %v23324_v22 = vpack.c.bf16 %v19036_v63, %v19032_v54  ;;  %v17120_v54 = vld [vmem:[%s30462_s9 + $0x10] sm:$0xff]  ;;  %v17121_v63 = vld [vmem:[%s30462_s9 + $0x18] sm:$0xff] }
 0xb58   : > { %23245 = vmatprep.subr.bf16.mxu1 %v23244_v13  ;;  %v19017_v13 = vld [vmem:[%s30460_s7 + $0x620] sm:$0xff] }
 0xb59   : > { %v23286_v28 = vpack.c.bf16 %v19017_v13, %v19013_v18  ;;  %v19040_v18 = vld [vmem:[%s30460_s7 + $0x6d8] sm:$0xff] }
 0xb5a   : > { %v19044_v13 = vld [vmem:[%s30460_s7 + $0x6f8] sm:$0xff] }
 0xb5b   : > { %23247 = vmatpush1.bf16.msra.mxu1 %v23246_v40  ;;  %v19021_v40 = vld [vmem:[%s30460_s7 + $0x640] sm:$0xff]  ;;  %v23328_v15 = vpack.c.bf16 %v19044_v13, %v19040_v18  ;;  %v17123_v13 = vld [vmem:[%s30462_s9 + $0x28] sm:$0xff] }
 0xb5c   : > { %23249 = vmatprep.subr.bf16.mxu1 %v23248_v50  ;;  %v19025_v50 = vld [vmem:[%s30460_s7 + $0x660] sm:$0xff] }
 0xb5d   : > { %v23290_v45 = vpack.c.bf16 %v19025_v50, %v19021_v40  ;;  %v19052_v40 = vld [vmem:[%s30460_s7 + $0x738] sm:$0xff]  ;;  %v17122_v18 = vld [vmem:[%s30462_s9 + $0x20] sm:$0xff] }
 0xb5f   : > { %23251 = vmatpush1.bf16.msra.mxu1 %v23250_v44  ;;  %v19029_v44 = vld [vmem:[%s30460_s7 + $0x680] sm:$0xff] }
 0xb60   : > { %23253 = vmatprep.subr.bf16.mxu1 %v23252_v5  ;;  %v19033_v5 = vld [vmem:[%s30460_s7 + $0x6a0] sm:$0xff] }
 0xb61   : > { %v23294_v31 = vpack.c.bf16 %v19033_v5, %v19029_v44  ;;  %v19060_v44 = vld [vmem:[%s30460_s7 + $0x778] sm:$0xff] }
 0xb62   : > { %16772 = vmatmul.mubr.f32.vlgmr.msra.gmra.mrb[174].mxu1 %v29910_v55 }
 0xb63   : > { %23255 = vmatpush1.bf16.msra.mxu1 %v23254_v42  ;;  %16842 = vmatprep.mubr.f32.mxu1 %v30694_v25  ;;  %v19037_v42 = vld [vmem:[%s30460_s7 + $0x6c0] sm:$0xff] }
 0xb64   : > { %23257 = vmatprep.subr.bf16.mxu1 %v23256_v6  ;;  %v19041_v6 = vld [vmem:[%s30460_s7 + $0x6e0] sm:$0xff] }
 0xb67   : > { %23259 = vmatpush1.bf16.msra.mxu1 %v23258_v39  ;;  %v19049_v39 = vld [vmem:[%s30460_s7 + $0x720] sm:$0xff] }
 0xb68   : > { %23261 = vmatprep.subr.bf16.mxu1 %v23260_v60  ;;  %v19054_v60 = vld [vmem:[%s30460_s7 + $0x748] sm:$0xff]  ;;  %v23302_v29 = vpack.c.bf16 %v19049_v39, %v19045_v21  ;;  %v19072_v21 = vld [vmem:[%s30460_s7 + $0x7d8] sm:$0xff] }
 0xb69   : > { %v23304_v10 = vpack.c.bf16 %v19058_v11, %v19054_v60  ;;  %v19076_v39 = vld [vmem:[%s30460_s7 + $0x7f8] sm:$0xff] }
 0xb6b   : > { %23263 = vmatpush1.bf16.msra.mxu1 %v23262_v27  ;;  %v19057_v27 = vld [vmem:[%s30460_s7 + $0x760] sm:$0xff] }
 0xb6c   : > { %23265 = vmatprep.subr.bf16.mxu1 %v23264_v19  ;;  %v19062_v19 = vld [vmem:[%s30460_s7 + $0x788] sm:$0xff]  ;;  %v23306_v47 = vpack.c.bf16 %v19057_v27, %v19053_v20  ;;  %v19071_v20 = vld [vmem:[%s30460_s7 + $0x7d0] sm:$0xff] }
 0xb6d   : > { %v23308_v41 = vpack.c.bf16 %v19066_v8, %v19062_v19  ;;  %v19075_v27 = vld [vmem:[%s30460_s7 + $0x7f0] sm:$0xff]  ;;  %v24721_v8 = vmov 1966171168  }
 0xb6e   : > { %v23346_v19 = vpack.c.bf16 %v19075_v27, %v19071_v20  ;;  %v17130_v27 = vld [vmem:[%s30462_s9 + $0x60] sm:$0xff] }
 0xb6f   : > { %23267 = vmatpush1.bf16.msra.mxu1 %v23266_v32  ;;  %v19065_v32 = vld [vmem:[%s30460_s7 + $0x7a0] sm:$0xff] }
 0xb70   : > { %23269 = vmatprep.subr.bf16.mxu1 %v23268_v17  ;;  %v19070_v17 = vld [vmem:[%s30460_s7 + $0x7c8] sm:$0xff]  ;;  %v23310_v36 = vpack.c.bf16 %v19065_v32, %v19061_v1 }
 0xb71   : > { %v23312_v52 = vpack.c.bf16 %v19074_v53, %v19070_v17 }
 0xb73   : > { %23271 = vmatpush1.bf16.msra.mxu1 %v23270_v34  ;;  %v19073_v34 = vld [vmem:[%s30460_s7 + $0x7e0] sm:$0xff] }
 0xb74   : > { %23273 = vmatprep.subr.bf16.mxu1 %v23272_v3  ;;  %v19016_v3 = vld [vmem:[%s30460_s7 + $0x618] sm:$0xff]  ;;  %v23314_v14 = vpack.c.bf16 %v19073_v34, %v19069_v37 }
 0xb75   : > { %v23316_v33 = vpack.c.bf16 %v19020_v26, %v19016_v3 }
 0xb77   : > { %23275 = vmatpush1.bf16.msra.mxu1 %v23274_v12  ;;  %v19019_v12 = vld [vmem:[%s30460_s7 + $0x630] sm:$0xff] }
 0xb78   : > { %23277 = vmatprep.subr.bf16.mxu1 %v23276_v59  ;;  %v19024_v59 = vld [vmem:[%s30460_s7 + $0x658] sm:$0xff]  ;;  %v23318_v2 = vpack.c.bf16 %v19019_v12, %v19015_v57  ;;  %v17134_v57 = vld [vmem:[%s30462_s9 + $0x80] sm:$0xff]  ;;  %v17135_v12 = vld [vmem:[%s30462_s9 + $0x88] sm:$0xff] }
 0xb79   : > { %v23320_v49 = vpack.c.bf16 %v19028_v16, %v19024_v59  ;;  %v17118_v59 = vld [vmem:[%s30462_s9] sm:$0xff]  ;;  %v23348_v16 = vpack.c.bf16 %v17135_v12, %v17134_v57 }
 0xb7b   : > { %23279 = vmatpush1.bf16.msra.mxu1 %v23278_v4  ;;  %v19027_v4 = vld [vmem:[%s30460_s7 + $0x670] sm:$0xff] }
 0xb7c   : > { %23281 = vmatprep.subr.bf16.mxu1 %v23280_v61  ;;  %v16879_v61 = vld [vmem:[#allocation7 + $0x5] sm:$0x1]  ;;  %v23322_v9 = vpack.c.bf16 %v19027_v4, %v19023_v48  ;;  %v17137_v48 = vld [vmem:[%s30462_s9 + $0x98] sm:$0xff] }
 0xb7f   : > { %23283 = vmatpush1.bf16.msra.mxu1 %v23282_v0  ;;  %v19031_v0 = vld [vmem:[%s30460_s7 + $0x690] sm:$0xff] }
 0xb80   : > { %23285 = vmatprep.subr.bf16.mxu1 %v23284_v7  ;;  %v19035_v7 = vld [vmem:[%s30460_s7 + $0x6b0] sm:$0xff] }
 0xb82   : > { %16843 = vmatmul.mubr.f32.vlgmr.msra.gmra.mrb[176].mxu1 %v29910_v55  ;;  %v23298_v55 = vpack.c.bf16 %v19041_v6, %v19037_v42  ;;  %v19068_v42 = vld [vmem:[%s30460_s7 + $0x7b8] sm:$0xff] }
 0xb83   : > { %23287 = vmatpush1.bf16.msra.mxu1 %v23286_v28  ;;  %17009 = vmatprep.mubr.f32.mxu1 %v30694_v25  ;;  %v19043_v28 = vld [vmem:[%s30460_s7 + $0x6f0] sm:$0xff] }
 0xb84   : > { %23289 = vmatprep.subr.bf16.mxu1 %v23288_v58  ;;  %v19048_v58 = vld [vmem:[%s30460_s7 + $0x718] sm:$0xff]  ;;  %v23330_v50 = vpack.c.bf16 %v19043_v28, %v19039_v38  ;;  %v23358_v38 = vpack.c.bf16 %v17123_v13, %v17122_v18 }
 0xb85   : > { %v23332_v62 = vpack.c.bf16 %v19052_v40, %v19048_v58  ;;  %v17124_v58 = vld [vmem:[%s30462_s9 + $0x30] sm:$0xff]  ;;  %v17125_v40 = vld [vmem:[%s30462_s9 + $0x38] sm:$0xff] }
 0xb87   : > { %23291 = vmatpush1.bf16.msra.mxu1 %v23290_v45  ;;  %v19051_v45 = vld [vmem:[%s30460_s7 + $0x730] sm:$0xff] }
 0xb88   : > { %23293 = vmatprep.subr.bf16.mxu1 %v23292_v35  ;;  %v19056_v35 = vld [vmem:[%s30460_s7 + $0x758] sm:$0xff]  ;;  %v23334_v5 = vpack.c.bf16 %v19051_v45, %v19047_v23  ;;  %v17143_v23 = vld [vmem:[%s30462_s9 + $0xc8] sm:$0xff] }
 0xb89   : > { %v23336_v30 = vpack.c.bf16 %v19060_v44, %v19056_v35  ;;  %v17126_v35 = vld [vmem:[%s30462_s9 + $0x40] sm:$0xff]  ;;  %v17127_v44 = vld [vmem:[%s30462_s9 + $0x48] sm:$0xff] }
 0xb8b   : > { %23295 = vmatpush1.bf16.msra.mxu1 %v23294_v31  ;;  %v19059_v31 = vld [vmem:[%s30460_s7 + $0x770] sm:$0xff] }
 0xb8c   : > { %23297 = vmatprep.subr.bf16.mxu1 %v23296_v24  ;;  %v19064_v24 = vld [vmem:[%s30460_s7 + $0x798] sm:$0xff]  ;;  %v23338_v6 = vpack.c.bf16 %v19059_v31, %v19055_v56  ;;  %v17144_v31 = vld [vmem:[%s30462_s9 + $0xd0] sm:$0xff] }
 0xb8d   : > { %v23340_v51 = vpack.c.bf16 %v19068_v42, %v19064_v24  ;;  %v17145_v24 = vld [vmem:[%s30462_s9 + $0xd8] sm:$0xff] }
 0xb8f   : > { %23299 = vmatpush1.bf16.msra.mxu1 %v23298_v55  ;;  %v19067_v55 = vld [vmem:[%s30460_s7 + $0x7b0] sm:$0xff] }
 0xb90   : > { %23301 = vmatprep.subr.bf16.mxu1 %v23300_v46 }
 0xb93   : > { %23303 = vmatpush1.bf16.msra.mxu1 %v23302_v29  ;;  %v23342_v29 = vpack.c.bf16 %v19067_v55, %v19063_v43  ;;  %v17129_v43 = vld [vmem:[%s30462_s9 + $0x58] sm:$0xff] }
 0xb94   : > { %23305 = vmatprep.subr.bf16.mxu1 %v23304_v10  ;;  %v23344_v10 = vpack.c.bf16 %v19076_v39, %v19072_v21 }
 0xb97   : > { %23307 = vmatpush1.bf16.msra.mxu1 %v23306_v47  ;;  %v16380_v47 = vunpack.c.l.s4 %v24721_v8 }
 0xb98   : > { %23309 = vmatprep.subr.bf16.mxu1 %v23308_v41  ;;  %v16382_v41 = vlaneseq }
 0xb99   : > { %v16381_v1 = vunpack.c.0.s8 %v16380_v47 }
 0xb9a   : > { %v30181_v32 = vshrl.u32 %v16382_v41, 7 }
 0xb9b   : > { %23311 = vmatpush1.bf16.msra.mxu1 %v23310_v36 }
 0xb9c   : > { %23313 = vmatprep.subr.bf16.mxu1 %v23312_v52  ;;  %v30184_v17 = vsub.s32 %v16381_v1, %v30181_v32  ;;  %v17148_v1 = vld [vmem:[%s30462_s9 + $0xf0] sm:$0xff] }
 0xb9f   : > { %23315 = vmatpush1.bf16.msra.mxu1 %v23314_v14 }
 0xba0   : > { %23317 = vmatprep.subr.bf16.mxu1 %v23316_v33 }
 0xba2   : > { %17010 = vmatmul.mubr.f32.vlgmr.msra.gmra.mrb[178].mxu1 %v16879_v61 }
 0xba3   : > { %23319 = vmatpush1.bf16.msra.mxu1 %v23318_v2  ;;  %17080 = vmatprep.mubr.f32.mxu1 %v30694_v25  ;;  %v23326_v25 = vpack.c.bf16 %v19035_v7, %v19031_v0  ;;  %v17119_v2 = vld [vmem:[%s30462_s9 + $0x8] sm:$0xff]  ;;  %v23354_v0 = vpack.c.bf16 %v17121_v63, %v17120_v54 }
 0xba4   : > { %23321 = vmatprep.subr.bf16.mxu1 %v23320_v49  ;;  %v17136_v49 = vld [vmem:[%s30462_s9 + $0x90] sm:$0xff]  ;;  %v23350_v4 = vpack.c.bf16 %v17119_v2, %v17118_v59 }
 0xba7   : > { %23323 = vmatpush1.bf16.msra.mxu1 %v23322_v9  ;;  %v17138_v9 = vld [vmem:[%s30462_s9 + $0xa0] sm:$0xff] }
 0xba8   : > { %23325 = vmatprep.subr.bf16.mxu1 %v23324_v22  ;;  %v17139_v22 = vld [vmem:[%s30462_s9 + $0xa8] sm:$0xff] }
 0xba9   : > { %v23356_v7 = vpack.c.bf16 %v17139_v22, %v17138_v9 }
 0xbab   : > { %23327 = vmatpush1.bf16.msra.mxu1 %v23326_v25  ;;  %v17140_v25 = vld [vmem:[%s30462_s9 + $0xb0] sm:$0xff] }
 0xbac   : > { %23329 = vmatprep.subr.bf16.mxu1 %v23328_v15  ;;  %v17141_v15 = vld [vmem:[%s30462_s9 + $0xb8] sm:$0xff] }
 0xbad   : > { %v23360_v28 = vpack.c.bf16 %v17141_v15, %v17140_v25 }
 0xbaf   : > { %23331 = vmatpush1.bf16.msra.mxu1 %v23330_v50  ;;  %v23362_v50 = vpack.c.bf16 %v17125_v40, %v17124_v58  ;;  %v17190_v40 = vsub.s32 1, %v30181_v32 }
 0xbb0   : > { %23333 = vmatprep.subr.bf16.mxu1 %v23332_v62  ;;  %v17142_v62 = vld [vmem:[%s30462_s9 + $0xc0] sm:$0xff] }
 0xbb1   : > { %v23364_v45 = vpack.c.bf16 %v17143_v23, %v17142_v62  ;;  %v17150_v62 = vld [vmem:[%s30462_s9 + $0x100] sm:$0xff]  ;;  %v17151_v23 = vld [vmem:[%s30462_s9 + $0x108] sm:$0xff] }
 0xbb3   : > { %23335 = vmatpush1.bf16.msra.mxu1 %v23334_v5  ;;  %v23366_v5 = vpack.c.bf16 %v17127_v44, %v17126_v35  ;;  %v17198_v35 = vsub.s32 3, %v30181_v32  ;;  %v17169_v44 = vld [vmem:[%s30462_s9 + $0x198] sm:$0xff] }
 0xbb4   : > { %23337 = vmatprep.subr.bf16.mxu1 %v23336_v30 }
 0xbb5   : > { %v16297_v46 = vpop.f32.mrb[166].mxu1 }
 0xbb6   : > { %v16299_v60 = vpop.f32.mrb[167].mxu1 }
 0xbb7   : > { %v16377_v11 = vcombine.low %v16297_v46, %v16299_v60  ;;  %23339 = vmatpush1.bf16.msra.mxu1 %v23338_v6  ;;  %v23368_v6 = vpack.c.bf16 %v17145_v24, %v17144_v31  ;;  %v16165_v60 = vld [vmem:[%s30461_s8] sm:$0xf]  ;;  %v17152_v24 = vld [vmem:[%s30462_s9 + $0x110] sm:$0xff] }
 0xbb8   : > { %23341 = vmatprep.subr.bf16.mxu1 %v23340_v51  ;;  %v17128_v51 = vld [vmem:[%s30462_s9 + $0x50] sm:$0xff] }
 0xbb9   : > { %v16385_v37 = vrot.slane %v16377_v11, %v30184_v17  ;;  %v23370_v55 = vpack.c.bf16 %v17129_v43, %v17128_v51  ;;  %v17146_v11 = vld [vmem:[%s30462_s9 + $0xe0] sm:$0xff]  ;;  %v17171_v43 = vld [vmem:[%s30462_s9 + $0x1a8] sm:$0xff] }
 0xbba   : > { %v17170_v51 = vld [vmem:[%s30462_s9 + $0x1a0] sm:$0xff] }
 0xbbb   : > { %23343 = vmatpush1.bf16.msra.mxu1 %v23342_v29  ;;  %v17147_v29 = vld [vmem:[%s30462_s9 + $0xe8] sm:$0xff] }
 0xbbc   : > { %23345 = vmatprep.subr.bf16.mxu1 %v23344_v10  ;;  %v23372_v20 = vpack.c.bf16 %v17147_v29, %v17146_v11  ;;  %v17173_v11 = vld [vmem:[%s30462_s9 + $0x1b8] sm:$0xff] }
 0xbbf   : > { %23347 = vmatpush1.bf16.msra.mxu1 %v23346_v19  ;;  %v17131_v19 = vld [vmem:[%s30462_s9 + $0x68] sm:$0xff] }
 0xbc0   : > { %23349 = vmatprep.subr.bf16.mxu1 %v23348_v16  ;;  %v23374_v8 = vpack.c.bf16 %v17131_v19, %v17130_v27  ;;  %v17157_v27 = vld [vmem:[%s30462_s9 + $0x138] sm:$0xff]  ;;  %v17174_v19 = vld [vmem:[%s30462_s9 + $0x1c0] sm:$0xff] }
 0xbc2   : > { %17081 = vmatmul.mubr.f32.vlgmr.msra.gmra.mrb[180].mxu1 %v16879_v61  ;;  %v23352_v61 = vpack.c.bf16 %v17137_v48, %v17136_v49 }
 0xbc3   : > { %23351 = vmatpush3.bf16.msra.mxu1 %v23350_v4 }
 0xbc4   : > { %23353 = vmatprep.subr.bf16.mxu1 %v23352_v61 }
 0xbc7   : > { %23355 = vmatpush3.bf16.msra.mxu1 %v23354_v0 }
 0xbc8   : > { %23357 = vmatprep.subr.bf16.mxu1 %v23356_v7 }
 0xbcb   : > { %23359 = vmatpush3.bf16.msra.mxu1 %v23358_v38 }
 0xbcc   : > { %23361 = vmatprep.subr.bf16.mxu1 %v23360_v28 }
 0xbcf   : > { %23363 = vmatpush3.bf16.msra.mxu1 %v23362_v50  ;;  %v17186_v50 = vsub.s32 0, %v30181_v32 }
 0xbd0   : > { %23365 = vmatprep.subr.bf16.mxu1 %v23364_v45 }
 0xbd3   : > { %23367 = vmatpush3.bf16.msra.mxu1 %v23366_v5 }
 0xbd4   : > { %23369 = vmatprep.subr.bf16.mxu1 %v23368_v6 }
 0xbd5   : > { %v16368_v53 = vpop.f32.mrb[168].mxu1 }
 0xbd6   : > { %v16370_v36 = vpop.f32.mrb[169].mxu1 }
 0xbd7   : > { %v16378_v52 = vcombine.low %v16368_v53, %v16370_v36  ;;  %23371 = vmatpush3.bf16.msra.mxu1 %v23370_v55  ;;  %v17149_v53 = vld [vmem:[%s30462_s9 + $0xf8] sm:$0xff] }
 0xbd8   : > { %23373 = vmatprep.subr.bf16.mxu1 %v23372_v20  ;;  %v17156_v20 = vld [vmem:[%s30462_s9 + $0x130] sm:$0xff] }
 0xbd9   : > { %v16392_v34 = vrot.slane %v16378_v52, %v30184_v17  ;;  %v23376_v52 = vpack.c.bf16 %v17149_v53, %v17148_v1  ;;  %v17158_v1 = vld [vmem:[%s30462_s9 + $0x140] sm:$0xff]  ;;  %v17159_v53 = vld [vmem:[%s30462_s9 + $0x148] sm:$0xff] }
 0xbdb   : > { %v16393_v3 = vcombine.low %v16385_v37, %v16392_v34  ;;  %23375 = vmatpush3.bf16.msra.mxu1 %v23374_v8  ;;  %v17132_v37 = vld [vmem:[%s30462_s9 + $0x70] sm:$0xff]  ;;  %v17133_v34 = vld [vmem:[%s30462_s9 + $0x78] sm:$0xff]  ;;  %v17175_v8 = vld [vmem:[%s30462_s9 + $0x1c8] sm:$0xff] }
 0xbdc   : > { %23377 = vmatprep.subr.bf16.mxu1 %v23376_v52  ;;  %v17177_v52 = vld [vmem:[%s30462_s9 + $0x1d8] sm:$0xff] }
 0xbdd   : > { %v16400_v46 = vrot.slane %v16393_v3, %v30184_v17  ;;  %v23378_v3 = vpack.c.bf16 %v17133_v34, %v17132_v37  ;;  %v23398_v37 = vpack.c.bf16 %v17159_v53, %v17158_v1 }
 0xbdf   : > { %v16402_v47 = vadd.f32 %v16400_v46, %v16165_v60  ;;  %23379 = vmatpush3.bf16.msra.mxu1 %v23378_v3  ;;  %v23388_v46 = vpack.c.bf16 %v17171_v43, %v17170_v51  ;;  %v17172_v60 = vld [vmem:[%s30462_s9 + $0x1b0] sm:$0xff] }
 0xbe0   : > { %v17160_v3 = vld [vmem:[%s30462_s9 + $0x150] sm:$0xff] }
 0xbf5   : > { %v16535_v26 = vpop.f32.mrb[170].mxu1 }
 0xbf6   : > { %v16537_v14 = vpop.f32.mrb[171].mxu1 }
 0xbf7   : > { %v16615_v33 = vcombine.low %v16535_v26, %v16537_v14  ;;  %v17166_v26 = vld [vmem:[%s30462_s9 + $0x180] sm:$0xff]  ;;  %v17167_v14 = vld [vmem:[%s30462_s9 + $0x188] sm:$0xff] }
 0xbf9   : > { %v16623_v21 = vrot.slane %v16615_v33, %v30184_v17  ;;  %v23380_v33 = vpack.c.bf16 %v17167_v14, %v17166_v26  ;;  %v17161_v26 = vld [vmem:[%s30462_s9 + $0x158] sm:$0xff]  ;;  %v17178_v14 = vld [vmem:[%s30462_s9 + $0x1e0] sm:$0xff] }
 0xbfb   : > { %23381 = vmatprep.subr.bf16.mxu1 %v23380_v33  ;;  %v17179_v33 = vld [vmem:[%s30462_s9 + $0x1e8] sm:$0xff] }
 0xc15   : > { %v16606_v30 = vpop.f32.mrb[172].mxu1 }
 0xc16   : > { %v16608_v56 = vpop.f32.mrb[173].mxu1 }
 0xc17   : > { %v16616_v42 = vcombine.low %v16606_v30, %v16608_v56  ;;  %v23382_v56 = vpack.c.bf16 %v17151_v23, %v17150_v62 }
 0xc19   : > { %v16630_v39 = vrot.slane %v16616_v42, %v30184_v17  ;;  %v17153_v42 = vld [vmem:[%s30462_s9 + $0x118] sm:$0xff] }
 0xc1a   : > { %v23386_v55 = vpack.c.bf16 %v17153_v42, %v17152_v24 }
 0xc1b   : > { %v16631_v10 = vcombine.low %v16623_v21, %v16630_v39  ;;  %v17154_v21 = vld [vmem:[%s30462_s9 + $0x120] sm:$0xff]  ;;  %v17155_v39 = vld [vmem:[%s30462_s9 + $0x128] sm:$0xff] }
 0xc1c   : > { %v23390_v29 = vpack.c.bf16 %v17155_v39, %v17154_v21 }
 0xc1d   : > { %v16638_v41 = vrot.slane %v16631_v10, %v30184_v17  ;;  %v23392_v10 = vpack.c.bf16 %v17173_v11, %v17172_v60 }
 0xc1f   : > { %v16640_v36 = vadd.f32 %v16638_v41, %v16402_v47  ;;  %v23394_v47 = vpack.c.bf16 %v17157_v27, %v17156_v20  ;;  %v23396_v41 = vpack.c.bf16 %v17175_v8, %v17174_v19 }
 0xc35   : > { %v16773_v57 = vpop.f32.mrb[174].mxu1 }
 0xc36   : > { %v16775_v12 = vpop.f32.mrb[175].mxu1 }
 0xc37   : > { %v16853_v59 = vcombine.low %v16773_v57, %v16775_v12  ;;  %v23402_v57 = vpack.c.bf16 %v17161_v26, %v17160_v3  ;;  %v23404_v12 = vpack.c.bf16 %v17179_v33, %v17178_v14 }
 0xc39   : > { %v16861_v48 = vrot.slane %v16853_v59, %v30184_v17  ;;  %v17162_v59 = vld [vmem:[%s30462_s9 + $0x160] sm:$0xff] }
 0xc55   : > { %v16844_v16 = vpop.f32.mrb[176].mxu1 }
 0xc56   : > { %v16846_v2 = vpop.f32.mrb[177].mxu1 }
 0xc57   : > { %v16854_v49 = vcombine.low %v16844_v16, %v16846_v2  ;;  %v17163_v16 = vld [vmem:[%s30462_s9 + $0x168] sm:$0xff]  ;;  %v17180_v2 = vld [vmem:[%s30462_s9 + $0x1f0] sm:$0xff] }
 0xc59   : > { %v16868_v4 = vrot.slane %v16854_v49, %v30184_v17  ;;  %v17181_v49 = vld [vmem:[%s30462_s9 + $0x1f8] sm:$0xff] }
 0xc5b   : > { %v16869_v61 = vcombine.low %v16861_v48, %v16868_v4  ;;  %v23406_v48 = vpack.c.bf16 %v17163_v16, %v17162_v59  ;;  %v23408_v4 = vpack.c.bf16 %v17181_v49, %v17180_v2 }
 0xc5d   : > { %v16876_v54 = vrot.slane %v16869_v61, %v30184_v17  ;;  %v17164_v61 = vld [vmem:[%s30462_s9 + $0x170] sm:$0xff] }
 0xc5f   : > { %v16878_v63 = vadd.f32 %v16876_v54, %v16640_v36  ;;  %v17176_v36 = vld [vmem:[%s30462_s9 + $0x1d0] sm:$0xff]  ;;  %v17165_v54 = vld [vmem:[%s30462_s9 + $0x178] sm:$0xff] }
 0xc60   : > { %v23400_v34 = vpack.c.bf16 %v17177_v52, %v17176_v36 }
 0xc75   : > { %v17011_v9 = vpop.f32.mrb[178].mxu1 }
 0xc76   : > { %v17013_v22 = vpop.f32.mrb[179].mxu1 }
 0xc77   : > { %v17091_v0 = vcombine.low %v17011_v9, %v17013_v22  ;;  %v17194_v9 = vsub.s32 2, %v30181_v32 }
 0xc79   : > { %v17099_v25 = vrot.slane %v17091_v0, %v30184_v17 }
 0xc95   : > { %v17082_v7 = vpop.f32.mrb[180].mxu1 }
 0xc96   : > { %v17084_v18 = vpop.f32.mrb[181].mxu1 }
 0xc97   : > { %v17092_v13 = vcombine.low %v17082_v7, %v17084_v18 }
 0xc99   : > { %v17106_v15 = vrot.slane %v17092_v13, %v30184_v17  ;;  %v17182_v13 = vld [vmem:[%s30463_s10] sm:$0x1] }
 0xc9b   : > { %v17107_v38 = vcombine.low %v17099_v25, %v17106_v15 }
 0xc9d   : > { %v17114_v28 = vrot.slane %v17107_v38, %v30184_v17  ;;  %v17168_v17 = vld [vmem:[%s30462_s9 + $0x190] sm:$0xff] }
 0xc9e   : > { %v23384_v31 = vpack.c.bf16 %v17169_v44, %v17168_v17 }
 0xc9f   : > { %v17116_v58 = vadd.f32 %v17114_v28, %v16878_v63  ;;  %v23410_v63 = vpack.c.bf16 %v17165_v54, %v17164_v61 }
 0xca1   : > { %v30311_v45 = vmax.f32 %v17116_v58, 0.0 }
 0xca3   : > { %v17191_v5 = vrot.slane %v30311_v45, %v17190_v40  ;;  %v17187_v30 = vrot.slane %v30311_v45, %v17186_v50  ;;  %v17199_v6 = vrot.slane %v30311_v45, %v17198_v35  ;;  %v17195_v22 = vrot.slane %v30311_v45, %v17194_v9 }
 0xca5   : > { %17268 = vmatprep.mubr.f32.mxu1 %v17191_v5 }
 0xca6   : > { %17269 = vmatmul.mubr.f32.vlgmr.msra.gmra.mrb[182].mxu1 %v17187_v30 }
 0xca7   : > { %23383 = vmatpush3.bf16.msra.mxu1 %v23382_v56  ;;  %17338 = vmatprep.mubr.f32.mxu1 %v17199_v6 }
 0xca8   : > { %23385 = vmatprep.subr.bf16.mxu1 %v23384_v31 }
 0xcab   : > { %23387 = vmatpush3.bf16.msra.mxu1 %v23386_v55 }
 0xcac   : > { %23389 = vmatprep.subr.bf16.mxu1 %v23388_v46 }
 0xcaf   : > { %23391 = vmatpush3.bf16.msra.mxu1 %v23390_v29 }
 0xcb0   : > { %23393 = vmatprep.subr.bf16.mxu1 %v23392_v10 }
 0xcb3   : > { %23395 = vmatpush3.bf16.msra.mxu1 %v23394_v47 }
 0xcb4   : > { %23397 = vmatprep.subr.bf16.mxu1 %v23396_v41 }
 0xcb7   : > { %23399 = vmatpush3.bf16.msra.mxu1 %v23398_v37 }
 0xcb8   : > { %23401 = vmatprep.subr.bf16.mxu1 %v23400_v34 }
 0xcbb   : > { %23403 = vmatpush3.bf16.msra.mxu1 %v23402_v57 }
 0xcbc   : > { %23405 = vmatprep.subr.bf16.mxu1 %v23404_v12 }
 0xcbf   : > { %23407 = vmatpush3.bf16.msra.mxu1 %v23406_v48 }
 0xcc0   : > { %23409 = vmatprep.subr.bf16.mxu1 %v23408_v4 }
 0xcc3   : > { %23411 = vmatpush3.bf16.msra.mxu1 %v23410_v63 }
 0xcc6   : > { %17339 = vmatmul.mubr.f32.vlgmr.msra.gmra.mrb[184].mxu1 %v17195_v22 }
 0xd79   : > { %v20579_v0 = vpop.f32.mrb[182].mxu1 }
 0xd7a   : > { %v20580_v7 = vpop.f32.mrb[183].mxu1 }
 0xd7b   : > { %v20581_v18 = vadd.f32 %v20580_v7, %v20579_v0 }
 0xd7d   : > { %v17271_v38 = vadd.f32 %v20581_v18, %v17182_v13 }
 0xd99   : > { %v20614_v25 = vpop.f32.mrb[184].mxu1 }
 0xd9a   : > { %v20615_v15 = vpop.f32.mrb[185].mxu1 }
 0xd9b   : > { %v20616_v32 = vadd.f32 %v20615_v15, %v20614_v25 }
 0xd9d   : > { %v17341_v28 = vadd.f32 %v20616_v32, %v17271_v38 }
 0xd9f   : > { %17345 = vst.msk [vmem:[%s378_s13] sm:$0x1] %vm17344_vm4, %v17341_v28 }
 0xda0   : > { %24669 = shalt.err (!%p24666_p3)
}
 0xda1   : > { %s24670_s25 = scalar_lea.hbm %s30411_s24, 16  ;;  %s24674_s15 = scalar_lea.hbm %s30464_s11, 32 }
 0xda2   : > { %p24671_p4 = scmp.ne.s32.totalorder %s30411_s24, %s24670_s25  ;;  %p24675_p9 = scmp.lt.u32.totalorder %s30411_s24, %s30464_s11 }
 0xda3   : > { %p24676_p10 = scmp.lt.u32.totalorder %s24674_s15, %s24670_s25  ;;  %p24678_p12 = scmp.lt.u32.totalorder %s24670_s25, %s30411_s24 }
 0xda4   : > { %p24672_p7 = pnand %p24671_p4, %p24821_p5 }
 0xda5   : > { %p24677_p11 = por %p24676_p10, %p24675_p9 }
 0xda6   : > { %p24673_p8 = pneg %p24672_p7 }
 0xda7   : > { %p24679_p13 = por %p24678_p12, %p24677_p11 }
 0xda9   : > { %p24680_p0 = pnand %p24679_p13, %p24673_p8 }
 0xdab   : > { %24683 = shalt.err (!%p24680_p0)
}
 0xdac   : > { %24599 = dma.vmem_to_hbm [thread:$0]  (%p24821_p5), %s30413_s14, 16, %s30411_s24, %s17347_s0  }
 0xdad PF: > { %p24605_p1 = scmp.ge.s32.totalorder %s24718_s20, 2  ;;  %s17371_s22 = sand.u32 1, %s24706_s17  }
 0xdae   : > { %s17372_s29 = scalar_lea.sflag [#allocation9], %s17371_s22 }
 0xdaf   : > { %p24602_p2 = pnand %p24605_p1, %p24825_p6 }
 0xdb1   : > { %24701 = dma.done.wait (!%p24602_p2), %s17372_s29, 16  }
 0xdb2   : > { %24703 = vsyncadd (!%p24602_p2), %s17372_s29, 4294967280  ;;  %p21_p3 = scmp.ge.s32.totalorder %s24808_s23, 4   ;;  %s30695_s17 = smov %s24710_s18 }
 0xdb3   : > { %s30696_s18 = smov %s24714_s19  ;;  %s30697_s19 = smov %s24819_s26 }
 0xdb4   : > { %s30698_s20 = smov %s24808_s23  ;;  %23 = sbr.rel (!%p21_p3) target bundleno = 5 (0x5), region = 197 }
 0xdbb   :  { %17376 = vsyncpa [#allocation9], 1 }
 0xdbc   :  { %17378 = vsyncpa [#allocation9 + $0x1], 1 }

</bundles_post_ra>
